<compile_context>
chip_gen: v5e
topology: v5e:2x2
jax: 0.10.0
libtpu: 0.0.40
codegen_flags: <defaults>
</compile_context>

<pallas_src>
import functools
import math

import jax
import jax.numpy as jnp
from jax.experimental import pallas as pl
from jax.experimental.pallas import tpu as pltpu

# ----------------------------- hyper-params -----------------------------
SEGWIDTH = 8
D_MODEL = 32
N_HEADS = 2
D_KV = 16
D_FF = 64
N_LAYERS = 1          # args.layers
D_LAYERS = 1          # args.d_layers
N_FEATURES = 80       # melspec
VOCAB = 91 + SEGWIDTH
N_BUCKETS = 32
MAX_DIST = 128
CODEBOOK = 2048
EPS = 1e-6
NEG_INF = -1e9
LANE = 128            # lane-dense padded width for the final projections

_VMEM = pltpu.MemorySpace.VMEM


# --------------------------------------------------------------------------
# pure-jnp helpers traced INSIDE the single Pallas mega-kernel (2-D tiles only)
# --------------------------------------------------------------------------
def _rmsnorm(x, w):
    var = jnp.mean(x * x, axis=-1, keepdims=True)
    return x * jax.lax.rsqrt(var + EPS) * w


def _softmax(s):
    s = s - jnp.max(s, axis=-1, keepdims=True)
    e = jnp.exp(s)
    return e * pl.reciprocal(jnp.sum(e, axis=-1, keepdims=True), approx=True)


def _mha(x_q, x_kv, qkv_w, o_w, bias):
    """Multi-head T5 attention on 2-D tiles (no 1/sqrt(d) scaling).

    x_q: (Lq, D), x_kv: (Lk, D)
    qkv_w: (3, H, D, Dk) per-head projections, o_w: (H, Dk, D) per-head output proj.
    bias: (H, Lq, Lk), (Lq, Lk) or None.
    Sum over heads of ctx_h @ o_w[h] == concat(ctx_h) @ W_o.
    """
    out = None
    for h in range(N_HEADS):
        q = jnp.dot(x_q, qkv_w[0, h], preferred_element_type=jnp.float32)   # (Lq, Dk)
        k = jnp.dot(x_kv, qkv_w[1, h], preferred_element_type=jnp.float32)  # (Lk, Dk)
        v = jnp.dot(x_kv, qkv_w[2, h], preferred_element_type=jnp.float32)  # (Lk, Dk)
        s = jax.lax.dot_general(q, k, (((1,), (1,)), ((), ())),
                                preferred_element_type=jnp.float32)          # (Lq, Lk)
        if bias is not None:
            s = s + (bias if bias.ndim == 2 else bias[h])
        a = _softmax(s)
        ctx = jnp.dot(a, v, preferred_element_type=jnp.float32)              # (Lq, Dk)
        o_h = jnp.dot(ctx, o_w[h], preferred_element_type=jnp.float32)       # (Lq, D)
        out = o_h if out is None else out + o_h
    return out


def _ffn(x, wi, wo):
    h = jnp.maximum(jnp.dot(x, wi, preferred_element_type=jnp.float32), 0.0)
    return jnp.dot(h, wo, preferred_element_type=jnp.float32)


def _t5_stack(x, stack, enc=None, cross_bias=None):
    """x: (L, D); enc: (Lk, D) or None (decoder cross-attention memory)."""
    h = x
    for blk in stack["blocks"]:
        n = _rmsnorm(h, blk["ln1"])
        h = h + _mha(n, n, blk["qkv"], blk["o"], stack["self_bias"])
        if enc is not None:
            n = _rmsnorm(h, blk["ln_cross"])
            h = h + _mha(n, enc, blk["cqkv"], blk["co"], cross_bias)
        n = _rmsnorm(h, blk["ln_ff"])
        h = h + _ffn(n, blk["wi"], blk["wo"])
    return _rmsnorm(h, stack["final_ln"])


def _vq(x, codebook, e2):
    """Nearest-codebook quantization. x: (M, D), codebook: (K, D), e2: (1, K)."""
    x2 = jnp.sum(x * x, axis=-1, keepdims=True)                               # (M, 1)
    xe = jax.lax.dot_general(x, codebook, (((1,), (1,)), ((), ())),
                             preferred_element_type=jnp.float32)              # (M, K)
    dist = x2 - 2.0 * xe + e2
    dmin = jnp.min(dist, axis=-1, keepdims=True)
    col = jax.lax.broadcasted_iota(jnp.int32, dist.shape, 1)
    ids = jnp.min(jnp.where(dist <= dmin, col, CODEBOOK), axis=-1, keepdims=True)  # first argmin
    onehot = (col == ids).astype(jnp.float32)
    quant = jnp.dot(onehot, codebook, preferred_element_type=jnp.float32)     # (M, D)
    return quant, (quant - x) ** 2


# --------------------------------------------------------------------------
# the mega-kernel (one grid step == one batch element)
# --------------------------------------------------------------------------
def _thoegaze_kernel(*refs, treedef, n_params):
    x_ref, c_ref, de_ref = refs[0], refs[1], refs[2]
    param_refs = refs[3:3 + n_params]
    syn_ref, trans_ref, t_ref, vq_ref = refs[3 + n_params:]

    # all weights live in VMEM; read them once and rebuild the param pytree
    p = jax.tree_util.tree_unflatten(treedef, [r[...] for r in param_refs])

    T = x_ref.shape[1]
    Lk = T + T // 2

    x2d = x_ref[0].astype(jnp.float32)    # (T, F)
    c2d = c_ref[0].astype(jnp.float32)    # (T, F)
    de2d = de_ref[0].astype(jnp.float32)  # (T, D)

    # fused input embedding: x and c in a single matmul
    xc = jnp.concatenate([x2d, c2d], axis=0)                                   # (2T, F)
    xce = jnp.dot(xc, p["emb_w"], preferred_element_type=jnp.float32) + p["emb_b"]
    xe = xce[:T]
    ce = xce[T:]

    # encoders
    s = _t5_stack(xe, p["s_encoder"])
    t_enc = _t5_stack(ce, p["t_encoder"])
    t_mean = jnp.mean(t_enc, axis=0, keepdims=True)                            # mean pooling (1, D)

    # VQ straight-through (forward value == quantized); losses share one forward value
    quant, vq_sq = _vq(s, p["vq_codebook"], p["vq_e2"])
    vq_ref[0] = vq_sq
    t_ref[0] = t_mean

    # pad memory to 1.5*T (matches nn.functional.pad of _s in the original)
    s_pad = jnp.concatenate(
        [quant, jnp.zeros((T // 2, D_MODEL), jnp.float32)], axis=0)            # (Lk, D)

    # cross-attention mask-bias for the transcription decoder (padded keys masked out)
    col = jax.lax.broadcasted_iota(jnp.int32, (T, Lk), 1)
    cross_bias = jnp.where(col >= T, NEG_INF, 0.0).astype(jnp.float32)

    # transcription branch (s_decoder over shifted target-token embeddings)
    sdec = _t5_stack(de2d, p["s_decoder"], enc=s_pad, cross_bias=cross_bias)
    trans_ref[0] = (jnp.dot(sdec, p["lin_w"], preferred_element_type=jnp.float32)
                    + p["lin_b"])                                              # (T, 128) lane-dense

    # auto-regression synthesis branch
    x_shift = jnp.concatenate(
        [jnp.zeros((1, D_MODEL), jnp.float32), xe[:T - 1]], axis=0)            # shifted embedded x
    enc_h = s_pad + t_mean
    dec = _t5_stack(x_shift, p["decoder"], enc=enc_h, cross_bias=None)
    syn_ref[0] = (jnp.dot(dec, p["out_w"], preferred_element_type=jnp.float32)
                  + p["out_b"])                                                # (T, 128) lane-dense


# --------------------------------------------------------------------------
# JAX glue: relative-position bias, weight repacking, forward wrapper
# --------------------------------------------------------------------------
def _relative_position_bucket(rel_pos, bidirectional, num_buckets=N_BUCKETS, max_distance=MAX_DIST):
    buckets = jnp.zeros_like(rel_pos)
    if bidirectional:
        num_buckets //= 2
        buckets = buckets + (rel_pos > 0).astype(jnp.int32) * num_buckets
        rel_pos = jnp.abs(rel_pos)
    else:
        rel_pos = -jnp.minimum(rel_pos, 0)
    max_exact = num_buckets // 2
    is_small = rel_pos < max_exact
    rel_large = max_exact + (
        jnp.log(jnp.maximum(rel_pos, 1).astype(jnp.float32) / max_exact)
        / math.log(max_distance / max_exact)
        * (num_buckets - max_exact)
    ).astype(jnp.int32)
    rel_large = jnp.minimum(rel_large, num_buckets - 1)
    return buckets + jnp.where(is_small, rel_pos, rel_large)


def compute_position_bias(qlen, klen, rel_emb, bidirectional):
    ctx = jnp.arange(qlen, dtype=jnp.int32)[:, None]
    mem = jnp.arange(klen, dtype=jnp.int32)[None, :]
    buckets = _relative_position_bucket(mem - ctx, bidirectional)
    bias = jnp.take(rel_emb, buckets, axis=0)          # (q, k, H)
    return jnp.transpose(bias, (2, 0, 1))              # (H, q, k)


def _split_heads(w):  # (D, H*Dk) -> (H, D, Dk)
    return w.reshape(D_MODEL, N_HEADS, D_KV).transpose(1, 0, 2)


def _split_o(w):      # (H*Dk, D) -> (H, Dk, D)
    return w.reshape(N_HEADS, D_KV, D_MODEL)


def _prep_block(blk, is_decoder):
    out = dict(
        ln1=blk["ln1"].reshape(1, D_MODEL),
        qkv=jnp.stack([_split_heads(blk["self_attn"]["q"]),
                       _split_heads(blk["self_attn"]["k"]),
                       _split_heads(blk["self_attn"]["v"])], axis=0),
        o=_split_o(blk["self_attn"]["o"]),
        ln_ff=blk["ln_ff"].reshape(1, D_MODEL),
        wi=blk["wi"],
        wo=blk["wo"],
    )
    if is_decoder:
        out["ln_cross"] = blk["ln_cross"].reshape(1, D_MODEL)
        out["cqkv"] = jnp.stack([_split_heads(blk["cross_attn"]["q"]),
                                 _split_heads(blk["cross_attn"]["k"]),
                                 _split_heads(blk["cross_attn"]["v"])], axis=0)
        out["co"] = _split_o(blk["cross_attn"]["o"])
    return out


def _prep_stack(stack, is_decoder, qlen):
    bias = compute_position_bias(qlen, qlen, stack["rel_emb"], bidirectional=not is_decoder)
    if is_decoder:
        causal = jnp.tril(jnp.ones((qlen, qlen), jnp.float32))
        bias = bias + (1.0 - causal)[None] * NEG_INF
    return dict(
        blocks=[_prep_block(b, is_decoder) for b in stack["blocks"]],
        final_ln=stack["final_ln"].reshape(1, D_MODEL),
        self_bias=bias.astype(jnp.float32),
    )


def prepare_kernel_params(params):
    """Repack raw params once: per-head weight splits, padded output projections,
    precomputed position biases and codebook squared norms."""
    lin_w = jnp.zeros((D_MODEL, LANE), jnp.float32).at[:, :VOCAB].set(params["lin_w"])
    lin_b = jnp.zeros((1, LANE), jnp.float32).at[0, :VOCAB].set(params["lin_b"])
    out_w = jnp.zeros((D_MODEL, LANE), jnp.float32).at[:, :N_FEATURES].set(params["out_w"])
    out_b = jnp.zeros((1, LANE), jnp.float32).at[0, :N_FEATURES].set(params["out_b"])
    cb = params["vq_codebook"].astype(jnp.float32)
    kp = dict(
        emb_w=params["emb_w"],
        emb_b=params["emb_b"].reshape(1, D_MODEL),
        s_encoder=_prep_stack(params["s_encoder"], False, SEGWIDTH),
        t_encoder=_prep_stack(params["t_encoder"], False, SEGWIDTH),
        decoder=_prep_stack(params["decoder"], True, SEGWIDTH),
        s_decoder=_prep_stack(params["s_decoder"], True, SEGWIDTH),
        vq_codebook=cb,
        vq_e2=jnp.sum(cb * cb, axis=-1, keepdims=True).T,   # (1, K), constant per codebook
        lin_w=lin_w, lin_b=lin_b, out_w=out_w, out_b=out_b,
    )
    return kp, params["tgt_emb"]


def shift_right(ids):
    shifted = jnp.zeros_like(ids)
    shifted = shifted.at[..., 1:].set(ids[..., :-1])
    shifted = shifted.at[..., 0].set(1)
    return jnp.where(shifted == -100, 0, shifted)


@jax.jit
def thoegaze_forward(kp, tgt_emb, x, c, decoder_input):
    B, T, F = x.shape
    dec_in = shift_right(decoder_input)
    dec_emb = jnp.take(tgt_emb, dec_in, axis=0)           # (B, T, D)

    flat, treedef = jax.tree_util.tree_flatten(kp)
    kernel = functools.partial(_thoegaze_kernel, treedef=treedef, n_params=len(flat))

    data_specs = [
        pl.BlockSpec((1, T, F), lambda b: (b, 0, 0)),
        pl.BlockSpec((1, T, F), lambda b: (b, 0, 0)),
        pl.BlockSpec((1, T, D_MODEL), lambda b: (b, 0, 0)),
    ]
    param_specs = [pl.BlockSpec(memory_space=_VMEM)] * len(flat)   # whole array, VMEM-resident
    out_specs = (
        pl.BlockSpec((1, T, LANE), lambda b: (b, 0, 0)),
        pl.BlockSpec((1, T, LANE), lambda b: (b, 0, 0)),
        pl.BlockSpec((1, 1, D_MODEL), lambda b: (b, 0, 0)),
        pl.BlockSpec((1, T, D_MODEL), lambda b: (b, 0, 0)),
    )

    syn_pad, trans_pad, t_out, vq_sq = pl.pallas_call(
        kernel,
        out_shape=(
            jax.ShapeDtypeStruct((B, T, LANE), jnp.float32),
            jax.ShapeDtypeStruct((B, T, LANE), jnp.float32),
            jax.ShapeDtypeStruct((B, 1, D_MODEL), jnp.float32),
            jax.ShapeDtypeStruct((B, T, D_MODEL), jnp.float32),
        ),
        grid=(B,),
        in_specs=data_specs + param_specs,
        out_specs=out_specs,
        compiler_params=pltpu.CompilerParams(dimension_semantics=("parallel",)),
    )(x, c, dec_emb, *flat)

    synout = syn_pad[..., :N_FEATURES]
    trans = trans_pad[..., :VOCAB]
    return {"synout": synout, "trans": trans, "t": t_out,
            "vq": {"commitment": vq_sq, "codebook": vq_sq}}


# ----------------------------- parameter init -----------------------------
def _dense(key, shape, scale=0.05):
    return scale * jax.random.normal(key, shape, dtype=jnp.float32)


def init_params(key):
    keys = iter(jax.random.split(key, 256))

    def init_attn():
        inner = N_HEADS * D_KV
        return dict(q=_dense(next(keys), (D_MODEL, inner)),
                    k=_dense(next(keys), (D_MODEL, inner)),
                    v=_dense(next(keys), (D_MODEL, inner)),
                    o=_dense(next(keys), (inner, D_MODEL)))

    def init_block(is_decoder):
        blk = dict(
            ln1=1.0 + 0.02 * jax.random.normal(next(keys), (D_MODEL,), jnp.float32),
            self_attn=init_attn(),
            ln_ff=1.0 + 0.02 * jax.random.normal(next(keys), (D_MODEL,), jnp.float32),
            wi=_dense(next(keys), (D_MODEL, D_FF)),
            wo=_dense(next(keys), (D_FF, D_MODEL)),
        )
        if is_decoder:
            blk["ln_cross"] = 1.0 + 0.02 * jax.random.normal(next(keys), (D_MODEL,), jnp.float32)
            blk["cross_attn"] = init_attn()
        return blk

    def init_stack(num_layers, is_decoder):
        return dict(rel_emb=_dense(next(keys), (N_BUCKETS, N_HEADS)),
                    blocks=[init_block(is_decoder) for _ in range(num_layers)],
                    final_ln=1.0 + 0.02 * jax.random.normal(next(keys), (D_MODEL,), jnp.float32))

    return dict(
        emb_w=_dense(next(keys), (N_FEATURES, D_MODEL)),
        emb_b=_dense(next(keys), (D_MODEL,)),
        vq_codebook=_dense(next(keys), (CODEBOOK, D_MODEL), scale=1.0),
        s_encoder=init_stack(N_LAYERS, False),
        t_encoder=init_stack(N_LAYERS, False),
        decoder=init_stack(N_LAYERS, True),
        s_decoder=init_stack(D_LAYERS, True),
        tgt_emb=_dense(next(keys), (VOCAB, D_MODEL)),
        lin_w=_dense(next(keys), (D_MODEL, VOCAB)),
        lin_b=_dense(next(keys), (VOCAB,)),
        out_w=_dense(next(keys), (D_MODEL, N_FEATURES)),
        out_b=_dense(next(keys), (N_FEATURES,)),
    )


# ----------------------------- main -----------------------------
if __name__ == "__main__":
    key = jax.random.PRNGKey(0)
    kx, kc, kd, kparam = jax.random.split(key, 4)
    B, T = 2, SEGWIDTH
    x = jax.random.normal(kx, (B, T, N_FEATURES), jnp.float32)
    c = jax.random.normal(kc, (B, T, N_FEATURES), jnp.float32)
    decoder_input = jax.random.randint(kd, (B, T), 0, VOCAB, dtype=jnp.int32)

    params = init_params(kparam)
    kp, tgt_emb = prepare_kernel_params(params)   # one-time weight repacking

    out = thoegaze_forward(kp, tgt_emb, x, c, decoder_input)
    jax.block_until_ready(out)

    assert out["synout"].shape == (B, T, N_FEATURES)
    assert out["trans"].shape == (B, T, VOCAB)
    assert out["t"].shape == (B, 1, D_MODEL)
    assert out["vq"]["commitment"].shape == (B, T, D_MODEL)
    print("KERNEL_OK")
</pallas_src>

<mosaic_0001>
module attributes {stable_mosaic.version = 11 : i64} {
  func.func @_thoegaze_kernel(%arg0: i32, %arg1: memref<1x8x80xf32, #tpu.memory_space<vmem>>, %arg2: memref<1x8x80xf32, #tpu.memory_space<vmem>>, %arg3: memref<1x8x32xf32, #tpu.memory_space<vmem>>, %arg4: memref<2x16x32xf32, #tpu.memory_space<vmem>>, %arg5: memref<3x2x32x16xf32, #tpu.memory_space<vmem>>, %arg6: memref<1x32xf32, #tpu.memory_space<vmem>>, %arg7: memref<1x32xf32, #tpu.memory_space<vmem>>, %arg8: memref<1x32xf32, #tpu.memory_space<vmem>>, %arg9: memref<2x16x32xf32, #tpu.memory_space<vmem>>, %arg10: memref<3x2x32x16xf32, #tpu.memory_space<vmem>>, %arg11: memref<32x64xf32, #tpu.memory_space<vmem>>, %arg12: memref<64x32xf32, #tpu.memory_space<vmem>>, %arg13: memref<1x32xf32, #tpu.memory_space<vmem>>, %arg14: memref<2x8x8xf32, #tpu.memory_space<vmem>>, %arg15: memref<1x32xf32, #tpu.memory_space<vmem>>, %arg16: memref<80x32xf32, #tpu.memory_space<vmem>>, %arg17: memref<1x128xf32, #tpu.memory_space<vmem>>, %arg18: memref<32x128xf32, #tpu.memory_space<vmem>>, %arg19: memref<1x128xf32, #tpu.memory_space<vmem>>, %arg20: memref<32x128xf32, #tpu.memory_space<vmem>>, %arg21: memref<2x16x32xf32, #tpu.memory_space<vmem>>, %arg22: memref<3x2x32x16xf32, #tpu.memory_space<vmem>>, %arg23: memref<1x32xf32, #tpu.memory_space<vmem>>, %arg24: memref<1x32xf32, #tpu.memory_space<vmem>>, %arg25: memref<1x32xf32, #tpu.memory_space<vmem>>, %arg26: memref<2x16x32xf32, #tpu.memory_space<vmem>>, %arg27: memref<3x2x32x16xf32, #tpu.memory_space<vmem>>, %arg28: memref<32x64xf32, #tpu.memory_space<vmem>>, %arg29: memref<64x32xf32, #tpu.memory_space<vmem>>, %arg30: memref<1x32xf32, #tpu.memory_space<vmem>>, %arg31: memref<2x8x8xf32, #tpu.memory_space<vmem>>, %arg32: memref<1x32xf32, #tpu.memory_space<vmem>>, %arg33: memref<1x32xf32, #tpu.memory_space<vmem>>, %arg34: memref<2x16x32xf32, #tpu.memory_space<vmem>>, %arg35: memref<3x2x32x16xf32, #tpu.memory_space<vmem>>, %arg36: memref<32x64xf32, #tpu.memory_space<vmem>>, %arg37: memref<64x32xf32, #tpu.memory_space<vmem>>, %arg38: memref<1x32xf32, #tpu.memory_space<vmem>>, %arg39: memref<2x8x8xf32, #tpu.memory_space<vmem>>, %arg40: memref<1x32xf32, #tpu.memory_space<vmem>>, %arg41: memref<1x32xf32, #tpu.memory_space<vmem>>, %arg42: memref<2x16x32xf32, #tpu.memory_space<vmem>>, %arg43: memref<3x2x32x16xf32, #tpu.memory_space<vmem>>, %arg44: memref<32x64xf32, #tpu.memory_space<vmem>>, %arg45: memref<64x32xf32, #tpu.memory_space<vmem>>, %arg46: memref<1x32xf32, #tpu.memory_space<vmem>>, %arg47: memref<2x8x8xf32, #tpu.memory_space<vmem>>, %arg48: memref<2048x32xf32, #tpu.memory_space<vmem>>, %arg49: memref<1x2048xf32, #tpu.memory_space<vmem>>, %arg50: memref<1x8x128xf32, #tpu.memory_space<vmem>>, %arg51: memref<1x8x128xf32, #tpu.memory_space<vmem>>, %arg52: memref<1x1x32xf32, #tpu.memory_space<vmem>>, %arg53: memref<1x8x32xf32, #tpu.memory_space<vmem>>) attributes {dimension_semantics = [#tpu.dimension_semantics<parallel>], iteration_bounds = array<i64: 2>, scalar_prefetch = 0 : i64, scratch_operands = 0 : i64, tpu.core_type = #tpu.core_type<tc>, window_params = [{transform_indices = @transform_0, window_bounds = array<i64: 1, 8, 80>}, {transform_indices = @transform_1, window_bounds = array<i64: 1, 8, 80>}, {transform_indices = @transform_2, window_bounds = array<i64: 1, 8, 32>}, {pipeline_mode = #tpu.pipeline_mode<synchronous>, transform_indices = @transform_3, window_bounds = array<i64: 2, 16, 32>}, {pipeline_mode = #tpu.pipeline_mode<synchronous>, transform_indices = @transform_4, window_bounds = array<i64: 3, 2, 32, 16>}, {pipeline_mode = #tpu.pipeline_mode<synchronous>, transform_indices = @transform_5, window_bounds = array<i64: 1, 32>}, {pipeline_mode = #tpu.pipeline_mode<synchronous>, transform_indices = @transform_6, window_bounds = array<i64: 1, 32>}, {pipeline_mode = #tpu.pipeline_mode<synchronous>, transform_indices = @transform_7, window_bounds = array<i64: 1, 32>}, {pipeline_mode = #tpu.pipeline_mode<synchronous>, transform_indices = @transform_8, window_bounds = array<i64: 2, 16, 32>}, {pipeline_mode = #tpu.pipeline_mode<synchronous>, transform_indices = @transform_9, window_bounds = array<i64: 3, 2, 32, 16>}, {pipeline_mode = #tpu.pipeline_mode<synchronous>, transform_indices = @transform_10, window_bounds = array<i64: 32, 64>}, {pipeline_mode = #tpu.pipeline_mode<synchronous>, transform_indices = @transform_11, window_bounds = array<i64: 64, 32>}, {pipeline_mode = #tpu.pipeline_mode<synchronous>, transform_indices = @transform_12, window_bounds = array<i64: 1, 32>}, {pipeline_mode = #tpu.pipeline_mode<synchronous>, transform_indices = @transform_13, window_bounds = array<i64: 2, 8, 8>}, {pipeline_mode = #tpu.pipeline_mode<synchronous>, transform_indices = @transform_14, window_bounds = array<i64: 1, 32>}, {pipeline_mode = #tpu.pipeline_mode<synchronous>, transform_indices = @transform_15, window_bounds = array<i64: 80, 32>}, {pipeline_mode = #tpu.pipeline_mode<synchronous>, transform_indices = @transform_16, window_bounds = array<i64: 1, 128>}, {pipeline_mode = #tpu.pipeline_mode<synchronous>, transform_indices = @transform_17, window_bounds = array<i64: 32, 128>}, {pipeline_mode = #tpu.pipeline_mode<synchronous>, transform_indices = @transform_18, window_bounds = array<i64: 1, 128>}, {pipeline_mode = #tpu.pipeline_mode<synchronous>, transform_indices = @transform_19, window_bounds = array<i64: 32, 128>}, {pipeline_mode = #tpu.pipeline_mode<synchronous>, transform_indices = @transform_20, window_bounds = array<i64: 2, 16, 32>}, {pipeline_mode = #tpu.pipeline_mode<synchronous>, transform_indices = @transform_21, window_bounds = array<i64: 3, 2, 32, 16>}, {pipeline_mode = #tpu.pipeline_mode<synchronous>, transform_indices = @transform_22, window_bounds = array<i64: 1, 32>}, {pipeline_mode = #tpu.pipeline_mode<synchronous>, transform_indices = @transform_23, window_bounds = array<i64: 1, 32>}, {pipeline_mode = #tpu.pipeline_mode<synchronous>, transform_indices = @transform_24, window_bounds = array<i64: 1, 32>}, {pipeline_mode = #tpu.pipeline_mode<synchronous>, transform_indices = @transform_25, window_bounds = array<i64: 2, 16, 32>}, {pipeline_mode = #tpu.pipeline_mode<synchronous>, transform_indices = @transform_26, window_bounds = array<i64: 3, 2, 32, 16>}, {pipeline_mode = #tpu.pipeline_mode<synchronous>, transform_indices = @transform_27, window_bounds = array<i64: 32, 64>}, {pipeline_mode = #tpu.pipeline_mode<synchronous>, transform_indices = @transform_28, window_bounds = array<i64: 64, 32>}, {pipeline_mode = #tpu.pipeline_mode<synchronous>, transform_indices = @transform_29, window_bounds = array<i64: 1, 32>}, {pipeline_mode = #tpu.pipeline_mode<synchronous>, transform_indices = @transform_30, window_bounds = array<i64: 2, 8, 8>}, {pipeline_mode = #tpu.pipeline_mode<synchronous>, transform_indices = @transform_31, window_bounds = array<i64: 1, 32>}, {pipeline_mode = #tpu.pipeline_mode<synchronous>, transform_indices = @transform_32, window_bounds = array<i64: 1, 32>}, {pipeline_mode = #tpu.pipeline_mode<synchronous>, transform_indices = @transform_33, window_bounds = array<i64: 2, 16, 32>}, {pipeline_mode = #tpu.pipeline_mode<synchronous>, transform_indices = @transform_34, window_bounds = array<i64: 3, 2, 32, 16>}, {pipeline_mode = #tpu.pipeline_mode<synchronous>, transform_indices = @transform_35, window_bounds = array<i64: 32, 64>}, {pipeline_mode = #tpu.pipeline_mode<synchronous>, transform_indices = @transform_36, window_bounds = array<i64: 64, 32>}, {pipeline_mode = #tpu.pipeline_mode<synchronous>, transform_indices = @transform_37, window_bounds = array<i64: 1, 32>}, {pipeline_mode = #tpu.pipeline_mode<synchronous>, transform_indices = @transform_38, window_bounds = array<i64: 2, 8, 8>}, {pipeline_mode = #tpu.pipeline_mode<synchronous>, transform_indices = @transform_39, window_bounds = array<i64: 1, 32>}, {pipeline_mode = #tpu.pipeline_mode<synchronous>, transform_indices = @transform_40, window_bounds = array<i64: 1, 32>}, {pipeline_mode = #tpu.pipeline_mode<synchronous>, transform_indices = @transform_41, window_bounds = array<i64: 2, 16, 32>}, {pipeline_mode = #tpu.pipeline_mode<synchronous>, transform_indices = @transform_42, window_bounds = array<i64: 3, 2, 32, 16>}, {pipeline_mode = #tpu.pipeline_mode<synchronous>, transform_indices = @transform_43, window_bounds = array<i64: 32, 64>}, {pipeline_mode = #tpu.pipeline_mode<synchronous>, transform_indices = @transform_44, window_bounds = array<i64: 64, 32>}, {pipeline_mode = #tpu.pipeline_mode<synchronous>, transform_indices = @transform_45, window_bounds = array<i64: 1, 32>}, {pipeline_mode = #tpu.pipeline_mode<synchronous>, transform_indices = @transform_46, window_bounds = array<i64: 2, 8, 8>}, {pipeline_mode = #tpu.pipeline_mode<synchronous>, transform_indices = @transform_47, window_bounds = array<i64: 2048, 32>}, {pipeline_mode = #tpu.pipeline_mode<synchronous>, transform_indices = @transform_48, window_bounds = array<i64: 1, 2048>}, {transform_indices = @transform_49, window_bounds = array<i64: 1, 8, 128>}, {transform_indices = @transform_50, window_bounds = array<i64: 1, 8, 128>}, {transform_indices = @transform_51, window_bounds = array<i64: 1, 1, 32>}, {transform_indices = @transform_52, window_bounds = array<i64: 1, 8, 32>}]} {
    %c0 = arith.constant 0 : index
    %c0_0 = arith.constant 0 : index
    %c0_1 = arith.constant 0 : index
    %0 = vector.load %arg4[%c0, %c0_0, %c0_1] : memref<2x16x32xf32, #tpu.memory_space<vmem>>, vector<2x16x32xf32>
    %c0_2 = arith.constant 0 : index
    %c0_3 = arith.constant 0 : index
    %c0_4 = arith.constant 0 : index
    %c0_5 = arith.constant 0 : index
    %1 = vector.load %arg5[%c0_2, %c0_3, %c0_4, %c0_5] : memref<3x2x32x16xf32, #tpu.memory_space<vmem>>, vector<3x2x32x16xf32>
    %c0_6 = arith.constant 0 : index
    %c0_7 = arith.constant 0 : index
    %2 = vector.load %arg6[%c0_6, %c0_7] : memref<1x32xf32, #tpu.memory_space<vmem>>, vector<1x32xf32>
    %c0_8 = arith.constant 0 : index
    %c0_9 = arith.constant 0 : index
    %3 = vector.load %arg7[%c0_8, %c0_9] : memref<1x32xf32, #tpu.memory_space<vmem>>, vector<1x32xf32>
    %c0_10 = arith.constant 0 : index
    %c0_11 = arith.constant 0 : index
    %4 = vector.load %arg8[%c0_10, %c0_11] : memref<1x32xf32, #tpu.memory_space<vmem>>, vector<1x32xf32>
    %c0_12 = arith.constant 0 : index
    %c0_13 = arith.constant 0 : index
    %c0_14 = arith.constant 0 : index
    %5 = vector.load %arg9[%c0_12, %c0_13, %c0_14] : memref<2x16x32xf32, #tpu.memory_space<vmem>>, vector<2x16x32xf32>
    %c0_15 = arith.constant 0 : index
    %c0_16 = arith.constant 0 : index
    %c0_17 = arith.constant 0 : index
    %c0_18 = arith.constant 0 : index
    %6 = vector.load %arg10[%c0_15, %c0_16, %c0_17, %c0_18] : memref<3x2x32x16xf32, #tpu.memory_space<vmem>>, vector<3x2x32x16xf32>
    %c0_19 = arith.constant 0 : index
    %c0_20 = arith.constant 0 : index
    %7 = vector.load %arg11[%c0_19, %c0_20] : memref<32x64xf32, #tpu.memory_space<vmem>>, vector<32x64xf32>
    %c0_21 = arith.constant 0 : index
    %c0_22 = arith.constant 0 : index
    %8 = vector.load %arg12[%c0_21, %c0_22] : memref<64x32xf32, #tpu.memory_space<vmem>>, vector<64x32xf32>
    %c0_23 = arith.constant 0 : index
    %c0_24 = arith.constant 0 : index
    %9 = vector.load %arg13[%c0_23, %c0_24] : memref<1x32xf32, #tpu.memory_space<vmem>>, vector<1x32xf32>
    %c0_25 = arith.constant 0 : index
    %c0_26 = arith.constant 0 : index
    %c0_27 = arith.constant 0 : index
    %10 = vector.load %arg14[%c0_25, %c0_26, %c0_27] : memref<2x8x8xf32, #tpu.memory_space<vmem>>, vector<2x8x8xf32>
    %c0_28 = arith.constant 0 : index
    %c0_29 = arith.constant 0 : index
    %11 = vector.load %arg15[%c0_28, %c0_29] : memref<1x32xf32, #tpu.memory_space<vmem>>, vector<1x32xf32>
    %c0_30 = arith.constant 0 : index
    %c0_31 = arith.constant 0 : index
    %12 = vector.load %arg16[%c0_30, %c0_31] : memref<80x32xf32, #tpu.memory_space<vmem>>, vector<80x32xf32>
    %c0_32 = arith.constant 0 : index
    %c0_33 = arith.constant 0 : index
    %13 = vector.load %arg17[%c0_32, %c0_33] : memref<1x128xf32, #tpu.memory_space<vmem>>, vector<1x128xf32>
    %c0_34 = arith.constant 0 : index
    %c0_35 = arith.constant 0 : index
    %14 = vector.load %arg18[%c0_34, %c0_35] : memref<32x128xf32, #tpu.memory_space<vmem>>, vector<32x128xf32>
    %c0_36 = arith.constant 0 : index
    %c0_37 = arith.constant 0 : index
    %15 = vector.load %arg19[%c0_36, %c0_37] : memref<1x128xf32, #tpu.memory_space<vmem>>, vector<1x128xf32>
    %c0_38 = arith.constant 0 : index
    %c0_39 = arith.constant 0 : index
    %16 = vector.load %arg20[%c0_38, %c0_39] : memref<32x128xf32, #tpu.memory_space<vmem>>, vector<32x128xf32>
    %c0_40 = arith.constant 0 : index
    %c0_41 = arith.constant 0 : index
    %c0_42 = arith.constant 0 : index
    %17 = vector.load %arg21[%c0_40, %c0_41, %c0_42] : memref<2x16x32xf32, #tpu.memory_space<vmem>>, vector<2x16x32xf32>
    %c0_43 = arith.constant 0 : index
    %c0_44 = arith.constant 0 : index
    %c0_45 = arith.constant 0 : index
    %c0_46 = arith.constant 0 : index
    %18 = vector.load %arg22[%c0_43, %c0_44, %c0_45, %c0_46] : memref<3x2x32x16xf32, #tpu.memory_space<vmem>>, vector<3x2x32x16xf32>
    %c0_47 = arith.constant 0 : index
    %c0_48 = arith.constant 0 : index
    %19 = vector.load %arg23[%c0_47, %c0_48] : memref<1x32xf32, #tpu.memory_space<vmem>>, vector<1x32xf32>
    %c0_49 = arith.constant 0 : index
    %c0_50 = arith.constant 0 : index
    %20 = vector.load %arg24[%c0_49, %c0_50] : memref<1x32xf32, #tpu.memory_space<vmem>>, vector<1x32xf32>
    %c0_51 = arith.constant 0 : index
    %c0_52 = arith.constant 0 : index
    %21 = vector.load %arg25[%c0_51, %c0_52] : memref<1x32xf32, #tpu.memory_space<vmem>>, vector<1x32xf32>
    %c0_53 = arith.constant 0 : index
    %c0_54 = arith.constant 0 : index
    %c0_55 = arith.constant 0 : index
    %22 = vector.load %arg26[%c0_53, %c0_54, %c0_55] : memref<2x16x32xf32, #tpu.memory_space<vmem>>, vector<2x16x32xf32>
    %c0_56 = arith.constant 0 : index
    %c0_57 = arith.constant 0 : index
    %c0_58 = arith.constant 0 : index
    %c0_59 = arith.constant 0 : index
    %23 = vector.load %arg27[%c0_56, %c0_57, %c0_58, %c0_59] : memref<3x2x32x16xf32, #tpu.memory_space<vmem>>, vector<3x2x32x16xf32>
    %c0_60 = arith.constant 0 : index
    %c0_61 = arith.constant 0 : index
    %24 = vector.load %arg28[%c0_60, %c0_61] : memref<32x64xf32, #tpu.memory_space<vmem>>, vector<32x64xf32>
    %c0_62 = arith.constant 0 : index
    %c0_63 = arith.constant 0 : index
    %25 = vector.load %arg29[%c0_62, %c0_63] : memref<64x32xf32, #tpu.memory_space<vmem>>, vector<64x32xf32>
    %c0_64 = arith.constant 0 : index
    %c0_65 = arith.constant 0 : index
    %26 = vector.load %arg30[%c0_64, %c0_65] : memref<1x32xf32, #tpu.memory_space<vmem>>, vector<1x32xf32>
    %c0_66 = arith.constant 0 : index
    %c0_67 = arith.constant 0 : index
    %c0_68 = arith.constant 0 : index
    %27 = vector.load %arg31[%c0_66, %c0_67, %c0_68] : memref<2x8x8xf32, #tpu.memory_space<vmem>>, vector<2x8x8xf32>
    %c0_69 = arith.constant 0 : index
    %c0_70 = arith.constant 0 : index
    %28 = vector.load %arg32[%c0_69, %c0_70] : memref<1x32xf32, #tpu.memory_space<vmem>>, vector<1x32xf32>
    %c0_71 = arith.constant 0 : index
    %c0_72 = arith.constant 0 : index
    %29 = vector.load %arg33[%c0_71, %c0_72] : memref<1x32xf32, #tpu.memory_space<vmem>>, vector<1x32xf32>
    %c0_73 = arith.constant 0 : index
    %c0_74 = arith.constant 0 : index
    %c0_75 = arith.constant 0 : index
    %30 = vector.load %arg34[%c0_73, %c0_74, %c0_75] : memref<2x16x32xf32, #tpu.memory_space<vmem>>, vector<2x16x32xf32>
    %c0_76 = arith.constant 0 : index
    %c0_77 = arith.constant 0 : index
    %c0_78 = arith.constant 0 : index
    %c0_79 = arith.constant 0 : index
    %31 = vector.load %arg35[%c0_76, %c0_77, %c0_78, %c0_79] : memref<3x2x32x16xf32, #tpu.memory_space<vmem>>, vector<3x2x32x16xf32>
    %c0_80 = arith.constant 0 : index
    %c0_81 = arith.constant 0 : index
    %32 = vector.load %arg36[%c0_80, %c0_81] : memref<32x64xf32, #tpu.memory_space<vmem>>, vector<32x64xf32>
    %c0_82 = arith.constant 0 : index
    %c0_83 = arith.constant 0 : index
    %33 = vector.load %arg37[%c0_82, %c0_83] : memref<64x32xf32, #tpu.memory_space<vmem>>, vector<64x32xf32>
    %c0_84 = arith.constant 0 : index
    %c0_85 = arith.constant 0 : index
    %34 = vector.load %arg38[%c0_84, %c0_85] : memref<1x32xf32, #tpu.memory_space<vmem>>, vector<1x32xf32>
    %c0_86 = arith.constant 0 : index
    %c0_87 = arith.constant 0 : index
    %c0_88 = arith.constant 0 : index
    %35 = vector.load %arg39[%c0_86, %c0_87, %c0_88] : memref<2x8x8xf32, #tpu.memory_space<vmem>>, vector<2x8x8xf32>
    %c0_89 = arith.constant 0 : index
    %c0_90 = arith.constant 0 : index
    %36 = vector.load %arg40[%c0_89, %c0_90] : memref<1x32xf32, #tpu.memory_space<vmem>>, vector<1x32xf32>
    %c0_91 = arith.constant 0 : index
    %c0_92 = arith.constant 0 : index
    %37 = vector.load %arg41[%c0_91, %c0_92] : memref<1x32xf32, #tpu.memory_space<vmem>>, vector<1x32xf32>
    %c0_93 = arith.constant 0 : index
    %c0_94 = arith.constant 0 : index
    %c0_95 = arith.constant 0 : index
    %38 = vector.load %arg42[%c0_93, %c0_94, %c0_95] : memref<2x16x32xf32, #tpu.memory_space<vmem>>, vector<2x16x32xf32>
    %c0_96 = arith.constant 0 : index
    %c0_97 = arith.constant 0 : index
    %c0_98 = arith.constant 0 : index
    %c0_99 = arith.constant 0 : index
    %39 = vector.load %arg43[%c0_96, %c0_97, %c0_98, %c0_99] : memref<3x2x32x16xf32, #tpu.memory_space<vmem>>, vector<3x2x32x16xf32>
    %c0_100 = arith.constant 0 : index
    %c0_101 = arith.constant 0 : index
    %40 = vector.load %arg44[%c0_100, %c0_101] : memref<32x64xf32, #tpu.memory_space<vmem>>, vector<32x64xf32>
    %c0_102 = arith.constant 0 : index
    %c0_103 = arith.constant 0 : index
    %41 = vector.load %arg45[%c0_102, %c0_103] : memref<64x32xf32, #tpu.memory_space<vmem>>, vector<64x32xf32>
    %c0_104 = arith.constant 0 : index
    %c0_105 = arith.constant 0 : index
    %42 = vector.load %arg46[%c0_104, %c0_105] : memref<1x32xf32, #tpu.memory_space<vmem>>, vector<1x32xf32>
    %c0_106 = arith.constant 0 : index
    %c0_107 = arith.constant 0 : index
    %c0_108 = arith.constant 0 : index
    %43 = vector.load %arg47[%c0_106, %c0_107, %c0_108] : memref<2x8x8xf32, #tpu.memory_space<vmem>>, vector<2x8x8xf32>
    %c0_109 = arith.constant 0 : index
    %c0_110 = arith.constant 0 : index
    %44 = vector.load %arg48[%c0_109, %c0_110] : memref<2048x32xf32, #tpu.memory_space<vmem>>, vector<2048x32xf32>
    %c0_111 = arith.constant 0 : index
    %c0_112 = arith.constant 0 : index
    %45 = vector.load %arg49[%c0_111, %c0_112] : memref<1x2048xf32, #tpu.memory_space<vmem>>, vector<1x2048xf32>
    %c0_113 = arith.constant 0 : index
    %c0_114 = arith.constant 0 : index
    %c0_115 = arith.constant 0 : index
    %46 = vector.load %arg1[%c0_113, %c0_114, %c0_115] : memref<1x8x80xf32, #tpu.memory_space<vmem>>, vector<1x8x80xf32>
    %47 = vector.shape_cast %46 : vector<1x8x80xf32> to vector<8x80xf32>
    %c0_116 = arith.constant 0 : index
    %c0_117 = arith.constant 0 : index
    %c0_118 = arith.constant 0 : index
    %48 = vector.load %arg2[%c0_116, %c0_117, %c0_118] : memref<1x8x80xf32, #tpu.memory_space<vmem>>, vector<1x8x80xf32>
    %49 = vector.shape_cast %48 : vector<1x8x80xf32> to vector<8x80xf32>
    %c0_119 = arith.constant 0 : index
    %c0_120 = arith.constant 0 : index
    %c0_121 = arith.constant 0 : index
    %50 = vector.load %arg3[%c0_119, %c0_120, %c0_121] : memref<1x8x32xf32, #tpu.memory_space<vmem>>, vector<1x8x32xf32>
    %51 = vector.shape_cast %50 : vector<1x8x32xf32> to vector<8x32xf32>
    %52 = tpu.concatenate %47, %49 in 0 : vector<8x80xf32>, vector<8x80xf32> -> vector<16x80xf32>
    %cst = arith.constant dense<0.000000e+00> : vector<16x32xf32>
    %53 = tpu.matmul %52, %12, %cst {dimension_numbers = #tpu.dot_dimension_numbers<[1], [0], [0], [1], [0, 0, 1, 1], [], []>} : vector<16x80xf32>, vector<80x32xf32>, vector<16x32xf32> -> vector<16x32xf32>
    %54 = vector.broadcast %11 : vector<1x32xf32> to vector<16x32xf32>
    %55 = arith.addf %53, %54 : vector<16x32xf32>
    %56 = vector.extract_strided_slice %55 {offsets = [0, 0], sizes = [8, 32], strides = [1, 1]} : vector<16x32xf32> to vector<8x32xf32>
    %57 = vector.extract_strided_slice %55 {offsets = [8, 0], sizes = [8, 32], strides = [1, 1]} : vector<16x32xf32> to vector<8x32xf32>
    %58 = arith.mulf %56, %56 : vector<8x32xf32>
    %cst_122 = arith.constant dense<0.000000e+00> : vector<8xf32>
    %59 = vector.multi_reduction <add>, %58, %cst_122 [1] : vector<8x32xf32> to vector<8xf32>
    %60 = vector.shape_cast %59 : vector<8xf32> to vector<8x1xf32>
    %cst_123 = arith.constant 3.200000e+01 : f32
    %61 = vector.broadcast %cst_123 : f32 to vector<8x1xf32>
    %62 = arith.divf %60, %61 : vector<8x1xf32>
    %cst_124 = arith.constant 9.99999997E-7 : f32
    %63 = vector.broadcast %cst_124 : f32 to vector<8x1xf32>
    %64 = arith.addf %62, %63 : vector<8x1xf32>
    %65 = math.rsqrt %64 : vector<8x1xf32>
    %66 = vector.broadcast %65 : vector<8x1xf32> to vector<8x32xf32>
    %67 = arith.mulf %56, %66 : vector<8x32xf32>
    %68 = vector.broadcast %28 : vector<1x32xf32> to vector<8x32xf32>
    %69 = arith.mulf %67, %68 : vector<8x32xf32>
    %70 = vector.extract_strided_slice %31 {offsets = [0, 0, 0, 0], sizes = [1, 1, 32, 16], strides = [1, 1, 1, 1]} : vector<3x2x32x16xf32> to vector<1x1x32x16xf32>
    %71 = vector.shape_cast %70 : vector<1x1x32x16xf32> to vector<32x16xf32>
    %cst_125 = arith.constant dense<0.000000e+00> : vector<8x16xf32>
    %72 = tpu.matmul %69, %71, %cst_125 {dimension_numbers = #tpu.dot_dimension_numbers<[1], [0], [0], [1], [0, 0, 1, 1], [], []>} : vector<8x32xf32>, vector<32x16xf32>, vector<8x16xf32> -> vector<8x16xf32>
    %73 = vector.extract_strided_slice %31 {offsets = [1, 0, 0, 0], sizes = [1, 1, 32, 16], strides = [1, 1, 1, 1]} : vector<3x2x32x16xf32> to vector<1x1x32x16xf32>
    %74 = vector.shape_cast %73 : vector<1x1x32x16xf32> to vector<32x16xf32>
    %cst_126 = arith.constant dense<0.000000e+00> : vector<8x16xf32>
    %75 = tpu.matmul %69, %74, %cst_126 {dimension_numbers = #tpu.dot_dimension_numbers<[1], [0], [0], [1], [0, 0, 1, 1], [], []>} : vector<8x32xf32>, vector<32x16xf32>, vector<8x16xf32> -> vector<8x16xf32>
    %76 = vector.extract_strided_slice %31 {offsets = [2, 0, 0, 0], sizes = [1, 1, 32, 16], strides = [1, 1, 1, 1]} : vector<3x2x32x16xf32> to vector<1x1x32x16xf32>
    %77 = vector.shape_cast %76 : vector<1x1x32x16xf32> to vector<32x16xf32>
    %cst_127 = arith.constant dense<0.000000e+00> : vector<8x16xf32>
    %78 = tpu.matmul %69, %77, %cst_127 {dimension_numbers = #tpu.dot_dimension_numbers<[1], [0], [0], [1], [0, 0, 1, 1], [], []>} : vector<8x32xf32>, vector<32x16xf32>, vector<8x16xf32> -> vector<8x16xf32>
    %cst_128 = arith.constant dense<0.000000e+00> : vector<8x8xf32>
    %79 = tpu.matmul %72, %75, %cst_128 {dimension_numbers = #tpu.dot_dimension_numbers<[1], [1], [0], [0], [0, 0, 1, 0], [], []>} : vector<8x16xf32>, vector<8x16xf32>, vector<8x8xf32> -> vector<8x8xf32>
    %80 = vector.extract_strided_slice %35 {offsets = [0, 0, 0], sizes = [1, 8, 8], strides = [1, 1, 1]} : vector<2x8x8xf32> to vector<1x8x8xf32>
    %81 = vector.shape_cast %80 : vector<1x8x8xf32> to vector<8x8xf32>
    %82 = arith.addf %79, %81 : vector<8x8xf32>
    %cst_129 = arith.constant dense<0xFF800000> : vector<8xf32>
    %83 = vector.multi_reduction <maximumf>, %82, %cst_129 [1] : vector<8x8xf32> to vector<8xf32>
    %84 = vector.shape_cast %83 : vector<8xf32> to vector<8x1xf32>
    %85 = vector.broadcast %84 : vector<8x1xf32> to vector<8x8xf32>
    %86 = arith.subf %82, %85 : vector<8x8xf32>
    %87 = math.exp %86 : vector<8x8xf32>
    %cst_130 = arith.constant dense<0.000000e+00> : vector<8xf32>
    %88 = vector.multi_reduction <add>, %87, %cst_130 [1] : vector<8x8xf32> to vector<8xf32>
    %89 = vector.shape_cast %88 : vector<8xf32> to vector<8x1xf32>
    %90 = tpu.reciprocal %89 {approx = true} : vector<8x1xf32> -> vector<8x1xf32>
    %91 = vector.broadcast %90 : vector<8x1xf32> to vector<8x8xf32>
    %92 = arith.mulf %87, %91 : vector<8x8xf32>
    %cst_131 = arith.constant dense<0.000000e+00> : vector<8x16xf32>
    %93 = tpu.matmul %92, %78, %cst_131 {dimension_numbers = #tpu.dot_dimension_numbers<[1], [0], [0], [1], [0, 0, 1, 1], [], []>} : vector<8x8xf32>, vector<8x16xf32>, vector<8x16xf32> -> vector<8x16xf32>
    %94 = vector.extract_strided_slice %30 {offsets = [0, 0, 0], sizes = [1, 16, 32], strides = [1, 1, 1]} : vector<2x16x32xf32> to vector<1x16x32xf32>
    %95 = vector.shape_cast %94 : vector<1x16x32xf32> to vector<16x32xf32>
    %cst_132 = arith.constant dense<0.000000e+00> : vector<8x32xf32>
    %96 = tpu.matmul %93, %95, %cst_132 {dimension_numbers = #tpu.dot_dimension_numbers<[1], [0], [0], [1], [0, 0, 1, 1], [], []>} : vector<8x16xf32>, vector<16x32xf32>, vector<8x32xf32> -> vector<8x32xf32>
    %97 = vector.extract_strided_slice %31 {offsets = [0, 1, 0, 0], sizes = [1, 1, 32, 16], strides = [1, 1, 1, 1]} : vector<3x2x32x16xf32> to vector<1x1x32x16xf32>
    %98 = vector.shape_cast %97 : vector<1x1x32x16xf32> to vector<32x16xf32>
    %cst_133 = arith.constant dense<0.000000e+00> : vector<8x16xf32>
    %99 = tpu.matmul %69, %98, %cst_133 {dimension_numbers = #tpu.dot_dimension_numbers<[1], [0], [0], [1], [0, 0, 1, 1], [], []>} : vector<8x32xf32>, vector<32x16xf32>, vector<8x16xf32> -> vector<8x16xf32>
    %100 = vector.extract_strided_slice %31 {offsets = [1, 1, 0, 0], sizes = [1, 1, 32, 16], strides = [1, 1, 1, 1]} : vector<3x2x32x16xf32> to vector<1x1x32x16xf32>
    %101 = vector.shape_cast %100 : vector<1x1x32x16xf32> to vector<32x16xf32>
    %cst_134 = arith.constant dense<0.000000e+00> : vector<8x16xf32>
    %102 = tpu.matmul %69, %101, %cst_134 {dimension_numbers = #tpu.dot_dimension_numbers<[1], [0], [0], [1], [0, 0, 1, 1], [], []>} : vector<8x32xf32>, vector<32x16xf32>, vector<8x16xf32> -> vector<8x16xf32>
    %103 = vector.extract_strided_slice %31 {offsets = [2, 1, 0, 0], sizes = [1, 1, 32, 16], strides = [1, 1, 1, 1]} : vector<3x2x32x16xf32> to vector<1x1x32x16xf32>
    %104 = vector.shape_cast %103 : vector<1x1x32x16xf32> to vector<32x16xf32>
    %cst_135 = arith.constant dense<0.000000e+00> : vector<8x16xf32>
    %105 = tpu.matmul %69, %104, %cst_135 {dimension_numbers = #tpu.dot_dimension_numbers<[1], [0], [0], [1], [0, 0, 1, 1], [], []>} : vector<8x32xf32>, vector<32x16xf32>, vector<8x16xf32> -> vector<8x16xf32>
    %cst_136 = arith.constant dense<0.000000e+00> : vector<8x8xf32>
    %106 = tpu.matmul %99, %102, %cst_136 {dimension_numbers = #tpu.dot_dimension_numbers<[1], [1], [0], [0], [0, 0, 1, 0], [], []>} : vector<8x16xf32>, vector<8x16xf32>, vector<8x8xf32> -> vector<8x8xf32>
    %107 = vector.extract_strided_slice %35 {offsets = [1, 0, 0], sizes = [1, 8, 8], strides = [1, 1, 1]} : vector<2x8x8xf32> to vector<1x8x8xf32>
    %108 = vector.shape_cast %107 : vector<1x8x8xf32> to vector<8x8xf32>
    %109 = arith.addf %106, %108 : vector<8x8xf32>
    %cst_137 = arith.constant dense<0xFF800000> : vector<8xf32>
    %110 = vector.multi_reduction <maximumf>, %109, %cst_137 [1] : vector<8x8xf32> to vector<8xf32>
    %111 = vector.shape_cast %110 : vector<8xf32> to vector<8x1xf32>
    %112 = vector.broadcast %111 : vector<8x1xf32> to vector<8x8xf32>
    %113 = arith.subf %109, %112 : vector<8x8xf32>
    %114 = math.exp %113 : vector<8x8xf32>
    %cst_138 = arith.constant dense<0.000000e+00> : vector<8xf32>
    %115 = vector.multi_reduction <add>, %114, %cst_138 [1] : vector<8x8xf32> to vector<8xf32>
    %116 = vector.shape_cast %115 : vector<8xf32> to vector<8x1xf32>
    %117 = tpu.reciprocal %116 {approx = true} : vector<8x1xf32> -> vector<8x1xf32>
    %118 = vector.broadcast %117 : vector<8x1xf32> to vector<8x8xf32>
    %119 = arith.mulf %114, %118 : vector<8x8xf32>
    %cst_139 = arith.constant dense<0.000000e+00> : vector<8x16xf32>
    %120 = tpu.matmul %119, %105, %cst_139 {dimension_numbers = #tpu.dot_dimension_numbers<[1], [0], [0], [1], [0, 0, 1, 1], [], []>} : vector<8x8xf32>, vector<8x16xf32>, vector<8x16xf32> -> vector<8x16xf32>
    %121 = vector.extract_strided_slice %30 {offsets = [1, 0, 0], sizes = [1, 16, 32], strides = [1, 1, 1]} : vector<2x16x32xf32> to vector<1x16x32xf32>
    %122 = vector.shape_cast %121 : vector<1x16x32xf32> to vector<16x32xf32>
    %cst_140 = arith.constant dense<0.000000e+00> : vector<8x32xf32>
    %123 = tpu.matmul %120, %122, %cst_140 {dimension_numbers = #tpu.dot_dimension_numbers<[1], [0], [0], [1], [0, 0, 1, 1], [], []>} : vector<8x16xf32>, vector<16x32xf32>, vector<8x32xf32> -> vector<8x32xf32>
    %124 = arith.addf %96, %123 : vector<8x32xf32>
    %125 = arith.addf %56, %124 : vector<8x32xf32>
    %126 = arith.mulf %125, %125 : vector<8x32xf32>
    %cst_141 = arith.constant dense<0.000000e+00> : vector<8xf32>
    %127 = vector.multi_reduction <add>, %126, %cst_141 [1] : vector<8x32xf32> to vector<8xf32>
    %128 = vector.shape_cast %127 : vector<8xf32> to vector<8x1xf32>
    %cst_142 = arith.constant 3.200000e+01 : f32
    %129 = vector.broadcast %cst_142 : f32 to vector<8x1xf32>
    %130 = arith.divf %128, %129 : vector<8x1xf32>
    %cst_143 = arith.constant 9.99999997E-7 : f32
    %131 = vector.broadcast %cst_143 : f32 to vector<8x1xf32>
    %132 = arith.addf %130, %131 : vector<8x1xf32>
    %133 = math.rsqrt %132 : vector<8x1xf32>
    %134 = vector.broadcast %133 : vector<8x1xf32> to vector<8x32xf32>
    %135 = arith.mulf %125, %134 : vector<8x32xf32>
    %136 = vector.broadcast %29 : vector<1x32xf32> to vector<8x32xf32>
    %137 = arith.mulf %135, %136 : vector<8x32xf32>
    %cst_144 = arith.constant dense<0.000000e+00> : vector<8x64xf32>
    %138 = tpu.matmul %137, %32, %cst_144 {dimension_numbers = #tpu.dot_dimension_numbers<[1], [0], [0], [1], [0, 0, 1, 1], [], []>} : vector<8x32xf32>, vector<32x64xf32>, vector<8x64xf32> -> vector<8x64xf32>
    %cst_145 = arith.constant 0.000000e+00 : f32
    %139 = vector.broadcast %cst_145 : f32 to vector<8x64xf32>
    %140 = arith.maximumf %138, %139 : vector<8x64xf32>
    %cst_146 = arith.constant dense<0.000000e+00> : vector<8x32xf32>
    %141 = tpu.matmul %140, %33, %cst_146 {dimension_numbers = #tpu.dot_dimension_numbers<[1], [0], [0], [1], [0, 0, 1, 1], [], []>} : vector<8x64xf32>, vector<64x32xf32>, vector<8x32xf32> -> vector<8x32xf32>
    %142 = arith.addf %125, %141 : vector<8x32xf32>
    %143 = arith.mulf %142, %142 : vector<8x32xf32>
    %cst_147 = arith.constant dense<0.000000e+00> : vector<8xf32>
    %144 = vector.multi_reduction <add>, %143, %cst_147 [1] : vector<8x32xf32> to vector<8xf32>
    %145 = vector.shape_cast %144 : vector<8xf32> to vector<8x1xf32>
    %cst_148 = arith.constant 3.200000e+01 : f32
    %146 = vector.broadcast %cst_148 : f32 to vector<8x1xf32>
    %147 = arith.divf %145, %146 : vector<8x1xf32>
    %cst_149 = arith.constant 9.99999997E-7 : f32
    %148 = vector.broadcast %cst_149 : f32 to vector<8x1xf32>
    %149 = arith.addf %147, %148 : vector<8x1xf32>
    %150 = math.rsqrt %149 : vector<8x1xf32>
    %151 = vector.broadcast %150 : vector<8x1xf32> to vector<8x32xf32>
    %152 = arith.mulf %142, %151 : vector<8x32xf32>
    %153 = vector.broadcast %34 : vector<1x32xf32> to vector<8x32xf32>
    %154 = arith.mulf %152, %153 : vector<8x32xf32>
    %155 = arith.mulf %57, %57 : vector<8x32xf32>
    %cst_150 = arith.constant dense<0.000000e+00> : vector<8xf32>
    %156 = vector.multi_reduction <add>, %155, %cst_150 [1] : vector<8x32xf32> to vector<8xf32>
    %157 = vector.shape_cast %156 : vector<8xf32> to vector<8x1xf32>
    %cst_151 = arith.constant 3.200000e+01 : f32
    %158 = vector.broadcast %cst_151 : f32 to vector<8x1xf32>
    %159 = arith.divf %157, %158 : vector<8x1xf32>
    %cst_152 = arith.constant 9.99999997E-7 : f32
    %160 = vector.broadcast %cst_152 : f32 to vector<8x1xf32>
    %161 = arith.addf %159, %160 : vector<8x1xf32>
    %162 = math.rsqrt %161 : vector<8x1xf32>
    %163 = vector.broadcast %162 : vector<8x1xf32> to vector<8x32xf32>
    %164 = arith.mulf %57, %163 : vector<8x32xf32>
    %165 = vector.broadcast %36 : vector<1x32xf32> to vector<8x32xf32>
    %166 = arith.mulf %164, %165 : vector<8x32xf32>
    %167 = vector.extract_strided_slice %39 {offsets = [0, 0, 0, 0], sizes = [1, 1, 32, 16], strides = [1, 1, 1, 1]} : vector<3x2x32x16xf32> to vector<1x1x32x16xf32>
    %168 = vector.shape_cast %167 : vector<1x1x32x16xf32> to vector<32x16xf32>
    %cst_153 = arith.constant dense<0.000000e+00> : vector<8x16xf32>
    %169 = tpu.matmul %166, %168, %cst_153 {dimension_numbers = #tpu.dot_dimension_numbers<[1], [0], [0], [1], [0, 0, 1, 1], [], []>} : vector<8x32xf32>, vector<32x16xf32>, vector<8x16xf32> -> vector<8x16xf32>
    %170 = vector.extract_strided_slice %39 {offsets = [1, 0, 0, 0], sizes = [1, 1, 32, 16], strides = [1, 1, 1, 1]} : vector<3x2x32x16xf32> to vector<1x1x32x16xf32>
    %171 = vector.shape_cast %170 : vector<1x1x32x16xf32> to vector<32x16xf32>
    %cst_154 = arith.constant dense<0.000000e+00> : vector<8x16xf32>
    %172 = tpu.matmul %166, %171, %cst_154 {dimension_numbers = #tpu.dot_dimension_numbers<[1], [0], [0], [1], [0, 0, 1, 1], [], []>} : vector<8x32xf32>, vector<32x16xf32>, vector<8x16xf32> -> vector<8x16xf32>
    %173 = vector.extract_strided_slice %39 {offsets = [2, 0, 0, 0], sizes = [1, 1, 32, 16], strides = [1, 1, 1, 1]} : vector<3x2x32x16xf32> to vector<1x1x32x16xf32>
    %174 = vector.shape_cast %173 : vector<1x1x32x16xf32> to vector<32x16xf32>
    %cst_155 = arith.constant dense<0.000000e+00> : vector<8x16xf32>
    %175 = tpu.matmul %166, %174, %cst_155 {dimension_numbers = #tpu.dot_dimension_numbers<[1], [0], [0], [1], [0, 0, 1, 1], [], []>} : vector<8x32xf32>, vector<32x16xf32>, vector<8x16xf32> -> vector<8x16xf32>
    %cst_156 = arith.constant dense<0.000000e+00> : vector<8x8xf32>
    %176 = tpu.matmul %169, %172, %cst_156 {dimension_numbers = #tpu.dot_dimension_numbers<[1], [1], [0], [0], [0, 0, 1, 0], [], []>} : vector<8x16xf32>, vector<8x16xf32>, vector<8x8xf32> -> vector<8x8xf32>
    %177 = vector.extract_strided_slice %43 {offsets = [0, 0, 0], sizes = [1, 8, 8], strides = [1, 1, 1]} : vector<2x8x8xf32> to vector<1x8x8xf32>
    %178 = vector.shape_cast %177 : vector<1x8x8xf32> to vector<8x8xf32>
    %179 = arith.addf %176, %178 : vector<8x8xf32>
    %cst_157 = arith.constant dense<0xFF800000> : vector<8xf32>
    %180 = vector.multi_reduction <maximumf>, %179, %cst_157 [1] : vector<8x8xf32> to vector<8xf32>
    %181 = vector.shape_cast %180 : vector<8xf32> to vector<8x1xf32>
    %182 = vector.broadcast %181 : vector<8x1xf32> to vector<8x8xf32>
    %183 = arith.subf %179, %182 : vector<8x8xf32>
    %184 = math.exp %183 : vector<8x8xf32>
    %cst_158 = arith.constant dense<0.000000e+00> : vector<8xf32>
    %185 = vector.multi_reduction <add>, %184, %cst_158 [1] : vector<8x8xf32> to vector<8xf32>
    %186 = vector.shape_cast %185 : vector<8xf32> to vector<8x1xf32>
    %187 = tpu.reciprocal %186 {approx = true} : vector<8x1xf32> -> vector<8x1xf32>
    %188 = vector.broadcast %187 : vector<8x1xf32> to vector<8x8xf32>
    %189 = arith.mulf %184, %188 : vector<8x8xf32>
    %cst_159 = arith.constant dense<0.000000e+00> : vector<8x16xf32>
    %190 = tpu.matmul %189, %175, %cst_159 {dimension_numbers = #tpu.dot_dimension_numbers<[1], [0], [0], [1], [0, 0, 1, 1], [], []>} : vector<8x8xf32>, vector<8x16xf32>, vector<8x16xf32> -> vector<8x16xf32>
    %191 = vector.extract_strided_slice %38 {offsets = [0, 0, 0], sizes = [1, 16, 32], strides = [1, 1, 1]} : vector<2x16x32xf32> to vector<1x16x32xf32>
    %192 = vector.shape_cast %191 : vector<1x16x32xf32> to vector<16x32xf32>
    %cst_160 = arith.constant dense<0.000000e+00> : vector<8x32xf32>
    %193 = tpu.matmul %190, %192, %cst_160 {dimension_numbers = #tpu.dot_dimension_numbers<[1], [0], [0], [1], [0, 0, 1, 1], [], []>} : vector<8x16xf32>, vector<16x32xf32>, vector<8x32xf32> -> vector<8x32xf32>
    %194 = vector.extract_strided_slice %39 {offsets = [0, 1, 0, 0], sizes = [1, 1, 32, 16], strides = [1, 1, 1, 1]} : vector<3x2x32x16xf32> to vector<1x1x32x16xf32>
    %195 = vector.shape_cast %194 : vector<1x1x32x16xf32> to vector<32x16xf32>
    %cst_161 = arith.constant dense<0.000000e+00> : vector<8x16xf32>
    %196 = tpu.matmul %166, %195, %cst_161 {dimension_numbers = #tpu.dot_dimension_numbers<[1], [0], [0], [1], [0, 0, 1, 1], [], []>} : vector<8x32xf32>, vector<32x16xf32>, vector<8x16xf32> -> vector<8x16xf32>
    %197 = vector.extract_strided_slice %39 {offsets = [1, 1, 0, 0], sizes = [1, 1, 32, 16], strides = [1, 1, 1, 1]} : vector<3x2x32x16xf32> to vector<1x1x32x16xf32>
    %198 = vector.shape_cast %197 : vector<1x1x32x16xf32> to vector<32x16xf32>
    %cst_162 = arith.constant dense<0.000000e+00> : vector<8x16xf32>
    %199 = tpu.matmul %166, %198, %cst_162 {dimension_numbers = #tpu.dot_dimension_numbers<[1], [0], [0], [1], [0, 0, 1, 1], [], []>} : vector<8x32xf32>, vector<32x16xf32>, vector<8x16xf32> -> vector<8x16xf32>
    %200 = vector.extract_strided_slice %39 {offsets = [2, 1, 0, 0], sizes = [1, 1, 32, 16], strides = [1, 1, 1, 1]} : vector<3x2x32x16xf32> to vector<1x1x32x16xf32>
    %201 = vector.shape_cast %200 : vector<1x1x32x16xf32> to vector<32x16xf32>
    %cst_163 = arith.constant dense<0.000000e+00> : vector<8x16xf32>
    %202 = tpu.matmul %166, %201, %cst_163 {dimension_numbers = #tpu.dot_dimension_numbers<[1], [0], [0], [1], [0, 0, 1, 1], [], []>} : vector<8x32xf32>, vector<32x16xf32>, vector<8x16xf32> -> vector<8x16xf32>
    %cst_164 = arith.constant dense<0.000000e+00> : vector<8x8xf32>
    %203 = tpu.matmul %196, %199, %cst_164 {dimension_numbers = #tpu.dot_dimension_numbers<[1], [1], [0], [0], [0, 0, 1, 0], [], []>} : vector<8x16xf32>, vector<8x16xf32>, vector<8x8xf32> -> vector<8x8xf32>
    %204 = vector.extract_strided_slice %43 {offsets = [1, 0, 0], sizes = [1, 8, 8], strides = [1, 1, 1]} : vector<2x8x8xf32> to vector<1x8x8xf32>
    %205 = vector.shape_cast %204 : vector<1x8x8xf32> to vector<8x8xf32>
    %206 = arith.addf %203, %205 : vector<8x8xf32>
    %cst_165 = arith.constant dense<0xFF800000> : vector<8xf32>
    %207 = vector.multi_reduction <maximumf>, %206, %cst_165 [1] : vector<8x8xf32> to vector<8xf32>
    %208 = vector.shape_cast %207 : vector<8xf32> to vector<8x1xf32>
    %209 = vector.broadcast %208 : vector<8x1xf32> to vector<8x8xf32>
    %210 = arith.subf %206, %209 : vector<8x8xf32>
    %211 = math.exp %210 : vector<8x8xf32>
    %cst_166 = arith.constant dense<0.000000e+00> : vector<8xf32>
    %212 = vector.multi_reduction <add>, %211, %cst_166 [1] : vector<8x8xf32> to vector<8xf32>
    %213 = vector.shape_cast %212 : vector<8xf32> to vector<8x1xf32>
    %214 = tpu.reciprocal %213 {approx = true} : vector<8x1xf32> -> vector<8x1xf32>
    %215 = vector.broadcast %214 : vector<8x1xf32> to vector<8x8xf32>
    %216 = arith.mulf %211, %215 : vector<8x8xf32>
    %cst_167 = arith.constant dense<0.000000e+00> : vector<8x16xf32>
    %217 = tpu.matmul %216, %202, %cst_167 {dimension_numbers = #tpu.dot_dimension_numbers<[1], [0], [0], [1], [0, 0, 1, 1], [], []>} : vector<8x8xf32>, vector<8x16xf32>, vector<8x16xf32> -> vector<8x16xf32>
    %218 = vector.extract_strided_slice %38 {offsets = [1, 0, 0], sizes = [1, 16, 32], strides = [1, 1, 1]} : vector<2x16x32xf32> to vector<1x16x32xf32>
    %219 = vector.shape_cast %218 : vector<1x16x32xf32> to vector<16x32xf32>
    %cst_168 = arith.constant dense<0.000000e+00> : vector<8x32xf32>
    %220 = tpu.matmul %217, %219, %cst_168 {dimension_numbers = #tpu.dot_dimension_numbers<[1], [0], [0], [1], [0, 0, 1, 1], [], []>} : vector<8x16xf32>, vector<16x32xf32>, vector<8x32xf32> -> vector<8x32xf32>
    %221 = arith.addf %193, %220 : vector<8x32xf32>
    %222 = arith.addf %57, %221 : vector<8x32xf32>
    %223 = arith.mulf %222, %222 : vector<8x32xf32>
    %cst_169 = arith.constant dense<0.000000e+00> : vector<8xf32>
    %224 = vector.multi_reduction <add>, %223, %cst_169 [1] : vector<8x32xf32> to vector<8xf32>
    %225 = vector.shape_cast %224 : vector<8xf32> to vector<8x1xf32>
    %cst_170 = arith.constant 3.200000e+01 : f32
    %226 = vector.broadcast %cst_170 : f32 to vector<8x1xf32>
    %227 = arith.divf %225, %226 : vector<8x1xf32>
    %cst_171 = arith.constant 9.99999997E-7 : f32
    %228 = vector.broadcast %cst_171 : f32 to vector<8x1xf32>
    %229 = arith.addf %227, %228 : vector<8x1xf32>
    %230 = math.rsqrt %229 : vector<8x1xf32>
    %231 = vector.broadcast %230 : vector<8x1xf32> to vector<8x32xf32>
    %232 = arith.mulf %222, %231 : vector<8x32xf32>
    %233 = vector.broadcast %37 : vector<1x32xf32> to vector<8x32xf32>
    %234 = arith.mulf %232, %233 : vector<8x32xf32>
    %cst_172 = arith.constant dense<0.000000e+00> : vector<8x64xf32>
    %235 = tpu.matmul %234, %40, %cst_172 {dimension_numbers = #tpu.dot_dimension_numbers<[1], [0], [0], [1], [0, 0, 1, 1], [], []>} : vector<8x32xf32>, vector<32x64xf32>, vector<8x64xf32> -> vector<8x64xf32>
    %cst_173 = arith.constant 0.000000e+00 : f32
    %236 = vector.broadcast %cst_173 : f32 to vector<8x64xf32>
    %237 = arith.maximumf %235, %236 : vector<8x64xf32>
    %cst_174 = arith.constant dense<0.000000e+00> : vector<8x32xf32>
    %238 = tpu.matmul %237, %41, %cst_174 {dimension_numbers = #tpu.dot_dimension_numbers<[1], [0], [0], [1], [0, 0, 1, 1], [], []>} : vector<8x64xf32>, vector<64x32xf32>, vector<8x32xf32> -> vector<8x32xf32>
    %239 = arith.addf %222, %238 : vector<8x32xf32>
    %240 = arith.mulf %239, %239 : vector<8x32xf32>
    %cst_175 = arith.constant dense<0.000000e+00> : vector<8xf32>
    %241 = vector.multi_reduction <add>, %240, %cst_175 [1] : vector<8x32xf32> to vector<8xf32>
    %242 = vector.shape_cast %241 : vector<8xf32> to vector<8x1xf32>
    %cst_176 = arith.constant 3.200000e+01 : f32
    %243 = vector.broadcast %cst_176 : f32 to vector<8x1xf32>
    %244 = arith.divf %242, %243 : vector<8x1xf32>
    %cst_177 = arith.constant 9.99999997E-7 : f32
    %245 = vector.broadcast %cst_177 : f32 to vector<8x1xf32>
    %246 = arith.addf %244, %245 : vector<8x1xf32>
    %247 = math.rsqrt %246 : vector<8x1xf32>
    %248 = vector.broadcast %247 : vector<8x1xf32> to vector<8x32xf32>
    %249 = arith.mulf %239, %248 : vector<8x32xf32>
    %250 = vector.broadcast %42 : vector<1x32xf32> to vector<8x32xf32>
    %251 = arith.mulf %249, %250 : vector<8x32xf32>
    %cst_178 = arith.constant dense<0.000000e+00> : vector<32xf32>
    %252 = vector.multi_reduction <add>, %251, %cst_178 [0] : vector<8x32xf32> to vector<32xf32>
    %253 = vector.shape_cast %252 : vector<32xf32> to vector<1x32xf32>
    %cst_179 = arith.constant 8.000000e+00 : f32
    %254 = vector.broadcast %cst_179 : f32 to vector<1x32xf32>
    %255 = arith.divf %253, %254 : vector<1x32xf32>
    %256 = arith.mulf %154, %154 : vector<8x32xf32>
    %cst_180 = arith.constant dense<0.000000e+00> : vector<8xf32>
    %257 = vector.multi_reduction <add>, %256, %cst_180 [1] : vector<8x32xf32> to vector<8xf32>
    %258 = vector.shape_cast %257 : vector<8xf32> to vector<8x1xf32>
    %cst_181 = arith.constant dense<0.000000e+00> : vector<8x2048xf32>
    %259 = tpu.matmul %154, %44, %cst_181 {dimension_numbers = #tpu.dot_dimension_numbers<[1], [1], [0], [0], [0, 0, 1, 0], [], []>} : vector<8x32xf32>, vector<2048x32xf32>, vector<8x2048xf32> -> vector<8x2048xf32>
    %cst_182 = arith.constant 2.000000e+00 : f32
    %260 = vector.broadcast %cst_182 : f32 to vector<8x2048xf32>
    %261 = arith.mulf %260, %259 : vector<8x2048xf32>
    %262 = vector.broadcast %258 : vector<8x1xf32> to vector<8x2048xf32>
    %263 = arith.subf %262, %261 : vector<8x2048xf32>
    %264 = vector.broadcast %45 : vector<1x2048xf32> to vector<8x2048xf32>
    %265 = arith.addf %263, %264 : vector<8x2048xf32>
    %cst_183 = arith.constant dense<0x7F800000> : vector<8xf32>
    %266 = vector.multi_reduction <minimumf>, %265, %cst_183 [1] : vector<8x2048xf32> to vector<8xf32>
    %267 = vector.shape_cast %266 : vector<8xf32> to vector<8x1xf32>
    %268 = tpu.iota {dimensions = array<i32: 1>} : vector<8x2048xi32>
    %269 = vector.broadcast %267 : vector<8x1xf32> to vector<8x2048xf32>
    %270 = arith.cmpf ole, %265, %269 : vector<8x2048xf32>
    %c2048_i32 = arith.constant 2048 : i32
    %271 = vector.broadcast %c2048_i32 : i32 to vector<8x2048xi32>
    %272 = arith.select %270, %268, %271 : vector<8x2048xi1>, vector<8x2048xi32>
    %cst_184 = arith.constant dense<2147483647> : vector<8xi32>
    %273 = vector.multi_reduction <minsi>, %272, %cst_184 [1] : vector<8x2048xi32> to vector<8xi32>
    %274 = vector.shape_cast %273 : vector<8xi32> to vector<8x1xi32>
    %275 = vector.broadcast %274 : vector<8x1xi32> to vector<8x2048xi32>
    %276 = arith.cmpi eq, %268, %275 : vector<8x2048xi32>
    %277 = arith.extui %276 : vector<8x2048xi1> to vector<8x2048xi32>
    %278 = arith.sitofp %277 : vector<8x2048xi32> to vector<8x2048xf32>
    %cst_185 = arith.constant dense<0.000000e+00> : vector<8x32xf32>
    %279 = tpu.matmul %278, %44, %cst_185 {dimension_numbers = #tpu.dot_dimension_numbers<[1], [0], [0], [1], [0, 0, 1, 1], [], []>} : vector<8x2048xf32>, vector<2048x32xf32>, vector<8x32xf32> -> vector<8x32xf32>
    %280 = arith.subf %279, %154 : vector<8x32xf32>
    %281 = arith.mulf %280, %280 : vector<8x32xf32>
    %c0_186 = arith.constant 0 : index
    %c0_187 = arith.constant 0 : index
    %c0_188 = arith.constant 0 : index
    %282 = vector.load %arg53[%c0_186, %c0_187, %c0_188] : memref<1x8x32xf32, #tpu.memory_space<vmem>>, vector<1x8x32xf32>
    %283 = vector.shape_cast %282 : vector<1x8x32xf32> to vector<8x32xf32>
    %284 = vector.shape_cast %281 : vector<8x32xf32> to vector<1x8x32xf32>
    tpu.vector_store %arg53[%c0_186, %c0_187, %c0_188], %284 {strides = array<i32>} : memref<1x8x32xf32, #tpu.memory_space<vmem>>, vector<1x8x32xf32>,
    %c0_189 = arith.constant 0 : index
    %c0_190 = arith.constant 0 : index
    %c0_191 = arith.constant 0 : index
    %285 = vector.load %arg52[%c0_189, %c0_190, %c0_191] : memref<1x1x32xf32, #tpu.memory_space<vmem>>, vector<1x1x32xf32>
    %286 = vector.shape_cast %285 : vector<1x1x32xf32> to vector<1x32xf32>
    %287 = vector.shape_cast %255 : vector<1x32xf32> to vector<1x1x32xf32>
    tpu.vector_store %arg52[%c0_189, %c0_190, %c0_191], %287 {strides = array<i32>} : memref<1x1x32xf32, #tpu.memory_space<vmem>>, vector<1x1x32xf32>,
    %cst_192 = arith.constant 0.000000e+00 : f32
    %288 = vector.broadcast %cst_192 : f32 to vector<4x32xf32>
    %289 = tpu.concatenate %279, %288 in 0 : vector<8x32xf32>, vector<4x32xf32> -> vector<12x32xf32>
    %290 = tpu.iota {dimensions = array<i32: 1>} : vector<8x12xi32>
    %c8_i32 = arith.constant 8 : i32
    %291 = vector.broadcast %c8_i32 : i32 to vector<8x12xi32>
    %292 = arith.cmpi sge, %290, %291 : vector<8x12xi32>
    %cst_193 = arith.constant -1.000000e+09 : f32
    %cst_194 = arith.constant 0.000000e+00 : f32
    %293 = vector.broadcast %cst_193 : f32 to vector<8x12xf32>
    %294 = vector.broadcast %cst_194 : f32 to vector<8x12xf32>
    %295 = arith.select %292, %293, %294 : vector<8x12xi1>, vector<8x12xf32>
    %296 = arith.mulf %51, %51 : vector<8x32xf32>
    %cst_195 = arith.constant dense<0.000000e+00> : vector<8xf32>
    %297 = vector.multi_reduction <add>, %296, %cst_195 [1] : vector<8x32xf32> to vector<8xf32>
    %298 = vector.shape_cast %297 : vector<8xf32> to vector<8x1xf32>
    %cst_196 = arith.constant 3.200000e+01 : f32
    %299 = vector.broadcast %cst_196 : f32 to vector<8x1xf32>
    %300 = arith.divf %298, %299 : vector<8x1xf32>
    %cst_197 = arith.constant 9.99999997E-7 : f32
    %301 = vector.broadcast %cst_197 : f32 to vector<8x1xf32>
    %302 = arith.addf %300, %301 : vector<8x1xf32>
    %303 = math.rsqrt %302 : vector<8x1xf32>
    %304 = vector.broadcast %303 : vector<8x1xf32> to vector<8x32xf32>
    %305 = arith.mulf %51, %304 : vector<8x32xf32>
    %306 = vector.broadcast %19 : vector<1x32xf32> to vector<8x32xf32>
    %307 = arith.mulf %305, %306 : vector<8x32xf32>
    %308 = vector.extract_strided_slice %23 {offsets = [0, 0, 0, 0], sizes = [1, 1, 32, 16], strides = [1, 1, 1, 1]} : vector<3x2x32x16xf32> to vector<1x1x32x16xf32>
    %309 = vector.shape_cast %308 : vector<1x1x32x16xf32> to vector<32x16xf32>
    %cst_198 = arith.constant dense<0.000000e+00> : vector<8x16xf32>
    %310 = tpu.matmul %307, %309, %cst_198 {dimension_numbers = #tpu.dot_dimension_numbers<[1], [0], [0], [1], [0, 0, 1, 1], [], []>} : vector<8x32xf32>, vector<32x16xf32>, vector<8x16xf32> -> vector<8x16xf32>
    %311 = vector.extract_strided_slice %23 {offsets = [1, 0, 0, 0], sizes = [1, 1, 32, 16], strides = [1, 1, 1, 1]} : vector<3x2x32x16xf32> to vector<1x1x32x16xf32>
    %312 = vector.shape_cast %311 : vector<1x1x32x16xf32> to vector<32x16xf32>
    %cst_199 = arith.constant dense<0.000000e+00> : vector<8x16xf32>
    %313 = tpu.matmul %307, %312, %cst_199 {dimension_numbers = #tpu.dot_dimension_numbers<[1], [0], [0], [1], [0, 0, 1, 1], [], []>} : vector<8x32xf32>, vector<32x16xf32>, vector<8x16xf32> -> vector<8x16xf32>
    %314 = vector.extract_strided_slice %23 {offsets = [2, 0, 0, 0], sizes = [1, 1, 32, 16], strides = [1, 1, 1, 1]} : vector<3x2x32x16xf32> to vector<1x1x32x16xf32>
    %315 = vector.shape_cast %314 : vector<1x1x32x16xf32> to vector<32x16xf32>
    %cst_200 = arith.constant dense<0.000000e+00> : vector<8x16xf32>
    %316 = tpu.matmul %307, %315, %cst_200 {dimension_numbers = #tpu.dot_dimension_numbers<[1], [0], [0], [1], [0, 0, 1, 1], [], []>} : vector<8x32xf32>, vector<32x16xf32>, vector<8x16xf32> -> vector<8x16xf32>
    %cst_201 = arith.constant dense<0.000000e+00> : vector<8x8xf32>
    %317 = tpu.matmul %310, %313, %cst_201 {dimension_numbers = #tpu.dot_dimension_numbers<[1], [1], [0], [0], [0, 0, 1, 0], [], []>} : vector<8x16xf32>, vector<8x16xf32>, vector<8x8xf32> -> vector<8x8xf32>
    %318 = vector.extract_strided_slice %27 {offsets = [0, 0, 0], sizes = [1, 8, 8], strides = [1, 1, 1]} : vector<2x8x8xf32> to vector<1x8x8xf32>
    %319 = vector.shape_cast %318 : vector<1x8x8xf32> to vector<8x8xf32>
    %320 = arith.addf %317, %319 : vector<8x8xf32>
    %cst_202 = arith.constant dense<0xFF800000> : vector<8xf32>
    %321 = vector.multi_reduction <maximumf>, %320, %cst_202 [1] : vector<8x8xf32> to vector<8xf32>
    %322 = vector.shape_cast %321 : vector<8xf32> to vector<8x1xf32>
    %323 = vector.broadcast %322 : vector<8x1xf32> to vector<8x8xf32>
    %324 = arith.subf %320, %323 : vector<8x8xf32>
    %325 = math.exp %324 : vector<8x8xf32>
    %cst_203 = arith.constant dense<0.000000e+00> : vector<8xf32>
    %326 = vector.multi_reduction <add>, %325, %cst_203 [1] : vector<8x8xf32> to vector<8xf32>
    %327 = vector.shape_cast %326 : vector<8xf32> to vector<8x1xf32>
    %328 = tpu.reciprocal %327 {approx = true} : vector<8x1xf32> -> vector<8x1xf32>
    %329 = vector.broadcast %328 : vector<8x1xf32> to vector<8x8xf32>
    %330 = arith.mulf %325, %329 : vector<8x8xf32>
    %cst_204 = arith.constant dense<0.000000e+00> : vector<8x16xf32>
    %331 = tpu.matmul %330, %316, %cst_204 {dimension_numbers = #tpu.dot_dimension_numbers<[1], [0], [0], [1], [0, 0, 1, 1], [], []>} : vector<8x8xf32>, vector<8x16xf32>, vector<8x16xf32> -> vector<8x16xf32>
    %332 = vector.extract_strided_slice %22 {offsets = [0, 0, 0], sizes = [1, 16, 32], strides = [1, 1, 1]} : vector<2x16x32xf32> to vector<1x16x32xf32>
    %333 = vector.shape_cast %332 : vector<1x16x32xf32> to vector<16x32xf32>
    %cst_205 = arith.constant dense<0.000000e+00> : vector<8x32xf32>
    %334 = tpu.matmul %331, %333, %cst_205 {dimension_numbers = #tpu.dot_dimension_numbers<[1], [0], [0], [1], [0, 0, 1, 1], [], []>} : vector<8x16xf32>, vector<16x32xf32>, vector<8x32xf32> -> vector<8x32xf32>
    %335 = vector.extract_strided_slice %23 {offsets = [0, 1, 0, 0], sizes = [1, 1, 32, 16], strides = [1, 1, 1, 1]} : vector<3x2x32x16xf32> to vector<1x1x32x16xf32>
    %336 = vector.shape_cast %335 : vector<1x1x32x16xf32> to vector<32x16xf32>
    %cst_206 = arith.constant dense<0.000000e+00> : vector<8x16xf32>
    %337 = tpu.matmul %307, %336, %cst_206 {dimension_numbers = #tpu.dot_dimension_numbers<[1], [0], [0], [1], [0, 0, 1, 1], [], []>} : vector<8x32xf32>, vector<32x16xf32>, vector<8x16xf32> -> vector<8x16xf32>
    %338 = vector.extract_strided_slice %23 {offsets = [1, 1, 0, 0], sizes = [1, 1, 32, 16], strides = [1, 1, 1, 1]} : vector<3x2x32x16xf32> to vector<1x1x32x16xf32>
    %339 = vector.shape_cast %338 : vector<1x1x32x16xf32> to vector<32x16xf32>
    %cst_207 = arith.constant dense<0.000000e+00> : vector<8x16xf32>
    %340 = tpu.matmul %307, %339, %cst_207 {dimension_numbers = #tpu.dot_dimension_numbers<[1], [0], [0], [1], [0, 0, 1, 1], [], []>} : vector<8x32xf32>, vector<32x16xf32>, vector<8x16xf32> -> vector<8x16xf32>
    %341 = vector.extract_strided_slice %23 {offsets = [2, 1, 0, 0], sizes = [1, 1, 32, 16], strides = [1, 1, 1, 1]} : vector<3x2x32x16xf32> to vector<1x1x32x16xf32>
    %342 = vector.shape_cast %341 : vector<1x1x32x16xf32> to vector<32x16xf32>
    %cst_208 = arith.constant dense<0.000000e+00> : vector<8x16xf32>
    %343 = tpu.matmul %307, %342, %cst_208 {dimension_numbers = #tpu.dot_dimension_numbers<[1], [0], [0], [1], [0, 0, 1, 1], [], []>} : vector<8x32xf32>, vector<32x16xf32>, vector<8x16xf32> -> vector<8x16xf32>
    %cst_209 = arith.constant dense<0.000000e+00> : vector<8x8xf32>
    %344 = tpu.matmul %337, %340, %cst_209 {dimension_numbers = #tpu.dot_dimension_numbers<[1], [1], [0], [0], [0, 0, 1, 0], [], []>} : vector<8x16xf32>, vector<8x16xf32>, vector<8x8xf32> -> vector<8x8xf32>
    %345 = vector.extract_strided_slice %27 {offsets = [1, 0, 0], sizes = [1, 8, 8], strides = [1, 1, 1]} : vector<2x8x8xf32> to vector<1x8x8xf32>
    %346 = vector.shape_cast %345 : vector<1x8x8xf32> to vector<8x8xf32>
    %347 = arith.addf %344, %346 : vector<8x8xf32>
    %cst_210 = arith.constant dense<0xFF800000> : vector<8xf32>
    %348 = vector.multi_reduction <maximumf>, %347, %cst_210 [1] : vector<8x8xf32> to vector<8xf32>
    %349 = vector.shape_cast %348 : vector<8xf32> to vector<8x1xf32>
    %350 = vector.broadcast %349 : vector<8x1xf32> to vector<8x8xf32>
    %351 = arith.subf %347, %350 : vector<8x8xf32>
    %352 = math.exp %351 : vector<8x8xf32>
    %cst_211 = arith.constant dense<0.000000e+00> : vector<8xf32>
    %353 = vector.multi_reduction <add>, %352, %cst_211 [1] : vector<8x8xf32> to vector<8xf32>
    %354 = vector.shape_cast %353 : vector<8xf32> to vector<8x1xf32>
    %355 = tpu.reciprocal %354 {approx = true} : vector<8x1xf32> -> vector<8x1xf32>
    %356 = vector.broadcast %355 : vector<8x1xf32> to vector<8x8xf32>
    %357 = arith.mulf %352, %356 : vector<8x8xf32>
    %cst_212 = arith.constant dense<0.000000e+00> : vector<8x16xf32>
    %358 = tpu.matmul %357, %343, %cst_212 {dimension_numbers = #tpu.dot_dimension_numbers<[1], [0], [0], [1], [0, 0, 1, 1], [], []>} : vector<8x8xf32>, vector<8x16xf32>, vector<8x16xf32> -> vector<8x16xf32>
    %359 = vector.extract_strided_slice %22 {offsets = [1, 0, 0], sizes = [1, 16, 32], strides = [1, 1, 1]} : vector<2x16x32xf32> to vector<1x16x32xf32>
    %360 = vector.shape_cast %359 : vector<1x16x32xf32> to vector<16x32xf32>
    %cst_213 = arith.constant dense<0.000000e+00> : vector<8x32xf32>
    %361 = tpu.matmul %358, %360, %cst_213 {dimension_numbers = #tpu.dot_dimension_numbers<[1], [0], [0], [1], [0, 0, 1, 1], [], []>} : vector<8x16xf32>, vector<16x32xf32>, vector<8x32xf32> -> vector<8x32xf32>
    %362 = arith.addf %334, %361 : vector<8x32xf32>
    %363 = arith.addf %51, %362 : vector<8x32xf32>
    %364 = arith.mulf %363, %363 : vector<8x32xf32>
    %cst_214 = arith.constant dense<0.000000e+00> : vector<8xf32>
    %365 = vector.multi_reduction <add>, %364, %cst_214 [1] : vector<8x32xf32> to vector<8xf32>
    %366 = vector.shape_cast %365 : vector<8xf32> to vector<8x1xf32>
    %cst_215 = arith.constant 3.200000e+01 : f32
    %367 = vector.broadcast %cst_215 : f32 to vector<8x1xf32>
    %368 = arith.divf %366, %367 : vector<8x1xf32>
    %cst_216 = arith.constant 9.99999997E-7 : f32
    %369 = vector.broadcast %cst_216 : f32 to vector<8x1xf32>
    %370 = arith.addf %368, %369 : vector<8x1xf32>
    %371 = math.rsqrt %370 : vector<8x1xf32>
    %372 = vector.broadcast %371 : vector<8x1xf32> to vector<8x32xf32>
    %373 = arith.mulf %363, %372 : vector<8x32xf32>
    %374 = vector.broadcast %20 : vector<1x32xf32> to vector<8x32xf32>
    %375 = arith.mulf %373, %374 : vector<8x32xf32>
    %376 = vector.extract_strided_slice %18 {offsets = [0, 0, 0, 0], sizes = [1, 1, 32, 16], strides = [1, 1, 1, 1]} : vector<3x2x32x16xf32> to vector<1x1x32x16xf32>
    %377 = vector.shape_cast %376 : vector<1x1x32x16xf32> to vector<32x16xf32>
    %cst_217 = arith.constant dense<0.000000e+00> : vector<8x16xf32>
    %378 = tpu.matmul %375, %377, %cst_217 {dimension_numbers = #tpu.dot_dimension_numbers<[1], [0], [0], [1], [0, 0, 1, 1], [], []>} : vector<8x32xf32>, vector<32x16xf32>, vector<8x16xf32> -> vector<8x16xf32>
    %379 = vector.extract_strided_slice %18 {offsets = [1, 0, 0, 0], sizes = [1, 1, 32, 16], strides = [1, 1, 1, 1]} : vector<3x2x32x16xf32> to vector<1x1x32x16xf32>
    %380 = vector.shape_cast %379 : vector<1x1x32x16xf32> to vector<32x16xf32>
    %cst_218 = arith.constant dense<0.000000e+00> : vector<12x16xf32>
    %381 = tpu.matmul %289, %380, %cst_218 {dimension_numbers = #tpu.dot_dimension_numbers<[1], [0], [0], [1], [0, 0, 1, 1], [], []>} : vector<12x32xf32>, vector<32x16xf32>, vector<12x16xf32> -> vector<12x16xf32>
    %382 = vector.extract_strided_slice %18 {offsets = [2, 0, 0, 0], sizes = [1, 1, 32, 16], strides = [1, 1, 1, 1]} : vector<3x2x32x16xf32> to vector<1x1x32x16xf32>
    %383 = vector.shape_cast %382 : vector<1x1x32x16xf32> to vector<32x16xf32>
    %cst_219 = arith.constant dense<0.000000e+00> : vector<12x16xf32>
    %384 = tpu.matmul %289, %383, %cst_219 {dimension_numbers = #tpu.dot_dimension_numbers<[1], [0], [0], [1], [0, 0, 1, 1], [], []>} : vector<12x32xf32>, vector<32x16xf32>, vector<12x16xf32> -> vector<12x16xf32>
    %cst_220 = arith.constant dense<0.000000e+00> : vector<8x12xf32>
    %385 = tpu.matmul %378, %381, %cst_220 {dimension_numbers = #tpu.dot_dimension_numbers<[1], [1], [0], [0], [0, 0, 1, 0], [], []>} : vector<8x16xf32>, vector<12x16xf32>, vector<8x12xf32> -> vector<8x12xf32>
    %386 = arith.addf %385, %295 : vector<8x12xf32>
    %cst_221 = arith.constant dense<0xFF800000> : vector<8xf32>
    %387 = vector.multi_reduction <maximumf>, %386, %cst_221 [1] : vector<8x12xf32> to vector<8xf32>
    %388 = vector.shape_cast %387 : vector<8xf32> to vector<8x1xf32>
    %389 = vector.broadcast %388 : vector<8x1xf32> to vector<8x12xf32>
    %390 = arith.subf %386, %389 : vector<8x12xf32>
    %391 = math.exp %390 : vector<8x12xf32>
    %cst_222 = arith.constant dense<0.000000e+00> : vector<8xf32>
    %392 = vector.multi_reduction <add>, %391, %cst_222 [1] : vector<8x12xf32> to vector<8xf32>
    %393 = vector.shape_cast %392 : vector<8xf32> to vector<8x1xf32>
    %394 = tpu.reciprocal %393 {approx = true} : vector<8x1xf32> -> vector<8x1xf32>
    %395 = vector.broadcast %394 : vector<8x1xf32> to vector<8x12xf32>
    %396 = arith.mulf %391, %395 : vector<8x12xf32>
    %cst_223 = arith.constant dense<0.000000e+00> : vector<8x16xf32>
    %397 = tpu.matmul %396, %384, %cst_223 {dimension_numbers = #tpu.dot_dimension_numbers<[1], [0], [0], [1], [0, 0, 1, 1], [], []>} : vector<8x12xf32>, vector<12x16xf32>, vector<8x16xf32> -> vector<8x16xf32>
    %398 = vector.extract_strided_slice %17 {offsets = [0, 0, 0], sizes = [1, 16, 32], strides = [1, 1, 1]} : vector<2x16x32xf32> to vector<1x16x32xf32>
    %399 = vector.shape_cast %398 : vector<1x16x32xf32> to vector<16x32xf32>
    %cst_224 = arith.constant dense<0.000000e+00> : vector<8x32xf32>
    %400 = tpu.matmul %397, %399, %cst_224 {dimension_numbers = #tpu.dot_dimension_numbers<[1], [0], [0], [1], [0, 0, 1, 1], [], []>} : vector<8x16xf32>, vector<16x32xf32>, vector<8x32xf32> -> vector<8x32xf32>
    %401 = vector.extract_strided_slice %18 {offsets = [0, 1, 0, 0], sizes = [1, 1, 32, 16], strides = [1, 1, 1, 1]} : vector<3x2x32x16xf32> to vector<1x1x32x16xf32>
    %402 = vector.shape_cast %401 : vector<1x1x32x16xf32> to vector<32x16xf32>
    %cst_225 = arith.constant dense<0.000000e+00> : vector<8x16xf32>
    %403 = tpu.matmul %375, %402, %cst_225 {dimension_numbers = #tpu.dot_dimension_numbers<[1], [0], [0], [1], [0, 0, 1, 1], [], []>} : vector<8x32xf32>, vector<32x16xf32>, vector<8x16xf32> -> vector<8x16xf32>
    %404 = vector.extract_strided_slice %18 {offsets = [1, 1, 0, 0], sizes = [1, 1, 32, 16], strides = [1, 1, 1, 1]} : vector<3x2x32x16xf32> to vector<1x1x32x16xf32>
    %405 = vector.shape_cast %404 : vector<1x1x32x16xf32> to vector<32x16xf32>
    %cst_226 = arith.constant dense<0.000000e+00> : vector<12x16xf32>
    %406 = tpu.matmul %289, %405, %cst_226 {dimension_numbers = #tpu.dot_dimension_numbers<[1], [0], [0], [1], [0, 0, 1, 1], [], []>} : vector<12x32xf32>, vector<32x16xf32>, vector<12x16xf32> -> vector<12x16xf32>
    %407 = vector.extract_strided_slice %18 {offsets = [2, 1, 0, 0], sizes = [1, 1, 32, 16], strides = [1, 1, 1, 1]} : vector<3x2x32x16xf32> to vector<1x1x32x16xf32>
    %408 = vector.shape_cast %407 : vector<1x1x32x16xf32> to vector<32x16xf32>
    %cst_227 = arith.constant dense<0.000000e+00> : vector<12x16xf32>
    %409 = tpu.matmul %289, %408, %cst_227 {dimension_numbers = #tpu.dot_dimension_numbers<[1], [0], [0], [1], [0, 0, 1, 1], [], []>} : vector<12x32xf32>, vector<32x16xf32>, vector<12x16xf32> -> vector<12x16xf32>
    %cst_228 = arith.constant dense<0.000000e+00> : vector<8x12xf32>
    %410 = tpu.matmul %403, %406, %cst_228 {dimension_numbers = #tpu.dot_dimension_numbers<[1], [1], [0], [0], [0, 0, 1, 0], [], []>} : vector<8x16xf32>, vector<12x16xf32>, vector<8x12xf32> -> vector<8x12xf32>
    %411 = arith.addf %410, %295 : vector<8x12xf32>
    %cst_229 = arith.constant dense<0xFF800000> : vector<8xf32>
    %412 = vector.multi_reduction <maximumf>, %411, %cst_229 [1] : vector<8x12xf32> to vector<8xf32>
    %413 = vector.shape_cast %412 : vector<8xf32> to vector<8x1xf32>
    %414 = vector.broadcast %413 : vector<8x1xf32> to vector<8x12xf32>
    %415 = arith.subf %411, %414 : vector<8x12xf32>
    %416 = math.exp %415 : vector<8x12xf32>
    %cst_230 = arith.constant dense<0.000000e+00> : vector<8xf32>
    %417 = vector.multi_reduction <add>, %416, %cst_230 [1] : vector<8x12xf32> to vector<8xf32>
    %418 = vector.shape_cast %417 : vector<8xf32> to vector<8x1xf32>
    %419 = tpu.reciprocal %418 {approx = true} : vector<8x1xf32> -> vector<8x1xf32>
    %420 = vector.broadcast %419 : vector<8x1xf32> to vector<8x12xf32>
    %421 = arith.mulf %416, %420 : vector<8x12xf32>
    %cst_231 = arith.constant dense<0.000000e+00> : vector<8x16xf32>
    %422 = tpu.matmul %421, %409, %cst_231 {dimension_numbers = #tpu.dot_dimension_numbers<[1], [0], [0], [1], [0, 0, 1, 1], [], []>} : vector<8x12xf32>, vector<12x16xf32>, vector<8x16xf32> -> vector<8x16xf32>
    %423 = vector.extract_strided_slice %17 {offsets = [1, 0, 0], sizes = [1, 16, 32], strides = [1, 1, 1]} : vector<2x16x32xf32> to vector<1x16x32xf32>
    %424 = vector.shape_cast %423 : vector<1x16x32xf32> to vector<16x32xf32>
    %cst_232 = arith.constant dense<0.000000e+00> : vector<8x32xf32>
    %425 = tpu.matmul %422, %424, %cst_232 {dimension_numbers = #tpu.dot_dimension_numbers<[1], [0], [0], [1], [0, 0, 1, 1], [], []>} : vector<8x16xf32>, vector<16x32xf32>, vector<8x32xf32> -> vector<8x32xf32>
    %426 = arith.addf %400, %425 : vector<8x32xf32>
    %427 = arith.addf %363, %426 : vector<8x32xf32>
    %428 = arith.mulf %427, %427 : vector<8x32xf32>
    %cst_233 = arith.constant dense<0.000000e+00> : vector<8xf32>
    %429 = vector.multi_reduction <add>, %428, %cst_233 [1] : vector<8x32xf32> to vector<8xf32>
    %430 = vector.shape_cast %429 : vector<8xf32> to vector<8x1xf32>
    %cst_234 = arith.constant 3.200000e+01 : f32
    %431 = vector.broadcast %cst_234 : f32 to vector<8x1xf32>
    %432 = arith.divf %430, %431 : vector<8x1xf32>
    %cst_235 = arith.constant 9.99999997E-7 : f32
    %433 = vector.broadcast %cst_235 : f32 to vector<8x1xf32>
    %434 = arith.addf %432, %433 : vector<8x1xf32>
    %435 = math.rsqrt %434 : vector<8x1xf32>
    %436 = vector.broadcast %435 : vector<8x1xf32> to vector<8x32xf32>
    %437 = arith.mulf %427, %436 : vector<8x32xf32>
    %438 = vector.broadcast %21 : vector<1x32xf32> to vector<8x32xf32>
    %439 = arith.mulf %437, %438 : vector<8x32xf32>
    %cst_236 = arith.constant dense<0.000000e+00> : vector<8x64xf32>
    %440 = tpu.matmul %439, %24, %cst_236 {dimension_numbers = #tpu.dot_dimension_numbers<[1], [0], [0], [1], [0, 0, 1, 1], [], []>} : vector<8x32xf32>, vector<32x64xf32>, vector<8x64xf32> -> vector<8x64xf32>
    %cst_237 = arith.constant 0.000000e+00 : f32
    %441 = vector.broadcast %cst_237 : f32 to vector<8x64xf32>
    %442 = arith.maximumf %440, %441 : vector<8x64xf32>
    %cst_238 = arith.constant dense<0.000000e+00> : vector<8x32xf32>
    %443 = tpu.matmul %442, %25, %cst_238 {dimension_numbers = #tpu.dot_dimension_numbers<[1], [0], [0], [1], [0, 0, 1, 1], [], []>} : vector<8x64xf32>, vector<64x32xf32>, vector<8x32xf32> -> vector<8x32xf32>
    %444 = arith.addf %427, %443 : vector<8x32xf32>
    %445 = arith.mulf %444, %444 : vector<8x32xf32>
    %cst_239 = arith.constant dense<0.000000e+00> : vector<8xf32>
    %446 = vector.multi_reduction <add>, %445, %cst_239 [1] : vector<8x32xf32> to vector<8xf32>
    %447 = vector.shape_cast %446 : vector<8xf32> to vector<8x1xf32>
    %cst_240 = arith.constant 3.200000e+01 : f32
    %448 = vector.broadcast %cst_240 : f32 to vector<8x1xf32>
    %449 = arith.divf %447, %448 : vector<8x1xf32>
    %cst_241 = arith.constant 9.99999997E-7 : f32
    %450 = vector.broadcast %cst_241 : f32 to vector<8x1xf32>
    %451 = arith.addf %449, %450 : vector<8x1xf32>
    %452 = math.rsqrt %451 : vector<8x1xf32>
    %453 = vector.broadcast %452 : vector<8x1xf32> to vector<8x32xf32>
    %454 = arith.mulf %444, %453 : vector<8x32xf32>
    %455 = vector.broadcast %26 : vector<1x32xf32> to vector<8x32xf32>
    %456 = arith.mulf %454, %455 : vector<8x32xf32>
    %cst_242 = arith.constant dense<0.000000e+00> : vector<8x128xf32>
    %457 = tpu.matmul %456, %14, %cst_242 {dimension_numbers = #tpu.dot_dimension_numbers<[1], [0], [0], [1], [0, 0, 1, 1], [], []>} : vector<8x32xf32>, vector<32x128xf32>, vector<8x128xf32> -> vector<8x128xf32>
    %458 = vector.broadcast %13 : vector<1x128xf32> to vector<8x128xf32>
    %459 = arith.addf %457, %458 : vector<8x128xf32>
    %c0_243 = arith.constant 0 : index
    %c0_244 = arith.constant 0 : index
    %c0_245 = arith.constant 0 : index
    %460 = vector.load %arg51[%c0_243, %c0_244, %c0_245] : memref<1x8x128xf32, #tpu.memory_space<vmem>>, vector<1x8x128xf32>
    %461 = vector.shape_cast %460 : vector<1x8x128xf32> to vector<8x128xf32>
    %462 = vector.shape_cast %459 : vector<8x128xf32> to vector<1x8x128xf32>
    tpu.vector_store %arg51[%c0_243, %c0_244, %c0_245], %462 {strides = array<i32>} : memref<1x8x128xf32, #tpu.memory_space<vmem>>, vector<1x8x128xf32>,
    %cst_246 = arith.constant 0.000000e+00 : f32
    %463 = vector.broadcast %cst_246 : f32 to vector<1x32xf32>
    %464 = vector.extract_strided_slice %56 {offsets = [0, 0], sizes = [7, 32], strides = [1, 1]} : vector<8x32xf32> to vector<7x32xf32>
    %465 = tpu.concatenate %463, %464 in 0 : vector<1x32xf32>, vector<7x32xf32> -> vector<8x32xf32>
    %466 = vector.broadcast %255 : vector<1x32xf32> to vector<12x32xf32>
    %467 = arith.addf %289, %466 : vector<12x32xf32>
    %468 = arith.mulf %465, %465 : vector<8x32xf32>
    %cst_247 = arith.constant dense<0.000000e+00> : vector<8xf32>
    %469 = vector.multi_reduction <add>, %468, %cst_247 [1] : vector<8x32xf32> to vector<8xf32>
    %470 = vector.shape_cast %469 : vector<8xf32> to vector<8x1xf32>
    %cst_248 = arith.constant 3.200000e+01 : f32
    %471 = vector.broadcast %cst_248 : f32 to vector<8x1xf32>
    %472 = arith.divf %470, %471 : vector<8x1xf32>
    %cst_249 = arith.constant 9.99999997E-7 : f32
    %473 = vector.broadcast %cst_249 : f32 to vector<8x1xf32>
    %474 = arith.addf %472, %473 : vector<8x1xf32>
    %475 = math.rsqrt %474 : vector<8x1xf32>
    %476 = vector.broadcast %475 : vector<8x1xf32> to vector<8x32xf32>
    %477 = arith.mulf %465, %476 : vector<8x32xf32>
    %478 = vector.broadcast %2 : vector<1x32xf32> to vector<8x32xf32>
    %479 = arith.mulf %477, %478 : vector<8x32xf32>
    %480 = vector.extract_strided_slice %6 {offsets = [0, 0, 0, 0], sizes = [1, 1, 32, 16], strides = [1, 1, 1, 1]} : vector<3x2x32x16xf32> to vector<1x1x32x16xf32>
    %481 = vector.shape_cast %480 : vector<1x1x32x16xf32> to vector<32x16xf32>
    %cst_250 = arith.constant dense<0.000000e+00> : vector<8x16xf32>
    %482 = tpu.matmul %479, %481, %cst_250 {dimension_numbers = #tpu.dot_dimension_numbers<[1], [0], [0], [1], [0, 0, 1, 1], [], []>} : vector<8x32xf32>, vector<32x16xf32>, vector<8x16xf32> -> vector<8x16xf32>
    %483 = vector.extract_strided_slice %6 {offsets = [1, 0, 0, 0], sizes = [1, 1, 32, 16], strides = [1, 1, 1, 1]} : vector<3x2x32x16xf32> to vector<1x1x32x16xf32>
    %484 = vector.shape_cast %483 : vector<1x1x32x16xf32> to vector<32x16xf32>
    %cst_251 = arith.constant dense<0.000000e+00> : vector<8x16xf32>
    %485 = tpu.matmul %479, %484, %cst_251 {dimension_numbers = #tpu.dot_dimension_numbers<[1], [0], [0], [1], [0, 0, 1, 1], [], []>} : vector<8x32xf32>, vector<32x16xf32>, vector<8x16xf32> -> vector<8x16xf32>
    %486 = vector.extract_strided_slice %6 {offsets = [2, 0, 0, 0], sizes = [1, 1, 32, 16], strides = [1, 1, 1, 1]} : vector<3x2x32x16xf32> to vector<1x1x32x16xf32>
    %487 = vector.shape_cast %486 : vector<1x1x32x16xf32> to vector<32x16xf32>
    %cst_252 = arith.constant dense<0.000000e+00> : vector<8x16xf32>
    %488 = tpu.matmul %479, %487, %cst_252 {dimension_numbers = #tpu.dot_dimension_numbers<[1], [0], [0], [1], [0, 0, 1, 1], [], []>} : vector<8x32xf32>, vector<32x16xf32>, vector<8x16xf32> -> vector<8x16xf32>
    %cst_253 = arith.constant dense<0.000000e+00> : vector<8x8xf32>
    %489 = tpu.matmul %482, %485, %cst_253 {dimension_numbers = #tpu.dot_dimension_numbers<[1], [1], [0], [0], [0, 0, 1, 0], [], []>} : vector<8x16xf32>, vector<8x16xf32>, vector<8x8xf32> -> vector<8x8xf32>
    %490 = vector.extract_strided_slice %10 {offsets = [0, 0, 0], sizes = [1, 8, 8], strides = [1, 1, 1]} : vector<2x8x8xf32> to vector<1x8x8xf32>
    %491 = vector.shape_cast %490 : vector<1x8x8xf32> to vector<8x8xf32>
    %492 = arith.addf %489, %491 : vector<8x8xf32>
    %cst_254 = arith.constant dense<0xFF800000> : vector<8xf32>
    %493 = vector.multi_reduction <maximumf>, %492, %cst_254 [1] : vector<8x8xf32> to vector<8xf32>
    %494 = vector.shape_cast %493 : vector<8xf32> to vector<8x1xf32>
    %495 = vector.broadcast %494 : vector<8x1xf32> to vector<8x8xf32>
    %496 = arith.subf %492, %495 : vector<8x8xf32>
    %497 = math.exp %496 : vector<8x8xf32>
    %cst_255 = arith.constant dense<0.000000e+00> : vector<8xf32>
    %498 = vector.multi_reduction <add>, %497, %cst_255 [1] : vector<8x8xf32> to vector<8xf32>
    %499 = vector.shape_cast %498 : vector<8xf32> to vector<8x1xf32>
    %500 = tpu.reciprocal %499 {approx = true} : vector<8x1xf32> -> vector<8x1xf32>
    %501 = vector.broadcast %500 : vector<8x1xf32> to vector<8x8xf32>
    %502 = arith.mulf %497, %501 : vector<8x8xf32>
    %cst_256 = arith.constant dense<0.000000e+00> : vector<8x16xf32>
    %503 = tpu.matmul %502, %488, %cst_256 {dimension_numbers = #tpu.dot_dimension_numbers<[1], [0], [0], [1], [0, 0, 1, 1], [], []>} : vector<8x8xf32>, vector<8x16xf32>, vector<8x16xf32> -> vector<8x16xf32>
    %504 = vector.extract_strided_slice %5 {offsets = [0, 0, 0], sizes = [1, 16, 32], strides = [1, 1, 1]} : vector<2x16x32xf32> to vector<1x16x32xf32>
    %505 = vector.shape_cast %504 : vector<1x16x32xf32> to vector<16x32xf32>
    %cst_257 = arith.constant dense<0.000000e+00> : vector<8x32xf32>
    %506 = tpu.matmul %503, %505, %cst_257 {dimension_numbers = #tpu.dot_dimension_numbers<[1], [0], [0], [1], [0, 0, 1, 1], [], []>} : vector<8x16xf32>, vector<16x32xf32>, vector<8x32xf32> -> vector<8x32xf32>
    %507 = vector.extract_strided_slice %6 {offsets = [0, 1, 0, 0], sizes = [1, 1, 32, 16], strides = [1, 1, 1, 1]} : vector<3x2x32x16xf32> to vector<1x1x32x16xf32>
    %508 = vector.shape_cast %507 : vector<1x1x32x16xf32> to vector<32x16xf32>
    %cst_258 = arith.constant dense<0.000000e+00> : vector<8x16xf32>
    %509 = tpu.matmul %479, %508, %cst_258 {dimension_numbers = #tpu.dot_dimension_numbers<[1], [0], [0], [1], [0, 0, 1, 1], [], []>} : vector<8x32xf32>, vector<32x16xf32>, vector<8x16xf32> -> vector<8x16xf32>
    %510 = vector.extract_strided_slice %6 {offsets = [1, 1, 0, 0], sizes = [1, 1, 32, 16], strides = [1, 1, 1, 1]} : vector<3x2x32x16xf32> to vector<1x1x32x16xf32>
    %511 = vector.shape_cast %510 : vector<1x1x32x16xf32> to vector<32x16xf32>
    %cst_259 = arith.constant dense<0.000000e+00> : vector<8x16xf32>
    %512 = tpu.matmul %479, %511, %cst_259 {dimension_numbers = #tpu.dot_dimension_numbers<[1], [0], [0], [1], [0, 0, 1, 1], [], []>} : vector<8x32xf32>, vector<32x16xf32>, vector<8x16xf32> -> vector<8x16xf32>
    %513 = vector.extract_strided_slice %6 {offsets = [2, 1, 0, 0], sizes = [1, 1, 32, 16], strides = [1, 1, 1, 1]} : vector<3x2x32x16xf32> to vector<1x1x32x16xf32>
    %514 = vector.shape_cast %513 : vector<1x1x32x16xf32> to vector<32x16xf32>
    %cst_260 = arith.constant dense<0.000000e+00> : vector<8x16xf32>
    %515 = tpu.matmul %479, %514, %cst_260 {dimension_numbers = #tpu.dot_dimension_numbers<[1], [0], [0], [1], [0, 0, 1, 1], [], []>} : vector<8x32xf32>, vector<32x16xf32>, vector<8x16xf32> -> vector<8x16xf32>
    %cst_261 = arith.constant dense<0.000000e+00> : vector<8x8xf32>
    %516 = tpu.matmul %509, %512, %cst_261 {dimension_numbers = #tpu.dot_dimension_numbers<[1], [1], [0], [0], [0, 0, 1, 0], [], []>} : vector<8x16xf32>, vector<8x16xf32>, vector<8x8xf32> -> vector<8x8xf32>
    %517 = vector.extract_strided_slice %10 {offsets = [1, 0, 0], sizes = [1, 8, 8], strides = [1, 1, 1]} : vector<2x8x8xf32> to vector<1x8x8xf32>
    %518 = vector.shape_cast %517 : vector<1x8x8xf32> to vector<8x8xf32>
    %519 = arith.addf %516, %518 : vector<8x8xf32>
    %cst_262 = arith.constant dense<0xFF800000> : vector<8xf32>
    %520 = vector.multi_reduction <maximumf>, %519, %cst_262 [1] : vector<8x8xf32> to vector<8xf32>
    %521 = vector.shape_cast %520 : vector<8xf32> to vector<8x1xf32>
    %522 = vector.broadcast %521 : vector<8x1xf32> to vector<8x8xf32>
    %523 = arith.subf %519, %522 : vector<8x8xf32>
    %524 = math.exp %523 : vector<8x8xf32>
    %cst_263 = arith.constant dense<0.000000e+00> : vector<8xf32>
    %525 = vector.multi_reduction <add>, %524, %cst_263 [1] : vector<8x8xf32> to vector<8xf32>
    %526 = vector.shape_cast %525 : vector<8xf32> to vector<8x1xf32>
    %527 = tpu.reciprocal %526 {approx = true} : vector<8x1xf32> -> vector<8x1xf32>
    %528 = vector.broadcast %527 : vector<8x1xf32> to vector<8x8xf32>
    %529 = arith.mulf %524, %528 : vector<8x8xf32>
    %cst_264 = arith.constant dense<0.000000e+00> : vector<8x16xf32>
    %530 = tpu.matmul %529, %515, %cst_264 {dimension_numbers = #tpu.dot_dimension_numbers<[1], [0], [0], [1], [0, 0, 1, 1], [], []>} : vector<8x8xf32>, vector<8x16xf32>, vector<8x16xf32> -> vector<8x16xf32>
    %531 = vector.extract_strided_slice %5 {offsets = [1, 0, 0], sizes = [1, 16, 32], strides = [1, 1, 1]} : vector<2x16x32xf32> to vector<1x16x32xf32>
    %532 = vector.shape_cast %531 : vector<1x16x32xf32> to vector<16x32xf32>
    %cst_265 = arith.constant dense<0.000000e+00> : vector<8x32xf32>
    %533 = tpu.matmul %530, %532, %cst_265 {dimension_numbers = #tpu.dot_dimension_numbers<[1], [0], [0], [1], [0, 0, 1, 1], [], []>} : vector<8x16xf32>, vector<16x32xf32>, vector<8x32xf32> -> vector<8x32xf32>
    %534 = arith.addf %506, %533 : vector<8x32xf32>
    %535 = arith.addf %465, %534 : vector<8x32xf32>
    %536 = arith.mulf %535, %535 : vector<8x32xf32>
    %cst_266 = arith.constant dense<0.000000e+00> : vector<8xf32>
    %537 = vector.multi_reduction <add>, %536, %cst_266 [1] : vector<8x32xf32> to vector<8xf32>
    %538 = vector.shape_cast %537 : vector<8xf32> to vector<8x1xf32>
    %cst_267 = arith.constant 3.200000e+01 : f32
    %539 = vector.broadcast %cst_267 : f32 to vector<8x1xf32>
    %540 = arith.divf %538, %539 : vector<8x1xf32>
    %cst_268 = arith.constant 9.99999997E-7 : f32
    %541 = vector.broadcast %cst_268 : f32 to vector<8x1xf32>
    %542 = arith.addf %540, %541 : vector<8x1xf32>
    %543 = math.rsqrt %542 : vector<8x1xf32>
    %544 = vector.broadcast %543 : vector<8x1xf32> to vector<8x32xf32>
    %545 = arith.mulf %535, %544 : vector<8x32xf32>
    %546 = vector.broadcast %3 : vector<1x32xf32> to vector<8x32xf32>
    %547 = arith.mulf %545, %546 : vector<8x32xf32>
    %548 = vector.extract_strided_slice %1 {offsets = [0, 0, 0, 0], sizes = [1, 1, 32, 16], strides = [1, 1, 1, 1]} : vector<3x2x32x16xf32> to vector<1x1x32x16xf32>
    %549 = vector.shape_cast %548 : vector<1x1x32x16xf32> to vector<32x16xf32>
    %cst_269 = arith.constant dense<0.000000e+00> : vector<8x16xf32>
    %550 = tpu.matmul %547, %549, %cst_269 {dimension_numbers = #tpu.dot_dimension_numbers<[1], [0], [0], [1], [0, 0, 1, 1], [], []>} : vector<8x32xf32>, vector<32x16xf32>, vector<8x16xf32> -> vector<8x16xf32>
    %551 = vector.extract_strided_slice %1 {offsets = [1, 0, 0, 0], sizes = [1, 1, 32, 16], strides = [1, 1, 1, 1]} : vector<3x2x32x16xf32> to vector<1x1x32x16xf32>
    %552 = vector.shape_cast %551 : vector<1x1x32x16xf32> to vector<32x16xf32>
    %cst_270 = arith.constant dense<0.000000e+00> : vector<12x16xf32>
    %553 = tpu.matmul %467, %552, %cst_270 {dimension_numbers = #tpu.dot_dimension_numbers<[1], [0], [0], [1], [0, 0, 1, 1], [], []>} : vector<12x32xf32>, vector<32x16xf32>, vector<12x16xf32> -> vector<12x16xf32>
    %554 = vector.extract_strided_slice %1 {offsets = [2, 0, 0, 0], sizes = [1, 1, 32, 16], strides = [1, 1, 1, 1]} : vector<3x2x32x16xf32> to vector<1x1x32x16xf32>
    %555 = vector.shape_cast %554 : vector<1x1x32x16xf32> to vector<32x16xf32>
    %cst_271 = arith.constant dense<0.000000e+00> : vector<12x16xf32>
    %556 = tpu.matmul %467, %555, %cst_271 {dimension_numbers = #tpu.dot_dimension_numbers<[1], [0], [0], [1], [0, 0, 1, 1], [], []>} : vector<12x32xf32>, vector<32x16xf32>, vector<12x16xf32> -> vector<12x16xf32>
    %cst_272 = arith.constant dense<0.000000e+00> : vector<8x12xf32>
    %557 = tpu.matmul %550, %553, %cst_272 {dimension_numbers = #tpu.dot_dimension_numbers<[1], [1], [0], [0], [0, 0, 1, 0], [], []>} : vector<8x16xf32>, vector<12x16xf32>, vector<8x12xf32> -> vector<8x12xf32>
    %cst_273 = arith.constant dense<0xFF800000> : vector<8xf32>
    %558 = vector.multi_reduction <maximumf>, %557, %cst_273 [1] : vector<8x12xf32> to vector<8xf32>
    %559 = vector.shape_cast %558 : vector<8xf32> to vector<8x1xf32>
    %560 = vector.broadcast %559 : vector<8x1xf32> to vector<8x12xf32>
    %561 = arith.subf %557, %560 : vector<8x12xf32>
    %562 = math.exp %561 : vector<8x12xf32>
    %cst_274 = arith.constant dense<0.000000e+00> : vector<8xf32>
    %563 = vector.multi_reduction <add>, %562, %cst_274 [1] : vector<8x12xf32> to vector<8xf32>
    %564 = vector.shape_cast %563 : vector<8xf32> to vector<8x1xf32>
    %565 = tpu.reciprocal %564 {approx = true} : vector<8x1xf32> -> vector<8x1xf32>
    %566 = vector.broadcast %565 : vector<8x1xf32> to vector<8x12xf32>
    %567 = arith.mulf %562, %566 : vector<8x12xf32>
    %cst_275 = arith.constant dense<0.000000e+00> : vector<8x16xf32>
    %568 = tpu.matmul %567, %556, %cst_275 {dimension_numbers = #tpu.dot_dimension_numbers<[1], [0], [0], [1], [0, 0, 1, 1], [], []>} : vector<8x12xf32>, vector<12x16xf32>, vector<8x16xf32> -> vector<8x16xf32>
    %569 = vector.extract_strided_slice %0 {offsets = [0, 0, 0], sizes = [1, 16, 32], strides = [1, 1, 1]} : vector<2x16x32xf32> to vector<1x16x32xf32>
    %570 = vector.shape_cast %569 : vector<1x16x32xf32> to vector<16x32xf32>
    %cst_276 = arith.constant dense<0.000000e+00> : vector<8x32xf32>
    %571 = tpu.matmul %568, %570, %cst_276 {dimension_numbers = #tpu.dot_dimension_numbers<[1], [0], [0], [1], [0, 0, 1, 1], [], []>} : vector<8x16xf32>, vector<16x32xf32>, vector<8x32xf32> -> vector<8x32xf32>
    %572 = vector.extract_strided_slice %1 {offsets = [0, 1, 0, 0], sizes = [1, 1, 32, 16], strides = [1, 1, 1, 1]} : vector<3x2x32x16xf32> to vector<1x1x32x16xf32>
    %573 = vector.shape_cast %572 : vector<1x1x32x16xf32> to vector<32x16xf32>
    %cst_277 = arith.constant dense<0.000000e+00> : vector<8x16xf32>
    %574 = tpu.matmul %547, %573, %cst_277 {dimension_numbers = #tpu.dot_dimension_numbers<[1], [0], [0], [1], [0, 0, 1, 1], [], []>} : vector<8x32xf32>, vector<32x16xf32>, vector<8x16xf32> -> vector<8x16xf32>
    %575 = vector.extract_strided_slice %1 {offsets = [1, 1, 0, 0], sizes = [1, 1, 32, 16], strides = [1, 1, 1, 1]} : vector<3x2x32x16xf32> to vector<1x1x32x16xf32>
    %576 = vector.shape_cast %575 : vector<1x1x32x16xf32> to vector<32x16xf32>
    %cst_278 = arith.constant dense<0.000000e+00> : vector<12x16xf32>
    %577 = tpu.matmul %467, %576, %cst_278 {dimension_numbers = #tpu.dot_dimension_numbers<[1], [0], [0], [1], [0, 0, 1, 1], [], []>} : vector<12x32xf32>, vector<32x16xf32>, vector<12x16xf32> -> vector<12x16xf32>
    %578 = vector.extract_strided_slice %1 {offsets = [2, 1, 0, 0], sizes = [1, 1, 32, 16], strides = [1, 1, 1, 1]} : vector<3x2x32x16xf32> to vector<1x1x32x16xf32>
    %579 = vector.shape_cast %578 : vector<1x1x32x16xf32> to vector<32x16xf32>
    %cst_279 = arith.constant dense<0.000000e+00> : vector<12x16xf32>
    %580 = tpu.matmul %467, %579, %cst_279 {dimension_numbers = #tpu.dot_dimension_numbers<[1], [0], [0], [1], [0, 0, 1, 1], [], []>} : vector<12x32xf32>, vector<32x16xf32>, vector<12x16xf32> -> vector<12x16xf32>
    %cst_280 = arith.constant dense<0.000000e+00> : vector<8x12xf32>
    %581 = tpu.matmul %574, %577, %cst_280 {dimension_numbers = #tpu.dot_dimension_numbers<[1], [1], [0], [0], [0, 0, 1, 0], [], []>} : vector<8x16xf32>, vector<12x16xf32>, vector<8x12xf32> -> vector<8x12xf32>
    %cst_281 = arith.constant dense<0xFF800000> : vector<8xf32>
    %582 = vector.multi_reduction <maximumf>, %581, %cst_281 [1] : vector<8x12xf32> to vector<8xf32>
    %583 = vector.shape_cast %582 : vector<8xf32> to vector<8x1xf32>
    %584 = vector.broadcast %583 : vector<8x1xf32> to vector<8x12xf32>
    %585 = arith.subf %581, %584 : vector<8x12xf32>
    %586 = math.exp %585 : vector<8x12xf32>
    %cst_282 = arith.constant dense<0.000000e+00> : vector<8xf32>
    %587 = vector.multi_reduction <add>, %586, %cst_282 [1] : vector<8x12xf32> to vector<8xf32>
    %588 = vector.shape_cast %587 : vector<8xf32> to vector<8x1xf32>
    %589 = tpu.reciprocal %588 {approx = true} : vector<8x1xf32> -> vector<8x1xf32>
    %590 = vector.broadcast %589 : vector<8x1xf32> to vector<8x12xf32>
    %591 = arith.mulf %586, %590 : vector<8x12xf32>
    %cst_283 = arith.constant dense<0.000000e+00> : vector<8x16xf32>
    %592 = tpu.matmul %591, %580, %cst_283 {dimension_numbers = #tpu.dot_dimension_numbers<[1], [0], [0], [1], [0, 0, 1, 1], [], []>} : vector<8x12xf32>, vector<12x16xf32>, vector<8x16xf32> -> vector<8x16xf32>
    %593 = vector.extract_strided_slice %0 {offsets = [1, 0, 0], sizes = [1, 16, 32], strides = [1, 1, 1]} : vector<2x16x32xf32> to vector<1x16x32xf32>
    %594 = vector.shape_cast %593 : vector<1x16x32xf32> to vector<16x32xf32>
    %cst_284 = arith.constant dense<0.000000e+00> : vector<8x32xf32>
    %595 = tpu.matmul %592, %594, %cst_284 {dimension_numbers = #tpu.dot_dimension_numbers<[1], [0], [0], [1], [0, 0, 1, 1], [], []>} : vector<8x16xf32>, vector<16x32xf32>, vector<8x32xf32> -> vector<8x32xf32>
    %596 = arith.addf %571, %595 : vector<8x32xf32>
    %597 = arith.addf %535, %596 : vector<8x32xf32>
    %598 = arith.mulf %597, %597 : vector<8x32xf32>
    %cst_285 = arith.constant dense<0.000000e+00> : vector<8xf32>
    %599 = vector.multi_reduction <add>, %598, %cst_285 [1] : vector<8x32xf32> to vector<8xf32>
    %600 = vector.shape_cast %599 : vector<8xf32> to vector<8x1xf32>
    %cst_286 = arith.constant 3.200000e+01 : f32
    %601 = vector.broadcast %cst_286 : f32 to vector<8x1xf32>
    %602 = arith.divf %600, %601 : vector<8x1xf32>
    %cst_287 = arith.constant 9.99999997E-7 : f32
    %603 = vector.broadcast %cst_287 : f32 to vector<8x1xf32>
    %604 = arith.addf %602, %603 : vector<8x1xf32>
    %605 = math.rsqrt %604 : vector<8x1xf32>
    %606 = vector.broadcast %605 : vector<8x1xf32> to vector<8x32xf32>
    %607 = arith.mulf %597, %606 : vector<8x32xf32>
    %608 = vector.broadcast %4 : vector<1x32xf32> to vector<8x32xf32>
    %609 = arith.mulf %607, %608 : vector<8x32xf32>
    %cst_288 = arith.constant dense<0.000000e+00> : vector<8x64xf32>
    %610 = tpu.matmul %609, %7, %cst_288 {dimension_numbers = #tpu.dot_dimension_numbers<[1], [0], [0], [1], [0, 0, 1, 1], [], []>} : vector<8x32xf32>, vector<32x64xf32>, vector<8x64xf32> -> vector<8x64xf32>
    %cst_289 = arith.constant 0.000000e+00 : f32
    %611 = vector.broadcast %cst_289 : f32 to vector<8x64xf32>
    %612 = arith.maximumf %610, %611 : vector<8x64xf32>
    %cst_290 = arith.constant dense<0.000000e+00> : vector<8x32xf32>
    %613 = tpu.matmul %612, %8, %cst_290 {dimension_numbers = #tpu.dot_dimension_numbers<[1], [0], [0], [1], [0, 0, 1, 1], [], []>} : vector<8x64xf32>, vector<64x32xf32>, vector<8x32xf32> -> vector<8x32xf32>
    %614 = arith.addf %597, %613 : vector<8x32xf32>
    %615 = arith.mulf %614, %614 : vector<8x32xf32>
    %cst_291 = arith.constant dense<0.000000e+00> : vector<8xf32>
    %616 = vector.multi_reduction <add>, %615, %cst_291 [1] : vector<8x32xf32> to vector<8xf32>
    %617 = vector.shape_cast %616 : vector<8xf32> to vector<8x1xf32>
    %cst_292 = arith.constant 3.200000e+01 : f32
    %618 = vector.broadcast %cst_292 : f32 to vector<8x1xf32>
    %619 = arith.divf %617, %618 : vector<8x1xf32>
    %cst_293 = arith.constant 9.99999997E-7 : f32
    %620 = vector.broadcast %cst_293 : f32 to vector<8x1xf32>
    %621 = arith.addf %619, %620 : vector<8x1xf32>
    %622 = math.rsqrt %621 : vector<8x1xf32>
    %623 = vector.broadcast %622 : vector<8x1xf32> to vector<8x32xf32>
    %624 = arith.mulf %614, %623 : vector<8x32xf32>
    %625 = vector.broadcast %9 : vector<1x32xf32> to vector<8x32xf32>
    %626 = arith.mulf %624, %625 : vector<8x32xf32>
    %cst_294 = arith.constant dense<0.000000e+00> : vector<8x128xf32>
    %627 = tpu.matmul %626, %16, %cst_294 {dimension_numbers = #tpu.dot_dimension_numbers<[1], [0], [0], [1], [0, 0, 1, 1], [], []>} : vector<8x32xf32>, vector<32x128xf32>, vector<8x128xf32> -> vector<8x128xf32>
    %628 = vector.broadcast %15 : vector<1x128xf32> to vector<8x128xf32>
    %629 = arith.addf %627, %628 : vector<8x128xf32>
    %c0_295 = arith.constant 0 : index
    %c0_296 = arith.constant 0 : index
    %c0_297 = arith.constant 0 : index
    %630 = vector.load %arg50[%c0_295, %c0_296, %c0_297] : memref<1x8x128xf32, #tpu.memory_space<vmem>>, vector<1x8x128xf32>
    %631 = vector.shape_cast %630 : vector<1x8x128xf32> to vector<8x128xf32>
    %632 = vector.shape_cast %629 : vector<8x128xf32> to vector<1x8x128xf32>
    tpu.vector_store %arg50[%c0_295, %c0_296, %c0_297], %632 {strides = array<i32>} : memref<1x8x128xf32, #tpu.memory_space<vmem>>, vector<1x8x128xf32>,
    return
  }
  func.func @transform_0(%arg0: i32) -> (i32, i32, i32) {
    %c0_i32 = arith.constant 0 : i32
    %c0_i32_0 = arith.constant 0 : i32
    %c0_i32_1 = arith.constant 0 : i32
    return %arg0, %c0_i32, %c0_i32_0 : i32, i32, i32
  }
  func.func @transform_1(%arg0: i32) -> (i32, i32, i32) {
    %c0_i32 = arith.constant 0 : i32
    %c0_i32_0 = arith.constant 0 : i32
    %c0_i32_1 = arith.constant 0 : i32
    return %arg0, %c0_i32, %c0_i32_0 : i32, i32, i32
  }
  func.func @transform_2(%arg0: i32) -> (i32, i32, i32) {
    %c0_i32 = arith.constant 0 : i32
    %c0_i32_0 = arith.constant 0 : i32
    %c0_i32_1 = arith.constant 0 : i32
    return %arg0, %c0_i32, %c0_i32_0 : i32, i32, i32
  }
  func.func @transform_3(%arg0: i32) -> (i32, i32, i32) {
    %c0_i32 = arith.constant 0 : i32
    %c0_i32_0 = arith.constant 0 : i32
    %c0_i32_1 = arith.constant 0 : i32
    %c0_i32_2 = arith.constant 0 : i32
    return %c0_i32, %c0_i32_0, %c0_i32_1 : i32, i32, i32
  }
  func.func @transform_4(%arg0: i32) -> (i32, i32, i32, i32) {
    %c0_i32 = arith.constant 0 : i32
    %c0_i32_0 = arith.constant 0 : i32
    %c0_i32_1 = arith.constant 0 : i32
    %c0_i32_2 = arith.constant 0 : i32
    %c0_i32_3 = arith.constant 0 : i32
    return %c0_i32, %c0_i32_0, %c0_i32_1, %c0_i32_2 : i32, i32, i32, i32
  }
  func.func @transform_5(%arg0: i32) -> (i32, i32) {
    %c0_i32 = arith.constant 0 : i32
    %c0_i32_0 = arith.constant 0 : i32
    %c0_i32_1 = arith.constant 0 : i32
    return %c0_i32, %c0_i32_0 : i32, i32
  }
  func.func @transform_6(%arg0: i32) -> (i32, i32) {
    %c0_i32 = arith.constant 0 : i32
    %c0_i32_0 = arith.constant 0 : i32
    %c0_i32_1 = arith.constant 0 : i32
    return %c0_i32, %c0_i32_0 : i32, i32
  }
  func.func @transform_7(%arg0: i32) -> (i32, i32) {
    %c0_i32 = arith.constant 0 : i32
    %c0_i32_0 = arith.constant 0 : i32
    %c0_i32_1 = arith.constant 0 : i32
    return %c0_i32, %c0_i32_0 : i32, i32
  }
  func.func @transform_8(%arg0: i32) -> (i32, i32, i32) {
    %c0_i32 = arith.constant 0 : i32
    %c0_i32_0 = arith.constant 0 : i32
    %c0_i32_1 = arith.constant 0 : i32
    %c0_i32_2 = arith.constant 0 : i32
    return %c0_i32, %c0_i32_0, %c0_i32_1 : i32, i32, i32
  }
  func.func @transform_9(%arg0: i32) -> (i32, i32, i32, i32) {
    %c0_i32 = arith.constant 0 : i32
    %c0_i32_0 = arith.constant 0 : i32
    %c0_i32_1 = arith.constant 0 : i32
    %c0_i32_2 = arith.constant 0 : i32
    %c0_i32_3 = arith.constant 0 : i32
    return %c0_i32, %c0_i32_0, %c0_i32_1, %c0_i32_2 : i32, i32, i32, i32
  }
  func.func @transform_10(%arg0: i32) -> (i32, i32) {
    %c0_i32 = arith.constant 0 : i32
    %c0_i32_0 = arith.constant 0 : i32
    %c0_i32_1 = arith.constant 0 : i32
    return %c0_i32, %c0_i32_0 : i32, i32
  }
  func.func @transform_11(%arg0: i32) -> (i32, i32) {
    %c0_i32 = arith.constant 0 : i32
    %c0_i32_0 = arith.constant 0 : i32
    %c0_i32_1 = arith.constant 0 : i32
    return %c0_i32, %c0_i32_0 : i32, i32
  }
  func.func @transform_12(%arg0: i32) -> (i32, i32) {
    %c0_i32 = arith.constant 0 : i32
    %c0_i32_0 = arith.constant 0 : i32
    %c0_i32_1 = arith.constant 0 : i32
    return %c0_i32, %c0_i32_0 : i32, i32
  }
  func.func @transform_13(%arg0: i32) -> (i32, i32, i32) {
    %c0_i32 = arith.constant 0 : i32
    %c0_i32_0 = arith.constant 0 : i32
    %c0_i32_1 = arith.constant 0 : i32
    %c0_i32_2 = arith.constant 0 : i32
    return %c0_i32, %c0_i32_0, %c0_i32_1 : i32, i32, i32
  }
  func.func @transform_14(%arg0: i32) -> (i32, i32) {
    %c0_i32 = arith.constant 0 : i32
    %c0_i32_0 = arith.constant 0 : i32
    %c0_i32_1 = arith.constant 0 : i32
    return %c0_i32, %c0_i32_0 : i32, i32
  }
  func.func @transform_15(%arg0: i32) -> (i32, i32) {
    %c0_i32 = arith.constant 0 : i32
    %c0_i32_0 = arith.constant 0 : i32
    %c0_i32_1 = arith.constant 0 : i32
    return %c0_i32, %c0_i32_0 : i32, i32
  }
  func.func @transform_16(%arg0: i32) -> (i32, i32) {
    %c0_i32 = arith.constant 0 : i32
    %c0_i32_0 = arith.constant 0 : i32
    %c0_i32_1 = arith.constant 0 : i32
    return %c0_i32, %c0_i32_0 : i32, i32
  }
  func.func @transform_17(%arg0: i32) -> (i32, i32) {
    %c0_i32 = arith.constant 0 : i32
    %c0_i32_0 = arith.constant 0 : i32
    %c0_i32_1 = arith.constant 0 : i32
    return %c0_i32, %c0_i32_0 : i32, i32
  }
  func.func @transform_18(%arg0: i32) -> (i32, i32) {
    %c0_i32 = arith.constant 0 : i32
    %c0_i32_0 = arith.constant 0 : i32
    %c0_i32_1 = arith.constant 0 : i32
    return %c0_i32, %c0_i32_0 : i32, i32
  }
  func.func @transform_19(%arg0: i32) -> (i32, i32) {
    %c0_i32 = arith.constant 0 : i32
    %c0_i32_0 = arith.constant 0 : i32
    %c0_i32_1 = arith.constant 0 : i32
    return %c0_i32, %c0_i32_0 : i32, i32
  }
  func.func @transform_20(%arg0: i32) -> (i32, i32, i32) {
    %c0_i32 = arith.constant 0 : i32
    %c0_i32_0 = arith.constant 0 : i32
    %c0_i32_1 = arith.constant 0 : i32
    %c0_i32_2 = arith.constant 0 : i32
    return %c0_i32, %c0_i32_0, %c0_i32_1 : i32, i32, i32
  }
  func.func @transform_21(%arg0: i32) -> (i32, i32, i32, i32) {
    %c0_i32 = arith.constant 0 : i32
    %c0_i32_0 = arith.constant 0 : i32
    %c0_i32_1 = arith.constant 0 : i32
    %c0_i32_2 = arith.constant 0 : i32
    %c0_i32_3 = arith.constant 0 : i32
    return %c0_i32, %c0_i32_0, %c0_i32_1, %c0_i32_2 : i32, i32, i32, i32
  }
  func.func @transform_22(%arg0: i32) -> (i32, i32) {
    %c0_i32 = arith.constant 0 : i32
    %c0_i32_0 = arith.constant 0 : i32
    %c0_i32_1 = arith.constant 0 : i32
    return %c0_i32, %c0_i32_0 : i32, i32
  }
  func.func @transform_23(%arg0: i32) -> (i32, i32) {
    %c0_i32 = arith.constant 0 : i32
    %c0_i32_0 = arith.constant 0 : i32
    %c0_i32_1 = arith.constant 0 : i32
    return %c0_i32, %c0_i32_0 : i32, i32
  }
  func.func @transform_24(%arg0: i32) -> (i32, i32) {
    %c0_i32 = arith.constant 0 : i32
    %c0_i32_0 = arith.constant 0 : i32
    %c0_i32_1 = arith.constant 0 : i32
    return %c0_i32, %c0_i32_0 : i32, i32
  }
  func.func @transform_25(%arg0: i32) -> (i32, i32, i32) {
    %c0_i32 = arith.constant 0 : i32
    %c0_i32_0 = arith.constant 0 : i32
    %c0_i32_1 = arith.constant 0 : i32
    %c0_i32_2 = arith.constant 0 : i32
    return %c0_i32, %c0_i32_0, %c0_i32_1 : i32, i32, i32
  }
  func.func @transform_26(%arg0: i32) -> (i32, i32, i32, i32) {
    %c0_i32 = arith.constant 0 : i32
    %c0_i32_0 = arith.constant 0 : i32
    %c0_i32_1 = arith.constant 0 : i32
    %c0_i32_2 = arith.constant 0 : i32
    %c0_i32_3 = arith.constant 0 : i32
    return %c0_i32, %c0_i32_0, %c0_i32_1, %c0_i32_2 : i32, i32, i32, i32
  }
  func.func @transform_27(%arg0: i32) -> (i32, i32) {
    %c0_i32 = arith.constant 0 : i32
    %c0_i32_0 = arith.constant 0 : i32
    %c0_i32_1 = arith.constant 0 : i32
    return %c0_i32, %c0_i32_0 : i32, i32
  }
  func.func @transform_28(%arg0: i32) -> (i32, i32) {
    %c0_i32 = arith.constant 0 : i32
    %c0_i32_0 = arith.constant 0 : i32
    %c0_i32_1 = arith.constant 0 : i32
    return %c0_i32, %c0_i32_0 : i32, i32
  }
  func.func @transform_29(%arg0: i32) -> (i32, i32) {
    %c0_i32 = arith.constant 0 : i32
    %c0_i32_0 = arith.constant 0 : i32
    %c0_i32_1 = arith.constant 0 : i32
    return %c0_i32, %c0_i32_0 : i32, i32
  }
  func.func @transform_30(%arg0: i32) -> (i32, i32, i32) {
    %c0_i32 = arith.constant 0 : i32
    %c0_i32_0 = arith.constant 0 : i32
    %c0_i32_1 = arith.constant 0 : i32
    %c0_i32_2 = arith.constant 0 : i32
    return %c0_i32, %c0_i32_0, %c0_i32_1 : i32, i32, i32
  }
  func.func @transform_31(%arg0: i32) -> (i32, i32) {
    %c0_i32 = arith.constant 0 : i32
    %c0_i32_0 = arith.constant 0 : i32
    %c0_i32_1 = arith.constant 0 : i32
    return %c0_i32, %c0_i32_0 : i32, i32
  }
  func.func @transform_32(%arg0: i32) -> (i32, i32) {
    %c0_i32 = arith.constant 0 : i32
    %c0_i32_0 = arith.constant 0 : i32
    %c0_i32_1 = arith.constant 0 : i32
    return %c0_i32, %c0_i32_0 : i32, i32
  }
  func.func @transform_33(%arg0: i32) -> (i32, i32, i32) {
    %c0_i32 = arith.constant 0 : i32
    %c0_i32_0 = arith.constant 0 : i32
    %c0_i32_1 = arith.constant 0 : i32
    %c0_i32_2 = arith.constant 0 : i32
    return %c0_i32, %c0_i32_0, %c0_i32_1 : i32, i32, i32
  }
  func.func @transform_34(%arg0: i32) -> (i32, i32, i32, i32) {
    %c0_i32 = arith.constant 0 : i32
    %c0_i32_0 = arith.constant 0 : i32
    %c0_i32_1 = arith.constant 0 : i32
    %c0_i32_2 = arith.constant 0 : i32
    %c0_i32_3 = arith.constant 0 : i32
    return %c0_i32, %c0_i32_0, %c0_i32_1, %c0_i32_2 : i32, i32, i32, i32
  }
  func.func @transform_35(%arg0: i32) -> (i32, i32) {
    %c0_i32 = arith.constant 0 : i32
    %c0_i32_0 = arith.constant 0 : i32
    %c0_i32_1 = arith.constant 0 : i32
    return %c0_i32, %c0_i32_0 : i32, i32
  }
  func.func @transform_36(%arg0: i32) -> (i32, i32) {
    %c0_i32 = arith.constant 0 : i32
    %c0_i32_0 = arith.constant 0 : i32
    %c0_i32_1 = arith.constant 0 : i32
    return %c0_i32, %c0_i32_0 : i32, i32
  }
  func.func @transform_37(%arg0: i32) -> (i32, i32) {
    %c0_i32 = arith.constant 0 : i32
    %c0_i32_0 = arith.constant 0 : i32
    %c0_i32_1 = arith.constant 0 : i32
    return %c0_i32, %c0_i32_0 : i32, i32
  }
  func.func @transform_38(%arg0: i32) -> (i32, i32, i32) {
    %c0_i32 = arith.constant 0 : i32
    %c0_i32_0 = arith.constant 0 : i32
    %c0_i32_1 = arith.constant 0 : i32
    %c0_i32_2 = arith.constant 0 : i32
    return %c0_i32, %c0_i32_0, %c0_i32_1 : i32, i32, i32
  }
  func.func @transform_39(%arg0: i32) -> (i32, i32) {
    %c0_i32 = arith.constant 0 : i32
    %c0_i32_0 = arith.constant 0 : i32
    %c0_i32_1 = arith.constant 0 : i32
    return %c0_i32, %c0_i32_0 : i32, i32
  }
  func.func @transform_40(%arg0: i32) -> (i32, i32) {
    %c0_i32 = arith.constant 0 : i32
    %c0_i32_0 = arith.constant 0 : i32
    %c0_i32_1 = arith.constant 0 : i32
    return %c0_i32, %c0_i32_0 : i32, i32
  }
  func.func @transform_41(%arg0: i32) -> (i32, i32, i32) {
    %c0_i32 = arith.constant 0 : i32
    %c0_i32_0 = arith.constant 0 : i32
    %c0_i32_1 = arith.constant 0 : i32
    %c0_i32_2 = arith.constant 0 : i32
    return %c0_i32, %c0_i32_0, %c0_i32_1 : i32, i32, i32
  }
  func.func @transform_42(%arg0: i32) -> (i32, i32, i32, i32) {
    %c0_i32 = arith.constant 0 : i32
    %c0_i32_0 = arith.constant 0 : i32
    %c0_i32_1 = arith.constant 0 : i32
    %c0_i32_2 = arith.constant 0 : i32
    %c0_i32_3 = arith.constant 0 : i32
    return %c0_i32, %c0_i32_0, %c0_i32_1, %c0_i32_2 : i32, i32, i32, i32
  }
  func.func @transform_43(%arg0: i32) -> (i32, i32) {
    %c0_i32 = arith.constant 0 : i32
    %c0_i32_0 = arith.constant 0 : i32
    %c0_i32_1 = arith.constant 0 : i32
    return %c0_i32, %c0_i32_0 : i32, i32
  }
  func.func @transform_44(%arg0: i32) -> (i32, i32) {
    %c0_i32 = arith.constant 0 : i32
    %c0_i32_0 = arith.constant 0 : i32
    %c0_i32_1 = arith.constant 0 : i32
    return %c0_i32, %c0_i32_0 : i32, i32
  }
  func.func @transform_45(%arg0: i32) -> (i32, i32) {
    %c0_i32 = arith.constant 0 : i32
    %c0_i32_0 = arith.constant 0 : i32
    %c0_i32_1 = arith.constant 0 : i32
    return %c0_i32, %c0_i32_0 : i32, i32
  }
  func.func @transform_46(%arg0: i32) -> (i32, i32, i32) {
    %c0_i32 = arith.constant 0 : i32
    %c0_i32_0 = arith.constant 0 : i32
    %c0_i32_1 = arith.constant 0 : i32
    %c0_i32_2 = arith.constant 0 : i32
    return %c0_i32, %c0_i32_0, %c0_i32_1 : i32, i32, i32
  }
  func.func @transform_47(%arg0: i32) -> (i32, i32) {
    %c0_i32 = arith.constant 0 : i32
    %c0_i32_0 = arith.constant 0 : i32
    %c0_i32_1 = arith.constant 0 : i32
    return %c0_i32, %c0_i32_0 : i32, i32
  }
  func.func @transform_48(%arg0: i32) -> (i32, i32) {
    %c0_i32 = arith.constant 0 : i32
    %c0_i32_0 = arith.constant 0 : i32
    %c0_i32_1 = arith.constant 0 : i32
    return %c0_i32, %c0_i32_0 : i32, i32
  }
  func.func @transform_49(%arg0: i32) -> (i32, i32, i32) {
    %c0_i32 = arith.constant 0 : i32
    %c0_i32_0 = arith.constant 0 : i32
    %c0_i32_1 = arith.constant 0 : i32
    return %arg0, %c0_i32, %c0_i32_0 : i32, i32, i32
  }
  func.func @transform_50(%arg0: i32) -> (i32, i32, i32) {
    %c0_i32 = arith.constant 0 : i32
    %c0_i32_0 = arith.constant 0 : i32
    %c0_i32_1 = arith.constant 0 : i32
    return %arg0, %c0_i32, %c0_i32_0 : i32, i32, i32
  }
  func.func @transform_51(%arg0: i32) -> (i32, i32, i32) {
    %c0_i32 = arith.constant 0 : i32
    %c0_i32_0 = arith.constant 0 : i32
    %c0_i32_1 = arith.constant 0 : i32
    return %arg0, %c0_i32, %c0_i32_0 : i32, i32, i32
  }
  func.func @transform_52(%arg0: i32) -> (i32, i32, i32) {
    %c0_i32 = arith.constant 0 : i32
    %c0_i32_0 = arith.constant 0 : i32
    %c0_i32_1 = arith.constant 0 : i32
    return %arg0, %c0_i32, %c0_i32_0 : i32, i32, i32
  }
}

</mosaic_0001>

<bundles_post_ra>
// kernel: thoegaze_forward.1
= control target key start
LH: loop header
LB: loop body
LE: loop exit
PB: predicated region body
PF: predicated region fallthrough
CT: control target
= control target key end

     0   :  { %s7287_s6 = smov 1   ;;  %s7288_s10 = smov 2   ;;  %s9937_s0 = inlined_call_operand.smem [shape: u32[53], index: -1, kind: input, shape index: {}] }
   0x1   :  { %s7351_s5 = sld [smem:[%s9937_s0]]   ;;  %s7289_s14 = smov 3  }
   0x2   :  { %s7356_s9 = sld [smem:[%s9937_s0 + %s7287_s6]]   ;;  %s7290_s18 = smov 4  }
   0x3   :  { %s7361_s13 = sld [smem:[%s9937_s0 + %s7288_s10]]   ;;  %s7291_s22 = smov 5  }
   0x4   :  { %s7366_s17 = sld [smem:[%s9937_s0 + %s7289_s14]]   ;;  %s7292_s26 = smov 6  }
   0x5   :  { %s7371_s21 = sld [smem:[%s9937_s0 + %s7290_s18]]   ;;  %s7293_s30 = smov 7  }
   0x6   :  { %s7376_s25 = sld [smem:[%s9937_s0 + %s7291_s22]]   ;;  %s7294_s4 = smov 8  }
   0x7   :  { %10039 = sst [smem:[#allocation9_spill]] %s7351_s5  ;;  %s7295_s10 = smov 9  }
   0x8   :  { %10040 = sst [smem:[#allocation10_spill]] %s7356_s9  ;;  %s7296_s15 = smov 10  }
   0x9   :  { %10041 = sst [smem:[#allocation11_spill]] %s7361_s13  ;;  %s7297_s20 = smov 11  }
   0xa   :  { %10042 = sst [smem:[#allocation12_spill]] %s7366_s17  ;;  %s7299_s1 = smov 13  }
   0xb   :  { %10043 = sst [smem:[#allocation13_spill]] %s7371_s21  ;;  %s7300_s7 = smov 14  }
   0xc   :  { %10044 = sst [smem:[#allocation14_spill]] %s7376_s25  ;;  %s7302_s22 = smov 16  }
   0xd   :  { %s7381_s29 = sld [smem:[%s9937_s0 + %s7292_s26]]   ;;  %s7298_s26 = smov 12  }
   0xe   :  { %s7386_s3 = sld [smem:[%s9937_s0 + %s7293_s30]]   ;;  %s7303_s28 = smov 17  }
   0xf   :  { %s7391_s8 = sld [smem:[%s9937_s0 + %s7294_s4]]  }
  0x10   :  { %s7396_s14 = sld [smem:[%s9937_s0 + %s7295_s10]]  }
  0x11   :  { %s7401_s19 = sld [smem:[%s9937_s0 + %s7296_s15]]   ;;  %s7301_s15 = smov 15  }
  0x12   :  { %s7406_s24 = sld [smem:[%s9937_s0 + %s7297_s20]]  }
  0x13   :  { %10045 = sst [smem:[#allocation15_spill]] %s7381_s29 }
  0x14   :  { %10046 = sst [smem:[#allocation16_spill]] %s7386_s3 }
  0x15   :  { %10047 = sst [smem:[#allocation17_spill]] %s7391_s8 }
  0x16   :  { %10048 = sst [smem:[#allocation18_spill]] %s7396_s14 }
  0x17   :  { %10049 = sst [smem:[#allocation19_spill]] %s7401_s19 }
  0x18   :  { %10050 = sst [smem:[#allocation20_spill]] %s7406_s24 }
  0x19   :  { %s7411_s30 = sld [smem:[%s9937_s0 + %s7298_s26]]  }
  0x1a   :  { %s7416_s6 = sld [smem:[%s9937_s0 + %s7299_s1]]  }
  0x1b   :  { %s7421_s12 = sld [smem:[%s9937_s0 + %s7300_s7]]   ;;  %s7304_s7 = smov 18  }
  0x1c   :  { %s7426_s20 = sld [smem:[%s9937_s0 + %s7301_s15]]   ;;  %s7305_s15 = smov 19  }
  0x1d   :  { %s7431_s27 = sld [smem:[%s9937_s0 + %s7302_s22]]   ;;  %s7306_s22 = smov 20  }
  0x1e   :  { %s7436_s4 = sld [smem:[%s9937_s0 + %s7303_s28]]   ;;  %s7307_s28 = smov 21  }
  0x1f   :  { %10051 = sst [smem:[#allocation21_spill]] %s7411_s30 }
  0x20   :  { %10052 = sst [smem:[#allocation22_spill]] %s7416_s6 }
  0x21   :  { %10053 = sst [smem:[#allocation23_spill]] %s7421_s12 }
  0x22   :  { %s7441_s30 = sld [smem:[%s9937_s0 + %s7304_s7]]   ;;  %s7308_s7 = smov 22  }
  0x23   :  { %10054 = sst [smem:[#allocation24_spill]] %s7431_s27 }
  0x24   :  { %10055 = sst [smem:[#allocation25_spill]] %s7436_s4 }
  0x25   :  { %s7446_s3 = sld [smem:[%s9937_s0 + %s7305_s15]]   ;;  %s7309_s15 = smov 23  }
  0x26   :  { %s7451_s24 = sld [smem:[%s9937_s0 + %s7306_s22]]   ;;  %s7310_s22 = smov 24  }
  0x27   :  { %s7456_s19 = sld [smem:[%s9937_s0 + %s7307_s28]]   ;;  %s7311_s28 = smov 25  }
  0x28   :  { %10056 = sst [smem:[#allocation26_spill]] %s7441_s30 }
  0x29   :  { %s7461_s30 = sld [smem:[%s9937_s0 + %s7308_s7]]   ;;  %s7312_s7 = smov 26  }
  0x2a   :  { %s7471_s17 = sld [smem:[%s9937_s0 + %s7310_s22]]   ;;  %s7314_s22 = smov 28  }
  0x2b   :  { %10057 = sst [smem:[#allocation27_spill]] %s7446_s3 }
  0x2c   :  { %10058 = sst [smem:[#allocation28_spill]] %s7451_s24 }
  0x2d   :  { %10059 = sst [smem:[#allocation29_spill]] %s7456_s19 }
  0x2e   :  { %s7466_s3 = sld [smem:[%s9937_s0 + %s7309_s15]]   ;;  %s7313_s15 = smov 27  }
  0x2f   :  { %10060 = sst [smem:[#allocation30_spill]] %s7461_s30 }
  0x30   :  { %10062 = sst [smem:[#allocation32_spill]] %s7471_s17 }
  0x31   :  { %s7476_s29 = sld [smem:[%s9937_s0 + %s7311_s28]]   ;;  %s7315_s28 = smov 29  }
  0x32   :  { %s7481_s21 = sld [smem:[%s9937_s0 + %s7312_s7]]   ;;  %s7316_s7 = smov 30  }
  0x33   :  { %s7486_s8 = sld [smem:[%s9937_s0 + %s7313_s15]]   ;;  %s7317_s15 = smov 31  }
  0x34   :  { %10061 = sst [smem:[#allocation31_spill]] %s7466_s3 }
  0x35   :  { %s7491_s6 = sld [smem:[%s9937_s0 + %s7314_s22]]   ;;  %s7318_s22 = smov 32  }
  0x36   :  { %s7496_s27 = sld [smem:[%s9937_s0 + %s7315_s28]]   ;;  %s7319_s28 = smov 33  }
  0x37   :  { %10063 = sst [smem:[#allocation33_spill]] %s7476_s29 }
  0x38   :  { %10064 = sst [smem:[#allocation34_spill]] %s7481_s21 }
  0x39   :  { %10065 = sst [smem:[#allocation35_spill]] %s7486_s8 }
  0x3a   :  { %s7501_s4 = sld [smem:[%s9937_s0 + %s7316_s7]]   ;;  %s7320_s7 = smov 34  }
  0x3b   :  { %10066 = sst [smem:[#allocation36_spill]] %s7491_s6 }
  0x3c   :  { %10067 = sst [smem:[#allocation37_spill]] %s7496_s27 }
  0x3d   :  { %s7506_s17 = sld [smem:[%s9937_s0 + %s7317_s15]]   ;;  %s7321_s15 = smov 35  }
  0x3e   :  { %s7511_s6 = sld [smem:[%s9937_s0 + %s7318_s22]]   ;;  %s7322_s22 = smov 36  }
  0x3f   :  { %s7516_s27 = sld [smem:[%s9937_s0 + %s7319_s28]]   ;;  %s7323_s28 = smov 37  }
  0x40   :  { %10068 = sst [smem:[#allocation38_spill]] %s7501_s4 }
  0x41   :  { %s7521_s8 = sld [smem:[%s9937_s0 + %s7320_s7]]   ;;  %s7324_s7 = smov 38  }
  0x42   :  { %s7526_s25 = sld [smem:[%s9937_s0 + %s7321_s15]]   ;;  %s7325_s15 = smov 39  }
  0x43   :  { %10069 = sst [smem:[#allocation39_spill]] %s7506_s17 }
  0x44   :  { %10070 = sst [smem:[#allocation40_spill]] %s7511_s6 }
  0x45   :  { %s7531_s14 = sld [smem:[%s9937_s0 + %s7322_s22]]   ;;  %s7326_s22 = smov 40  }
  0x46   :  { %s7536_s24 = sld [smem:[%s9937_s0 + %s7323_s28]]   ;;  %s7327_s28 = smov 41  }
  0x47   :  { %10071 = sst [smem:[#allocation41_spill]] %s7521_s8 }
  0x48   :  { %s7541_s3 = sld [smem:[%s9937_s0 + %s7324_s7]]   ;;  %s7328_s7 = smov 42  }
  0x49   :  { %s7546_s19 = sld [smem:[%s9937_s0 + %s7325_s15]]   ;;  %s7329_s15 = smov 43  }
  0x4a   :  { %s7551_s29 = sld [smem:[%s9937_s0 + %s7326_s22]]   ;;  %s7330_s22 = smov 44  }
  0x4b   :  { %10072 = sst [smem:[#allocation42_spill]] %s7531_s14 }
  0x4c   :  { %10073 = sst [smem:[#allocation43_spill]] %s7536_s24 }
  0x4d   :  { %s7556_s4 = sld [smem:[%s9937_s0 + %s7327_s28]]   ;;  %s7331_s28 = smov 45  }
  0x4e   :  { %10074 = sst [smem:[#allocation44_spill]] %s7541_s3 }
  0x4f   :  { %10075 = sst [smem:[#allocation45_spill]] %s7546_s19 }
  0x50   :  { %10076 = sst [smem:[#allocation46_spill]] %s7551_s29 }
  0x51   :  { %s7561_s30 = sld [smem:[%s9937_s0 + %s7328_s7]]   ;;  %s7332_s7 = smov 46  }
  0x52   :  { %s7566_s21 = sld [smem:[%s9937_s0 + %s7329_s15]]   ;;  %s7333_s15 = smov 47  }
  0x53   :  { %10077 = sst [smem:[#allocation47_spill]] %s7556_s4 }
  0x54   :  { %s7571_s13 = sld [smem:[%s9937_s0 + %s7330_s22]]   ;;  %s7334_s22 = smov 48  }
  0x55   :  { %s7576_s29 = sld [smem:[%s9937_s0 + %s7331_s28]]   ;;  %s7335_s28 = smov 49  }
  0x56   :  { %s7581_s24 = sld [smem:[%s9937_s0 + %s7332_s7]]   ;;  %s7336_s7 = smov 50  }
  0x57   :  { %s7601_s4 = sld [smem:[%s9937_s0 + %s7336_s7]]  }
  0x58   :  { %10078 = sst [smem:[#allocation48_spill]] %s7566_s21 }
  0x59   :  { %s7586_s21 = sld [smem:[%s9937_s0 + %s7333_s15]]   ;;  %s7337_s15 = smov 51  }
  0x5a   :  { %10079 = sst [smem:[#allocation49_spill]] %s7571_s13 }
  0x5b   :  { %10080 = sst [smem:[#allocation50_spill]] %s7576_s29 }
  0x5c   :  { %s7591_s13 = sld [smem:[%s9937_s0 + %s7334_s22]]   ;;  %s7338_s22 = smov 52  }
  0x5d   :  { %s7596_s29 = sld [smem:[%s9937_s0 + %s7335_s28]]  }
  0x5e   :  { %10083 = sst [smem:[#allocation53_spill]] %s7601_s4 }
  0x5f   :  { %10081 = sst [smem:[#allocation51_spill]] %s7586_s21 }
  0x60   :  { %s7606_s21 = sld [smem:[%s9937_s0 + %s7337_s15]]  }
  0x62   :  { %10082 = sst [smem:[#allocation52_spill]] %s7591_s13 }
  0x63   :  { %s7611_s13 = sld [smem:[%s9937_s0 + %s7338_s22]]  }
  0x69   :  { %10084 = sst [smem:[#allocation54_spill]] %s7611_s13 }
  0x6a   :  { %111 = vsyncpa [#allocation3], 0 }
  0x6b   :  { %113 = vsyncpa [#allocation3 + $0x1], 0 }
  0x6c   :  { %114 = vsyncpa [#allocation5], 0 }
  0x6d   :  { %116 = vsyncpa [#allocation5 + $0x1], 0  ;;  %s7613_s28 = smov 0   ;;  %s7615_s1 = smov 0  }
  0x6e   :  { %s7617_s2 = smov 0   ;;  %s7619_s7 = smov 0  }
  0x6f LB: > { %s10085_s4 = sld [smem:[#allocation53_spill]]  ;;  %s7634_s0 = sadd.s32 4294967295, %s7285_s7   ;;  %s7285_s7 = sphi %s7619_s7, %s10319_s7   ;;  %s7281_s2 = sphi %s7617_s2, %s10318_s2   ;;  %s7277_s1 = sphi %s7615_s1, %s10317_s1   ;;  %s7273_s28 = sphi %s7613_s28, %s10316_s28  }
  0x70   : > { %s10086_s14 = sld [smem:[#allocation42_spill]]  ;;  %s9959_s10 = sadd.s32 4294967294, %s7285_s7  }
  0x71   : > { %s10087_s8 = sld [smem:[#allocation41_spill]]  ;;  %s7638_s11 = sadd.s32 1, %s7285_s7  }
  0x72   : > { %s10088_s3 = sld [smem:[#allocation44_spill]]  ;;  %s1173_s15 = sadd.s32 1, %s7281_s2 }
  0x73   : > { %s1170_s16 = ssub.s32 %s7285_s7, %s7638_s11  ;;  %p1183_p0 = scmp.ne.s32.totalorder %s7281_s2, %s7277_s1 }
  0x74   : > { %p1171_p1 = scmp.eq.s32.totalorder %s1170_s16, 0  ;;  %p1184_p2 = scmp.eq.s32.totalorder %s7634_s0, 1 }
  0x75   : > { %p1189_p3 = scmp.ne.s32.totalorder %s7277_s1, %s7273_s28  ;;  %p1190_p4 = scmp.eq.s32.totalorder %s9959_s10, 1 }
  0x76   : > { %s7651_s18 = scalar_select %p1171_p1, %s7281_s2, %s1173_s15  }
  0x77   : > { %p7653_p5 = por %p1184_p2, %p1183_p0  ;;  %p7657_p6 = por %p1190_p4, %p1189_p3 }
  0x78   : > { %p6472_p7 = scmp.ge.s32.totalorder %s7285_s7, 1  ;;  %p1445_p8 = scmp.lt.s32.totalorder %s7285_s7, 3 }
  0x7a   : > { %p1446_p9 = pnand %p6472_p7, %p1445_p8 }
  0x7c   : > { %1449 = sbr.rel (%p1446_p9) target bundleno = 9834 (0x266a), region = 216 }
  0x81   : > { %v1687_v0 = vld [vmem:[%s7426_s20 + $0x48] sm:$0xff]  ;;  %v1686_v1 = vld [vmem:[%s7426_s20 + $0x40] sm:$0xff]  ;;  %v1685_v2 = vld [vmem:[%s7426_s20 + $0x38] sm:$0xff]  ;;  %s10091_s5 = sld [smem:[#allocation9_spill]]  ;;  %p1587_p10 = scmp.lt.s32.totalorder %s7634_s0, 1  ;;  %vm2126_vm0 = vcmask 654336  }
  0x82   : > { %2139 = vmatpush.msra.mxu0 %v1687_v0  ;;  %v1684_v3 = vld [vmem:[%s7426_s20 + $0x30] sm:$0xff]  ;;  %v1683_v4 = vld [vmem:[%s7426_s20 + $0x28] sm:$0xff]  ;;  %v1682_v5 = vld [vmem:[%s7426_s20 + $0x20] sm:$0xff]  ;;  %s10092_s12 = sld [smem:[#allocation23_spill]]  ;;  %vm10007_vm1 = vcmask 261120   ;;  %v7339_v16 = vmov 32.0  }
  0x83   : > { %s1588_s26 = scalar_select %p1587_p10, %s7634_s0, 1  ;;  %v1681_v6 = vld [vmem:[%s7426_s20 + $0x18] sm:$0xff]  ;;  %v1680_v7 = vld [vmem:[%s7426_s20 + $0x10] sm:$0xff]  ;;  %v1679_v8 = vld [vmem:[%s7426_s20 + $0x8] sm:$0xff]  ;;  %7019 = vrcp.f32 %v7339_v16  ;;  %vm10006_vm6 = vcmask 130048   ;;  %vm10005_vm7 = vcmask 64512  }
  0x84   : > { %2140 = vmatpush.msra.mxu0 %v1686_v1  ;;  %v1678_v9 = vld [vmem:[%s7426_s20] sm:$0xff]  ;;  %v1781_v20 = vld [vmem:[%s10087_s8 + $0x18] sm:$0xff]  ;;  %v1780_v23 = vld [vmem:[%s10087_s8 + $0x10] sm:$0xff]  ;;  %s10095_s17 = sld [smem:[#allocation39_spill]]  ;;  %vm10004_vm14 = vcmask 523264  }
  0x85   : > { %s7672_s15 = sshll.u32 %s1588_s26, 3  ;;  %v1789_v21 = vld [vmem:[%s10087_s8 + $0x58] sm:$0xff]  ;;  %2200 = vmatpush.msra.mxu1 %v1781_v20  ;;  %v1788_v24 = vld [vmem:[%s10087_s8 + $0x50] sm:$0xff]  ;;  %v1779_v27 = vld [vmem:[%s10087_s8 + $0x8] sm:$0xff]  ;;  %s10096_s9 = sld [smem:[#allocation10_spill]] }
  0x86   : > { %2141 = vmatpush.msra.mxu0 %v1685_v2  ;;  %v1797_v22 = vld [vmem:[%s10087_s8 + $0x98] sm:$0xff]  ;;  %2220 = vmatpush.msra.mxu2 %v1789_v21  ;;  %v1796_v25 = vld [vmem:[%s10087_s8 + $0x90] sm:$0xff]  ;;  %v1787_v28 = vld [vmem:[%s10087_s8 + $0x48] sm:$0xff]  ;;  %s10097_s19 = sld [smem:[#allocation45_spill]] }
  0x87   : > { %s1590_s16 = scalar_lea.vmem %s10091_s5, %s7672_s15  ;;  %2240 = vmatpush.msra.mxu3 %v1797_v22  ;;  %2201 = vmatpush.msra.mxu1 %v1780_v23  ;;  %v1795_v29 = vld [vmem:[%s10087_s8 + $0x88] sm:$0xff]  ;;  %v1778_v30 = vld [vmem:[%s10087_s8] sm:$0xff]  ;;  %v1785_v34 = vld [vmem:[%s10087_s8 + $0x38] sm:$0xff]  ;;  %s10098_s6 = sld [smem:[#allocation40_spill]] }
  0x88   : > { %2142 = vmatpush.msra.mxu0 %v1684_v3  ;;  %v2120_v10 = vld [vmem:[%s1590_s16] sm:$0xff]  ;;  %2221 = vmatpush.msra.mxu2 %v1788_v24  ;;  %v1784_v35 = vld [vmem:[%s10087_s8 + $0x30] sm:$0xff]  ;;  %v1783_v37 = vld [vmem:[%s10087_s8 + $0x28] sm:$0xff]  ;;  %s10099_s16 = sld [smem:[#allocation47_spill]] }
  0x89   : > { %v7681_v11 = vld [vmem:[%s10092_s12] ss:$0 sm:$0xff]  ;;  %v7020_v17 = vpop.eup %7019  ;;  %2241 = vmatpush.msra.mxu3 %v1796_v25  ;;  %2202 = vmatpush.msra.mxu1 %v1779_v27  ;;  %v1793_v52 = vld [vmem:[%s10087_s8 + $0x78] sm:$0xff]  ;;  %v1792_v55 = vld [vmem:[%s10087_s8 + $0x70] sm:$0xff]  ;;  %s10101_s10 = sld [smem:[#allocation43_spill]] }
  0x8a   : > { %2143 = vmatpush.msra.mxu0 %v1683_v4  ;;  %v2162_v18 = vmul.f32 32.0, %v7020_v17  ;;  %2222 = vmatpush.msra.mxu2 %v1787_v28  ;;  %v1786_v31 = vld [vmem:[%s10087_s8 + $0x40] sm:$0xff]  ;;  %vm2166_vm2 = vweird.f32 %v7020_v17  ;;  %v1791_v57 = vld [vmem:[%s10087_s8 + $0x68] sm:$0xff]  ;;  %s10106_s5 = sld [smem:[#allocation49_spill]] }
  0x8b   : > { %2242 = vmatpush.msra.mxu3 %v1795_v29  ;;  %v1794_v32 = vld [vmem:[%s10087_s8 + $0x80] sm:$0xff]  ;;  %2203 = vmatpush.msra.mxu1 %v1778_v30  ;;  %s1594_s26 = scalar_lea.vmem %s10096_s9, %s7672_s15  ;;  %s10207_s13 = sld [smem:[#allocation54_spill]] }
  0x8c   : > { %2144 = vmatpush.msra.mxu0 %v1682_v5  ;;  %v2163_v19 = vsub.f32 1.0, %v2162_v18  ;;  %2223 = vmatpush.msra.mxu2 %v1786_v31  ;;  %v1782_v39 = vld [vmem:[%s10087_s8 + $0x20] sm:$0xff]  ;;  %v1775_v18 = vld [vmem:[%s7516_s27 + $0x8] sm:$0xff]  ;;  %v1834_v31 = vld [vmem:[%s7561_s30 + $0x58] sm:$0xff] }
  0x8d   : > { %2243 = vmatpush.msra.mxu3 %v1794_v32  ;;  %v7003_v48 = vld [vmem:[%s10095_s17] ss:$0 sm:$0xff] }
  0x8e   : > { %2145 = vmatpush.msra.mxu0 %v1681_v6  ;;  %v2164_v26 = vmul.f32 %v7020_v17, %v2163_v19  ;;  %v1790_v58 = vld [vmem:[%s10087_s8 + $0x60] sm:$0xff] }
  0x8f   : > { %2322 = vmatpush.msrb.mxu3 %v1785_v34  ;;  %v1815_v59 = vld [vmem:[%s10088_s3] sm:$0xff]  ;;  %v1832_v34 = vld [vmem:[%s7561_s30 + $0x48] sm:$0xff] }
  0x90   : > { %2146 = vmatpush.msra.mxu0 %v1680_v7  ;;  %v2165_v33 = vadd.f32 %v7020_v17, %v2164_v26  ;;  %v2121_v1 = vld [vmem:[%s1594_s26] sm:$0xff]  ;;  %v1816_v7 = vld [vmem:[%s10088_s3 + $0x8] sm:$0xff]  ;;  %s10100_s26 = sld [smem:[#allocation51_spill]] }
  0x91   : > { %2323 = vmatpush.msrb.mxu3 %v1784_v35  ;;  %v1798_v16 = vld [vmem:[%s10087_s8 + $0xa0] sm:$0xff]  ;;  %s10105_s3 = sld [smem:[#allocation46_spill]] }
  0x92   : > { %2147 = vmatpush.msra.mxu0 %v1679_v8  ;;  %v7703_v36 = vsel %vm2166_vm2, %v7020_v17, %v2165_v33  ;;  %v1774_v30 = vld [vmem:[%s7516_s27] sm:$0xff]  ;;  %v1833_v33 = vld [vmem:[%s7561_s30 + $0x50] sm:$0xff] }
  0x93   : > { %10094 = vst [vmem:[#allocation56_spill] sm:$0xff] %v7703_v36  ;;  %2324 = vmatpush.msrb.mxu3 %v1783_v37  ;;  %v1831_v35 = vld [vmem:[%s7561_s30 + $0x40] sm:$0xff] }
  0x94   : > { %2148 = vmatpush.msra.mxu0 %v1678_v9 }
  0x95   : > { %6479 = vmatmul.msk.f32.vlgmr.msra.gmra.mxu0 %vm2126_vm0, %v2120_v10  ;;  %2325 = vmatpush.msrb.mxu3 %v1782_v39 }
  0x9d   : > { %6480 = vmatmul.msk.f32.gmra.mxu0 %vm2126_vm0, %v2121_v1  ;;  %v1843_v1 = vld [vmem:[%s7561_s30 + $0xa0] sm:$0xff] }
 0x112   : > { %v2150_v12 = vpop.f32.mrf.mxu0 }
 0x113   : > { %v7684_v13 = vadd.f32 %v7681_v11, %v2150_v12  ;;  %v1801_v12 = vld [vmem:[%s10087_s8 + $0xb8] sm:$0xff] }
 0x115   : > { %10093 = vst [vmem:[#allocation55_spill] sm:$0xff] %v7684_v13  ;;  %v2156_v14 = vmul.f32 %v7684_v13, %v7684_v13 }
 0x117   : > { %v2158_v15 = vsel %vm10007_vm1, %v2156_v14, 0.0  ;;  %v1800_v14 = vld [vmem:[%s10087_s8 + $0xb0] sm:$0xff] }
 0x118   : > { %2159 = vadd.xlane.f32.xlu0 %v2158_v15  ;;  %v1799_v15 = vld [vmem:[%s10087_s8 + $0xa8] sm:$0xff]  ;;  %s10245_s8 = sld [smem:[#allocation35_spill]] }
 0x11a   : > { %v2153_v24 = vpop.f32.mrf.mxu0 }
 0x11b   : > { %v7747_v25 = vadd.f32 %v7681_v11, %v2153_v24  ;;  %v1860_v24 = vld [vmem:[%s7581_s24] sm:$0xff] }
 0x11d   : > { %v2568_v28 = vmul.f32 %v7747_v25, %v7747_v25 }
 0x11f   : > { %v2569_v29 = vsel %vm10007_vm1, %v2568_v28, 0.0 }
 0x18b   : > { %v2160_v38 = vpop.xlane.xlu0 %2159 }
 0x18c   : > { %v2168_v40 = vmul.f32 %v7703_v36, %v2160_v38 }
 0x18e   : > { %v2169_v41 = vadd.f32 1e-06, %v2168_v40 }
 0x190   : > { %7021 = vrsqrt.f32 %v2169_v41  ;;  %vm2176_vm4 = vweird.f32 %v2169_v41 }
 0x196   : > { %v7022_v42 = vpop.eup %7021 }
 0x197   : > { %v2171_v43 = vmul.f32 %v7022_v42, %v2169_v41  ;;  %vm2177_vm3 = vweird.f32 %v7022_v42 }
 0x198   : > { %vm2178_vm5 = vmor %vm2176_vm4, %vm2177_vm3 }
 0x199   : > { %v2172_v44 = vmul.f32 %v7022_v42, %v2171_v43 }
 0x19b   : > { %v2173_v45 = vmul.f32 0.5, %v2172_v44 }
 0x19d   : > { %v2174_v46 = vsub.f32 1.5, %v2173_v45 }
 0x19f   : > { %v2175_v47 = vmul.f32 %v7022_v42, %v2174_v46 }
 0x1a1   : > { %v2179_v49 = vsel %vm2178_vm5, %v7022_v42, %v2175_v47 }
 0x1a2   : > { %v2180_v50 = vmul.f32 %v2179_v49, %v7684_v13  ;;  %v7004_v49 = vld [vmem:[%s10097_s19] ss:$0 sm:$0xff] }
 0x1a4   : > { %v7710_v51 = vmul.f32 %v7003_v48, %v2180_v50 }
 0x1a6   : > { %6481 = vmatmul.msk.f32.vlgmr.msra.gmra.mxu1 %vm10007_vm1, %v7710_v51  ;;  %6482 = vmatmul.msk.f32.vlgmr.msra.gmra.mxu2 %vm10007_vm1, %v7710_v51 }
 0x1a7   : > { %6483 = vmatmul.msk.f32.vlgmr.msra.gmra.mxu3 %vm10007_vm1, %v7710_v51 }
 0x1af   : > { %6487 = vmatmul.msk.f32.vlgmr.msrb.gmra.mxu3 %vm10007_vm1, %v7710_v51 }
 0x223   : > { %v2205_v56 = vpop.f32.mrf.mxu1 }
 0x229   : > { %v2225_v53 = vpop.f32.mrf.mxu2 }
 0x22a   : > { %v2245_v54 = vpop.f32.mrf.mxu3  ;;  %6484 = vmatpush.xpose.msk.msrb.mxu1 %vm10006_vm6, %v2225_v53  ;;  %v1777_v53 = vld [vmem:[%s7516_s27 + $0x18] sm:$0xff] }
 0x22b   : > { %2305 = vmatpush.msrb.mxu2 %v2245_v54  ;;  %v1776_v54 = vld [vmem:[%s7516_s27 + $0x10] sm:$0xff] }
 0x22d   : > { %6485 = vmatmul.msk.f32.vlgmr.msrb.gmra.mxu1 %vm10006_vm6, %v2205_v56  ;;  %2362 = vmatpush.msra.mxu2 %v1801_v12  ;;  %v1825_v56 = vld [vmem:[%s7561_s30 + $0x10] sm:$0xff]  ;;  %v1802_v12 = vld [vmem:[%s7526_s25] sm:$0xff] }
 0x22e   : > { %2342 = vmatpush.msra.mxu1 %v1793_v52 }
 0x22f   : > { %2363 = vmatpush.msra.mxu2 %v1800_v14  ;;  %v1842_v14 = vld [vmem:[%s7561_s30 + $0x98] sm:$0xff] }
 0x230   : > { %2343 = vmatpush.msra.mxu1 %v1792_v55  ;;  %v1826_v55 = vld [vmem:[%s7561_s30 + $0x18] sm:$0xff] }
 0x231   : > { %2364 = vmatpush.msra.mxu2 %v1799_v15  ;;  %v1841_v15 = vld [vmem:[%s7561_s30 + $0x90] sm:$0xff] }
 0x232   : > { %2344 = vmatpush.msra.mxu1 %v1791_v57  ;;  %v2327_v0 = vpop.f32.mrf.mxu3  ;;  %v1824_v57 = vld [vmem:[%s7561_s30 + $0x8] sm:$0xff] }
 0x233   : > { %2365 = vmatpush.msra.mxu2 %v1798_v16  ;;  %v1840_v16 = vld [vmem:[%s7561_s30 + $0x88] sm:$0xff] }
 0x234   : > { %2345 = vmatpush.msra.mxu1 %v1790_v58  ;;  %v1823_v58 = vld [vmem:[%s7561_s30] sm:$0xff] }
 0x235   : > { %6488 = vmatmul.msk.f32.vlgmr.msra.gmra.mxu1 %vm10007_vm1, %v7710_v51 }
 0x2aa   : > { %v2272_v60 = vpop.f32.mrf.mxu1 }
 0x2ab   : > { %v2273_v61 = vadd.f32 %v2272_v60, %v1815_v59 }
 0x2ad   : > { %v2276_v62 = vsel %vm10005_vm7, %v2273_v61, -inf }
 0x2ae   : > { %2277 = vmax.xlane.f32.xlu0 %v2276_v62  ;;  %v1846_v62 = vld [vmem:[%s7561_s30 + $0xb8] sm:$0xff] }
 0x2b2   : > { %v2347_v63 = vpop.f32.mrf.mxu1 }
 0x2b3   : > { %6490 = vmatpush.xpose.msk.msra.mxu3 %vm10006_vm6, %v2347_v63  ;;  %v1845_v63 = vld [vmem:[%s7561_s30 + $0xb0] sm:$0xff] }
 0x2b6   : > { %6491 = vmatmul.msk.f32.vlgmr.msra.gmra.mxu3 %vm10006_vm6, %v2327_v0  ;;  %v1844_v0 = vld [vmem:[%s7561_s30 + $0xa8] sm:$0xff] }
 0x2b7   : > { %2470 = vmatpush.msrb.mxu3 %v1775_v18 }
 0x2b9   : > { %2471 = vmatpush.msrb.mxu3 %v1774_v30 }
 0x2bb   : > { %2624 = vmatpush.msra.mxu3 %v1834_v31 }
 0x2bd   : > { %2625 = vmatpush.msra.mxu3 %v1833_v33 }
 0x2bf   : > { %2626 = vmatpush.msra.mxu3 %v1832_v34 }
 0x2c1   : > { %2627 = vmatpush.msra.mxu3 %v1831_v35  ;;  %v1830_v35 = vld [vmem:[%s7561_s30 + $0x38] sm:$0xff] }
 0x321   : > { %v2278_v2 = vpop.xlane.xlu0 %2277 }
 0x322   : > { %v2279_v3 = vsub.f32 %v2273_v61, %v2278_v2 }
 0x324   : > { %v2280_v4 = vmul.f32 1.442695, %v2279_v3 }
 0x326   : > { %7023 = vpow2.f32 %v2280_v4 }
 0x32c   : > { %v7024_v5 = vpop.eup %7023 }
 0x32d   : > { %v2282_v6 = vsel %vm10005_vm7, %v7024_v5, 0.0 }
 0x32e   : > { %2283 = vadd.xlane.f32.xlu1 %v2282_v6 }
 0x339   : > { %v2393_v8 = vpop.f32.mrf.mxu3 }
 0x33a   : > { %v2394_v9 = vadd.f32 %v2393_v8, %v1816_v7  ;;  %v1805_v8 = vld [vmem:[%s7526_s25 + $0x18] sm:$0xff] }
 0x33b   : > { %2513 = vmatpush.msrb.mxu0 %v1805_v8  ;;  %v7839_v8 = vld [vmem:[%s10100_s26 + $0xf0] sm:$0xff] }
 0x33c   : > { %v2396_v10 = vsel %vm10005_vm7, %v2394_v9, -inf }
 0x33d   : > { %2397 = vmax.xlane.f32.xlu1 %v2396_v10  ;;  %v1803_v10 = vld [vmem:[%s7526_s25 + $0x8] sm:$0xff] }
 0x3a1   : > { %v2284_v17 = vpop.xlane.xlu1 %2283 }
 0x3a2   : > { %7025 = vrcp.f32 %v2284_v17  ;;  %v1839_v17 = vld [vmem:[%s7561_s30 + $0x80] sm:$0xff] }
 0x3a8   : > { %v7026_v19 = vpop.eup %7025 }
 0x3a9   : > { %v2286_v20 = vmul.f32 %v7026_v19, %v7024_v5 }
 0x3ab   : > { %6486 = vmatmul.msk.f32.vlgmr.msrb.gmra.mxu2 %vm10005_vm7, %v2286_v20 }
 0x3ac   : > { %2447 = vmatpush.msrb.mxu2 %v1777_v53  ;;  %v1835_v53 = vld [vmem:[%s7561_s30 + $0x60] sm:$0xff] }
 0x3ae   : > { %2448 = vmatpush.msrb.mxu2 %v1776_v54 }
 0x3b0   : > { %v2398_v21 = vpop.xlane.xlu1 %2397 }
 0x3b1   : > { %v2399_v22 = vsub.f32 %v2394_v9, %v2398_v21  ;;  %v1804_v9 = vld [vmem:[%s7526_s25 + $0x10] sm:$0xff] }
 0x3b2   : > { %2514 = vmatpush.msrb.mxu0 %v1804_v9  ;;  %v7845_v9 = vld [vmem:[%s10100_s26 + $0xe8] sm:$0xff] }
 0x3b3   : > { %v2400_v23 = vmul.f32 1.442695, %v2399_v22  ;;  %6489 = vmatmul.msk.f32.vlgmr.msra.gmra.mxu2 %vm10007_vm1, %v7710_v51 }
 0x3b4   : > { %2604 = vmatpush.msra.mxu2 %v1826_v55  ;;  %2515 = vmatpush.msrb.mxu0 %v1803_v10  ;;  %v7850_v10 = vld [vmem:[%s10100_s26 + $0xe0] sm:$0xff] }
 0x3b5   : > { %7027 = vpow2.f32 %v2400_v23 }
 0x3b6   : > { %2605 = vmatpush.msra.mxu2 %v1825_v56  ;;  %2516 = vmatpush.msrb.mxu0 %v1802_v12  ;;  %v7855_v12 = vld [vmem:[%s10100_s26 + $0xd8] sm:$0xff] }
 0x3b8   : > { %2606 = vmatpush.msra.mxu2 %v1824_v57  ;;  %2644 = vmatpush.msra.mxu0 %v1842_v14  ;;  %v1861_v14 = vld [vmem:[%s7581_s24 + $0x8] sm:$0xff] }
 0x3ba   : > { %2607 = vmatpush.msra.mxu2 %v1823_v58  ;;  %2645 = vmatpush.msra.mxu0 %v1841_v15  ;;  %v7861_v15 = vld [vmem:[%s10100_s26 + $0xd0] sm:$0xff] }
 0x3bb   : > { %v7028_v26 = vpop.eup %7027 }
 0x3bc   : > { %v2402_v27 = vsel %vm10005_vm7, %v7028_v26, 0.0  ;;  %2646 = vmatpush.msra.mxu0 %v1840_v16 }
 0x3bd   : > { %2403 = vadd.xlane.f32.xlu2 %v2402_v27 }
 0x3be   : > { %2647 = vmatpush.msra.mxu0 %v1839_v17 }
 0x3c5   : > { %2570 = vadd.xlane.f32.xlu2 %v2569_v29 }
 0x42e   : > { %v2307_v32 = vpop.f32.mrf.mxu2 }
 0x42f   : > { %6494 = vmatmul.msk.f32.vlgmr.msrb.gmra.mxu3 %vm10006_vm6, %v2307_v32  ;;  %v7005_v32 = vld [vmem:[%s10098_s6] ss:$0 sm:$0xff]  ;;  %s10210_s6 = sld [smem:[#allocation38_spill]] }
 0x430   : > { %v2404_v11 = vpop.xlane.xlu2 %2403 }
 0x431   : > { %7029 = vrcp.f32 %v2404_v11 }
 0x436   : > { %v2367_v37 = vpop.f32.mrf.mxu2 }
 0x437   : > { %v7030_v38 = vpop.eup %7029  ;;  %2425 = vmatpush.msrb.mxu1 %v2367_v37  ;;  %v1829_v37 = vld [vmem:[%s7561_s30 + $0x30] sm:$0xff] }
 0x438   : > { %v2406_v39 = vmul.f32 %v7030_v38, %v7028_v26  ;;  %v2571_v40 = vpop.xlane.xlu2 %2570  ;;  %v1828_v38 = vld [vmem:[%s7561_s30 + $0x28] sm:$0xff] }
 0x439   : > { %v2572_v41 = vmul.f32 %v2571_v40, %v7703_v36 }
 0x43a   : > { %6492 = vmatmul.msk.f32.vlgmr.msrb.gmra.mxu1 %vm10005_vm7, %v2406_v39  ;;  %v1827_v39 = vld [vmem:[%s7561_s30 + $0x20] sm:$0xff] }
 0x43b   : > { %v2573_v42 = vadd.f32 1e-06, %v2572_v41  ;;  %v1813_v41 = vld [vmem:[%s10086_s14 + $0x38] sm:$0xff] }
 0x43c   : > { %2534 = vmatpush.msra.mxu1 %v1813_v41  ;;  %v7968_v41 = vld [vmem:[%s10100_s26 + $0x2b0] sm:$0xff] }
 0x43d   : > { %7031 = vrsqrt.f32 %v2573_v42  ;;  %vm2580_vm8 = vweird.f32 %v2573_v42 }
 0x443   : > { %v7032_v43 = vpop.eup %7031 }
 0x444   : > { %v2575_v44 = vmul.f32 %v7032_v43, %v2573_v42  ;;  %vm2581_vm9 = vweird.f32 %v7032_v43  ;;  %v1812_v42 = vld [vmem:[%s10086_s14 + $0x30] sm:$0xff] }
 0x445   : > { %vm2582_vm10 = vmor %vm2580_vm8, %vm2581_vm9  ;;  %2535 = vmatpush.msra.mxu1 %v1812_v42  ;;  %v7973_v42 = vld [vmem:[%s10100_s26 + $0x2a8] sm:$0xff] }
 0x446   : > { %v2576_v45 = vmul.f32 %v7032_v43, %v2575_v44  ;;  %v1810_v44 = vld [vmem:[%s10086_s14 + $0x20] sm:$0xff] }
 0x448   : > { %v2577_v46 = vmul.f32 0.5, %v2576_v45  ;;  %v1809_v45 = vld [vmem:[%s10086_s14 + $0x18] sm:$0xff] }
 0x44a   : > { %v2578_v47 = vsub.f32 1.5, %v2577_v46  ;;  %v1808_v46 = vld [vmem:[%s10086_s14 + $0x10] sm:$0xff] }
 0x44c   : > { %v2579_v48 = vmul.f32 %v7032_v43, %v2578_v47  ;;  %v1807_v47 = vld [vmem:[%s10086_s14 + $0x8] sm:$0xff] }
 0x44e   : > { %v2583_v50 = vsel %vm2582_vm10, %v7032_v43, %v2579_v48  ;;  %v1811_v43 = vld [vmem:[%s10086_s14 + $0x28] sm:$0xff]  ;;  %v1806_v48 = vld [vmem:[%s10086_s14] sm:$0xff] }
 0x44f   : > { %v2584_v51 = vmul.f32 %v2583_v50, %v7747_v25  ;;  %2536 = vmatpush.msra.mxu1 %v1811_v43  ;;  %v1837_v50 = vld [vmem:[%s7561_s30 + $0x70] sm:$0xff]  ;;  %v7978_v43 = vld [vmem:[%s10100_s26 + $0x2a0] sm:$0xff] }
 0x451   : > { %v7763_v52 = vmul.f32 %v7004_v49, %v2584_v51  ;;  %2537 = vmatpush.msra.mxu1 %v1810_v44  ;;  %v1838_v49 = vld [vmem:[%s7561_s30 + $0x78] sm:$0xff]  ;;  %v1836_v51 = vld [vmem:[%s7561_s30 + $0x68] sm:$0xff] }
 0x452   : > { %v7983_v44 = vld [vmem:[%s10100_s26 + $0x298] sm:$0xff] }
 0x453   : > { %6498 = vmatmul.msk.f32.vlgmr.msra.gmra.mxu3 %vm10007_vm1, %v7763_v52  ;;  %2538 = vmatpush.msra.mxu1 %v1809_v45  ;;  %v7988_v45 = vld [vmem:[%s10100_s26 + $0x290] sm:$0xff] }
 0x455   : > { %2539 = vmatpush.msra.mxu1 %v1808_v46  ;;  %v7993_v46 = vld [vmem:[%s10100_s26 + $0x288] sm:$0xff] }
 0x457   : > { %2540 = vmatpush.msra.mxu1 %v1807_v47 }
 0x459   : > { %2541 = vmatpush.msra.mxu1 %v1806_v48 }
 0x45b   : > { %2744 = vmatpush.msrb.mxu1 %v1838_v49  ;;  %v7998_v49 = vld [vmem:[%s10100_s26 + $0x280] sm:$0xff] }
 0x45d   : > { %2745 = vmatpush.msrb.mxu1 %v1837_v50 }
 0x45f   : > { %2746 = vmatpush.msrb.mxu1 %v1836_v51 }
 0x461   : > { %2747 = vmatpush.msrb.mxu1 %v1835_v53 }
 0x4b2   : > { %v2473_v60 = vpop.f32.mrf.mxu3 }
 0x4b7   : > { %v2427_v59 = vpop.f32.mrf.mxu1 }
 0x4b8   : > { %6493 = vmatmul.msk.f32.vlgmr.msrb.gmra.mxu2 %vm10006_vm6, %v2427_v59 }
 0x4c0   : > { %6497 = vmatmul.msk.f32.vlgmr.msra.gmra.mxu2 %vm10007_vm1, %v7763_v52 }
 0x4d6   : > { %v2629_v61 = vpop.f32.mrf.mxu3 }
 0x4d7   : > { %6500 = vmatpush.xpose.msk.msrb.mxu2 %vm10006_vm6, %v2629_v61 }
 0x4db   : > { %2764 = vmatpush.msra.mxu2 %v1846_v62  ;;  %v1820_v62 = vld [vmem:[%s10099_s16 + $0x8] sm:$0xff] }
 0x4dd   : > { %2765 = vmatpush.msra.mxu2 %v1845_v63 }
 0x4df   : > { %2766 = vmatpush.msra.mxu2 %v1844_v0 }
 0x4e1   : > { %2767 = vmatpush.msra.mxu2 %v1843_v1 }
 0x53b   : > { %v2450_v2 = vpop.f32.mrf.mxu2 }
 0x53c   : > { %v2474_v3 = vadd.f32 %v2473_v60, %v2450_v2 }
 0x53e   : > { %v7782_v4 = vadd.f32 %v2474_v3, %v7684_v13  ;;  %v8719_v13 = vld [vmem:[%s10100_s26 + $0x510] sm:$0xff] }
 0x53f   : > { %10120 = vst [vmem:[#allocation72_spill] sm:$0xff] %v8719_v13 }
 0x540   : > { %v2477_v5 = vmul.f32 %v7782_v4, %v7782_v4 }
 0x542   : > { %v2478_v6 = vsel %vm10007_vm1, %v2477_v5, 0.0 }
 0x543   : > { %2479 = vadd.xlane.f32.xlu0 %v2478_v6  ;;  %v2609_v7 = vpop.f32.mrf.mxu2  ;;  %v7834_v6 = vld [vmem:[%s10100_s26 + $0xf8] sm:$0xff] }
 0x544   : > { %6501 = vmatmul.msk.f32.vlgmr.msrb.gmra.mxu2 %vm10006_vm6, %v2609_v7 }
 0x545   : > { %2872 = vmatpush.msrb.mxu2 %v1820_v62 }
 0x54c   : > { %6505 = vmatmul.msk.f32.vlgmr.msra.gmra.mxu2 %vm10007_vm1, %v7763_v52 }
 0x5b6   : > { %v2480_v18 = vpop.xlane.xlu0 %2479 }
 0x5b7   : > { %v2481_v19 = vmul.f32 %v2480_v18, %v7703_v36  ;;  %v7866_v18 = vld [vmem:[%s10100_s26 + $0xc8] sm:$0xff] }
 0x5b9   : > { %v2482_v20 = vadd.f32 1e-06, %v2481_v19 }
 0x5bb   : > { %7033 = vrsqrt.f32 %v2482_v20  ;;  %vm2489_vm12 = vweird.f32 %v2482_v20 }
 0x5c1   : > { %v7034_v21 = vpop.eup %7033 }
 0x5c2   : > { %v2484_v22 = vmul.f32 %v7034_v21, %v2482_v20  ;;  %vm2490_vm11 = vweird.f32 %v7034_v21 }
 0x5c3   : > { %vm2491_vm13 = vmor %vm2489_vm12, %vm2490_vm11 }
 0x5c4   : > { %v2485_v23 = vmul.f32 %v7034_v21, %v2484_v22 }
 0x5c6   : > { %v2486_v26 = vmul.f32 0.5, %v2485_v23  ;;  %v7882_v23 = vld [vmem:[%s10100_s26 + $0xb8] sm:$0xff] }
 0x5c7   : > { %v2675_v27 = vpop.f32.mrf.mxu2 }
 0x5c8   : > { %v2487_v28 = vsub.f32 1.5, %v2486_v26  ;;  %v2676_v29 = vadd.f32 %v2675_v27, %v1860_v24  ;;  %v7888_v24 = vld [vmem:[%s10100_s26 + $0xb0] sm:$0xff]  ;;  %v7893_v26 = vld [vmem:[%s10100_s26 + $0xa8] sm:$0xff]  ;;  %v7898_v27 = vld [vmem:[%s10100_s26 + $0xa0] sm:$0xff] }
 0x5ca   : > { %v2488_v30 = vmul.f32 %v7034_v21, %v2487_v28  ;;  %v2678_v31 = vsel %vm10005_vm7, %v2676_v29, -inf  ;;  %v7903_v28 = vld [vmem:[%s10100_s26 + $0x98] sm:$0xff] }
 0x5cb   : > { %2679 = vmax.xlane.f32.xlu1 %v2678_v31  ;;  %v7918_v31 = vld [vmem:[%s10100_s26 + $0x80] sm:$0xff] }
 0x5cc   : > { %v2492_v33 = vsel %vm2491_vm13, %v7034_v21, %v2488_v30  ;;  %v7875_v21 = vld [vmem:[%s10100_s26 + $0xc0] sm:$0xff]  ;;  %v7913_v30 = vld [vmem:[%s10100_s26 + $0x88] sm:$0xff] }
 0x5cd   : > { %v2493_v11 = vmul.f32 %v2492_v33, %v7782_v4  ;;  %v7928_v33 = vld [vmem:[%s10100_s26 + $0x2f0] sm:$0xff] }
 0x5cf   : > { %v2497_v34 = vmul.f32 %v7005_v32, %v2493_v11  ;;  %v2769_v40 = vpop.f32.mrf.mxu2  ;;  %v7921_v32 = vld [vmem:[%s10100_s26 + $0x2f8] sm:$0xff]  ;;  %v7933_v11 = vld [vmem:[%s10100_s26 + $0x2e8] sm:$0xff] }
 0x5d1   : > { %6495 = vmatmul.msk.f32.vlgmr.msrb.gmra.mxu0 %vm10007_vm1, %v2497_v34  ;;  %v7938_v34 = vld [vmem:[%s10100_s26 + $0x2e0] sm:$0xff] }
 0x5d2   : > { %2724 = vmatpush.msrb.mxu0 %v1830_v35  ;;  %v7943_v35 = vld [vmem:[%s10100_s26 + $0x2d8] sm:$0xff] }
 0x5d4   : > { %2725 = vmatpush.msrb.mxu0 %v1829_v37  ;;  %v7948_v37 = vld [vmem:[%s10100_s26 + $0x2d0] sm:$0xff] }
 0x5d6   : > { %2726 = vmatpush.msrb.mxu0 %v1828_v38  ;;  %v7953_v38 = vld [vmem:[%s10100_s26 + $0x2c8] sm:$0xff] }
 0x5d8   : > { %2727 = vmatpush.msrb.mxu0 %v1827_v39  ;;  %v7958_v39 = vld [vmem:[%s10100_s26 + $0x2c0] sm:$0xff] }
 0x5d9   : > { %6499 = vmatmul.msk.f32.vlgmr.msra.gmra.mxu0 %vm10007_vm1, %v7763_v52 }
 0x5da   : > { %2827 = vmatpush.msra.mxu0 %v2769_v40  ;;  %v7963_v40 = vld [vmem:[%s10100_s26 + $0x2b8] sm:$0xff] }
 0x5e1   : > { %6503 = vmatmul.msk.f32.vlgmr.msrb.gmra.mxu0 %vm10007_vm1, %v7763_v52 }
 0x63e   : > { %v2680_v54 = vpop.xlane.xlu1 %2679 }
 0x63f   : > { %v2681_v55 = vsub.f32 %v2676_v29, %v2680_v54  ;;  %v7908_v29 = vld [vmem:[%s10100_s26 + $0x90] sm:$0xff] }
 0x641   : > { %v2682_v56 = vmul.f32 1.442695, %v2681_v55 }
 0x643   : > { %7035 = vpow2.f32 %v2682_v56 }
 0x649   : > { %v7036_v57 = vpop.eup %7035 }
 0x64a   : > { %v2684_v58 = vsel %vm10005_vm7, %v7036_v57, 0.0 }
 0x64b   : > { %2685 = vadd.xlane.f32.xlu2 %v2684_v58 }
 0x64e   : > { %v2518_v59 = vpop.f32.mrf.mxu0 }
 0x64f   : > { %v2521_v60 = vmax.f32 %v2518_v59, 0.0 }
 0x651   : > { %6496 = vmatmul.msk.f32.vlgmr.msra.gmra.mxu1 %vm10004_vm14, %v2521_v60 }
 0x656   : > { %v2649_v61 = vpop.f32.mrf.mxu0 }
 0x657   : > { %2707 = vmatpush.msrb.mxu3 %v2649_v61 }
 0x659   : > { %6504 = vmatmul.msk.f32.vlgmr.msrb.gmra.mxu1 %vm10007_vm1, %v7763_v52  ;;  %v1819_v52 = vld [vmem:[%s10099_s16] sm:$0xff] }
 0x65a   : > { %2873 = vmatpush.msrb.mxu2 %v1819_v52 }
 0x65c   : > { %6530 = vmatpush.xpose.msk.msra.mxu2 %vm10007_vm1, %v7834_v6 }
 0x65e   : > { %v2729_v5 = vpop.f32.mrf.mxu0 }
 0x660   : > { %6531 = vmatpush.xpose.msk.msra.mxu2 %vm10007_vm1, %v7839_v8 }
 0x664   : > { %6532 = vmatpush.xpose.msk.msra.mxu2 %vm10007_vm1, %v7845_v9 }
 0x668   : > { %6533 = vmatpush.xpose.msk.msra.mxu2 %vm10007_vm1, %v7850_v10 }
 0x66c   : > { %6534 = vmatpush.xpose.msk.msra.mxu2 %vm10007_vm1, %v7855_v12 }
 0x670   : > { %6535 = vmatpush.xpose.msk.msra.mxu2 %vm10007_vm1, %v7861_v15 }
 0x674   : > { %6536 = vmatpush.xpose.msk.msra.mxu2 %vm10007_vm1, %v7866_v18 }
 0x678   : > { %6537 = vmatpush.xpose.msk.msra.mxu2 %vm10007_vm1, %v7875_v21 }
 0x67c   : > { %6538 = vmatpush.xpose.msk.msra.mxu2 %vm10007_vm1, %v7882_v23 }
 0x680   : > { %6539 = vmatpush.xpose.msk.msra.mxu2 %vm10007_vm1, %v7888_v24 }
 0x684   : > { %6540 = vmatpush.xpose.msk.msra.mxu2 %vm10007_vm1, %v7893_v26 }
 0x688   : > { %6541 = vmatpush.xpose.msk.msra.mxu2 %vm10007_vm1, %v7898_v27 }
 0x68c   : > { %6542 = vmatpush.xpose.msk.msra.mxu2 %vm10007_vm1, %v7903_v28 }
 0x690   : > { %6543 = vmatpush.xpose.msk.msra.mxu2 %vm10007_vm1, %v7908_v29 }
 0x694   : > { %6544 = vmatpush.xpose.msk.msra.mxu2 %vm10007_vm1, %v7913_v30 }
 0x698   : > { %6545 = vmatpush.xpose.msk.msra.mxu2 %vm10007_vm1, %v7918_v31 }
 0x6be   : > { %v2686_v63 = vpop.xlane.xlu2 %2685 }
 0x6bf   : > { %7037 = vrcp.f32 %v2686_v63  ;;  %v7006_v63 = vld [vmem:[%s10101_s10] ss:$0 sm:$0xff]  ;;  %s10104_s10 = sld [smem:[#allocation48_spill]] }
 0x6c5   : > { %v7038_v0 = vpop.eup %7037 }
 0x6c6   : > { %v2688_v1 = vmul.f32 %v7038_v0, %v7036_v57 }
 0x6c8   : > { %6502 = vmatmul.msk.f32.vlgmr.msrb.gmra.mxu3 %vm10005_vm7, %v2688_v1 }
 0x6ce   : > { %v2543_v2 = vpop.f32.mrf.mxu1 }
 0x6cf   : > { %v7869_v19 = vadd.f32 %v2543_v2, %v7782_v4 }
 0x6d1   : > { %v2547_v22 = vmul.f32 %v7869_v19, %v7869_v19 }
 0x6d3   : > { %v2548_v4 = vsel %vm10007_vm1, %v2547_v22, 0.0  ;;  %v2014_v22 = vld [vmem:[%s10100_s26 + $0x4c0] sm:$0xff] }
 0x6d6   : > { %v2749_v3 = vpop.f32.mrf.mxu1 }
 0x6d7   : > { %6506 = vmatpush.xpose.msk.msra.mxu3 %vm10006_vm6, %v2749_v3  ;;  %v2021_v3 = vld [vmem:[%s10100_s26 + $0x4f8] sm:$0xff] }
 0x6da   : > { %6507 = vmatmul.msk.f32.vlgmr.msra.gmra.mxu3 %vm10006_vm6, %v2729_v5 }
 0x74b   : > { %v2709_v7 = vpop.f32.mrf.mxu3 }
 0x74c   : > { %6510 = vmatmul.msk.f32.vlgmr.msrb.gmra.mxu2 %vm10006_vm6, %v2709_v7  ;;  %v2020_v7 = vld [vmem:[%s10100_s26 + $0x4f0] sm:$0xff] }
 0x74d   : > { %6598 = vmatpush.xpose.msk.msrb.mxu2 %vm10007_vm1, %v7921_v32 }
 0x751   : > { %6599 = vmatpush.xpose.msk.msrb.mxu2 %vm10007_vm1, %v7928_v33 }
 0x755   : > { %6600 = vmatpush.xpose.msk.msrb.mxu2 %vm10007_vm1, %v7933_v11 }
 0x759   : > { %6601 = vmatpush.xpose.msk.msrb.mxu2 %vm10007_vm1, %v7938_v34 }
 0x75d   : > { %v2795_v16 = vpop.f32.mrf.mxu3  ;;  %6602 = vmatpush.xpose.msk.msrb.mxu2 %vm10007_vm1, %v7943_v35 }
 0x75e   : > { %v2796_v17 = vadd.f32 %v2795_v16, %v1861_v14  ;;  %v2019_v14 = vld [vmem:[%s10100_s26 + $0x4e8] sm:$0xff]  ;;  %v2018_v16 = vld [vmem:[%s10100_s26 + $0x4e0] sm:$0xff] }
 0x760   : > { %v2798_v20 = vsel %vm10005_vm7, %v2796_v17, -inf }
 0x761   : > { %2799 = vmax.xlane.f32.xlu0 %v2798_v20  ;;  %6603 = vmatpush.xpose.msk.msrb.mxu2 %vm10007_vm1, %v7948_v37  ;;  %v2015_v20 = vld [vmem:[%s10100_s26 + $0x4c8] sm:$0xff] }
 0x765   : > { %6604 = vmatpush.xpose.msk.msrb.mxu2 %vm10007_vm1, %v7953_v38 }
 0x769   : > { %2549 = vadd.xlane.f32.xlu0 %v2548_v4  ;;  %6605 = vmatpush.xpose.msk.msrb.mxu2 %vm10007_vm1, %v7958_v39  ;;  %v2013_v4 = vld [vmem:[%s10100_s26 + $0x4b8] sm:$0xff] }
 0x76d   : > { %6606 = vmatpush.xpose.msk.msrb.mxu2 %vm10007_vm1, %v7963_v40 }
 0x771   : > { %6607 = vmatpush.xpose.msk.msrb.mxu2 %vm10007_vm1, %v7968_v41 }
 0x775   : > { %6608 = vmatpush.xpose.msk.msrb.mxu2 %vm10007_vm1, %v7973_v42 }
 0x779   : > { %6609 = vmatpush.xpose.msk.msrb.mxu2 %vm10007_vm1, %v7978_v43 }
 0x77d   : > { %6610 = vmatpush.xpose.msk.msrb.mxu2 %vm10007_vm1, %v7983_v44 }
 0x781   : > { %6611 = vmatpush.xpose.msk.msrb.mxu2 %vm10007_vm1, %v7988_v45 }
 0x785   : > { %6612 = vmatpush.xpose.msk.msrb.mxu2 %vm10007_vm1, %v7993_v46 }
 0x789   : > { %6613 = vmatpush.xpose.msk.msrb.mxu2 %vm10007_vm1, %v7998_v49 }
 0x7d4   : > { %v2800_v47 = vpop.xlane.xlu0 %2799 }
 0x7d5   : > { %v2801_v48 = vsub.f32 %v2796_v17, %v2800_v47  ;;  %v2017_v17 = vld [vmem:[%s10100_s26 + $0x4d8] sm:$0xff]  ;;  %v2012_v47 = vld [vmem:[%s10100_s26 + $0x4b0] sm:$0xff] }
 0x7d7   : > { %v2802_v50 = vmul.f32 1.442695, %v2801_v48  ;;  %v2011_v48 = vld [vmem:[%s10100_s26 + $0x4a8] sm:$0xff] }
 0x7d9   : > { %7039 = vpow2.f32 %v2802_v50  ;;  %v2010_v50 = vld [vmem:[%s10100_s26 + $0x4a0] sm:$0xff] }
 0x7dc   : > { %v2550_v51 = vpop.xlane.xlu0 %2549 }
 0x7dd   : > { %v2551_v53 = vmul.f32 %v2550_v51, %v7703_v36  ;;  %v2009_v51 = vld [vmem:[%s10100_s26 + $0x498] sm:$0xff] }
 0x7df   : > { %v8003_v54 = vpop.eup %7039  ;;  %v2552_v55 = vadd.f32 1e-06, %v2551_v53  ;;  %v2008_v53 = vld [vmem:[%s10100_s26 + $0x490] sm:$0xff] }
 0x7e0   : > { %v2804_v56 = vsel %vm10005_vm7, %v8003_v54, 0.0 }
 0x7e1   : > { %7041 = vrsqrt.f32 %v2552_v55  ;;  %2805 = vadd.xlane.f32.xlu1 %v2804_v56  ;;  %vm2559_vm0 = vweird.f32 %v2552_v55  ;;  %v2006_v56 = vld [vmem:[%s10100_s26 + $0x480] sm:$0xff] }
 0x7e7   : > { %v7042_v57 = vpop.eup %7041 }
 0x7e8   : > { %v2554_v58 = vmul.f32 %v7042_v57, %v2552_v55  ;;  %vm2560_vm15 = vweird.f32 %v7042_v57  ;;  %v2007_v55 = vld [vmem:[%s10100_s26 + $0x488] sm:$0xff] }
 0x7e9   : > { %vm2561_vm2 = vmor %vm2559_vm0, %vm2560_vm15 }
 0x7ea   : > { %v2555_v59 = vmul.f32 %v7042_v57, %v2554_v58  ;;  %v2084_v58 = vld [vmem:[%s10100_s26 + $0x6f0] sm:$0xff] }
 0x7ec   : > { %v2556_v60 = vmul.f32 0.5, %v2555_v59  ;;  %v2083_v59 = vld [vmem:[%s10100_s26 + $0x6e8] sm:$0xff] }
 0x7ee   : > { %v2557_v61 = vsub.f32 1.5, %v2556_v60  ;;  %v2082_v60 = vld [vmem:[%s10100_s26 + $0x6e0] sm:$0xff] }
 0x7f0   : > { %v2558_v62 = vmul.f32 %v7042_v57, %v2557_v61  ;;  %v2081_v61 = vld [vmem:[%s10100_s26 + $0x6d8] sm:$0xff] }
 0x7f2   : > { %v2562_v0 = vsel %vm2561_vm2, %v7042_v57, %v2558_v62  ;;  %v2085_v57 = vld [vmem:[%s10100_s26 + $0x6f8] sm:$0xff]  ;;  %v2080_v62 = vld [vmem:[%s10100_s26 + $0x6d0] sm:$0xff] }
 0x7f3   : > { %v2563_v1 = vmul.f32 %v2562_v0, %v7869_v19  ;;  %v2016_v19 = vld [vmem:[%s10100_s26 + $0x4d0] sm:$0xff]  ;;  %v2078_v0 = vld [vmem:[%s10100_s26 + $0x6c0] sm:$0xff] }
 0x7f5   : > { %v8009_v2 = vmul.f32 %v7006_v63, %v2563_v1  ;;  %v2079_v63 = vld [vmem:[%s10100_s26 + $0x6c8] sm:$0xff]  ;;  %v2077_v1 = vld [vmem:[%s10100_s26 + $0x6b8] sm:$0xff] }
 0x7f7   : > { %10102 = vst [vmem:[#allocation57_spill] sm:$0xff] %v8009_v2  ;;  %6546 = vmatmul.msk.f32.vlgmr.msra.gmra.mxu2 %vm10007_vm1, %v8009_v2  ;;  %v2984_v5 = vmul.f32 %v8009_v2, %v8009_v2 }
 0x7f8   : > { %6666 = vmatpush.xpose.msk.msra.mxu2 %vm10007_vm1, %v2021_v3 }
 0x7f9   : > { %v2985_v52 = vsel %vm10007_vm1, %v2984_v5, 0.0  ;;  %v2076_v5 = vld [vmem:[%s10100_s26 + $0x6b0] sm:$0xff] }
 0x7fa   : > { %2986 = vadd.xlane.f32.xlu1 %v2985_v52  ;;  %v2075_v52 = vld [vmem:[%s10100_s26 + $0x6a8] sm:$0xff] }
 0x7fc   : > { %6667 = vmatpush.xpose.msk.msra.mxu2 %vm10007_vm1, %v2020_v7 }
 0x7ff   : > { %6614 = vmatmul.msk.f32.vlgmr.msrb.gmra.mxu2 %vm10007_vm1, %v8009_v2 }
 0x800   : > { %6668 = vmatpush.xpose.msk.msra.mxu2 %vm10007_vm1, %v2019_v14 }
 0x804   : > { %6669 = vmatpush.xpose.msk.msra.mxu2 %vm10007_vm1, %v2018_v16  ;;  %v2074_v16 = vld [vmem:[%s10100_s26 + $0x6a0] sm:$0xff] }
 0x808   : > { %6670 = vmatpush.xpose.msk.msra.mxu2 %vm10007_vm1, %v2017_v17  ;;  %v2073_v17 = vld [vmem:[%s10100_s26 + $0x698] sm:$0xff] }
 0x80c   : > { %6671 = vmatpush.xpose.msk.msra.mxu2 %vm10007_vm1, %v2016_v19  ;;  %v2072_v19 = vld [vmem:[%s10100_s26 + $0x690] sm:$0xff] }
 0x810   : > { %6672 = vmatpush.xpose.msk.msra.mxu2 %vm10007_vm1, %v2015_v20  ;;  %v1822_v20 = vld [vmem:[%s10099_s16 + $0x18] sm:$0xff] }
 0x811   : > { %2849 = vmatpush.msra.mxu1 %v1822_v20 }
 0x814   : > { %6673 = vmatpush.xpose.msk.msra.mxu2 %vm10007_vm1, %v2014_v22  ;;  %v1821_v22 = vld [vmem:[%s10099_s16 + $0x10] sm:$0xff]  ;;  %s7183_s16 = scalar_lea.hbm %s10085_s4, 16 }
 0x815   : > { %2850 = vmatpush.msra.mxu1 %v1821_v22 }
 0x818   : > { %6674 = vmatpush.xpose.msk.msra.mxu2 %vm10007_vm1, %v2013_v4  ;;  %v8086_v4 = vld [vmem:[%s10100_s26 + $0x78] sm:$0xff] }
 0x819   : > { %6513 = vmatpush.xpose.msk.msrb.mxu1 %vm10007_vm1, %v8086_v4 }
 0x81c   : > { %6675 = vmatpush.xpose.msk.msra.mxu2 %vm10007_vm1, %v2012_v47  ;;  %v2070_v47 = vld [vmem:[%s10100_s26 + $0x680] sm:$0xff] }
 0x820   : > { %6676 = vmatpush.xpose.msk.msra.mxu2 %vm10007_vm1, %v2011_v48  ;;  %v8093_v48 = vld [vmem:[%s10100_s26 + $0x70] sm:$0xff] }
 0x821   : > { %6514 = vmatpush.xpose.msk.msrb.mxu1 %vm10007_vm1, %v8093_v48 }
 0x824   : > { %6677 = vmatpush.xpose.msk.msra.mxu2 %vm10007_vm1, %v2010_v50  ;;  %v8099_v50 = vld [vmem:[%s10100_s26 + $0x68] sm:$0xff] }
 0x825   : > { %6515 = vmatpush.xpose.msk.msrb.mxu1 %vm10007_vm1, %v8099_v50 }
 0x828   : > { %6678 = vmatpush.xpose.msk.msra.mxu2 %vm10007_vm1, %v2009_v51  ;;  %v8108_v51 = vld [vmem:[%s10100_s26 + $0x60] sm:$0xff] }
 0x829   : > { %6516 = vmatpush.xpose.msk.msrb.mxu1 %vm10007_vm1, %v8108_v51 }
 0x82c   : > { %6679 = vmatpush.xpose.msk.msra.mxu2 %vm10007_vm1, %v2008_v53  ;;  %v8115_v53 = vld [vmem:[%s10100_s26 + $0x58] sm:$0xff] }
 0x82d   : > { %6517 = vmatpush.xpose.msk.msrb.mxu1 %vm10007_vm1, %v8115_v53 }
 0x830   : > { %6680 = vmatpush.xpose.msk.msra.mxu2 %vm10007_vm1, %v2007_v55  ;;  %v2001_v55 = vld [vmem:[%s10100_s26 + $0x458] sm:$0xff] }
 0x834   : > { %6681 = vmatpush.xpose.msk.msra.mxu2 %vm10007_vm1, %v2006_v56  ;;  %v2000_v56 = vld [vmem:[%s10100_s26 + $0x450] sm:$0xff] }
 0x837   : > { %6682 = vmatmul.msk.f32.vlgmr.msra.gmra.mxu2 %vm10007_vm1, %v8009_v2 }
 0x838   : > { %6734 = vmatpush.xpose.msk.msrb.mxu2 %vm10007_vm1, %v2085_v57  ;;  %v1999_v57 = vld [vmem:[%s10100_s26 + $0x448] sm:$0xff] }
 0x83c   : > { %6735 = vmatpush.xpose.msk.msrb.mxu2 %vm10007_vm1, %v2084_v58  ;;  %v1998_v58 = vld [vmem:[%s10100_s26 + $0x440] sm:$0xff] }
 0x840   : > { %6736 = vmatpush.xpose.msk.msrb.mxu2 %vm10007_vm1, %v2083_v59  ;;  %v1997_v59 = vld [vmem:[%s10100_s26 + $0x438] sm:$0xff] }
 0x844   : > { %6737 = vmatpush.xpose.msk.msrb.mxu2 %vm10007_vm1, %v2082_v60  ;;  %v1996_v60 = vld [vmem:[%s10100_s26 + $0x430] sm:$0xff] }
 0x848   : > { %6738 = vmatpush.xpose.msk.msrb.mxu2 %vm10007_vm1, %v2081_v61  ;;  %v1995_v61 = vld [vmem:[%s10100_s26 + $0x428] sm:$0xff] }
 0x84c   : > { %6739 = vmatpush.xpose.msk.msrb.mxu2 %vm10007_vm1, %v2080_v62  ;;  %v1994_v62 = vld [vmem:[%s10100_s26 + $0x420] sm:$0xff] }
 0x850   : > { %6740 = vmatpush.xpose.msk.msrb.mxu2 %vm10007_vm1, %v2079_v63  ;;  %v1993_v63 = vld [vmem:[%s10100_s26 + $0x418] sm:$0xff] }
 0x854   : > { %6741 = vmatpush.xpose.msk.msrb.mxu2 %vm10007_vm1, %v2078_v0  ;;  %v2806_v3 = vpop.xlane.xlu1 %2805  ;;  %v1992_v0 = vld [vmem:[%s10100_s26 + $0x410] sm:$0xff] }
 0x855   : > { %7043 = vrcp.f32 %v2806_v3  ;;  %v1990_v3 = vld [vmem:[%s10100_s26 + $0x400] sm:$0xff] }
 0x858   : > { %6742 = vmatpush.xpose.msk.msrb.mxu2 %vm10007_vm1, %v2077_v1  ;;  %v1991_v1 = vld [vmem:[%s10100_s26 + $0x408] sm:$0xff] }
 0x85b   : > { %v7044_v7 = vpop.eup %7043 }
 0x85c   : > { %6743 = vmatpush.xpose.msk.msrb.mxu2 %vm10007_vm1, %v2076_v5  ;;  %v2808_v14 = vmul.f32 %v7044_v7, %v8003_v54  ;;  %v2071_v54 = vld [vmem:[%s10100_s26 + $0x688] sm:$0xff]  ;;  %v2069_v5 = vld [vmem:[%s10100_s26 + $0x678] sm:$0xff]  ;;  %v2875_v7 = vpop.f32.mrf.mxu2 }
 0x85e   : > { %6508 = vmatmul.msk.f32.vlgmr.msra.gmra.mxu0 %vm10005_vm7, %v2808_v14 }
 0x860   : > { %6744 = vmatpush.xpose.msk.msrb.mxu2 %vm10007_vm1, %v2075_v52  ;;  %v2068_v52 = vld [vmem:[%s10100_s26 + $0x670] sm:$0xff] }
 0x864   : > { %6745 = vmatpush.xpose.msk.msrb.mxu2 %vm10007_vm1, %v2074_v16 }
 0x868   : > { %6746 = vmatpush.xpose.msk.msrb.mxu2 %vm10007_vm1, %v2073_v17 }
 0x86c   : > { %6747 = vmatpush.xpose.msk.msrb.mxu2 %vm10007_vm1, %v2072_v19  ;;  %v2067_v19 = vld [vmem:[%s10100_s26 + $0x668] sm:$0xff] }
 0x870   : > { %6748 = vmatpush.xpose.msk.msrb.mxu2 %vm10007_vm1, %v2071_v54  ;;  %v2066_v54 = vld [vmem:[%s10100_s26 + $0x660] sm:$0xff] }
 0x874   : > { %6749 = vmatpush.xpose.msk.msrb.mxu2 %vm10007_vm1, %v2070_v47  ;;  %v2065_v47 = vld [vmem:[%s10100_s26 + $0x658] sm:$0xff] }
 0x877   : > { %6750 = vmatmul.msk.f32.vlgmr.msrb.gmra.mxu2 %vm10007_vm1, %v8009_v2 }
 0x878   : > { %4339 = vmatpush.msra.mxu2 %v7834_v6  ;;  %v8122_v6 = vld [vmem:[%s10100_s26 + $0x50] sm:$0xff] }
 0x879   : > { %6518 = vmatpush.xpose.msk.msrb.mxu1 %vm10007_vm1, %v8122_v6 }
 0x87a   : > { %4340 = vmatpush.msra.mxu2 %v7839_v8  ;;  %v8129_v8 = vld [vmem:[%s10100_s26 + $0x48] sm:$0xff] }
 0x87c   : > { %4341 = vmatpush.msra.mxu2 %v7845_v9  ;;  %v8147_v9 = vld [vmem:[%s10100_s26 + $0x40] sm:$0xff] }
 0x87d   : > { %6519 = vmatpush.xpose.msk.msrb.mxu1 %vm10007_vm1, %v8129_v8 }
 0x87e   : > { %4342 = vmatpush.msra.mxu2 %v7850_v10  ;;  %v8154_v10 = vld [vmem:[%s10100_s26 + $0x38] sm:$0xff] }
 0x880   : > { %4343 = vmatpush.msra.mxu2 %v7855_v12  ;;  %v8160_v12 = vld [vmem:[%s10100_s26 + $0x30] sm:$0xff] }
 0x881   : > { %6520 = vmatpush.xpose.msk.msrb.mxu1 %vm10007_vm1, %v8147_v9 }
 0x882   : > { %4344 = vmatpush.msra.mxu2 %v7861_v15  ;;  %v8167_v15 = vld [vmem:[%s10100_s26 + $0x28] sm:$0xff] }
 0x884   : > { %4345 = vmatpush.msra.mxu2 %v7866_v18  ;;  %v8174_v18 = vld [vmem:[%s10100_s26 + $0x20] sm:$0xff] }
 0x885   : > { %6521 = vmatpush.xpose.msk.msrb.mxu1 %vm10007_vm1, %v8154_v10 }
 0x886   : > { %4346 = vmatpush.msra.mxu2 %v7875_v21  ;;  %v8181_v21 = vld [vmem:[%s10100_s26 + $0x18] sm:$0xff] }
 0x888   : > { %4347 = vmatpush.msra.mxu2 %v7882_v23  ;;  %v8188_v23 = vld [vmem:[%s10100_s26 + $0x10] sm:$0xff] }
 0x889   : > { %6522 = vmatpush.xpose.msk.msrb.mxu1 %vm10007_vm1, %v8160_v12 }
 0x88a   : > { %4348 = vmatpush.msra.mxu2 %v7888_v24  ;;  %v8193_v24 = vld [vmem:[%s10100_s26 + $0x8] sm:$0xff] }
 0x88c   : > { %4349 = vmatpush.msra.mxu2 %v7893_v26  ;;  %v8198_v26 = vld [vmem:[%s10100_s26] sm:$0xff] }
 0x88d   : > { %6523 = vmatpush.xpose.msk.msrb.mxu1 %vm10007_vm1, %v8167_v15 }
 0x88e   : > { %4350 = vmatpush.msra.mxu2 %v7898_v27  ;;  %v8203_v27 = vld [vmem:[%s10100_s26 + $0x278] sm:$0xff] }
 0x890   : > { %4351 = vmatpush.msra.mxu2 %v7903_v28 }
 0x891   : > { %6524 = vmatpush.xpose.msk.msrb.mxu1 %vm10007_vm1, %v8174_v18 }
 0x892   : > { %4352 = vmatpush.msra.mxu2 %v7908_v29  ;;  %v8209_v29 = vld [vmem:[%s10100_s26 + $0x270] sm:$0xff] }
 0x894   : > { %4353 = vmatpush.msra.mxu2 %v7913_v30  ;;  %v8214_v30 = vld [vmem:[%s10100_s26 + $0x268] sm:$0xff] }
 0x895   : > { %6525 = vmatpush.xpose.msk.msrb.mxu1 %vm10007_vm1, %v8181_v21 }
 0x896   : > { %4354 = vmatpush.msra.mxu2 %v7918_v31  ;;  %v8221_v31 = vld [vmem:[%s10100_s26 + $0x260] sm:$0xff] }
 0x898   : > { %4419 = vmatpush.msrb.mxu2 %v7921_v32  ;;  %v8226_v32 = vld [vmem:[%s10100_s26 + $0x258] sm:$0xff] }
 0x899   : > { %6526 = vmatpush.xpose.msk.msrb.mxu1 %vm10007_vm1, %v8188_v23 }
 0x89a   : > { %4420 = vmatpush.msrb.mxu2 %v7928_v33  ;;  %v8231_v33 = vld [vmem:[%s10100_s26 + $0x250] sm:$0xff] }
 0x89c   : > { %4421 = vmatpush.msrb.mxu2 %v7933_v11  ;;  %v8236_v11 = vld [vmem:[%s10100_s26 + $0x248] sm:$0xff] }
 0x89d   : > { %6527 = vmatpush.xpose.msk.msrb.mxu1 %vm10007_vm1, %v8193_v24 }
 0x89e   : > { %4422 = vmatpush.msrb.mxu2 %v7938_v34  ;;  %v8241_v34 = vld [vmem:[%s10100_s26 + $0x240] sm:$0xff] }
 0x8a0   : > { %4423 = vmatpush.msrb.mxu2 %v7943_v35  ;;  %v8246_v35 = vld [vmem:[%s10100_s26 + $0x238] sm:$0xff] }
 0x8a1   : > { %6528 = vmatpush.xpose.msk.msrb.mxu1 %vm10007_vm1, %v8198_v26 }
 0x8a2   : > { %4424 = vmatpush.msrb.mxu2 %v7948_v37  ;;  %v8251_v37 = vld [vmem:[%s10100_s26 + $0x230] sm:$0xff] }
 0x8a4   : > { %4425 = vmatpush.msrb.mxu2 %v7953_v38  ;;  %v8256_v38 = vld [vmem:[%s10100_s26 + $0x228] sm:$0xff] }
 0x8a6   : > { %4426 = vmatpush.msrb.mxu2 %v7958_v39  ;;  %v8261_v39 = vld [vmem:[%s10100_s26 + $0x220] sm:$0xff] }
 0x8a8   : > { %4427 = vmatpush.msrb.mxu2 %v7963_v40  ;;  %v8266_v40 = vld [vmem:[%s10100_s26 + $0x218] sm:$0xff] }
 0x8aa   : > { %4428 = vmatpush.msrb.mxu2 %v7968_v41  ;;  %v8271_v41 = vld [vmem:[%s10100_s26 + $0x210] sm:$0xff] }
 0x8ac   : > { %4429 = vmatpush.msrb.mxu2 %v7973_v42  ;;  %v8276_v42 = vld [vmem:[%s10100_s26 + $0x208] sm:$0xff] }
 0x8ae   : > { %4430 = vmatpush.msrb.mxu2 %v7978_v43  ;;  %v8281_v43 = vld [vmem:[%s10100_s26 + $0x200] sm:$0xff] }
 0x8b0   : > { %4431 = vmatpush.msrb.mxu2 %v7983_v44  ;;  %v2005_v44 = vld [vmem:[%s10100_s26 + $0x478] sm:$0xff] }
 0x8b2   : > { %4432 = vmatpush.msrb.mxu2 %v7988_v45  ;;  %v2004_v45 = vld [vmem:[%s10100_s26 + $0x470] sm:$0xff] }
 0x8b4   : > { %4433 = vmatpush.msrb.mxu2 %v7993_v46  ;;  %v2003_v46 = vld [vmem:[%s10100_s26 + $0x468] sm:$0xff] }
 0x8b6   : > { %4434 = vmatpush.msrb.mxu2 %v7998_v49  ;;  %v2002_v49 = vld [vmem:[%s10100_s26 + $0x460] sm:$0xff] }
 0x8db   : > { %v2829_v28 = vpop.f32.mrf.mxu0 }
 0x8dc   : > { %6509 = vmatmul.msk.f32.vlgmr.msra.gmra.mxu1 %vm10006_vm6, %v2829_v28  ;;  %v2063_v28 = vld [vmem:[%s10100_s26 + $0x648] sm:$0xff] }
 0x8dd   : > { %6581 = vmatpush.xpose.msk.msra.mxu1 %vm10007_vm1, %v8203_v27 }
 0x8e1   : > { %6582 = vmatpush.xpose.msk.msra.mxu1 %vm10007_vm1, %v8209_v29 }
 0x8e4   : > { %6529 = vmatmul.msk.f32.vlgmr.msrb.gmra.mxu1 %vm10007_vm1, %v8009_v2 }
 0x8e5   : > { %6583 = vmatpush.xpose.msk.msra.mxu1 %vm10007_vm1, %v8214_v30 }
 0x8e9   : > { %6584 = vmatpush.xpose.msk.msra.mxu1 %vm10007_vm1, %v8221_v31 }
 0x8ed   : > { %6585 = vmatpush.xpose.msk.msra.mxu1 %vm10007_vm1, %v8226_v32 }
 0x8f1   : > { %6586 = vmatpush.xpose.msk.msra.mxu1 %vm10007_vm1, %v8231_v33 }
 0x8f5   : > { %6587 = vmatpush.xpose.msk.msra.mxu1 %vm10007_vm1, %v8236_v11 }
 0x8f9   : > { %6588 = vmatpush.xpose.msk.msra.mxu1 %vm10007_vm1, %v8241_v34 }
 0x8fd   : > { %6589 = vmatpush.xpose.msk.msra.mxu1 %vm10007_vm1, %v8246_v35 }
 0x901   : > { %6590 = vmatpush.xpose.msk.msra.mxu1 %vm10007_vm1, %v8251_v37 }
 0x905   : > { %6591 = vmatpush.xpose.msk.msra.mxu1 %vm10007_vm1, %v8256_v38 }
 0x909   : > { %6592 = vmatpush.xpose.msk.msra.mxu1 %vm10007_vm1, %v8261_v39 }
 0x90d   : > { %6593 = vmatpush.xpose.msk.msra.mxu1 %vm10007_vm1, %v8266_v40 }
 0x911   : > { %6594 = vmatpush.xpose.msk.msra.mxu1 %vm10007_vm1, %v8271_v41 }
 0x915   : > { %6595 = vmatpush.xpose.msk.msra.mxu1 %vm10007_vm1, %v8276_v42 }
 0x919   : > { %6596 = vmatpush.xpose.msk.msra.mxu1 %vm10007_vm1, %v8281_v43 }
 0x91c   : > { %6597 = vmatmul.msk.f32.vlgmr.msra.gmra.mxu1 %vm10007_vm1, %v8009_v2 }
 0x91d   : > { %6649 = vmatpush.xpose.msk.msrb.mxu1 %vm10007_vm1, %v2005_v44  ;;  %v2062_v44 = vld [vmem:[%s10100_s26 + $0x640] sm:$0xff] }
 0x921   : > { %6650 = vmatpush.xpose.msk.msrb.mxu1 %vm10007_vm1, %v2004_v45  ;;  %v2061_v45 = vld [vmem:[%s10100_s26 + $0x638] sm:$0xff] }
 0x925   : > { %6651 = vmatpush.xpose.msk.msrb.mxu1 %vm10007_vm1, %v2003_v46  ;;  %v2060_v46 = vld [vmem:[%s10100_s26 + $0x630] sm:$0xff] }
 0x929   : > { %6652 = vmatpush.xpose.msk.msrb.mxu1 %vm10007_vm1, %v2002_v49  ;;  %v2059_v49 = vld [vmem:[%s10100_s26 + $0x628] sm:$0xff] }
 0x92d   : > { %6653 = vmatpush.xpose.msk.msrb.mxu1 %vm10007_vm1, %v2001_v55  ;;  %v2058_v55 = vld [vmem:[%s10100_s26 + $0x620] sm:$0xff] }
 0x931   : > { %6654 = vmatpush.xpose.msk.msrb.mxu1 %vm10007_vm1, %v2000_v56  ;;  %v1850_v56 = vld [vmem:[%s10104_s10 + $0x18] sm:$0xff] }
 0x932   : > { %2915 = vmatpush.msrb.mxu3 %v1850_v56  ;;  %v8565_v56 = vld [vmem:[%s10100_s26 + $0x1e8] sm:$0xff] }
 0x935   : > { %6655 = vmatpush.xpose.msk.msrb.mxu1 %vm10007_vm1, %v1999_v57  ;;  %v1849_v57 = vld [vmem:[%s10104_s10 + $0x10] sm:$0xff] }
 0x936   : > { %2916 = vmatpush.msrb.mxu3 %v1849_v57  ;;  %v8570_v57 = vld [vmem:[%s10100_s26 + $0x310] sm:$0xff] }
 0x939   : > { %6656 = vmatpush.xpose.msk.msrb.mxu1 %vm10007_vm1, %v1998_v58  ;;  %v1848_v58 = vld [vmem:[%s10104_s10 + $0x8] sm:$0xff] }
 0x93a   : > { %2917 = vmatpush.msrb.mxu3 %v1848_v58  ;;  %v8575_v58 = vld [vmem:[%s10100_s26 + $0x1e0] sm:$0xff] }
 0x93d   : > { %6657 = vmatpush.xpose.msk.msrb.mxu1 %vm10007_vm1, %v1997_v59  ;;  %v2057_v59 = vld [vmem:[%s10100_s26 + $0x618] sm:$0xff] }
 0x941   : > { %6658 = vmatpush.xpose.msk.msrb.mxu1 %vm10007_vm1, %v1996_v60  ;;  %v1847_v60 = vld [vmem:[%s10104_s10] sm:$0xff] }
 0x942   : > { %2918 = vmatpush.msrb.mxu3 %v1847_v60  ;;  %v8585_v60 = vld [vmem:[%s10100_s26 + $0x1d8] sm:$0xff] }
 0x945   : > { %6659 = vmatpush.xpose.msk.msrb.mxu1 %vm10007_vm1, %v1995_v61  ;;  %v8357_v61 = vld [vmem:[%s10100_s26 + $0x178] sm:$0xff] }
 0x946   : > { %6547 = vmatpush.xpose.msk.msra.mxu3 %vm10007_vm1, %v8357_v61 }
 0x949   : > { %6660 = vmatpush.xpose.msk.msrb.mxu1 %vm10007_vm1, %v1994_v62  ;;  %v2056_v62 = vld [vmem:[%s10100_s26 + $0x610] sm:$0xff] }
 0x94d   : > { %6661 = vmatpush.xpose.msk.msrb.mxu1 %vm10007_vm1, %v1993_v63  ;;  %v8364_v63 = vld [vmem:[%s10100_s26 + $0x170] sm:$0xff] }
 0x94e   : > { %6548 = vmatpush.xpose.msk.msra.mxu3 %vm10007_vm1, %v8364_v63 }
 0x951   : > { %6662 = vmatpush.xpose.msk.msrb.mxu1 %vm10007_vm1, %v1992_v0  ;;  %v2055_v0 = vld [vmem:[%s10100_s26 + $0x608] sm:$0xff] }
 0x955   : > { %6663 = vmatpush.xpose.msk.msrb.mxu1 %vm10007_vm1, %v1991_v1  ;;  %v8371_v1 = vld [vmem:[%s10100_s26 + $0x168] sm:$0xff] }
 0x956   : > { %6549 = vmatpush.xpose.msk.msra.mxu3 %vm10007_vm1, %v8371_v1 }
 0x959   : > { %6664 = vmatpush.xpose.msk.msrb.mxu1 %vm10007_vm1, %v1990_v3  ;;  %v2852_v14 = vpop.f32.mrf.mxu1  ;;  %v2054_v3 = vld [vmem:[%s10100_s26 + $0x600] sm:$0xff] }
 0x95a   : > { %v2876_v16 = vadd.f32 %v2875_v7, %v2852_v14  ;;  %v8393_v7 = vld [vmem:[%s10100_s26 + $0x150] sm:$0xff]  ;;  %v8521_v14 = vld [vmem:[%s10100_s26 + $0x340] sm:$0xff] }
 0x95c   : > { %6665 = vmatmul.msk.f32.vlgmr.msrb.gmra.mxu1 %vm10007_vm1, %v8009_v2  ;;  %v8326_v17 = vadd.f32 %v2876_v16, %v7747_v25  ;;  %v2064_v25 = vld [vmem:[%s10100_s26 + $0x650] sm:$0xff]  ;;  %v8526_v16 = vld [vmem:[%s10100_s26 + $0x338] sm:$0xff] }
 0x95d   : > { %6717 = vmatpush.xpose.msk.msra.mxu1 %vm10007_vm1, %v2069_v5  ;;  %v8378_v5 = vld [vmem:[%s10100_s26 + $0x160] sm:$0xff] }
 0x95e   : > { %10103 = vst [vmem:[#allocation58_spill] sm:$0xff] %v8326_v17  ;;  %v2879_v20 = vmul.f32 %v8326_v17, %v8326_v17  ;;  %6550 = vmatpush.xpose.msk.msra.mxu3 %vm10007_vm1, %v8378_v5 }
 0x960   : > { %v2880_v22 = vsel %vm10007_vm1, %v2879_v20, 0.0  ;;  %v1855_v20 = vld [vmem:[%s10106_s5 + $0x20] sm:$0xff] }
 0x961   : > { %6718 = vmatpush.xpose.msk.msra.mxu1 %vm10007_vm1, %v2068_v52  ;;  %2881 = vadd.xlane.f32.xlu2 %v2880_v22  ;;  %v8385_v52 = vld [vmem:[%s10100_s26 + $0x158] sm:$0xff]  ;;  %v8533_v22 = vld [vmem:[%s10100_s26 + $0x330] sm:$0xff] }
 0x962   : > { %6551 = vmatpush.xpose.msk.msra.mxu3 %vm10007_vm1, %v8385_v52 }
 0x965   : > { %6719 = vmatpush.xpose.msk.msra.mxu1 %vm10007_vm1, %v2067_v19  ;;  %v1856_v19 = vld [vmem:[%s10106_s5 + $0x28] sm:$0xff] }
 0x966   : > { %6552 = vmatpush.xpose.msk.msra.mxu3 %vm10007_vm1, %v8393_v7 }
 0x969   : > { %6720 = vmatpush.xpose.msk.msra.mxu1 %vm10007_vm1, %v2066_v54  ;;  %v1854_v54 = vld [vmem:[%s10106_s5 + $0x18] sm:$0xff] }
 0x96d   : > { %6721 = vmatpush.xpose.msk.msra.mxu1 %vm10007_vm1, %v2065_v47  ;;  %v1853_v47 = vld [vmem:[%s10106_s5 + $0x10] sm:$0xff] }
 0x971   : > { %6722 = vmatpush.xpose.msk.msra.mxu1 %vm10007_vm1, %v2064_v25  ;;  %v8540_v25 = vld [vmem:[%s10100_s26 + $0x328] sm:$0xff] }
 0x975   : > { %6723 = vmatpush.xpose.msk.msra.mxu1 %vm10007_vm1, %v2063_v28  ;;  %v1852_v28 = vld [vmem:[%s10106_s5 + $0x8] sm:$0xff] }
 0x979   : > { %6724 = vmatpush.xpose.msk.msra.mxu1 %vm10007_vm1, %v2062_v44  ;;  %v1851_v44 = vld [vmem:[%s10106_s5] sm:$0xff] }
 0x97d   : > { %6725 = vmatpush.xpose.msk.msra.mxu1 %vm10007_vm1, %v2061_v45  ;;  %v8545_v45 = vld [vmem:[%s10100_s26 + $0x1f8] sm:$0xff] }
 0x981   : > { %6726 = vmatpush.xpose.msk.msra.mxu1 %vm10007_vm1, %v2060_v46  ;;  %v8550_v46 = vld [vmem:[%s10100_s26 + $0x320] sm:$0xff] }
 0x985   : > { %6727 = vmatpush.xpose.msk.msra.mxu1 %vm10007_vm1, %v2059_v49  ;;  %v8555_v49 = vld [vmem:[%s10100_s26 + $0x1f0] sm:$0xff] }
 0x989   : > { %6728 = vmatpush.xpose.msk.msra.mxu1 %vm10007_vm1, %v2058_v55  ;;  %v8560_v55 = vld [vmem:[%s10100_s26 + $0x318] sm:$0xff] }
 0x98d   : > { %6729 = vmatpush.xpose.msk.msra.mxu1 %vm10007_vm1, %v2057_v59  ;;  %v8580_v59 = vld [vmem:[%s10100_s26 + $0x308] sm:$0xff] }
 0x991   : > { %6730 = vmatpush.xpose.msk.msra.mxu1 %vm10007_vm1, %v2056_v62  ;;  %v8590_v62 = vld [vmem:[%s10100_s26 + $0x300] sm:$0xff] }
 0x995   : > { %6731 = vmatpush.xpose.msk.msra.mxu1 %vm10007_vm1, %v2055_v0  ;;  %v8595_v0 = vld [vmem:[%s10100_s26 + $0x578] sm:$0xff] }
 0x996   : > { %10107 = vst [vmem:[#allocation59_spill] sm:$0xff] %v8595_v0 }
 0x999   : > { %6732 = vmatpush.xpose.msk.msra.mxu1 %vm10007_vm1, %v2054_v3  ;;  %v8598_v3 = vld [vmem:[%s10100_s26 + $0x1d0] sm:$0xff] }
 0x99c   : > { %6733 = vmatmul.msk.f32.vlgmr.msra.gmra.mxu1 %vm10007_vm1, %v8009_v2 }
 0x99d   : > { %4319 = vmatpush.msrb.mxu1 %v8086_v4  ;;  %v8400_v4 = vld [vmem:[%s10100_s26 + $0x148] sm:$0xff] }
 0x99e   : > { %6553 = vmatpush.xpose.msk.msra.mxu3 %vm10007_vm1, %v8400_v4 }
 0x99f   : > { %4320 = vmatpush.msrb.mxu1 %v8093_v48  ;;  %v8407_v48 = vld [vmem:[%s10100_s26 + $0x140] sm:$0xff] }
 0x9a1   : > { %4321 = vmatpush.msrb.mxu1 %v8099_v50  ;;  %v8414_v50 = vld [vmem:[%s10100_s26 + $0x138] sm:$0xff] }
 0x9a2   : > { %6554 = vmatpush.xpose.msk.msra.mxu3 %vm10007_vm1, %v8407_v48 }
 0x9a3   : > { %4322 = vmatpush.msrb.mxu1 %v8108_v51  ;;  %v8428_v51 = vld [vmem:[%s10100_s26 + $0x130] sm:$0xff] }
 0x9a5   : > { %4323 = vmatpush.msrb.mxu1 %v8115_v53  ;;  %v8435_v53 = vld [vmem:[%s10100_s26 + $0x128] sm:$0xff] }
 0x9a6   : > { %6555 = vmatpush.xpose.msk.msra.mxu3 %vm10007_vm1, %v8414_v50 }
 0x9a7   : > { %4324 = vmatpush.msrb.mxu1 %v8122_v6  ;;  %v8442_v6 = vld [vmem:[%s10100_s26 + $0x120] sm:$0xff] }
 0x9a9   : > { %4325 = vmatpush.msrb.mxu1 %v8129_v8  ;;  %v8449_v8 = vld [vmem:[%s10100_s26 + $0x118] sm:$0xff] }
 0x9aa   : > { %6556 = vmatpush.xpose.msk.msra.mxu3 %vm10007_vm1, %v8428_v51 }
 0x9ab   : > { %4326 = vmatpush.msrb.mxu1 %v8147_v9  ;;  %v8456_v9 = vld [vmem:[%s10100_s26 + $0x110] sm:$0xff] }
 0x9ad   : > { %4327 = vmatpush.msrb.mxu1 %v8154_v10  ;;  %v8463_v10 = vld [vmem:[%s10100_s26 + $0x108] sm:$0xff] }
 0x9ae   : > { %6557 = vmatpush.xpose.msk.msra.mxu3 %vm10007_vm1, %v8435_v53 }
 0x9af   : > { %4328 = vmatpush.msrb.mxu1 %v8160_v12  ;;  %v8470_v12 = vld [vmem:[%s10100_s26 + $0x100] sm:$0xff] }
 0x9b1   : > { %4329 = vmatpush.msrb.mxu1 %v8167_v15 }
 0x9b2   : > { %6558 = vmatpush.xpose.msk.msra.mxu3 %vm10007_vm1, %v8442_v6 }
 0x9b3   : > { %4330 = vmatpush.msrb.mxu1 %v8174_v18 }
 0x9b5   : > { %4331 = vmatpush.msrb.mxu1 %v8181_v21 }
 0x9b6   : > { %6559 = vmatpush.xpose.msk.msra.mxu3 %vm10007_vm1, %v8449_v8 }
 0x9b7   : > { %4332 = vmatpush.msrb.mxu1 %v8188_v23 }
 0x9b9   : > { %4333 = vmatpush.msrb.mxu1 %v8193_v24 }
 0x9ba   : > { %6560 = vmatpush.xpose.msk.msra.mxu3 %vm10007_vm1, %v8456_v9 }
 0x9bb   : > { %4334 = vmatpush.msrb.mxu1 %v8198_v26 }
 0x9bd   : > { %4399 = vmatpush.msra.mxu1 %v8203_v27 }
 0x9be   : > { %6561 = vmatpush.xpose.msk.msra.mxu3 %vm10007_vm1, %v8463_v10 }
 0x9bf   : > { %4400 = vmatpush.msra.mxu1 %v8209_v29 }
 0x9c1   : > { %4401 = vmatpush.msra.mxu1 %v8214_v30 }
 0x9c2   : > { %6562 = vmatpush.xpose.msk.msra.mxu3 %vm10007_vm1, %v8470_v12 }
 0x9c3   : > { %4402 = vmatpush.msra.mxu1 %v8221_v31  ;;  %v7007_v31 = vld [vmem:[%s10105_s3] ss:$0 sm:$0xff]  ;;  %s10149_s3 = sld [smem:[#allocation52_spill]] }
 0x9c5   : > { %4403 = vmatpush.msra.mxu1 %v8226_v32 }
 0x9c7   : > { %4404 = vmatpush.msra.mxu1 %v8231_v33 }
 0x9c9   : > { %4405 = vmatpush.msra.mxu1 %v8236_v11 }
 0x9cb   : > { %4406 = vmatpush.msra.mxu1 %v8241_v34  ;;  %v8481_v34 = vld [vmem:[%s10100_s26 + $0x378] sm:$0xff] }
 0x9cd   : > { %4407 = vmatpush.msra.mxu1 %v8246_v35  ;;  %v8487_v35 = vld [vmem:[%s10100_s26 + $0x370] sm:$0xff] }
 0x9cf   : > { %4408 = vmatpush.msra.mxu1 %v8251_v37  ;;  %v8492_v37 = vld [vmem:[%s10100_s26 + $0x368] sm:$0xff] }
 0x9d1   : > { %4409 = vmatpush.msra.mxu1 %v8256_v38  ;;  %v8499_v38 = vld [vmem:[%s10100_s26 + $0x360] sm:$0xff] }
 0x9d3   : > { %4410 = vmatpush.msra.mxu1 %v8261_v39  ;;  %v8504_v39 = vld [vmem:[%s10100_s26 + $0x358] sm:$0xff] }
 0x9d4   : > { %v2882_v15 = vpop.xlane.xlu2 %2881 }
 0x9d5   : > { %4411 = vmatpush.msra.mxu1 %v8266_v40  ;;  %v2883_v18 = vmul.f32 %v2882_v15, %v7703_v36  ;;  %v8509_v40 = vld [vmem:[%s10100_s26 + $0x350] sm:$0xff]  ;;  %v8724_v36 = vld [vmem:[%s10100_s26 + $0x508] sm:$0xff] }
 0x9d6   : > { %v8607_v15 = vld [vmem:[%s10100_s26 + $0x570] sm:$0xff]  ;;  %10121 = vst [vmem:[#allocation73_spill] sm:$0xff] %v8724_v36 }
 0x9d7   : > { %4412 = vmatpush.msra.mxu1 %v8271_v41  ;;  %v2884_v21 = vadd.f32 1e-06, %v2883_v18  ;;  %v8514_v41 = vld [vmem:[%s10100_s26 + $0x348] sm:$0xff]  ;;  %10108 = vst [vmem:[#allocation60_spill] sm:$0xff] %v8607_v15 }
 0x9d8   : > { %v8610_v18 = vld [vmem:[%s10100_s26 + $0x1c8] sm:$0xff] }
 0x9d9   : > { %4413 = vmatpush.msra.mxu1 %v8276_v42  ;;  %7045 = vrsqrt.f32 %v2884_v21  ;;  %vm2891_vm4 = vweird.f32 %v2884_v21  ;;  %v1858_v42 = vld [vmem:[%s10106_s5 + $0x38] sm:$0xff] }
 0x9da   : > { %2935 = vmatpush.msrb.mxu0 %v1858_v42  ;;  %v8672_v42 = vld [vmem:[%s10100_s26 + $0x198] sm:$0xff] }
 0x9db   : > { %4414 = vmatpush.msra.mxu1 %v8281_v43  ;;  %v1857_v43 = vld [vmem:[%s10106_s5 + $0x30] sm:$0xff] }
 0x9dc   : > { %2936 = vmatpush.msrb.mxu0 %v1857_v43  ;;  %v8679_v43 = vld [vmem:[%s10100_s26 + $0x538] sm:$0xff] }
 0x9dd   : > { %10115 = vst [vmem:[#allocation67_spill] sm:$0xff] %v8679_v43 }
 0x9de   : > { %2937 = vmatpush.msrb.mxu0 %v1856_v19  ;;  %v8682_v19 = vld [vmem:[%s10100_s26 + $0x190] sm:$0xff] }
 0x9df   : > { %v7046_v23 = vpop.eup %7045 }
 0x9e0   : > { %v2886_v24 = vmul.f32 %v7046_v23, %v2884_v21  ;;  %vm2892_vm3 = vweird.f32 %v7046_v23  ;;  %2938 = vmatpush.msrb.mxu0 %v1855_v20  ;;  %v8619_v21 = vld [vmem:[%s10100_s26 + $0x568] sm:$0xff]  ;;  %v8689_v20 = vld [vmem:[%s10100_s26 + $0x530] sm:$0xff] }
 0x9e1   : > { %vm2893_vm5 = vmor %vm2891_vm4, %vm2892_vm3  ;;  %10109 = vst [vmem:[#allocation61_spill] sm:$0xff] %v8619_v21 }
 0x9e2   : > { %v2887_v26 = vmul.f32 %v7046_v23, %v2886_v24  ;;  %2939 = vmatpush.msrb.mxu0 %v1854_v54  ;;  %v8629_v24 = vld [vmem:[%s10100_s26 + $0x560] sm:$0xff]  ;;  %10116 = vst [vmem:[#allocation68_spill] sm:$0xff] %v8689_v20  ;;  %v8692_v54 = vld [vmem:[%s10100_s26 + $0x188] sm:$0xff] }
 0x9e3   : > { %10110 = vst [vmem:[#allocation62_spill] sm:$0xff] %v8629_v24 }
 0x9e4   : > { %v2888_v27 = vmul.f32 0.5, %v2887_v26  ;;  %2940 = vmatpush.msrb.mxu0 %v1853_v47  ;;  %v8632_v26 = vld [vmem:[%s10100_s26 + $0x1b8] sm:$0xff]  ;;  %v8699_v47 = vld [vmem:[%s10100_s26 + $0x528] sm:$0xff] }
 0x9e5   : > { %10117 = vst [vmem:[#allocation69_spill] sm:$0xff] %v8699_v47 }
 0x9e6   : > { %v2889_v29 = vsub.f32 1.5, %v2888_v27  ;;  %2941 = vmatpush.msrb.mxu0 %v1852_v28  ;;  %v8639_v27 = vld [vmem:[%s10100_s26 + $0x558] sm:$0xff]  ;;  %v8702_v28 = vld [vmem:[%s10100_s26 + $0x180] sm:$0xff] }
 0x9e7   : > { %10111 = vst [vmem:[#allocation63_spill] sm:$0xff] %v8639_v27 }
 0x9e8   : > { %v2890_v30 = vmul.f32 %v7046_v23, %v2889_v29  ;;  %2942 = vmatpush.msrb.mxu0 %v1851_v44  ;;  %v8642_v29 = vld [vmem:[%s10100_s26 + $0x1b0] sm:$0xff]  ;;  %v8709_v44 = vld [vmem:[%s10100_s26 + $0x520] sm:$0xff] }
 0x9e9   : > { %10118 = vst [vmem:[#allocation70_spill] sm:$0xff] %v8709_v44 }
 0x9ea   : > { %v2894_v32 = vsel %vm2893_vm5, %v7046_v23, %v2890_v30  ;;  %6564 = vmatpush.xpose.msk.msra.mxu0 %vm10007_vm1, %v8545_v45  ;;  %v8622_v23 = vld [vmem:[%s10100_s26 + $0x1c0] sm:$0xff]  ;;  %v8649_v30 = vld [vmem:[%s10100_s26 + $0x550] sm:$0xff] }
 0x9eb   : > { %v2895_v33 = vmul.f32 %v2894_v32, %v8326_v17  ;;  %10112 = vst [vmem:[#allocation64_spill] sm:$0xff] %v8649_v30  ;;  %v8659_v32 = vld [vmem:[%s10100_s26 + $0x548] sm:$0xff]  ;;  %v8714_v17 = vld [vmem:[%s10100_s26 + $0x518] sm:$0xff] }
 0x9ec   : > { %10113 = vst [vmem:[#allocation65_spill] sm:$0xff] %v8659_v32 }
 0x9ed   : > { %v2899_v11 = vmul.f32 %v7007_v31, %v2895_v33  ;;  %v8652_v31 = vld [vmem:[%s10100_s26 + $0x1a8] sm:$0xff]  ;;  %v8662_v33 = vld [vmem:[%s10100_s26 + $0x1a0] sm:$0xff]  ;;  %10119 = vst [vmem:[#allocation71_spill] sm:$0xff] %v8714_v17 }
 0x9ee   : > { %6565 = vmatpush.xpose.msk.msra.mxu0 %vm10007_vm1, %v8555_v49 }
 0x9ef   : > { %6511 = vmatmul.msk.f32.vlgmr.msrb.gmra.mxu3 %vm10007_vm1, %v2899_v11  ;;  %v8669_v11 = vld [vmem:[%s10100_s26 + $0x540] sm:$0xff] }
 0x9f0   : > { %6615 = vmatpush.xpose.msk.msrb.mxu3 %vm10007_vm1, %v8481_v34  ;;  %10114 = vst [vmem:[#allocation66_spill] sm:$0xff] %v8669_v11 }
 0x9f2   : > { %6566 = vmatpush.xpose.msk.msra.mxu0 %vm10007_vm1, %v8565_v56 }
 0x9f4   : > { %6616 = vmatpush.xpose.msk.msrb.mxu3 %vm10007_vm1, %v8487_v35 }
 0x9f6   : > { %6567 = vmatpush.xpose.msk.msra.mxu0 %vm10007_vm1, %v8575_v58 }
 0x9f7   : > { %6563 = vmatmul.msk.f32.vlgmr.msra.gmra.mxu3 %vm10007_vm1, %v8009_v2 }
 0x9f8   : > { %6617 = vmatpush.xpose.msk.msrb.mxu3 %vm10007_vm1, %v8492_v37 }
 0x9fa   : > { %6568 = vmatpush.xpose.msk.msra.mxu0 %vm10007_vm1, %v8585_v60 }
 0x9fc   : > { %6618 = vmatpush.xpose.msk.msrb.mxu3 %vm10007_vm1, %v8499_v38 }
 0x9fe   : > { %6569 = vmatpush.xpose.msk.msra.mxu0 %vm10007_vm1, %v8598_v3 }
 0xa00   : > { %6619 = vmatpush.xpose.msk.msrb.mxu3 %vm10007_vm1, %v8504_v39 }
 0xa02   : > { %6570 = vmatpush.xpose.msk.msra.mxu0 %vm10007_vm1, %v8610_v18 }
 0xa04   : > { %6620 = vmatpush.xpose.msk.msrb.mxu3 %vm10007_vm1, %v8509_v40 }
 0xa06   : > { %6571 = vmatpush.xpose.msk.msra.mxu0 %vm10007_vm1, %v8622_v23 }
 0xa08   : > { %6621 = vmatpush.xpose.msk.msrb.mxu3 %vm10007_vm1, %v8514_v41 }
 0xa0a   : > { %6572 = vmatpush.xpose.msk.msra.mxu0 %vm10007_vm1, %v8632_v26 }
 0xa0c   : > { %6622 = vmatpush.xpose.msk.msrb.mxu3 %vm10007_vm1, %v8521_v14 }
 0xa0e   : > { %6573 = vmatpush.xpose.msk.msra.mxu0 %vm10007_vm1, %v8642_v29 }
 0xa10   : > { %6623 = vmatpush.xpose.msk.msrb.mxu3 %vm10007_vm1, %v8526_v16 }
 0xa12   : > { %6574 = vmatpush.xpose.msk.msra.mxu0 %vm10007_vm1, %v8652_v31 }
 0xa14   : > { %6624 = vmatpush.xpose.msk.msrb.mxu3 %vm10007_vm1, %v8533_v22 }
 0xa16   : > { %6575 = vmatpush.xpose.msk.msra.mxu0 %vm10007_vm1, %v8662_v33 }
 0xa18   : > { %6625 = vmatpush.xpose.msk.msrb.mxu3 %vm10007_vm1, %v8540_v25 }
 0xa1a   : > { %6576 = vmatpush.xpose.msk.msra.mxu0 %vm10007_vm1, %v8672_v42 }
 0xa1c   : > { %6626 = vmatpush.xpose.msk.msrb.mxu3 %vm10007_vm1, %v8550_v46 }
 0xa1e   : > { %6577 = vmatpush.xpose.msk.msra.mxu0 %vm10007_vm1, %v8682_v19 }
 0xa20   : > { %6627 = vmatpush.xpose.msk.msrb.mxu3 %vm10007_vm1, %v8560_v55 }
 0xa22   : > { %6578 = vmatpush.xpose.msk.msra.mxu0 %vm10007_vm1, %v8692_v54 }
 0xa24   : > { %6628 = vmatpush.xpose.msk.msrb.mxu3 %vm10007_vm1, %v8570_v57 }
 0xa26   : > { %6579 = vmatpush.xpose.msk.msra.mxu0 %vm10007_vm1, %v8702_v28 }
 0xa28   : > { %6629 = vmatpush.xpose.msk.msrb.mxu3 %vm10007_vm1, %v8580_v59 }
 0xa2c   : > { %6630 = vmatpush.xpose.msk.msrb.mxu3 %vm10007_vm1, %v8590_v62 }
 0xa2f   : > { %6631 = vmatmul.msk.f32.vlgmr.msrb.gmra.mxu3 %vm10007_vm1, %v8009_v2 }
 0xa30   : > { %6683 = vmatpush.xpose.msk.msra.mxu3 %vm10007_vm1, %v8595_v0  ;;  %v8867_v0 = vld [vmem:[%s10100_s26 + $0x708] sm:$0xff] }
 0xa31   : > { %10138 = vst [vmem:[#allocation90_spill] sm:$0xff] %v8867_v0 }
 0xa34   : > { %6684 = vmatpush.xpose.msk.msra.mxu3 %vm10007_vm1, %v8607_v15  ;;  %v8857_v15 = vld [vmem:[%s10100_s26 + $0x710] sm:$0xff] }
 0xa35   : > { %10137 = vst [vmem:[#allocation89_spill] sm:$0xff] %v8857_v15 }
 0xa38   : > { %6685 = vmatpush.xpose.msk.msra.mxu3 %vm10007_vm1, %v8619_v21  ;;  %v8847_v21 = vld [vmem:[%s10100_s26 + $0x718] sm:$0xff] }
 0xa39   : > { %10136 = vst [vmem:[#allocation88_spill] sm:$0xff] %v8847_v21 }
 0xa3c   : > { %6686 = vmatpush.xpose.msk.msra.mxu3 %vm10007_vm1, %v8629_v24  ;;  %v8837_v24 = vld [vmem:[%s10100_s26 + $0x720] sm:$0xff] }
 0xa3d   : > { %10134 = vst [vmem:[#allocation86_spill] sm:$0xff] %v8837_v24 }
 0xa40   : > { %6687 = vmatpush.xpose.msk.msra.mxu3 %vm10007_vm1, %v8639_v27  ;;  %v8827_v27 = vld [vmem:[%s10100_s26 + $0x728] sm:$0xff] }
 0xa41   : > { %10133 = vst [vmem:[#allocation85_spill] sm:$0xff] %v8827_v27 }
 0xa44   : > { %6688 = vmatpush.xpose.msk.msra.mxu3 %vm10007_vm1, %v8649_v30  ;;  %v8817_v30 = vld [vmem:[%s10100_s26 + $0x730] sm:$0xff] }
 0xa45   : > { %10132 = vst [vmem:[#allocation84_spill] sm:$0xff] %v8817_v30 }
 0xa48   : > { %6689 = vmatpush.xpose.msk.msra.mxu3 %vm10007_vm1, %v8659_v32  ;;  %v8807_v32 = vld [vmem:[%s10100_s26 + $0x738] sm:$0xff] }
 0xa49   : > { %10131 = vst [vmem:[#allocation83_spill] sm:$0xff] %v8807_v32 }
 0xa4c   : > { %6690 = vmatpush.xpose.msk.msra.mxu3 %vm10007_vm1, %v8669_v11  ;;  %v8797_v11 = vld [vmem:[%s10100_s26 + $0x740] sm:$0xff] }
 0xa4d   : > { %10130 = vst [vmem:[#allocation82_spill] sm:$0xff] %v8797_v11 }
 0xa50   : > { %6691 = vmatpush.xpose.msk.msra.mxu3 %vm10007_vm1, %v8679_v43  ;;  %v8787_v43 = vld [vmem:[%s10100_s26 + $0x748] sm:$0xff] }
 0xa51   : > { %10129 = vst [vmem:[#allocation81_spill] sm:$0xff] %v8787_v43 }
 0xa54   : > { %6692 = vmatpush.xpose.msk.msra.mxu3 %vm10007_vm1, %v8689_v20  ;;  %v8754_v20 = vld [vmem:[%s10100_s26 + $0x760] sm:$0xff] }
 0xa55   : > { %10126 = vst [vmem:[#allocation78_spill] sm:$0xff] %v8754_v20 }
 0xa58   : > { %6693 = vmatpush.xpose.msk.msra.mxu3 %vm10007_vm1, %v8699_v47  ;;  %v8729_v47 = vld [vmem:[%s10100_s26 + $0x500] sm:$0xff] }
 0xa59   : > { %10122 = vst [vmem:[#allocation74_spill] sm:$0xff] %v8729_v47 }
 0xa5c   : > { %6694 = vmatpush.xpose.msk.msra.mxu3 %vm10007_vm1, %v8709_v44  ;;  %v8732_v44 = vld [vmem:[%s10100_s26 + $0x778] sm:$0xff] }
 0xa5d   : > { %10123 = vst [vmem:[#allocation75_spill] sm:$0xff] %v8732_v44 }
 0xa60   : > { %6695 = vmatpush.xpose.msk.msra.mxu3 %vm10007_vm1, %v8714_v17  ;;  %v8739_v17 = vld [vmem:[%s10100_s26 + $0x770] sm:$0xff] }
 0xa61   : > { %10124 = vst [vmem:[#allocation76_spill] sm:$0xff] %v8739_v17 }
 0xa64   : > { %6696 = vmatpush.xpose.msk.msra.mxu3 %vm10007_vm1, %v8719_v13 }
 0xa68   : > { %6697 = vmatpush.xpose.msk.msra.mxu3 %vm10007_vm1, %v8724_v36  ;;  %v8746_v36 = vld [vmem:[%s10100_s26 + $0x768] sm:$0xff] }
 0xa69   : > { %10125 = vst [vmem:[#allocation77_spill] sm:$0xff] %v8746_v36 }
 0xa6c   : > { %6698 = vmatpush.xpose.msk.msra.mxu3 %vm10007_vm1, %v8729_v47 }
 0xa6f   : > { %6699 = vmatmul.msk.f32.vlgmr.msra.gmra.mxu3 %vm10007_vm1, %v8009_v2 }
 0xa70   : > { %6751 = vmatpush.xpose.msk.msrb.mxu3 %vm10007_vm1, %v8732_v44  ;;  %v8751_v44 = vld [vmem:[%s10100_s26 + $0x3f8] sm:$0xff] }
 0xa72   : > { %v2920_v13 = vpop.f32.mrf.mxu3 }
 0xa73   : > { %v2923_v47 = vmax.f32 %v2920_v13, 0.0  ;;  %v8772_v13 = vld [vmem:[%s10100_s26 + $0x3e8] sm:$0xff] }
 0xa74   : > { %6752 = vmatpush.xpose.msk.msrb.mxu3 %vm10007_vm1, %v8739_v17  ;;  %v8762_v17 = vld [vmem:[%s10100_s26 + $0x3f0] sm:$0xff] }
 0xa75   : > { %6512 = vmatmul.msk.f32.vlgmr.msrb.gmra.mxu0 %vm10004_vm14, %v2923_v47  ;;  %v8775_v47 = vld [vmem:[%s10100_s26 + $0x750] sm:$0xff] }
 0xa76   : > { %6632 = vmatpush.xpose.msk.msrb.mxu0 %vm10007_vm1, %v8751_v44  ;;  %10128 = vst [vmem:[#allocation80_spill] sm:$0xff] %v8775_v47 }
 0xa78   : > { %6753 = vmatpush.xpose.msk.msrb.mxu3 %vm10007_vm1, %v8746_v36  ;;  %v8765_v36 = vld [vmem:[%s10100_s26 + $0x758] sm:$0xff] }
 0xa79   : > { %10127 = vst [vmem:[#allocation79_spill] sm:$0xff] %v8765_v36 }
 0xa7a   : > { %6633 = vmatpush.xpose.msk.msrb.mxu0 %vm10007_vm1, %v8762_v17 }
 0xa7c   : > { %6754 = vmatpush.xpose.msk.msrb.mxu3 %vm10007_vm1, %v8754_v20  ;;  %v8784_v20 = vld [vmem:[%s10100_s26 + $0x3e0] sm:$0xff] }
 0xa7d   : > { %6580 = vmatmul.msk.f32.vlgmr.msra.gmra.mxu0 %vm10007_vm1, %v8009_v2 }
 0xa7e   : > { %6634 = vmatpush.xpose.msk.msrb.mxu0 %vm10007_vm1, %v8772_v13 }
 0xa80   : > { %6755 = vmatpush.xpose.msk.msrb.mxu3 %vm10007_vm1, %v8765_v36  ;;  %v8794_v36 = vld [vmem:[%s10100_s26 + $0x3d8] sm:$0xff] }
 0xa82   : > { %6635 = vmatpush.xpose.msk.msrb.mxu0 %vm10007_vm1, %v8784_v20 }
 0xa84   : > { %6756 = vmatpush.xpose.msk.msrb.mxu3 %vm10007_vm1, %v8775_v47  ;;  %v8804_v47 = vld [vmem:[%s10100_s26 + $0x3d0] sm:$0xff] }
 0xa86   : > { %6636 = vmatpush.xpose.msk.msrb.mxu0 %vm10007_vm1, %v8794_v36 }
 0xa88   : > { %6757 = vmatpush.xpose.msk.msrb.mxu3 %vm10007_vm1, %v8787_v43  ;;  %v8814_v43 = vld [vmem:[%s10100_s26 + $0x3c8] sm:$0xff] }
 0xa8a   : > { %6637 = vmatpush.xpose.msk.msrb.mxu0 %vm10007_vm1, %v8804_v47 }
 0xa8c   : > { %6758 = vmatpush.xpose.msk.msrb.mxu3 %vm10007_vm1, %v8797_v11  ;;  %v8824_v11 = vld [vmem:[%s10100_s26 + $0x3c0] sm:$0xff] }
 0xa8e   : > { %6638 = vmatpush.xpose.msk.msrb.mxu0 %vm10007_vm1, %v8814_v43 }
 0xa90   : > { %6759 = vmatpush.xpose.msk.msrb.mxu3 %vm10007_vm1, %v8807_v32  ;;  %v8834_v32 = vld [vmem:[%s10100_s26 + $0x3b8] sm:$0xff] }
 0xa92   : > { %6639 = vmatpush.xpose.msk.msrb.mxu0 %vm10007_vm1, %v8824_v11 }
 0xa94   : > { %6760 = vmatpush.xpose.msk.msrb.mxu3 %vm10007_vm1, %v8817_v30  ;;  %v8844_v30 = vld [vmem:[%s10100_s26 + $0x3b0] sm:$0xff] }
 0xa95   : > { %10135 = vst [vmem:[#allocation87_spill] sm:$0xff] %v8844_v30 }
 0xa96   : > { %6640 = vmatpush.xpose.msk.msrb.mxu0 %vm10007_vm1, %v8834_v32 }
 0xa98   : > { %6761 = vmatpush.xpose.msk.msrb.mxu3 %vm10007_vm1, %v8827_v27  ;;  %v8854_v27 = vld [vmem:[%s10100_s26 + $0x3a8] sm:$0xff] }
 0xa9a   : > { %6641 = vmatpush.xpose.msk.msrb.mxu0 %vm10007_vm1, %v8844_v30  ;;  %v8877_v30 = vld [vmem:[%s10100_s26 + $0x700] sm:$0xff] }
 0xa9b   : > { %10139 = vst [vmem:[#allocation91_spill] sm:$0xff] %v8877_v30 }
 0xa9c   : > { %6762 = vmatpush.xpose.msk.msrb.mxu3 %vm10007_vm1, %v8837_v24  ;;  %v8864_v24 = vld [vmem:[%s10100_s26 + $0x3a0] sm:$0xff] }
 0xa9e   : > { %6642 = vmatpush.xpose.msk.msrb.mxu0 %vm10007_vm1, %v8854_v27 }
 0xaa0   : > { %6763 = vmatpush.xpose.msk.msrb.mxu3 %vm10007_vm1, %v8847_v21  ;;  %v8874_v21 = vld [vmem:[%s10100_s26 + $0x398] sm:$0xff] }
 0xaa2   : > { %6643 = vmatpush.xpose.msk.msrb.mxu0 %vm10007_vm1, %v8864_v24 }
 0xaa4   : > { %6764 = vmatpush.xpose.msk.msrb.mxu3 %vm10007_vm1, %v8857_v15  ;;  %v8884_v15 = vld [vmem:[%s10100_s26 + $0x390] sm:$0xff] }
 0xaa6   : > { %6644 = vmatpush.xpose.msk.msrb.mxu0 %vm10007_vm1, %v8874_v21 }
 0xaa8   : > { %6765 = vmatpush.xpose.msk.msrb.mxu3 %vm10007_vm1, %v8867_v0  ;;  %v8893_v0 = vld [vmem:[%s10100_s26 + $0x388] sm:$0xff] }
 0xaaa   : > { %6645 = vmatpush.xpose.msk.msrb.mxu0 %vm10007_vm1, %v8884_v15 }
 0xaac   : > { %6766 = vmatpush.xpose.msk.msrb.mxu3 %vm10007_vm1, %v8877_v30  ;;  %v8903_v30 = vld [vmem:[%s10100_s26 + $0x5f8] sm:$0xff] }
 0xaae   : > { %6646 = vmatpush.xpose.msk.msrb.mxu0 %vm10007_vm1, %v8893_v0 }
 0xaaf   : > { %6767 = vmatmul.msk.f32.vlgmr.msrb.gmra.mxu3 %vm10007_vm1, %v8009_v2 }
 0xab0   : > { %4359 = vmatpush.msra.mxu3 %v8357_v61  ;;  %v8900_v61 = vld [vmem:[%s10100_s26 + $0x380] sm:$0xff] }
 0xab2   : > { %4360 = vmatpush.msra.mxu3 %v8364_v63  ;;  %6647 = vmatpush.xpose.msk.msrb.mxu0 %vm10007_vm1, %v8900_v61  ;;  %v8912_v63 = vld [vmem:[%s10100_s26 + $0x5f0] sm:$0xff] }
 0xab4   : > { %4361 = vmatpush.msra.mxu3 %v8371_v1  ;;  %v8921_v1 = vld [vmem:[%s10100_s26 + $0x5e8] sm:$0xff] }
 0xab5   : > { %6648 = vmatmul.msk.f32.vlgmr.msrb.gmra.mxu0 %vm10007_vm1, %v8009_v2 }
 0xab6   : > { %4362 = vmatpush.msra.mxu3 %v8378_v5  ;;  %6700 = vmatpush.xpose.msk.msra.mxu0 %vm10007_vm1, %v8903_v30  ;;  %v8928_v5 = vld [vmem:[%s10100_s26 + $0x5e0] sm:$0xff] }
 0xab8   : > { %4363 = vmatpush.msra.mxu3 %v8385_v52  ;;  %v8935_v52 = vld [vmem:[%s10100_s26 + $0x5d8] sm:$0xff] }
 0xaba   : > { %4364 = vmatpush.msra.mxu3 %v8393_v7  ;;  %6701 = vmatpush.xpose.msk.msra.mxu0 %vm10007_vm1, %v8912_v63  ;;  %v8942_v7 = vld [vmem:[%s10100_s26 + $0x5d0] sm:$0xff] }
 0xabc   : > { %4365 = vmatpush.msra.mxu3 %v8400_v4  ;;  %v8950_v4 = vld [vmem:[%s10100_s26 + $0x5c8] sm:$0xff] }
 0xabe   : > { %4366 = vmatpush.msra.mxu3 %v8407_v48  ;;  %6702 = vmatpush.xpose.msk.msra.mxu0 %vm10007_vm1, %v8921_v1  ;;  %v8957_v48 = vld [vmem:[%s10100_s26 + $0x5c0] sm:$0xff] }
 0xac0   : > { %4367 = vmatpush.msra.mxu3 %v8414_v50  ;;  %v8964_v50 = vld [vmem:[%s10100_s26 + $0x5b8] sm:$0xff] }
 0xac2   : > { %4368 = vmatpush.msra.mxu3 %v8428_v51  ;;  %6703 = vmatpush.xpose.msk.msra.mxu0 %vm10007_vm1, %v8928_v5  ;;  %v8971_v51 = vld [vmem:[%s10100_s26 + $0x5b0] sm:$0xff] }
 0xac4   : > { %4369 = vmatpush.msra.mxu3 %v8435_v53  ;;  %v8978_v53 = vld [vmem:[%s10100_s26 + $0x5a8] sm:$0xff] }
 0xac6   : > { %4370 = vmatpush.msra.mxu3 %v8442_v6  ;;  %6704 = vmatpush.xpose.msk.msra.mxu0 %vm10007_vm1, %v8935_v52  ;;  %v8985_v6 = vld [vmem:[%s10100_s26 + $0x5a0] sm:$0xff] }
 0xac8   : > { %4371 = vmatpush.msra.mxu3 %v8449_v8  ;;  %v8992_v8 = vld [vmem:[%s10100_s26 + $0x598] sm:$0xff] }
 0xaca   : > { %4372 = vmatpush.msra.mxu3 %v8456_v9  ;;  %6705 = vmatpush.xpose.msk.msra.mxu0 %vm10007_vm1, %v8942_v7  ;;  %v8999_v9 = vld [vmem:[%s10100_s26 + $0x590] sm:$0xff] }
 0xacc   : > { %4373 = vmatpush.msra.mxu3 %v8463_v10  ;;  %v9005_v10 = vld [vmem:[%s10100_s26 + $0x588] sm:$0xff] }
 0xace   : > { %4374 = vmatpush.msra.mxu3 %v8470_v12  ;;  %6706 = vmatpush.xpose.msk.msra.mxu0 %vm10007_vm1, %v8950_v4  ;;  %v9010_v12 = vld [vmem:[%s10100_s26 + $0x580] sm:$0xff] }
 0xad0   : > { %4439 = vmatpush.msrb.mxu3 %v8481_v34  ;;  %v9013_v34 = vld [vmem:[%s10100_s26 + $0x7f8] sm:$0xff] }
 0xad2   : > { %4440 = vmatpush.msrb.mxu3 %v8487_v35  ;;  %6707 = vmatpush.xpose.msk.msra.mxu0 %vm10007_vm1, %v8957_v48  ;;  %v9020_v35 = vld [vmem:[%s10100_s26 + $0x7f0] sm:$0xff] }
 0xad4   : > { %4441 = vmatpush.msrb.mxu3 %v8492_v37  ;;  %v9027_v37 = vld [vmem:[%s10100_s26 + $0x7e8] sm:$0xff] }
 0xad6   : > { %4442 = vmatpush.msrb.mxu3 %v8499_v38  ;;  %6708 = vmatpush.xpose.msk.msra.mxu0 %vm10007_vm1, %v8964_v50  ;;  %v9032_v38 = vld [vmem:[%s10100_s26 + $0x7e0] sm:$0xff] }
 0xad8   : > { %4443 = vmatpush.msrb.mxu3 %v8504_v39  ;;  %v9037_v39 = vld [vmem:[%s10100_s26 + $0x7d8] sm:$0xff] }
 0xada   : > { %4444 = vmatpush.msrb.mxu3 %v8509_v40  ;;  %6709 = vmatpush.xpose.msk.msra.mxu0 %vm10007_vm1, %v8971_v51  ;;  %v9042_v40 = vld [vmem:[%s10100_s26 + $0x7d0] sm:$0xff] }
 0xadc   : > { %4445 = vmatpush.msrb.mxu3 %v8514_v41  ;;  %v9047_v41 = vld [vmem:[%s10100_s26 + $0x7c8] sm:$0xff] }
 0xade   : > { %4446 = vmatpush.msrb.mxu3 %v8521_v14  ;;  %6710 = vmatpush.xpose.msk.msra.mxu0 %vm10007_vm1, %v8978_v53  ;;  %v9052_v14 = vld [vmem:[%s10100_s26 + $0x7c0] sm:$0xff] }
 0xae0   : > { %4447 = vmatpush.msrb.mxu3 %v8526_v16  ;;  %v9057_v16 = vld [vmem:[%s10100_s26 + $0x7b8] sm:$0xff] }
 0xae1   : > { %10140 = vst [vmem:[#allocation92_spill] sm:$0xff] %v9057_v16 }
 0xae2   : > { %4448 = vmatpush.msrb.mxu3 %v8533_v22  ;;  %6711 = vmatpush.xpose.msk.msra.mxu0 %vm10007_vm1, %v8985_v6  ;;  %v9062_v22 = vld [vmem:[%s10100_s26 + $0x7b0] sm:$0xff] }
 0xae3   : > { %10141 = vst [vmem:[#allocation93_spill] sm:$0xff] %v9062_v22 }
 0xae4   : > { %4449 = vmatpush.msrb.mxu3 %v8540_v25  ;;  %v9067_v25 = vld [vmem:[%s10100_s26 + $0x7a8] sm:$0xff] }
 0xae5   : > { %10142 = vst [vmem:[#allocation94_spill] sm:$0xff] %v9067_v25 }
 0xae6   : > { %4450 = vmatpush.msrb.mxu3 %v8550_v46  ;;  %6712 = vmatpush.xpose.msk.msra.mxu0 %vm10007_vm1, %v8992_v8  ;;  %v9072_v46 = vld [vmem:[%s10100_s26 + $0x7a0] sm:$0xff] }
 0xae7   : > { %10143 = vst [vmem:[#allocation95_spill] sm:$0xff] %v9072_v46 }
 0xae8   : > { %4451 = vmatpush.msrb.mxu3 %v8560_v55  ;;  %v9077_v55 = vld [vmem:[%s10100_s26 + $0x798] sm:$0xff] }
 0xae9   : > { %10144 = vst [vmem:[#allocation96_spill] sm:$0xff] %v9077_v55 }
 0xaea   : > { %4452 = vmatpush.msrb.mxu3 %v8570_v57  ;;  %6713 = vmatpush.xpose.msk.msra.mxu0 %vm10007_vm1, %v8999_v9  ;;  %v9082_v57 = vld [vmem:[%s10100_s26 + $0x790] sm:$0xff] }
 0xaeb   : > { %10145 = vst [vmem:[#allocation97_spill] sm:$0xff] %v9082_v57 }
 0xaec   : > { %4453 = vmatpush.msrb.mxu3 %v8580_v59  ;;  %v9087_v59 = vld [vmem:[%s10100_s26 + $0x788] sm:$0xff] }
 0xaed   : > { %10146 = vst [vmem:[#allocation98_spill] sm:$0xff] %v9087_v59 }
 0xaee   : > { %4454 = vmatpush.msrb.mxu3 %v8590_v62  ;;  %6714 = vmatpush.xpose.msk.msra.mxu0 %vm10007_vm1, %v9005_v10  ;;  %v9092_v62 = vld [vmem:[%s10100_s26 + $0x780] sm:$0xff] }
 0xaef   : > { %10147 = vst [vmem:[#allocation99_spill] sm:$0xff] %v9092_v62 }
 0xaf2   : > { %6715 = vmatpush.xpose.msk.msra.mxu0 %vm10007_vm1, %v9010_v12 }
 0xaf5   : > { %6716 = vmatmul.msk.f32.vlgmr.msra.gmra.mxu0 %vm10007_vm1, %v8009_v2 }
 0xaf6   : > { %6768 = vmatpush.xpose.msk.msrb.mxu0 %vm10007_vm1, %v9013_v34 }
 0xafa   : > { %6769 = vmatpush.xpose.msk.msrb.mxu0 %vm10007_vm1, %v9020_v35 }
 0xafe   : > { %6770 = vmatpush.xpose.msk.msrb.mxu0 %vm10007_vm1, %v9027_v37 }
 0xb02   : > { %6771 = vmatpush.xpose.msk.msrb.mxu0 %vm10007_vm1, %v9032_v38 }
 0xb06   : > { %6772 = vmatpush.xpose.msk.msrb.mxu0 %vm10007_vm1, %v9037_v39 }
 0xb0a   : > { %6773 = vmatpush.xpose.msk.msrb.mxu0 %vm10007_vm1, %v9042_v40 }
 0xb0e   : > { %6774 = vmatpush.xpose.msk.msrb.mxu0 %vm10007_vm1, %v9047_v41 }
 0xb12   : > { %6775 = vmatpush.xpose.msk.msrb.mxu0 %vm10007_vm1, %v9052_v14 }
 0xb16   : > { %6776 = vmatpush.xpose.msk.msrb.mxu0 %vm10007_vm1, %v9057_v16 }
 0xb1a   : > { %6777 = vmatpush.xpose.msk.msrb.mxu0 %vm10007_vm1, %v9062_v22 }
 0xb1e   : > { %6778 = vmatpush.xpose.msk.msrb.mxu0 %vm10007_vm1, %v9067_v25 }
 0xb22   : > { %6779 = vmatpush.xpose.msk.msrb.mxu0 %vm10007_vm1, %v9072_v46 }
 0xb26   : > { %6780 = vmatpush.xpose.msk.msrb.mxu0 %vm10007_vm1, %v9077_v55 }
 0xb2a   : > { %6781 = vmatpush.xpose.msk.msrb.mxu0 %vm10007_vm1, %v9082_v57 }
 0xb2e   : > { %6782 = vmatpush.xpose.msk.msrb.mxu0 %vm10007_vm1, %v9087_v59 }
 0xb32   : > { %6783 = vmatpush.xpose.msk.msrb.mxu0 %vm10007_vm1, %v9092_v62 }
 0xb35   : > { %6784 = vmatmul.msk.f32.vlgmr.msrb.gmra.mxu0 %vm10007_vm1, %v8009_v2 }
 0xb36   : > { %4379 = vmatpush.msra.mxu0 %v8545_v45  ;;  %v10148_v45 = vld [vmem:[#allocation87_spill] sm:$0xff] }
 0xb38   : > { %4380 = vmatpush.msra.mxu0 %v8555_v49  ;;  %v9130_v49 = vpop.f32.mrf.mxu0 }
 0xb39   : > { %10150 = vst [vmem:[#allocation87_spill] sm:$0xff] %v9130_v49 }
 0xb3a   : > { %4381 = vmatpush.msra.mxu0 %v8565_v56  ;;  %v3816_v56 = vpop.f32.mrf.mxu3 }
 0xb3b   : > { %v4081_v62 = vmul.f32 2.0, %v3816_v56 }
 0xb3c   : > { %4382 = vmatpush.msra.mxu0 %v8575_v58 }
 0xb3e   : > { %4383 = vmatpush.msra.mxu0 %v8585_v60 }
 0xb40   : > { %4384 = vmatpush.msra.mxu0 %v8598_v3  ;;  %v3836_v3 = vpop.f32.mrf.mxu0 }
 0xb42   : > { %4385 = vmatpush.msra.mxu0 %v8610_v18  ;;  %v3896_v18 = vpop.f32.mrf.mxu3 }
 0xb44   : > { %4386 = vmatpush.msra.mxu0 %v8622_v23 }
 0xb46   : > { %4387 = vmatpush.msra.mxu0 %v8632_v26 }
 0xb48   : > { %4388 = vmatpush.msra.mxu0 %v8642_v29  ;;  %v9136_v29 = vld [vmem:[%s10149_s3 + $0x8] sm:$0xff] }
 0xb4a   : > { %4389 = vmatpush.msra.mxu0 %v8652_v31  ;;  %v3976_v31 = vpop.f32.mrf.mxu3 }
 0xb4c   : > { %4390 = vmatpush.msra.mxu0 %v8662_v33 }
 0xb4e   : > { %4391 = vmatpush.msra.mxu0 %v8672_v42 }
 0xb50   : > { %4392 = vmatpush.msra.mxu0 %v8682_v19 }
 0xb52   : > { %4393 = vmatpush.msra.mxu0 %v8692_v54  ;;  %v4122_v54 = vperm.slane %v9136_v29, 1  ;;  %v4056_v59 = vpop.f32.mrf.mxu3 }
 0xb54   : > { %4394 = vmatpush.msra.mxu0 %v8702_v28 }
 0xb56   : > { %4459 = vmatpush.msrb.mxu0 %v8751_v44 }
 0xb58   : > { %4460 = vmatpush.msrb.mxu0 %v8762_v17  ;;  %v3776_v17 = vpop.f32.mrf.mxu1 }
 0xb5a   : > { %4461 = vmatpush.msrb.mxu0 %v8772_v13  ;;  %v4079_v13 = vmul.f32 2.0, %v3776_v17 }
 0xb5c   : > { %4462 = vmatpush.msrb.mxu0 %v8784_v20 }
 0xb5e   : > { %4463 = vmatpush.msrb.mxu0 %v8794_v36  ;;  %v3796_v36 = vpop.f32.mrf.mxu2 }
 0xb60   : > { %4464 = vmatpush.msrb.mxu0 %v8804_v47  ;;  %v3856_v58 = vpop.f32.mrf.mxu1 }
 0xb61   : > { %v4083_v33 = vmul.f32 2.0, %v3856_v58 }
 0xb62   : > { %4465 = vmatpush.msrb.mxu0 %v8814_v43 }
 0xb64   : > { %4466 = vmatpush.msrb.mxu0 %v8824_v11 }
 0xb66   : > { %4467 = vmatpush.msrb.mxu0 %v8834_v32  ;;  %v3876_v60 = vpop.f32.mrf.mxu2  ;;  %v9138_v32 = vpop.xlane.xlu1 %2986 }
 0xb67   : > { %v4084_v26 = vmul.f32 2.0, %v3876_v60  ;;  %v4099_v47 = vsub.f32 %v9138_v32, %v4083_v33  ;;  %v4095_v2 = vsub.f32 %v9138_v32, %v4079_v13  ;;  %v4089_v33 = vmul.f32 2.0, %v3976_v31 }
 0xb68   : > { %4468 = vmatpush.msrb.mxu0 %v10148_v45  ;;  %v3936_v23 = vpop.f32.mrf.mxu1  ;;  %v4123_v13 = vperm.slane %v9136_v29, 2 }
 0xb69   : > { %v4100_v43 = vsub.f32 %v9138_v32, %v4084_v26  ;;  %v4087_v58 = vmul.f32 2.0, %v3936_v23 }
 0xb6a   : > { %4469 = vmatpush.msrb.mxu0 %v8854_v27  ;;  %v9133_v27 = vld [vmem:[%s10149_s3] sm:$0xff]  ;;  %s10153_s3 = sld [smem:[#allocation11_spill]] }
 0xb6b   : > { %v4114_v42 = vperm.slane %v9133_v27, 1  ;;  %v4118_v19 = vperm.slane %v9133_v27, 5  ;;  %v4113_v17 = vperm.slane %v9133_v27, 0  ;;  %v4120_v31 = vperm.slane %v9133_v27, 7 }
 0xb6c   : > { %4470 = vmatpush.msrb.mxu0 %v8864_v24 }
 0xb6e   : > { %4471 = vmatpush.msrb.mxu0 %v8874_v21  ;;  %v3956_v24 = vpop.f32.mrf.mxu2  ;;  %v4080_v21 = vmul.f32 2.0, %v3796_v36  ;;  %v9150_v36 = vadd.f32 %v4118_v19, %v4100_v43  ;;  %v4103_v43 = vsub.f32 %v9138_v32, %v4087_v58 }
 0xb70   : > { %4472 = vmatpush.msrb.mxu0 %v8884_v15  ;;  %v3916_v15 = vpop.f32.mrf.mxu0  ;;  %v4096_v11 = vsub.f32 %v9138_v32, %v4080_v21  ;;  %v4016_v28 = vpop.f32.mrf.mxu1  ;;  %s1598_s5 = scalar_lea.vmem %s10153_s3, %s7672_s15  ;;  %s10201_s3 = sld [smem:[#allocation30_spill]] }
 0xb71   : > { %v4091_v60 = vmul.f32 2.0, %v4016_v28  ;;  %v4086_v49 = vmul.f32 2.0, %v3916_v15  ;;  %v4119_v15 = vperm.slane %v9133_v27, 6  ;;  %v4097_v28 = vsub.f32 %v9138_v32, %v4081_v62 }
 0xb72   : > { %4473 = vmatpush.msrb.mxu0 %v8893_v0  ;;  %v4088_v0 = vmul.f32 2.0, %v3956_v24  ;;  %v9148_v45 = vadd.f32 %v4114_v42, %v4096_v11  ;;  %v4121_v11 = vperm.slane %v9136_v29, 0  ;;  %v4082_v42 = vmul.f32 2.0, %v3836_v3 }
 0xb73   : > { %v4107_v19 = vsub.f32 %v9138_v32, %v4091_v60  ;;  %v4102_v56 = vsub.f32 %v9138_v32, %v4086_v49  ;;  %v4115_v3 = vperm.slane %v9133_v27, 2  ;;  %v4126_v60 = vperm.slane %v9136_v29, 5 }
 0xb74   : > { %4474 = vmatpush.msrb.mxu0 %v8900_v61  ;;  %v4104_v20 = vsub.f32 %v9138_v32, %v4088_v0  ;;  %v4117_v61 = vperm.slane %v9133_v27, 4  ;;  %v4085_v0 = vmul.f32 2.0, %v3896_v18  ;;  %v4125_v18 = vperm.slane %v9136_v29, 4 }
 0xb75   : > { %v9178_v62 = vadd.f32 %v4121_v11, %v4103_v43  ;;  %v9184_v55 = vadd.f32 %v4120_v31, %v4102_v56 }
 0xb76   : > { %v4036_v44 = vpop.f32.mrf.mxu2  ;;  %v9152_v21 = vadd.f32 %v4122_v54, %v4104_v20  ;;  %v9156_v57 = vadd.f32 %v4117_v61, %v4099_v47  ;;  %v4101_v20 = vsub.f32 %v9138_v32, %v4085_v0  ;;  %v4093_v54 = vmul.f32 2.0, %v4056_v59 }
 0xb77   : > { %v4092_v26 = vmul.f32 2.0, %v4036_v44  ;;  %v4105_v44 = vsub.f32 %v9138_v32, %v4089_v33  ;;  %v4098_v47 = vsub.f32 %v9138_v32, %v4082_v42  ;;  %v4116_v61 = vperm.slane %v9133_v27, 3 }
 0xb78   : > { %v3996_v24 = vpop.f32.mrf.mxu0  ;;  %v4124_v59 = vperm.slane %v9136_v29, 3  ;;  %v9180_v0 = vadd.f32 %v4119_v15, %v4101_v20  ;;  %v4109_v33 = vsub.f32 %v9138_v32, %v4093_v54  ;;  %v4127_v42 = vperm.slane %v9136_v29, 6 }
 0xb79   : > { %v4090_v23 = vmul.f32 2.0, %v3996_v24  ;;  %v4108_v49 = vsub.f32 %v9138_v32, %v4092_v26  ;;  %v9176_v24 = vadd.f32 %v4113_v17, %v4095_v2  ;;  %v9190_v26 = vadd.f32 %v4115_v3, %v4097_v28 }
 0xb7a   : > { %v9192_v46 = vadd.f32 %v4123_v13, %v4105_v44  ;;  %v4148_v17 = vadd.f32 %v4116_v61, %v4098_v47  ;;  %v4128_v15 = vperm.slane %v9136_v29, 7  ;;  %v4162_v20 = vmin.f32 %v9148_v45, %v9150_v36 }
 0xb7b   : > { %v4106_v58 = vsub.f32 %v9138_v32, %v4090_v23  ;;  %v4161_v27 = vmin.f32 %v9176_v24, %v9156_v57  ;;  %v9188_v23 = vadd.f32 %v4125_v18, %v4107_v19  ;;  %v9199_v54 = vadd.f32 %v4126_v60, %v4108_v49 }
 0xb7c   : > { %v4163_v19 = vmin.f32 %v9190_v26, %v9180_v0  ;;  %v9204_v18 = vadd.f32 %v4127_v42, %v4109_v33  ;;  %v4164_v31 = vmin.f32 %v4148_v17, %v9184_v55  ;;  %v4166_v3 = vmin.f32 %v4162_v20, %v9152_v21 }
 0xb7d   : > { %v9194_v11 = vadd.f32 %v4124_v59, %v4106_v58  ;;  %v4165_v56 = vmin.f32 %v4161_v27, %v9178_v62  ;;  %v4178_v42 = vlaneseq }
 0xb7e   : > { %v4167_v29 = vmin.f32 %v4163_v19, %v9192_v46  ;;  %v4170_v61 = vmin.f32 %v4166_v3, %v9199_v54 }
 0xb7f   : > { %v4168_v44 = vmin.f32 %v4164_v31, %v9194_v11  ;;  %v4169_v47 = vmin.f32 %v4165_v56, %v9188_v23 }
 0xb80   : > { %v4171_v58 = vmin.f32 %v4167_v29, %v9204_v18 }
 0xb81   : > { %v4173_v49 = vmin.f32 %v4169_v47, %v4170_v61 }
 0xbb2   : > { %v4076_v2 = vpop.f32.mrf.mxu0 }
 0xbb3   : > { %v4094_v43 = vmul.f32 2.0, %v4076_v2 }
 0xbb5   : > { %v4110_v28 = vsub.f32 %v9138_v32, %v4094_v43  ;;  %v9214_v32 = vand.u32 127, %v4178_v42 }
 0xbb7   : > { %v4160_v13 = vadd.f32 %v4128_v15, %v4110_v28  ;;  %v9217_v27 = vadd.s32 128, %v9214_v32  ;;  %v9220_v2 = vadd.s32 256, %v9214_v32  ;;  %v9223_v43 = vadd.s32 384, %v9214_v32 }
 0xbb8   : > { %v9226_v15 = vadd.s32 512, %v9214_v32  ;;  %v9229_v20 = vadd.s32 640, %v9214_v32  ;;  %v9232_v56 = vadd.s32 768, %v9214_v32  ;;  %v9235_v19 = vadd.s32 896, %v9214_v32 }
 0xbb9   : > { %v4172_v59 = vmin.f32 %v4168_v44, %v4160_v13  ;;  %v9238_v31 = vadd.s32 1024, %v9214_v32  ;;  %v9241_v28 = vadd.s32 1152, %v9214_v32  ;;  %v9244_v3 = vadd.s32 1280, %v9214_v32 }
 0xbba   : > { %v9247_v29 = vadd.s32 1408, %v9214_v32  ;;  %v9250_v47 = vadd.s32 1536, %v9214_v32  ;;  %v9253_v61 = vadd.s32 1664, %v9214_v32 }
 0xbbb   : > { %v4174_v60 = vmin.f32 %v4171_v58, %v4172_v59  ;;  %v9256_v58 = vadd.s32 1792, %v9214_v32  ;;  %v9259_v59 = vadd.s32 1920, %v9214_v32 }
 0xbbc   : > { %10151 = vst [vmem:[#allocation100_spill] sm:$0xff] %v9250_v47 }
 0xbbd   : > { %v4175_v33 = vmin.f32 %v4173_v49, %v4174_v60  ;;  %10152 = vst [vmem:[#allocation101_spill] sm:$0xff] %v9253_v61 }
 0xbbf   : > { %4176 = vmin.xlane.f32.xlu2 %v4175_v33 }
 0xc32   : > { %v4177_v44 = vpop.xlane.xlu2 %4176 }
 0xc33   : > { %vm4195_vm8 = vcmp.le.f32.partialorder %v9176_v24, %v4177_v44  ;;  %vm4196_vm9 = vcmp.le.f32.partialorder %v9148_v45, %v4177_v44  ;;  %vm4197_vm10 = vcmp.le.f32.partialorder %v9190_v26, %v4177_v44  ;;  %vm4198_vm11 = vcmp.le.f32.partialorder %v4148_v17, %v4177_v44 }
 0xc34   : > { %vm4199_vm12 = vcmp.le.f32.partialorder %v9156_v57, %v4177_v44  ;;  %vm4200_vm13 = vcmp.le.f32.partialorder %v9150_v36, %v4177_v44  ;;  %vm4201_vm15 = vcmp.le.f32.partialorder %v9180_v0, %v4177_v44  ;;  %vm4202_vm0 = vcmp.le.f32.partialorder %v9184_v55, %v4177_v44 }
 0xc35   : > { %vm4203_vm2 = vcmp.le.f32.partialorder %v9178_v62, %v4177_v44  ;;  %vm4204_vm3 = vcmp.le.f32.partialorder %v9152_v21, %v4177_v44  ;;  %vm4205_vm4 = vcmp.le.f32.partialorder %v9192_v46, %v4177_v44  ;;  %vm4206_vm5 = vcmp.le.f32.partialorder %v9194_v11, %v4177_v44 }
 0xc36   : > { %vm4207_vm14 = vcmp.le.f32.partialorder %v9188_v23, %v4177_v44  ;;  %vm4208_vm7 = vcmp.le.f32.partialorder %v9199_v54, %v4177_v44  ;;  %vm4209_vm6 = vcmp.le.f32.partialorder %v9204_v18, %v4177_v44  ;;  %vm4210_vm1 = vcmp.le.f32.partialorder %v4160_v13, %v4177_v44 }
 0xc37   : > { %v4211_v49 = vsel %vm4195_vm8, %v9214_v32, 2048  ;;  %v4212_v60 = vsel %vm4196_vm9, %v9217_v27, 2048  ;;  %v4213_v33 = vsel %vm4197_vm10, %v9220_v2, 2048  ;;  %v4214_v42 = vsel %vm4198_vm11, %v9223_v43, 2048 }
 0xc38   : > { %v4215_v25 = vsel %vm4199_vm12, %v9226_v15, 2048  ;;  %v4216_v24 = vsel %vm4200_vm13, %v9229_v20, 2048  ;;  %v4217_v45 = vsel %vm4201_vm15, %v9232_v56, 2048  ;;  %v4218_v26 = vsel %vm4202_vm0, %v9235_v19, 2048 }
 0xc39   : > { %v4219_v17 = vsel %vm4203_vm2, %v9238_v31, 2048  ;;  %v4220_v57 = vsel %vm4204_vm3, %v9241_v28, 2048  ;;  %v4221_v36 = vsel %vm4205_vm4, %v9244_v3, 2048  ;;  %v4222_v0 = vsel %vm4206_vm5, %v9247_v29, 2048 }
 0xc3a   : > { %v4223_v55 = vsel %vm4207_vm14, %v9250_v47, 2048  ;;  %v4224_v62 = vsel %vm4208_vm7, %v9253_v61, 2048  ;;  %v4225_v21 = vsel %vm4209_vm6, %v9256_v58, 2048  ;;  %v4226_v46 = vsel %vm4210_vm1, %v9259_v59, 2048 }
 0xc3b   : > { %vm4227_vm8 = vcmp.lt.s32.totalorder %v4211_v49, %v4215_v25  ;;  %vm4229_vm9 = vcmp.lt.s32.totalorder %v4212_v60, %v4216_v24  ;;  %vm4231_vm10 = vcmp.lt.s32.totalorder %v4213_v33, %v4217_v45  ;;  %vm4233_vm11 = vcmp.lt.s32.totalorder %v4214_v42, %v4218_v26 }
 0xc3c   : > { %v4228_v11 = vsel %vm4227_vm8, %v4211_v49, %v4215_v25  ;;  %v4230_v22 = vsel %vm4229_vm9, %v4212_v60, %v4216_v24  ;;  %v4232_v16 = vsel %vm4231_vm10, %v4213_v33, %v4217_v45  ;;  %v4234_v23 = vsel %vm4233_vm11, %v4214_v42, %v4218_v26 }
 0xc3d   : > { %vm4235_vm14 = vcmp.lt.s32.totalorder %v4228_v11, %v4219_v17  ;;  %vm4237_vm12 = vcmp.lt.s32.totalorder %v4230_v22, %v4220_v57  ;;  %vm4239_vm13 = vcmp.lt.s32.totalorder %v4232_v16, %v4221_v36  ;;  %vm4241_vm15 = vcmp.lt.s32.totalorder %v4234_v23, %v4222_v0 }
 0xc3e   : > { %v4236_v54 = vsel %vm4235_vm14, %v4228_v11, %v4219_v17  ;;  %v4238_v61 = vsel %vm4237_vm12, %v4230_v22, %v4220_v57  ;;  %v4240_v47 = vsel %vm4239_vm13, %v4232_v16, %v4221_v36  ;;  %v4242_v18 = vsel %vm4241_vm15, %v4234_v23, %v4222_v0  ;;  %v9323_v16 = vld [vmem:[%s1598_s5] sm:$0xff]  ;;  %v7099_v11 = vld [vmem:[%s10100_s26 + $0x478] sm:$0xff]  ;;  %v7102_v23 = vld [vmem:[%s10100_s26 + $0x4f0] sm:$0xff]  ;;  %s10192_s5 = sld [smem:[#allocation34_spill]] }
 0xc3f   : > { %vm4243_vm6 = vcmp.lt.s32.totalorder %v4236_v54, %v4223_v55  ;;  %vm4245_vm7 = vcmp.lt.s32.totalorder %v4238_v61, %v4224_v62  ;;  %vm4247_vm1 = vcmp.lt.s32.totalorder %v4240_v47, %v4225_v21  ;;  %vm4249_vm0 = vcmp.lt.s32.totalorder %v4242_v18, %v4226_v46 }
 0xc40   : > { %v4244_v13 = vsel %vm4243_vm6, %v4236_v54, %v4223_v55  ;;  %v4246_v44 = vsel %vm4245_vm7, %v4238_v61, %v4224_v62  ;;  %v4248_v25 = vsel %vm4247_vm1, %v4240_v47, %v4225_v21  ;;  %v4250_v49 = vsel %vm4249_vm0, %v4242_v18, %v4226_v46  ;;  %v10156_v54 = vld [vmem:[#allocation60_spill] sm:$0xff] }
 0xc41   : > { %vm4251_vm2 = vcmp.lt.s32.totalorder %v4244_v13, %v4246_v44  ;;  %vm4253_vm3 = vcmp.lt.s32.totalorder %v4248_v25, %v4250_v49  ;;  %v4646_v45 = vmul.f32 %v9323_v16, %v9323_v16  ;;  %vm10154_vm5 = vcmask 261120   ;;  %v7103_v18 = vld [vmem:[%s10100_s26 + $0x468] sm:$0xff] }
 0xc42   : > { %v4252_v60 = vsel %vm4251_vm2, %v4244_v13, %v4246_v44  ;;  %v4254_v33 = vsel %vm4253_vm3, %v4248_v25, %v4250_v49  ;;  %v7340_v46 = vmov 1.0   ;;  %v7104_v13 = vld [vmem:[%s10100_s26 + $0x4e8] sm:$0xff]  ;;  %v10157_v44 = vld [vmem:[#allocation61_spill] sm:$0xff]  ;;  %v7105_v25 = vld [vmem:[%s10100_s26 + $0x460] sm:$0xff] }
 0xc43   : > { %vm4255_vm4 = vcmp.lt.s32.totalorder %v4252_v60, %v4254_v33  ;;  %v4647_v26 = vsel %vm10154_vm5, %v4646_v45, 0.0  ;;  %v10158_v49 = vld [vmem:[#allocation62_spill] sm:$0xff]  ;;  %v10163_v45 = vld [vmem:[#allocation67_spill] sm:$0xff] }
 0xc44   : > { %v4256_v42 = vsel %vm4255_vm4, %v4252_v60, %v4254_v33  ;;  %4648 = vadd.xlane.f32.xlu2 %v4647_v26  ;;  %v7112_v60 = vld [vmem:[%s10100_s26 + $0x4c8] sm:$0xff]  ;;  %v10161_v33 = vld [vmem:[#allocation65_spill] sm:$0xff] }
 0xc45   : > { %v4258_v24 = vshra.s32 %v4256_v42, 16  ;;  %v4257_v47 = vand.u32 65535, %v4256_v42  ;;  %v7114_v42 = vld [vmem:[%s10100_s26 + $0x4c0] sm:$0xff]  ;;  %v7118_v26 = vld [vmem:[%s10100_s26 + $0x4b0] sm:$0xff] }
 0xc47   : > { %v4260_v22 = vcvt.s32.f32 %v4258_v24  ;;  %v4259_v17 = vcvt.s32.f32 %v4257_v47  ;;  %v10162_v24 = vld [vmem:[#allocation66_spill] sm:$0xff]  ;;  %v10164_v47 = vld [vmem:[#allocation68_spill] sm:$0xff] }
 0xc49   : > { %4261 = vmin.xlane.f32.xlu0 %v4260_v22 }
 0xcbc   : > { %v4262_v61 = vpop.xlane.xlu0 %4261 }
 0xcbd   : > { %vm4263_vm8 = vcmp.eq.f32.partialorder %v4260_v22, %v4262_v61  ;;  %v4268_v36 = vcvt.f32.s32 %v4262_v61  ;;  %v7116_v22 = vld [vmem:[%s10100_s26 + $0x4b8] sm:$0xff]  ;;  %v7120_v61 = vld [vmem:[%s10100_s26 + $0x4a8] sm:$0xff] }
 0xcbe   : > { %v4264_v57 = vsel %vm4263_vm8, %v4259_v17, inf  ;;  %v10165_v17 = vld [vmem:[#allocation69_spill] sm:$0xff] }
 0xcbf   : > { %4265 = vmin.xlane.f32.xlu1 %v4264_v57  ;;  %v4269_v55 = vshll.u32 %v4268_v36, 16  ;;  %v7122_v57 = vld [vmem:[%s10100_s26 + $0x4a0] sm:$0xff] }
 0xcc0   : > { %v10166_v36 = vld [vmem:[#allocation70_spill] sm:$0xff] }
 0xd32   : > { %v4266_v0 = vpop.xlane.xlu1 %4265 }
 0xd33   : > { %v4267_v62 = vcvt.f32.s32 %v4266_v0  ;;  %v7124_v0 = vld [vmem:[%s10100_s26 + $0x498] sm:$0xff] }
 0xd35   : > { %v9328_v21 = vadd.s32 %v4269_v55, %v4267_v62  ;;  %v10167_v55 = vld [vmem:[#allocation71_spill] sm:$0xff]  ;;  %v7126_v62 = vld [vmem:[%s10100_s26 + $0x490] sm:$0xff] }
 0xd37   : > { %vm4271_vm9 = vcmp.eq.s32.totalorder %v9214_v32, %v9328_v21  ;;  %vm4272_vm10 = vcmp.eq.s32.totalorder %v9217_v27, %v9328_v21  ;;  %vm4273_vm11 = vcmp.eq.s32.totalorder %v9220_v2, %v9328_v21  ;;  %vm4274_vm14 = vcmp.eq.s32.totalorder %v9223_v43, %v9328_v21  ;;  %v7100_v27 = vld [vmem:[%s10100_s26 + $0x4f8] sm:$0xff]  ;;  %v10155_v2 = vld [vmem:[#allocation59_spill] sm:$0xff]  ;;  %v7101_v43 = vld [vmem:[%s10100_s26 + $0x470] sm:$0xff] }
 0xd38   : > { %6801 = vmatmul.msk.f32.vlgmr.msrb.gmra.mxu1 %vm4271_vm9, %v7340_v46  ;;  %6802 = vmatmul.msk.f32.vlgmr.msra.gmra.mxu2 %vm4272_vm10, %v7340_v46  ;;  %vm4275_vm12 = vcmp.eq.s32.totalorder %v9226_v15, %v9328_v21  ;;  %vm4276_vm13 = vcmp.eq.s32.totalorder %v9229_v20, %v9328_v21  ;;  %vm4277_vm15 = vcmp.eq.s32.totalorder %v9232_v56, %v9328_v21  ;;  %v7109_v15 = vld [vmem:[%s10100_s26 + $0x450] sm:$0xff] }
 0xd39   : > { %6803 = vmatmul.msk.f32.vlgmr.msra.gmra.mxu3 %vm4273_vm11, %v7340_v46  ;;  %6804 = vmatmul.msk.f32.vlgmr.msra.gmra.mxu0 %vm4274_vm14, %v7340_v46  ;;  %vm4278_vm6 = vcmp.eq.s32.totalorder %v9235_v19, %v9328_v21  ;;  %v7110_v20 = vld [vmem:[%s10100_s26 + $0x4d0] sm:$0xff]  ;;  %v7111_v19 = vld [vmem:[%s10100_s26 + $0x448] sm:$0xff]  ;;  %vm4279_vm7 = vcmp.eq.s32.totalorder %v9238_v31, %v9328_v21  ;;  %vm4280_vm1 = vcmp.eq.s32.totalorder %v9241_v28, %v9328_v21  ;;  %vm10202_vm14 = vcmask 261120  }
 0xd3a   : > { %4479 = vmatpush.msrb.mxu1 %v7099_v11  ;;  %4499 = vmatpush.msra.mxu2 %v7100_v27  ;;  %v10160_v56 = vld [vmem:[#allocation64_spill] sm:$0xff]  ;;  %vm4281_vm0 = vcmp.eq.s32.totalorder %v9244_v3, %v9328_v21  ;;  %vm4282_vm2 = vcmp.eq.s32.totalorder %v9247_v29, %v9328_v21  ;;  %v10172_v31 = vld [vmem:[#allocation75_spill] sm:$0xff]  ;;  %vm4285_vm10 = vcmp.eq.s32.totalorder %v9256_v58, %v9328_v21 }
 0xd3b   : > { %4519 = vmatpush.msra.mxu3 %v10155_v2  ;;  %4539 = vmatpush.msra.mxu0 %v8903_v30  ;;  %v7106_v30 = vld [vmem:[%s10100_s26 + $0x4e0] sm:$0xff]  ;;  %v10168_v11 = vld [vmem:[#allocation72_spill] sm:$0xff]  ;;  %vm4286_vm11 = vcmp.eq.s32.totalorder %v9259_v59, %v9328_v21 }
 0xd3c   : > { %4480 = vmatpush.msrb.mxu1 %v7101_v43  ;;  %4500 = vmatpush.msra.mxu2 %v7102_v23  ;;  %v7127_v27 = vld [vmem:[%s10100_s26 + $0x408] sm:$0xff]  ;;  %v10169_v43 = vld [vmem:[#allocation73_spill] sm:$0xff] }
 0xd3d   : > { %4520 = vmatpush.msra.mxu3 %v10156_v54  ;;  %4540 = vmatpush.msra.mxu0 %v8912_v63  ;;  %v7107_v63 = vld [vmem:[%s10100_s26 + $0x458] sm:$0xff]  ;;  %v7128_v2 = vld [vmem:[%s10100_s26 + $0x488] sm:$0xff]  ;;  %v7129_v54 = vld [vmem:[%s10100_s26 + $0x400] sm:$0xff] }
 0xd3e   : > { %4481 = vmatpush.msrb.mxu1 %v7103_v18  ;;  %4501 = vmatpush.msra.mxu2 %v7104_v13  ;;  %v10170_v23 = vld [vmem:[#allocation56_spill] sm:$0xff]  ;;  %v7130_v18 = vld [vmem:[%s10100_s26 + $0x480] sm:$0xff] }
 0xd3f   : > { %4521 = vmatpush.msra.mxu3 %v10157_v44  ;;  %4541 = vmatpush.msra.mxu0 %v8921_v1  ;;  %v7108_v1 = vld [vmem:[%s10100_s26 + $0x4d8] sm:$0xff]  ;;  %v7133_v28 = vld [vmem:[%s10100_s26 + $0x670] sm:$0xff]  ;;  %v7135_v44 = vld [vmem:[%s10100_s26 + $0x668] sm:$0xff] }
 0xd40   : > { %4482 = vmatpush.msrb.mxu1 %v7105_v25  ;;  %4502 = vmatpush.msra.mxu2 %v7106_v30  ;;  %v10171_v13 = vld [vmem:[#allocation74_spill] sm:$0xff]  ;;  %v7134_v3 = vld [vmem:[%s10100_s26 + $0x6f0] sm:$0xff]  ;;  %v7136_v25 = vld [vmem:[%s10100_s26 + $0x6e8] sm:$0xff] }
 0xd41   : > { %4522 = vmatpush.msra.mxu3 %v10158_v49  ;;  %4542 = vmatpush.msra.mxu0 %v8928_v5  ;;  %v10159_v5 = vld [vmem:[#allocation63_spill] sm:$0xff]  ;;  %v10173_v29 = vld [vmem:[#allocation76_spill] sm:$0xff]  ;;  %v10174_v30 = vld [vmem:[#allocation77_spill] sm:$0xff] }
 0xd42   : > { %6805 = vmatmul.msk.f32.vlgmr.msra.gmra.mxu1 %vm4275_vm12, %v7340_v46  ;;  %6806 = vmatmul.msk.f32.vlgmr.msrb.gmra.mxu2 %vm4276_vm13, %v7340_v46  ;;  %v7138_v49 = vld [vmem:[%s10100_s26 + $0x6e0] sm:$0xff]  ;;  %v1751_v58 = vld [vmem:[%s10192_s5 + $0x90] sm:$0xff]  ;;  %vm10203_vm12 = vmmov %vm10202_vm14 }
 0xd43   : > { %6807 = vmatmul.msk.f32.vlgmr.msrb.gmra.mxu3 %vm4277_vm15, %v7340_v46  ;;  %6808 = vmatmul.msk.f32.vlgmr.msrb.gmra.mxu0 %vm4278_vm6, %v7340_v46  ;;  %v1747_v59 = vld [vmem:[%s10192_s5 + $0x70] sm:$0xff]  ;;  %vm10204_vm13 = vmmov %vm10203_vm12 }
 0xd44   : > { %4483 = vmatpush.msrb.mxu1 %v7107_v63  ;;  %4503 = vmatpush.msra.mxu2 %v7108_v1  ;;  %v10175_v63 = vld [vmem:[#allocation78_spill] sm:$0xff]  ;;  %vm10205_vm15 = vmmov %vm10203_vm12 }
 0xd45   : > { %4523 = vmatpush.msra.mxu3 %v10159_v5  ;;  %4543 = vmatpush.msra.mxu0 %v8935_v52  ;;  %v7113_v52 = vld [vmem:[%s10100_s26 + $0x440] sm:$0xff]  ;;  %v7140_v1 = vld [vmem:[%s10100_s26 + $0x6d8] sm:$0xff]  ;;  %vm10206_vm6 = vmmov %vm10203_vm12 }
 0xd46   : > { %4484 = vmatpush.msrb.mxu1 %v7109_v15  ;;  %4504 = vmatpush.msra.mxu2 %v7110_v20  ;;  %v10176_v5 = vld [vmem:[#allocation79_spill] sm:$0xff]  ;;  %v7141_v15 = vld [vmem:[%s10100_s26 + $0x650] sm:$0xff] }
 0xd47   : > { %4524 = vmatpush.msra.mxu3 %v10160_v56  ;;  %4544 = vmatpush.msra.mxu0 %v8942_v7  ;;  %v7115_v7 = vld [vmem:[%s10100_s26 + $0x438] sm:$0xff]  ;;  %v7142_v20 = vld [vmem:[%s10100_s26 + $0x6d0] sm:$0xff] }
 0xd48   : > { %4485 = vmatpush.msrb.mxu1 %v7111_v19  ;;  %4505 = vmatpush.msra.mxu2 %v7112_v60  ;;  %v10177_v56 = vld [vmem:[#allocation80_spill] sm:$0xff]  ;;  %v10178_v60 = vld [vmem:[#allocation81_spill] sm:$0xff] }
 0xd49   : > { %4525 = vmatpush.msra.mxu3 %v10161_v33  ;;  %4545 = vmatpush.msra.mxu0 %v8950_v4  ;;  %v7117_v4 = vld [vmem:[%s10100_s26 + $0x430] sm:$0xff]  ;;  %v7144_v19 = vld [vmem:[%s10100_s26 + $0x6c8] sm:$0xff]  ;;  %v7145_v33 = vld [vmem:[%s10100_s26 + $0x640] sm:$0xff] }
 0xd4a   : > { %4486 = vmatpush.msrb.mxu1 %v7113_v52  ;;  %4506 = vmatpush.msra.mxu2 %v7114_v42  ;;  %v7146_v52 = vld [vmem:[%s10100_s26 + $0x6c0] sm:$0xff] }
 0xd4b   : > { %4526 = vmatpush.msra.mxu3 %v10162_v24  ;;  %4546 = vmatpush.msra.mxu0 %v8957_v48  ;;  %v7119_v48 = vld [vmem:[%s10100_s26 + $0x428] sm:$0xff]  ;;  %v10179_v42 = vld [vmem:[#allocation82_spill] sm:$0xff] }
 0xd4c   : > { %4487 = vmatpush.msrb.mxu1 %v7115_v7  ;;  %4507 = vmatpush.msra.mxu2 %v7116_v22  ;;  %v7148_v24 = vld [vmem:[%s10100_s26 + $0x6b8] sm:$0xff]  ;;  %v10180_v22 = vld [vmem:[#allocation83_spill] sm:$0xff] }
 0xd4d   : > { %4527 = vmatpush.msra.mxu3 %v10163_v45  ;;  %4547 = vmatpush.msra.mxu0 %v8964_v50  ;;  %v7121_v50 = vld [vmem:[%s10100_s26 + $0x420] sm:$0xff]  ;;  %v7149_v45 = vld [vmem:[%s10100_s26 + $0x630] sm:$0xff] }
 0xd4e   : > { %4488 = vmatpush.msrb.mxu1 %v7117_v4  ;;  %4508 = vmatpush.msra.mxu2 %v7118_v26  ;;  %v7150_v4 = vld [vmem:[%s10100_s26 + $0x6b0] sm:$0xff] }
 0xd4f   : > { %4528 = vmatpush.msra.mxu3 %v10164_v47  ;;  %4548 = vmatpush.msra.mxu0 %v8971_v51  ;;  %v7123_v51 = vld [vmem:[%s10100_s26 + $0x418] sm:$0xff]  ;;  %v10182_v26 = vld [vmem:[#allocation84_spill] sm:$0xff] }
 0xd50   : > { %4489 = vmatpush.msrb.mxu1 %v7119_v48  ;;  %4509 = vmatpush.msra.mxu2 %v7120_v61  ;;  %v7151_v47 = vld [vmem:[%s10100_s26 + $0x628] sm:$0xff] }
 0xd51   : > { %4529 = vmatpush.msra.mxu3 %v10165_v17  ;;  %4549 = vmatpush.msra.mxu0 %v8978_v53  ;;  %v7125_v53 = vld [vmem:[%s10100_s26 + $0x410] sm:$0xff]  ;;  %v7152_v48 = vld [vmem:[%s10100_s26 + $0x6a8] sm:$0xff] }
 0xd52   : > { %4490 = vmatpush.msrb.mxu1 %v7121_v50  ;;  %4510 = vmatpush.msra.mxu2 %v7122_v57  ;;  %v10184_v17 = vld [vmem:[#allocation85_spill] sm:$0xff]  ;;  %v10185_v50 = vld [vmem:[#allocation94_spill] sm:$0xff] }
 0xd53   : > { %4530 = vmatpush.msra.mxu3 %v10166_v36  ;;  %4550 = vmatpush.msra.mxu0 %v8985_v6  ;;  %v4649_v6 = vpop.xlane.xlu2 %4648  ;;  %v7153_v57 = vld [vmem:[%s10100_s26 + $0x620] sm:$0xff] }
 0xd54   : > { %4491 = vmatpush.msrb.mxu1 %v7123_v51  ;;  %4511 = vmatpush.msra.mxu2 %v7124_v0  ;;  %v7154_v36 = vld [vmem:[%s10100_s26 + $0x6a0] sm:$0xff] }
 0xd55   : > { %4531 = vmatpush.msra.mxu3 %v10167_v55  ;;  %4551 = vmatpush.msra.mxu0 %v8992_v8  ;;  %v4650_v8 = vmul.f32 %v4649_v6, %v10170_v23  ;;  %v10186_v51 = vld [vmem:[#allocation86_spill] sm:$0xff]  ;;  %v10187_v0 = vld [vmem:[#allocation95_spill] sm:$0xff]  ;;  %v10189_v6 = vld [vmem:[#allocation96_spill] sm:$0xff] }
 0xd56   : > { %4492 = vmatpush.msrb.mxu1 %v7125_v53  ;;  %4512 = vmatpush.msra.mxu2 %v7126_v62  ;;  %v7155_v55 = vld [vmem:[%s10100_s26 + $0x618] sm:$0xff] }
 0xd57   : > { %4532 = vmatpush.msra.mxu3 %v10168_v11  ;;  %4552 = vmatpush.msra.mxu0 %v8999_v9  ;;  %v9431_v9 = vadd.f32 1e-06, %v4650_v8  ;;  %v7156_v53 = vld [vmem:[%s10100_s26 + $0x698] sm:$0xff]  ;;  %v10188_v11 = vld [vmem:[#allocation88_spill] sm:$0xff] }
 0xd58   : > { %4493 = vmatpush.msrb.mxu1 %v7127_v27  ;;  %4513 = vmatpush.msra.mxu2 %v7128_v2  ;;  %v7157_v27 = vld [vmem:[%s10100_s26 + $0x610] sm:$0xff] }
 0xd59   : > { %4533 = vmatpush.msra.mxu3 %v10169_v43  ;;  %4553 = vmatpush.msra.mxu0 %v9005_v10  ;;  %v7131_v10 = vld [vmem:[%s10100_s26 + $0x678] sm:$0xff]  ;;  %7047 = vrsqrt.f32 %v9431_v9  ;;  %v7158_v2 = vld [vmem:[%s10100_s26 + $0x690] sm:$0xff]  ;;  %vm4658_vm3 = vweird.f32 %v9431_v9 }
 0xd5a   : > { %4494 = vmatpush.msrb.mxu1 %v7129_v54  ;;  %4514 = vmatpush.msra.mxu2 %v7130_v18  ;;  %v10190_v43 = vld [vmem:[#allocation89_spill] sm:$0xff]  ;;  %v7159_v54 = vld [vmem:[%s10100_s26 + $0x608] sm:$0xff] }
 0xd5b   : > { %4534 = vmatpush.msra.mxu3 %v10171_v13  ;;  %4554 = vmatpush.msra.mxu0 %v9010_v12  ;;  %v7132_v12 = vld [vmem:[%s10100_s26 + $0x6f8] sm:$0xff]  ;;  %v7160_v18 = vld [vmem:[%s10100_s26 + $0x688] sm:$0xff] }
 0xd5c   : > { %6809 = vmatmul.msk.f32.vlgmr.msrb.gmra.mxu1 %vm4279_vm7, %v7340_v46  ;;  %6810 = vmatmul.msk.f32.vlgmr.msra.gmra.mxu2 %vm4280_vm1, %v7340_v46  ;;  %v10191_v8 = vld [vmem:[#allocation97_spill] sm:$0xff]  ;;  %vm10209_vm7 = vmmov %vm10206_vm6  ;;  %vm10211_vm1 = vcmask 130048  }
 0xd5d   : > { %6811 = vmatmul.msk.f32.vlgmr.msra.gmra.mxu3 %vm4281_vm0, %v7340_v46  ;;  %6812 = vmatmul.msk.f32.vlgmr.msra.gmra.mxu0 %vm4282_vm2, %v7340_v46  ;;  %vm10212_vm0 = vmmov %vm10211_vm1 }
 0xd5e   : > { %4559 = vmatpush.msra.mxu1 %v7131_v10  ;;  %4579 = vmatpush.msrb.mxu2 %v7132_v12  ;;  %v10193_v10 = vld [vmem:[#allocation90_spill] sm:$0xff]  ;;  %vm10213_vm2 = vmmov %vm10212_vm0 }
 0xd5f   : > { %4599 = vmatpush.msrb.mxu3 %v10172_v31  ;;  %4619 = vmatpush.msrb.mxu0 %v9013_v34  ;;  %v7137_v34 = vld [vmem:[%s10100_s26 + $0x660] sm:$0xff] }
 0xd60   : > { %4560 = vmatpush.msra.mxu1 %v7133_v28  ;;  %4580 = vmatpush.msrb.mxu2 %v7134_v3  ;;  %v10194_v12 = vld [vmem:[#allocation98_spill] sm:$0xff]  ;;  %v10197_v3 = vld [vmem:[#allocation91_spill] sm:$0xff] }
 0xd61   : > { %4600 = vmatpush.msrb.mxu3 %v10173_v29  ;;  %4620 = vmatpush.msrb.mxu0 %v9020_v35  ;;  %v7139_v35 = vld [vmem:[%s10100_s26 + $0x658] sm:$0xff]  ;;  %v7161_v31 = vld [vmem:[%s10100_s26 + $0x600] sm:$0xff] }
 0xd62   : > { %4561 = vmatpush.msra.mxu1 %v7135_v44  ;;  %4581 = vmatpush.msrb.mxu2 %v7136_v25  ;;  %v7162_v28 = vld [vmem:[%s10100_s26 + $0x680] sm:$0xff]  ;;  %v10199_v44 = vld [vmem:[#allocation100_spill] sm:$0xff]  ;;  %v10200_v25 = vld [vmem:[#allocation101_spill] sm:$0xff] }
 0xd63   : > { %4601 = vmatpush.msrb.mxu3 %v10174_v30  ;;  %4621 = vmatpush.msrb.mxu0 %v9027_v37  ;;  %v9454_v37 = vpop.eup %7047  ;;  %v10198_v29 = vld [vmem:[#allocation99_spill] sm:$0xff]  ;;  %vm4283_vm8 = vcmp.eq.s32.totalorder %v10199_v44, %v9328_v21  ;;  %vm4284_vm9 = vcmp.eq.s32.totalorder %v10200_v25, %v9328_v21  ;;  %v1736_v30 = vld [vmem:[%s10192_s5 + $0x18] sm:$0xff] }
 0xd64   : > { %4562 = vmatpush.msra.mxu1 %v7137_v34  ;;  %4582 = vmatpush.msrb.mxu2 %v7138_v49  ;;  %vm4659_vm4 = vweird.f32 %v9454_v37  ;;  %v1744_v34 = vld [vmem:[%s10192_s5 + $0x58] sm:$0xff]  ;;  %v1734_v21 = vld [vmem:[%s10192_s5 + $0x8] sm:$0xff] }
 0xd65   : > { %4602 = vmatpush.msrb.mxu3 %v10175_v63  ;;  %4622 = vmatpush.msrb.mxu0 %v9032_v38  ;;  %v7143_v38 = vld [vmem:[%s10100_s26 + $0x648] sm:$0xff]  ;;  %vm9502_vm5 = vmor %vm4658_vm3, %vm4659_vm4  ;;  %v1752_v49 = vld [vmem:[%s10192_s5 + $0x98] sm:$0xff]  ;;  %vm10216_vm4 = vcmask 64512  }
 0xd66   : > { %4563 = vmatpush.msra.mxu1 %v7139_v35  ;;  %4583 = vmatpush.msrb.mxu2 %v7140_v1  ;;  %v1748_v63 = vld [vmem:[%s10192_s5 + $0x78] sm:$0xff]  ;;  %v1735_v1 = vld [vmem:[%s10192_s5 + $0x10] sm:$0xff]  ;;  %vm10214_vm3 = vmmov %vm10206_vm6 }
 0xd67   : > { %4603 = vmatpush.msrb.mxu3 %v10176_v5  ;;  %4623 = vmatpush.msrb.mxu0 %v9037_v39  ;;  %v4653_v39 = vmul.f32 %v9454_v37, %v9431_v9  ;;  %v1743_v5 = vld [vmem:[%s10192_s5 + $0x50] sm:$0xff] }
 0xd68   : > { %4564 = vmatpush.msra.mxu1 %v7141_v15  ;;  %4584 = vmatpush.msrb.mxu2 %v7142_v20  ;;  %v7008_v15 = vld [vmem:[%s10201_s3] ss:$0 sm:$0xff]  ;;  %s1602_s3 = scalar_lea.vmem %s10207_s13, %s7672_s15  ;;  %s10215_s15 = sld [smem:[#allocation33_spill]] }
 0xd69   : > { %4604 = vmatpush.msrb.mxu3 %v10177_v56  ;;  %4624 = vmatpush.msrb.mxu0 %v9042_v40  ;;  %v7147_v40 = vld [vmem:[%s10100_s26 + $0x638] sm:$0xff]  ;;  %v4654_v7 = vmul.f32 %v9454_v37, %v4653_v39  ;;  %v1746_v56 = vld [vmem:[%s10192_s5 + $0x68] sm:$0xff]  ;;  %v1749_v39 = vld [vmem:[%s10192_s5 + $0x80] sm:$0xff] }
 0xd6a   : > { %4565 = vmatpush.msra.mxu1 %v7143_v38  ;;  %4585 = vmatpush.msrb.mxu2 %v7144_v19  ;;  %v1733_v38 = vld [vmem:[%s10192_s5] sm:$0xff] }
 0xd6b   : > { %4605 = vmatpush.msrb.mxu3 %v10178_v60  ;;  %4625 = vmatpush.msrb.mxu0 %v9047_v41  ;;  %v10181_v41 = vld [vmem:[#allocation92_spill] sm:$0xff]  ;;  %v4655_v61 = vmul.f32 0.5, %v4654_v7  ;;  %v1741_v19 = vld [vmem:[%s10192_s5 + $0x40] sm:$0xff] }
 0xd6c   : > { %4566 = vmatpush.msra.mxu1 %v7145_v33  ;;  %4586 = vmatpush.msrb.mxu2 %v7146_v52  ;;  %v1745_v60 = vld [vmem:[%s10192_s5 + $0x60] sm:$0xff]  ;;  %v1740_v52 = vld [vmem:[%s10192_s5 + $0x38] sm:$0xff] }
 0xd6d   : > { %4606 = vmatpush.msrb.mxu3 %v10179_v42  ;;  %4626 = vmatpush.msrb.mxu0 %v9052_v14  ;;  %v10183_v14 = vld [vmem:[#allocation93_spill] sm:$0xff]  ;;  %v4656_v62 = vsub.f32 1.5, %v4655_v61 }
 0xd6e   : > { %4567 = vmatpush.msra.mxu1 %v7147_v40  ;;  %4587 = vmatpush.msrb.mxu2 %v7148_v24  ;;  %v1739_v42 = vld [vmem:[%s10192_s5 + $0x30] sm:$0xff]  ;;  %v1738_v40 = vld [vmem:[%s10192_s5 + $0x28] sm:$0xff]  ;;  %v1737_v24 = vld [vmem:[%s10192_s5 + $0x20] sm:$0xff] }
 0xd6f   : > { %4607 = vmatpush.msrb.mxu3 %v10180_v22  ;;  %4627 = vmatpush.msrb.mxu0 %v10181_v41  ;;  %v4657_v13 = vmul.f32 %v9454_v37, %v4656_v62 }
 0xd70   : > { %4568 = vmatpush.msra.mxu1 %v7149_v45  ;;  %4588 = vmatpush.msrb.mxu2 %v7150_v4 }
 0xd71   : > { %4608 = vmatpush.msrb.mxu3 %v10182_v26  ;;  %4628 = vmatpush.msrb.mxu0 %v10183_v14  ;;  %v4661_v35 = vsel %vm9502_vm5, %v9454_v37, %v4657_v13  ;;  %v1742_v37 = vld [vmem:[%s10192_s5 + $0x48] sm:$0xff]  ;;  %vm10217_vm5 = vmmov %vm10216_vm4 }
 0xd72   : > { %4569 = vmatpush.msra.mxu1 %v7151_v47  ;;  %4589 = vmatpush.msrb.mxu2 %v7152_v48  ;;  %v4662_v20 = vmul.f32 %v4661_v35, %v9323_v16  ;;  %v1753_v35 = vld [vmem:[%s10192_s5 + $0xa0] sm:$0xff] }
 0xd73   : > { %4609 = vmatpush.msrb.mxu3 %v10184_v17  ;;  %4629 = vmatpush.msrb.mxu0 %v10185_v50 }
 0xd74   : > { %4570 = vmatpush.msra.mxu1 %v7153_v57  ;;  %4590 = vmatpush.msrb.mxu2 %v7154_v36  ;;  %v9543_v33 = vmul.f32 %v7008_v15, %v4662_v20 }
 0xd75   : > { %4610 = vmatpush.msrb.mxu3 %v10186_v51  ;;  %4630 = vmatpush.msrb.mxu0 %v10187_v0 }
 0xd76   : > { %4571 = vmatpush.msra.mxu1 %v7155_v55  ;;  %4591 = vmatpush.msrb.mxu2 %v7156_v53 }
 0xd77   : > { %4611 = vmatpush.msrb.mxu3 %v10188_v11  ;;  %4631 = vmatpush.msrb.mxu0 %v10189_v6 }
 0xd78   : > { %4572 = vmatpush.msra.mxu1 %v7157_v27  ;;  %4592 = vmatpush.msrb.mxu2 %v7158_v2 }
 0xd79   : > { %4612 = vmatpush.msrb.mxu3 %v10190_v43  ;;  %4632 = vmatpush.msrb.mxu0 %v10191_v8 }
 0xd7a   : > { %4573 = vmatpush.msra.mxu1 %v7159_v54  ;;  %4593 = vmatpush.msrb.mxu2 %v7160_v18 }
 0xd7b   : > { %4613 = vmatpush.msrb.mxu3 %v10193_v10  ;;  %4633 = vmatpush.msrb.mxu0 %v10194_v12 }
 0xd7c   : > { %4574 = vmatpush.msra.mxu1 %v7161_v31  ;;  %4594 = vmatpush.msrb.mxu2 %v7162_v28  ;;  %v10208_v31 = vld [vmem:[#allocation57_spill] sm:$0xff] }
 0xd7d   : > { %4614 = vmatpush.msrb.mxu3 %v10197_v3  ;;  %4634 = vmatpush.msrb.mxu0 %v10198_v29  ;;  %v1756_v29 = vld [vmem:[%s10192_s5 + $0xb8] sm:$0xff] }
 0xd7e   : > { %6813 = vmatmul.msk.f32.vlgmr.msra.gmra.mxu1 %vm4283_vm8, %v7340_v46  ;;  %6814 = vmatmul.msk.f32.vlgmr.msrb.gmra.mxu2 %vm4284_vm9, %v7340_v46  ;;  %vm10218_vm8 = vmmov %vm10216_vm4 }
 0xd7f   : > { %6815 = vmatmul.msk.f32.vlgmr.msrb.gmra.mxu3 %vm4285_vm10, %v7340_v46  ;;  %6816 = vmatmul.msk.f32.vlgmr.msrb.gmra.mxu0 %vm4286_vm11, %v7340_v46  ;;  %v1750_v46 = vld [vmem:[%s10192_s5 + $0x88] sm:$0xff]  ;;  %vm10219_vm9 = vmmov %vm10212_vm0 }
 0xd80   : > { %4682 = vmatpush.msrb.mxu1 %v1736_v30  ;;  %4702 = vmatpush.msra.mxu2 %v1744_v34  ;;  %v1755_v34 = vld [vmem:[%s10192_s5 + $0xb0] sm:$0xff]  ;;  %vm10221_vm10 = vmmov %vm10212_vm0 }
 0xd81   : > { %4722 = vmatpush.msra.mxu3 %v1752_v49  ;;  %4822 = vmatpush.msra.mxu0 %v1748_v63  ;;  %v1754_v63 = vld [vmem:[%s10192_s5 + $0xa8] sm:$0xff]  ;;  %vm10222_vm11 = vmmov %vm10216_vm4  ;;  %s10231_s5 = sld [smem:[#allocation31_spill]] }
 0xd82   : > { %4683 = vmatpush.msrb.mxu1 %v1735_v1  ;;  %4703 = vmatpush.msra.mxu2 %v1743_v5  ;;  %v1770_v1 = vld [vmem:[%s10210_s6] sm:$0xff] }
 0xd83   : > { %4723 = vmatpush.msra.mxu3 %v1751_v58  ;;  %4823 = vmatpush.msra.mxu0 %v1747_v59 }
 0xd84   : > { %4684 = vmatpush.msrb.mxu1 %v1734_v21  ;;  %4704 = vmatpush.msra.mxu2 %v1742_v37 }
 0xd85   : > { %4724 = vmatpush.msra.mxu3 %v1750_v46  ;;  %4824 = vmatpush.msra.mxu0 %v1746_v56 }
 0xd86   : > { %4685 = vmatpush.msrb.mxu1 %v1733_v38  ;;  %4705 = vmatpush.msra.mxu2 %v1741_v19  ;;  %v1730_v38 = vld [vmem:[%s10215_s15 + $0x8] sm:$0xff] }
 0xd87   : > { %4725 = vmatpush.msra.mxu3 %v1749_v39  ;;  %4825 = vmatpush.msra.mxu0 %v1745_v60 }
 0xd88   : > { %6817 = vmatmul.msk.f32.vlgmr.msrb.gmra.mxu1 %vm10202_vm14, %v9543_v33  ;;  %6818 = vmatmul.msk.f32.vlgmr.msra.gmra.mxu2 %vm10203_vm12, %v9543_v33  ;;  %vm10223_vm14 = vmmov %vm10216_vm4 }
 0xd89   : > { %6819 = vmatmul.msk.f32.vlgmr.msra.gmra.mxu3 %vm10204_vm13, %v9543_v33  ;;  %6824 = vmatmul.msk.f32.vlgmr.msra.gmra.mxu0 %vm10205_vm15, %v9543_v33  ;;  %vm10224_vm12 = vmmov %vm10216_vm4 }
 0xd8a   : > { %4802 = vmatpush.msrb.mxu3 %v1740_v52  ;;  %v1729_v52 = vld [vmem:[%s10215_s15] sm:$0xff]  ;;  %vm10225_vm13 = vmmov %vm10214_vm3 }
 0xd8b   : > { %vm10226_vm15 = vmmov %vm10214_vm3 }
 0xd8c   : > { %4803 = vmatpush.msrb.mxu3 %v1739_v42 }
 0xd8e   : > { %4804 = vmatpush.msrb.mxu3 %v1738_v40  ;;  %v1771_v40 = vld [vmem:[%s10210_s6 + $0x8] sm:$0xff]  ;;  %s10243_s6 = sld [smem:[#allocation14_spill]] }
 0xd90   : > { %4805 = vmatpush.msrb.mxu3 %v1737_v24 }
 0xd91   : > { %6823 = vmatmul.msk.f32.vlgmr.msrb.gmra.mxu3 %vm10206_vm6, %v9543_v33  ;;  %vm10227_vm6 = vmmov %vm10212_vm0 }
 0xdb5   : > { %v4336_v22 = vpop.f32.mrf.mxu1 }
 0xdb6   : > { %v4396_v26 = vpop.f32.mrf.mxu0 }
 0xdbb   : > { %v4356_v7 = vpop.f32.mrf.mxu2 }
 0xdbc   : > { %v4357_v41 = vadd.f32 %v4356_v7, %v4336_v22  ;;  %v4376_v45 = vpop.f32.mrf.mxu3 }
 0xdbe   : > { %v4377_v4 = vadd.f32 %v4376_v45, %v4357_v41 }
 0xdbf   : > { %v4416_v47 = vpop.f32.mrf.mxu1 }
 0xdc0   : > { %v4397_v14 = vadd.f32 %v4396_v26, %v4377_v4  ;;  %v4476_v36 = vpop.f32.mrf.mxu0 }
 0xdc2   : > { %v4417_v48 = vadd.f32 %v4416_v47, %v4397_v14 }
 0xdc5   : > { %v4436_v61 = vpop.f32.mrf.mxu2 }
 0xdc6   : > { %v4437_v17 = vadd.f32 %v4436_v61, %v4417_v48  ;;  %v4456_v50 = vpop.f32.mrf.mxu3 }
 0xdc8   : > { %v4457_v57 = vadd.f32 %v4456_v50, %v4437_v17 }
 0xdca   : > { %v4477_v0 = vadd.f32 %v4476_v36, %v4457_v57  ;;  %v1732_v57 = vld [vmem:[%s10215_s15 + $0x18] sm:$0xff] }
 0xdcb   : > { %4927 = vmatpush.msrb.mxu0 %v1732_v57 }
 0xdd9   : > { %v4496_v51 = vpop.f32.mrf.mxu1 }
 0xdda   : > { %v4497_v53 = vadd.f32 %v4496_v51, %v4477_v0  ;;  %v4556_v27 = vpop.f32.mrf.mxu0 }
 0xddf   : > { %v4516_v55 = vpop.f32.mrf.mxu2 }
 0xde0   : > { %v4517_v62 = vadd.f32 %v4516_v55, %v4497_v53  ;;  %v4536_v11 = vpop.f32.mrf.mxu3 }
 0xde2   : > { %v4537_v6 = vadd.f32 %v4536_v11, %v4517_v62  ;;  %v7341_v11 = vmov 0.0  }
 0xde4   : > { %v4557_v43 = vadd.f32 %v4556_v27, %v4537_v6  ;;  %v1731_v6 = vld [vmem:[%s10215_s15 + $0x10] sm:$0xff] }
 0xde5   : > { %4928 = vmatpush.msrb.mxu0 %v1731_v6  ;;  %v10239_v6 = vld [vmem:[#allocation55_spill] sm:$0xff] }
 0xdfb   : > { %v4576_v2 = vpop.f32.mrf.mxu1 }
 0xdfc   : > { %v4577_v8 = vadd.f32 %v4576_v2, %v4557_v43  ;;  %v4636_v10 = vpop.f32.mrf.mxu0 }
 0xe01   : > { %v4596_v54 = vpop.f32.mrf.mxu2 }
 0xe02   : > { %v4597_v18 = vadd.f32 %v4596_v54, %v4577_v8  ;;  %v4616_v13 = vpop.f32.mrf.mxu3 }
 0xe04   : > { %v4617_v12 = vadd.f32 %v4616_v13, %v4597_v18 }
 0xe05   : > { %v4687_v49 = vpop.f32.mrf.mxu1 }
 0xe06   : > { %v9559_v9 = vadd.f32 %v4636_v10, %v4617_v12  ;;  %v4827_v30 = vpop.f32.mrf.mxu0 }
 0xe08   : > { %v4639_v28 = vsub.f32 %v9559_v9, %v10208_v31 }
 0xe0a   : > { %v4640_v3 = vmul.f32 %v4639_v28, %v4639_v28 }
 0xe0b   : > { %v4707_v44 = vpop.f32.mrf.mxu2 }
 0xe0c   : > { %4641 = vst.msk [vmem:[%s1602_s3] sm:$0xff] %vm10209_vm7, %v4640_v3  ;;  %v4727_v25 = vpop.f32.mrf.mxu3  ;;  %6820 = vmatpush.xpose.msk.msra.mxu1 %vm10211_vm1, %v4707_v44  ;;  %s10220_s3 = sld [smem:[#allocation29_spill]]  ;;  %vm10228_vm7 = vmmov %vm10214_vm3 }
 0xe0d   : > { %4785 = vmatpush.msrb.mxu2 %v4727_v25  ;;  %vm10229_vm1 = vmmov %vm10212_vm0 }
 0xe0f   : > { %6826 = vmatpush.xpose.msk.msra.mxu2 %vm10212_vm0, %v4827_v30  ;;  %6821 = vmatmul.msk.f32.vlgmr.msra.gmra.mxu1 %vm10213_vm2, %v4687_v49  ;;  %vm10230_vm2 = vmmov %vm10214_vm3 }
 0xe10   : > { %4842 = vmatpush.msrb.mxu1 %v1756_v29 }
 0xe12   : > { %4843 = vmatpush.msrb.mxu1 %v1755_v34  ;;  %v1713_v47 = vld [vmem:[%s10220_s3 + $0x58] sm:$0xff]  ;;  %v1712_v48 = vld [vmem:[%s10220_s3 + $0x50] sm:$0xff]  ;;  %v1711_v61 = vld [vmem:[%s10220_s3 + $0x48] sm:$0xff] }
 0xe13   : > { %v1710_v17 = vld [vmem:[%s10220_s3 + $0x40] sm:$0xff]  ;;  %v1725_v0 = vld [vmem:[%s10220_s3 + $0xb8] sm:$0xff]  ;;  %v1724_v55 = vld [vmem:[%s10220_s3 + $0xb0] sm:$0xff] }
 0xe14   : > { %4844 = vmatpush.msrb.mxu1 %v1754_v63  ;;  %v1723_v53 = vld [vmem:[%s10220_s3 + $0xa8] sm:$0xff]  ;;  %v1722_v62 = vld [vmem:[%s10220_s3 + $0xa0] sm:$0xff]  ;;  %v1721_v27 = vld [vmem:[%s10220_s3 + $0x98] sm:$0xff] }
 0xe15   : > { %v1720_v2 = vld [vmem:[%s10220_s3 + $0x90] sm:$0xff]  ;;  %5042 = vmatpush.msra.mxu0 %v1721_v27  ;;  %v1719_v43 = vld [vmem:[%s10220_s3 + $0x88] sm:$0xff]  ;;  %v1718_v8 = vld [vmem:[%s10220_s3 + $0x80] sm:$0xff]  ;;  %v5418_v27 = vrot.slane %v10239_v6, 7 }
 0xe16   : > { %4845 = vmatpush.msrb.mxu1 %v1753_v35  ;;  %v1705_v10 = vld [vmem:[%s10220_s3 + $0x18] sm:$0xff]  ;;  %v1704_v12 = vld [vmem:[%s10220_s3 + $0x10] sm:$0xff]  ;;  %v1703_v31 = vld [vmem:[%s10220_s3 + $0x8] sm:$0xff] }
 0xe17   : > { %6825 = vmatmul.msk.f32.vlgmr.msrb.gmra.mxu1 %vm10214_vm3, %v9543_v33  ;;  %v4807_v33 = vpop.f32.mrf.mxu3  ;;  %5043 = vmatpush.msra.mxu0 %v1720_v2  ;;  %v1702_v28 = vld [vmem:[%s10220_s3] sm:$0xff]  ;;  %vm5097_vm3 = vcmask 1043456   ;;  %v1709_v35 = vld [vmem:[%s10220_s3 + $0x38] sm:$0xff] }
 0xe18   : > { %4950 = vmatpush.msra.mxu1 %v1730_v38  ;;  %v7009_v38 = vld [vmem:[%s10231_s5] ss:$0 sm:$0xff]  ;;  %s10240_s5 = sld [smem:[#allocation28_spill]] }
 0xe19   : > { %5044 = vmatpush.msra.mxu0 %v1719_v43 }
 0xe1a   : > { %4951 = vmatpush.msra.mxu1 %v1729_v52 }
 0xe1b   : > { %5045 = vmatpush.msra.mxu0 %v1718_v8 }
 0xe8c   : > { %v4753_v5 = vpop.f32.mrf.mxu1 }
 0xe8d   : > { %v4754_v58 = vadd.f32 %v4753_v5, %v1770_v1  ;;  %v1708_v1 = vld [vmem:[%s10220_s3 + $0x30] sm:$0xff]  ;;  %v1707_v5 = vld [vmem:[%s10220_s3 + $0x28] sm:$0xff] }
 0xe8f   : > { %v4756_v59 = vsel %vm10216_vm4, %v4754_v58, -inf }
 0xe90   : > { %4757 = vmax.xlane.f32.xlu0 %v4756_v59 }
 0xe94   : > { %v4847_v21 = vpop.f32.mrf.mxu1 }
 0xe95   : > { %4905 = vmatpush.msra.mxu3 %v4847_v21 }
 0xe97   : > { %5019 = vmatpush.msrb.mxu3 %v1713_v47 }
 0xe99   : > { %5020 = vmatpush.msrb.mxu3 %v1712_v48  ;;  %v1717_v48 = vld [vmem:[%s10220_s3 + $0x78] sm:$0xff] }
 0xe9b   : > { %5021 = vmatpush.msrb.mxu3 %v1711_v61  ;;  %v1715_v61 = vld [vmem:[%s10220_s3 + $0x68] sm:$0xff] }
 0xe9d   : > { %5022 = vmatpush.msrb.mxu3 %v1710_v17  ;;  %v1714_v17 = vld [vmem:[%s10220_s3 + $0x60] sm:$0xff] }
 0xf03   : > { %v4758_v37 = vpop.xlane.xlu0 %4757 }
 0xf04   : > { %v4759_v15 = vsub.f32 %v4754_v58, %v4758_v37 }
 0xf06   : > { %v4760_v20 = vmul.f32 1.442695, %v4759_v15 }
 0xf08   : > { %7049 = vpow2.f32 %v4760_v20 }
 0xf0e   : > { %v7050_v46 = vpop.eup %7049 }
 0xf0f   : > { %v4762_v56 = vsel %vm10217_vm5, %v7050_v46, 0.0 }
 0xf10   : > { %4763 = vadd.xlane.f32.xlu1 %v4762_v56 }
 0xf83   : > { %v4764_v19 = vpop.xlane.xlu1 %4763 }
 0xf84   : > { %7051 = vrcp.f32 %v4764_v19 }
 0xf8a   : > { %v7052_v39 = vpop.eup %7051 }
 0xf8b   : > { %v4766_v60 = vmul.f32 %v7052_v39, %v7050_v46 }
 0xf8d   : > { %6822 = vmatmul.msk.f32.vlgmr.msrb.gmra.mxu2 %vm10218_vm8, %v4766_v60 }
 0xf8e   : > { %4993 = vmatpush.msrb.mxu2 %v1705_v10 }
 0xf90   : > { %4994 = vmatpush.msrb.mxu2 %v1704_v12 }
 0xf92   : > { %4995 = vmatpush.msrb.mxu2 %v1703_v31 }
 0xf94   : > { %4996 = vmatpush.msrb.mxu2 %v1702_v28 }
 0xf95   : > { %6827 = vmatmul.msk.f32.vlgmr.msra.gmra.mxu2 %vm10219_vm9, %v4807_v33  ;;  %vm10232_vm9 = vmmov %vm10230_vm2  ;;  %v1706_v33 = vld [vmem:[%s10220_s3 + $0x20] sm:$0xff] }
0x1010   : > { %v4787_v42 = vpop.f32.mrf.mxu2 }
0x1011   : > { %6830 = vmatmul.msk.f32.vlgmr.msra.gmra.mxu1 %vm10221_vm10, %v4787_v42  ;;  %vm10233_vm10 = vmmov %vm10212_vm0 }
0x1018   : > { %v4873_v24 = vpop.f32.mrf.mxu2 }
0x1019   : > { %v4874_v7 = vadd.f32 %v4873_v24, %v1771_v40 }
0x101b   : > { %v4876_v22 = vsel %vm10222_vm11, %v4874_v7, -inf  ;;  %vm10234_vm11 = vmmov %vm10230_vm2 }
0x101c   : > { %4877 = vmax.xlane.f32.xlu2 %v4876_v22 }
0x108e   : > { %v4953_v3 = vpop.f32.mrf.mxu1 }
0x108f   : > { %v4878_v41 = vpop.xlane.xlu2 %4877 }
0x1090   : > { %v4879_v45 = vsub.f32 %v4874_v7, %v4878_v41 }
0x1092   : > { %v4880_v4 = vmul.f32 1.442695, %v4879_v45 }
0x1094   : > { %7053 = vpow2.f32 %v4880_v4 }
0x109a   : > { %v7054_v26 = vpop.eup %7053 }
0x109b   : > { %v4882_v14 = vsel %vm10223_vm14, %v7054_v26, 0.0  ;;  %vm4644_vm14 = vcmp.ge.s32.totalorder %v9214_v32, 8  ;;  %v1716_v32 = vld [vmem:[%s10220_s3 + $0x70] sm:$0xff]  ;;  %s10242_s3 = sld [smem:[#allocation18_spill]] }
0x109c   : > { %4883 = vadd.xlane.f32.xlu0 %v4882_v14  ;;  %v4645_v24 = vsel %vm4644_vm14, -1e+09, %v7341_v11 }
0x110f   : > { %v4884_v50 = vpop.xlane.xlu0 %4883 }
0x1110   : > { %7055 = vrcp.f32 %v4884_v50 }
0x1116   : > { %v7056_v36 = vpop.eup %7055 }
0x1117   : > { %v4886_v51 = vmul.f32 %v7056_v36, %v7054_v26 }
0x1119   : > { %6828 = vmatmul.msk.f32.vlgmr.msra.gmra.mxu3 %vm10224_vm12, %v4886_v51  ;;  %vm5082_vm12 = vcmask 97280  }
0x111a   : > { %5176 = vmatpush.msra.mxu3 %v1725_v0 }
0x111c   : > { %5177 = vmatpush.msra.mxu3 %v1724_v55 }
0x111e   : > { %5178 = vmatpush.msra.mxu3 %v1723_v53 }
0x1120   : > { %5179 = vmatpush.msra.mxu3 %v1722_v62 }
0x1121   : > { %6832 = vmatmul.msk.f32.vlgmr.msrb.gmra.mxu3 %vm10225_vm13, %v9559_v9  ;;  %vm10235_vm13 = vmmov %vm10230_vm2 }
0x1129   : > { %5026 = vmatmul.f32.gmra.mxu3 %v7341_v11 }
0x1131   : > { %6841 = vmatmul.msk.f32.vlgmr.msra.gmra.mxu3 %vm10226_vm15, %v9559_v9  ;;  %vm10236_vm15 = vmmov %vm10212_vm0 }
0x1139   : > { %5183 = vmatmul.f32.gmra.mxu3 %v7341_v11 }
0x119c   : > { %v4907_v54 = vpop.f32.mrf.mxu3 }
0x119d   : > { %6829 = vmatmul.msk.f32.vlgmr.msrb.gmra.mxu0 %vm10227_vm6, %v4907_v54  ;;  %vm10237_vm6 = vmmov %vm10212_vm0 }
0x11a4   : > { %v5024_v18 = vpop.f32.mrf.mxu3 }
0x11a5   : > { %6833 = vmatmul.msk.f32.vlgmr.msra.gmra.mxu0 %vm10228_vm7, %v9559_v9  ;;  %vm10238_vm7 = vmmov %vm10212_vm0 }
0x11ac   : > { %v5027_v13 = vpop.f32.mrf.mxu3 }
0x11ad   : > { %5049 = vmatmul.f32.gmra.mxu0 %v7341_v11  ;;  %6834 = vmatpush.xpose.msk.msrb.mxu1 %vm10229_vm1, %v5027_v13  ;;  %vm5420_vm1 = vcmask 1040384  }
0x11b1   : > { %6835 = vmatpush.xpose.msk.msrb.mxu1 %vm10212_vm0, %v5024_v18  ;;  %vm10241_vm0 = vmmov %vm10230_vm2 }
0x11b4   : > { %v5181_v52 = vpop.f32.mrf.mxu3 }
0x11b5   : > { %5133 = vmatpush.msra.mxu1 %v1709_v35 }
0x11b7   : > { %5134 = vmatpush.msra.mxu1 %v1708_v1 }
0x11b9   : > { %5135 = vmatpush.msra.mxu1 %v1707_v5 }
0x11bb   : > { %5136 = vmatpush.msra.mxu1 %v1706_v33 }
0x11bc   : > { %v5184_v42 = vpop.f32.mrf.mxu3 }
0x121a   : > { %v4930_v29 = vpop.f32.mrf.mxu0 }
0x121b   : > { %v4954_v44 = vadd.f32 %v4953_v3, %v4930_v29  ;;  %v1699_v3 = vld [vmem:[%s10240_s5 + $0x8] sm:$0xff]  ;;  %v1698_v29 = vld [vmem:[%s10240_s5] sm:$0xff] }
0x121d   : > { %v9618_v25 = vadd.f32 %v4954_v44, %v9323_v16 }
0x121f   : > { %v4957_v30 = vmul.f32 %v9618_v25, %v9618_v25 }
0x1221   : > { %v4958_v34 = vsel %vm10230_vm2, %v4957_v30, 0.0 }
0x1222   : > { %v5047_v49 = vpop.f32.mrf.mxu0  ;;  %4959 = vadd.xlane.f32.xlu1 %v4958_v34 }
0x122a   : > { %v5050_v63 = vpop.f32.mrf.mxu0 }
0x122b   : > { %6837 = vmatpush.msk.msra.mxu2 %vm5097_vm3, %v5050_v63 }
0x122d   : > { %5116 = vmatpush.msra.mxu2 %v5047_v49  ;;  %v1701_v49 = vld [vmem:[%s10240_s5 + $0x18] sm:$0xff] }
0x1295   : > { %v4960_v16 = vpop.xlane.xlu1 %4959 }
0x1296   : > { %v4961_v58 = vmul.f32 %v4960_v16, %v10170_v23 }
0x1298   : > { %v4962_v59 = vadd.f32 1e-06, %v4961_v58 }
0x129a   : > { %7057 = vrsqrt.f32 %v4962_v59  ;;  %vm4969_vm5 = vweird.f32 %v4962_v59 }
0x12a0   : > { %v7058_v21 = vpop.eup %7057 }
0x12a1   : > { %v4964_v37 = vmul.f32 %v7058_v21, %v4962_v59  ;;  %vm4970_vm4 = vweird.f32 %v7058_v21  ;;  %v1641_v59 = vld [vmem:[%s10242_s3 + $0x18] sm:$0xff] }
0x12a2   : > { %vm4971_vm8 = vmor %vm4969_vm5, %vm4970_vm4 }
0x12a3   : > { %v4965_v15 = vmul.f32 %v7058_v21, %v4964_v37  ;;  %v1640_v37 = vld [vmem:[%s10242_s3 + $0x10] sm:$0xff] }
0x12a5   : > { %v4966_v20 = vmul.f32 0.5, %v4965_v15  ;;  %v1639_v15 = vld [vmem:[%s10242_s3 + $0x8] sm:$0xff] }
0x12a7   : > { %v4967_v46 = vsub.f32 1.5, %v4966_v20 }
0x12a9   : > { %v4968_v56 = vmul.f32 %v7058_v21, %v4967_v46  ;;  %v1638_v46 = vld [vmem:[%s10242_s3] sm:$0xff] }
0x12ab   : > { %v4972_v19 = vsel %vm4971_vm8, %v7058_v21, %v4968_v56  ;;  %vm10244_vm8 = vmmov %vm10237_vm6 }
0x12ac   : > { %v4973_v39 = vmul.f32 %v4972_v19, %v9618_v25 }
0x12ae   : > { %v4977_v60 = vmul.f32 %v7009_v38, %v4973_v39  ;;  %v7010_v38 = vld [vmem:[%s10243_s6] ss:$0 sm:$0xff]  ;;  %s10249_s6 = sld [smem:[#allocation36_spill]] }
0x12b0   : > { %6831 = vmatmul.msk.f32.vlgmr.msrb.gmra.mxu2 %vm10232_vm9, %v4977_v60  ;;  %vm10246_vm9 = vmmov %vm10241_vm0 }
0x12b1   : > { %5153 = vmatpush.msrb.mxu2 %v1717_v48  ;;  %v1646_v48 = vld [vmem:[%s10242_s3 + $0x40] sm:$0xff] }
0x12b3   : > { %5154 = vmatpush.msrb.mxu2 %v1716_v32 }
0x12b4   : > { %v1764_v6 = vld [vmem:[%s10249_s6 + $0x18] sm:$0xff] }
0x12b5   : > { %5155 = vmatpush.msrb.mxu2 %v1715_v61 }
0x12b7   : > { %5156 = vmatpush.msrb.mxu2 %v1714_v17 }
0x1333   : > { %v4998_v40 = vpop.f32.mrf.mxu2 }
0x1334   : > { %6836 = vmatmul.msk.f32.vlgmr.msrb.gmra.mxu1 %vm10233_vm10, %v4998_v40  ;;  %vm10247_vm10 = vmmov %vm10237_vm6 }
0x1335   : > { %6845 = vmatpush.msk.msrb.mxu1 %vm5097_vm3, %v5184_v42 }
0x1337   : > { %5248 = vmatpush.msrb.mxu1 %v5181_v52 }
0x133c   : > { %6839 = vmatmul.msk.f32.vlgmr.msra.gmra.mxu1 %vm10234_vm11, %v4977_v60  ;;  %v1700_v60 = vld [vmem:[%s10240_s5 + $0x10] sm:$0xff]  ;;  %vm10248_vm11 = vmmov %vm10241_vm0  ;;  %s10250_s5 = sld [smem:[#allocation32_spill]] }
0x133d   : > { %5293 = vmatpush.msra.mxu1 %v1699_v3  ;;  %v1762_v3 = vld [vmem:[%s10249_s6 + $0x8] sm:$0xff] }
0x133f   : > { %5294 = vmatpush.msra.mxu1 %v1698_v29  ;;  %v1761_v29 = vld [vmem:[%s10249_s6] sm:$0xff] }
0x13b1   : > { %v5079_v7 = vpop.f32.mrf.mxu1 }
0x13b2   : > { %v5080_v22 = vadd.f32 %v5079_v7, %v4645_v24 }
0x13b4   : > { %v5083_v41 = vsel %vm5082_vm12, %v5080_v22, -inf }
0x13b5   : > { %5084 = vmax.xlane.f32.xlu2 %v5083_v41  ;;  %v1760_v41 = vld [vmem:[%s10245_s8 + $0x18] sm:$0xff] }
0x13b9   : > { %v5138_v53 = vpop.f32.mrf.mxu1 }
0x1428   : > { %v5085_v45 = vpop.xlane.xlu2 %5084 }
0x1429   : > { %v5086_v4 = vsub.f32 %v5080_v22, %v5085_v45  ;;  %v1759_v45 = vld [vmem:[%s10245_s8 + $0x10] sm:$0xff] }
0x142b   : > { %v5087_v26 = vmul.f32 1.442695, %v5086_v4  ;;  %v1758_v4 = vld [vmem:[%s10245_s8 + $0x8] sm:$0xff] }
0x142d   : > { %7059 = vpow2.f32 %v5087_v26  ;;  %v1757_v26 = vld [vmem:[%s10245_s8] sm:$0xff]  ;;  %s10251_s8 = sld [smem:[#allocation25_spill]] }
0x1433   : > { %v7060_v14 = vpop.eup %7059 }
0x1434   : > { %v5089_v47 = vsel %vm5082_vm12, %v7060_v14, 0.0 }
0x1435   : > { %5090 = vadd.xlane.f32.xlu0 %v5089_v47  ;;  %v1647_v47 = vld [vmem:[%s10242_s3 + $0x48] sm:$0xff] }
0x14a8   : > { %v5091_v50 = vpop.xlane.xlu0 %5090 }
0x14a9   : > { %7061 = vrcp.f32 %v5091_v50 }
0x14af   : > { %v7062_v57 = vpop.eup %7061 }
0x14b0   : > { %v5093_v36 = vmul.f32 %v7062_v57, %v7060_v14  ;;  %v1649_v14 = vld [vmem:[%s10242_s3 + $0x58] sm:$0xff] }
0x14b1   : > { %v1768_v57 = vld [vmem:[%s10249_s6 + $0x38] sm:$0xff] }
0x14b2   : > { %6838 = vmatmul.msk.f32.vlgmr.msra.gmra.mxu2 %vm5082_vm12, %v5093_v36  ;;  %v1767_v36 = vld [vmem:[%s10249_s6 + $0x30] sm:$0xff]  ;;  %5356 = vmatpush.msrb.mxu3 %v1768_v57 }
0x14b3   : > { %5336 = vmatpush.msra.mxu2 %v1760_v41 }
0x14b4   : > { %5357 = vmatpush.msrb.mxu3 %v1767_v36 }
0x14b5   : > { %5337 = vmatpush.msra.mxu2 %v1759_v45 }
0x14b7   : > { %5338 = vmatpush.msra.mxu2 %v1758_v4 }
0x14b9   : > { %5339 = vmatpush.msra.mxu2 %v1757_v26 }
0x14ba   : > { %6840 = vmatmul.msk.f32.vlgmr.msrb.gmra.mxu2 %vm10235_vm13, %v9559_v9 }
0x14bb   : > { %5480 = vmatpush.msrb.mxu2 %v1649_v14 }
0x14c2   : > { %5160 = vmatmul.f32.gmra.mxu2 %v7341_v11  ;;  %v9652_v11 = vsel %vm5420_vm1, 0.0, %v5418_v27  ;;  %vm10254_vm1 = vmmov %vm10241_vm0 }
0x14c3   : > { %v5424_v8 = vmul.f32 %v9652_v11, %v9652_v11 }
0x14c5   : > { %v5425_v54 = vsel %vm10241_vm0, %v5424_v8, 0.0  ;;  %v7011_v8 = vld [vmem:[%s10250_s5] ss:$0 sm:$0xff]  ;;  %s10260_s5 = sld [smem:[#allocation37_spill]] }
0x14cb   : > { %v7012_v26 = vld [vmem:[%s10260_s5] ss:$0 sm:$0xff]  ;;  %s9742_s5 = sand.u32 1, %s7277_s1  }
0x14cc   : > { %s10024_s9 = sshll.u32 %s9742_s5, 3 }
0x14cd   : > { %s9748_s10 = scalar_lea.vmem [#allocation4], %s10024_s9  ;;  %s10274_s9 = sld [smem:[#allocation50_spill]] }
0x14ce   : > { %s6233_s12 = sshll.u32 %s9748_s10, 4  ;;  %s6234_s12 = int_to_ptr.vmem [resolvable:$true] %s6233_s12 }
0x1535   : > { %v5118_v51 = vpop.f32.mrf.mxu2 }
0x153d   : > { %v5158_v0 = vpop.f32.mrf.mxu2 }
0x1545   : > { %v5161_v55 = vpop.f32.mrf.mxu2 }
0x1546   : > { %6842 = vmatpush.xpose.msk.msrb.mxu0 %vm10236_vm15, %v5161_v55 }
0x154a   : > { %6843 = vmatpush.xpose.msk.msrb.mxu0 %vm10237_vm6, %v5158_v0  ;;  %v1766_v0 = vld [vmem:[%s10249_s6 + $0x28] sm:$0xff]  ;;  %vm10252_vm6 = vmmov %vm10241_vm0 }
0x154b   : > { %5358 = vmatpush.msrb.mxu3 %v1766_v0 }
0x154d   : > { %6844 = vmatmul.msk.f32.vlgmr.msrb.gmra.mxu0 %vm10238_vm7, %v5138_v53  ;;  %v1765_v53 = vld [vmem:[%s10249_s6 + $0x20] sm:$0xff]  ;;  %vm10253_vm7 = vmmov %vm10241_vm0  ;;  %vm10255_vm0 = vcmask 523264  }
0x154e   : > { %5270 = vmatpush.msra.mxu0 %v1701_v49  ;;  %5359 = vmatpush.msrb.mxu3 %v1765_v53  ;;  %v1690_v49 = vld [vmem:[%s10251_s8 + $0x8] sm:$0xff] }
0x1550   : > { %5271 = vmatpush.msra.mxu0 %v1700_v60  ;;  %5360 = vmatpush.msrb.mxu3 %v1764_v6 }
0x15ca   : > { %v5213_v62 = vpop.f32.mrf.mxu0 }
0x15cb   : > { %v5214_v2 = vadd.f32 %v5213_v62, %v4645_v24 }
0x15cd   : > { %v5216_v43 = vsel %vm5082_vm12, %v5214_v2, -inf }
0x15ce   : > { %5217 = vmax.xlane.f32.xlu1 %v5216_v43 }
0x15d6   : > { %5426 = vadd.xlane.f32.xlu1 %v5425_v54 }
0x1641   : > { %v5218_v18 = vpop.xlane.xlu1 %5217 }
0x1642   : > { %v5219_v13 = vsub.f32 %v5214_v2, %v5218_v18  ;;  %v1763_v2 = vld [vmem:[%s10249_s6 + $0x10] sm:$0xff]  ;;  %s10262_s6 = sld [smem:[#allocation24_spill]] }
0x1643   : > { %5361 = vmatpush.msrb.mxu3 %v1763_v2 }
0x1644   : > { %v5220_v10 = vmul.f32 1.442695, %v5219_v13 }
0x1645   : > { %5362 = vmatpush.msrb.mxu3 %v1762_v3 }
0x1646   : > { %7063 = vpow2.f32 %v5220_v10  ;;  %v1645_v10 = vld [vmem:[%s10242_s3 + $0x38] sm:$0xff] }
0x1647   : > { %5363 = vmatpush.msrb.mxu3 %v1761_v29 }
0x1648   : > { %v7013_v57 = vld [vmem:[%s10262_s6] ss:$0 sm:$0xff]  ;;  %s10270_s6 = sld [smem:[#allocation17_spill]] }
0x1649   : > { %v5427_v28 = vpop.xlane.xlu1 %5426 }
0x164a   : > { %v5428_v44 = vmul.f32 %v5427_v28, %v10170_v23  ;;  %v1642_v28 = vld [vmem:[%s10242_s3 + $0x20] sm:$0xff] }
0x164c   : > { %v7064_v12 = vpop.eup %7063  ;;  %v5429_v30 = vadd.f32 1e-06, %v5428_v44  ;;  %v1692_v44 = vld [vmem:[%s10251_s8 + $0x18] sm:$0xff] }
0x164d   : > { %v5222_v31 = vsel %vm5082_vm12, %v7064_v12, 0.0  ;;  %5408 = vmatpush.msrb.mxu0 %v1692_v44 }
0x164e   : > { %5223 = vadd.xlane.f32.xlu2 %v5222_v31  ;;  %7065 = vrsqrt.f32 %v5429_v30  ;;  %vm5436_vm4 = vweird.f32 %v5429_v30  ;;  %v1643_v31 = vld [vmem:[%s10242_s3 + $0x28] sm:$0xff] }
0x1654   : > { %v7066_v34 = vpop.eup %7065 }
0x1655   : > { %v5431_v63 = vmul.f32 %v7066_v34, %v5429_v30  ;;  %vm5437_vm2 = vweird.f32 %v7066_v34  ;;  %v1691_v30 = vld [vmem:[%s10251_s8 + $0x10] sm:$0xff] }
0x1656   : > { %vm5438_vm5 = vmor %vm5436_vm4, %vm5437_vm2  ;;  %5409 = vmatpush.msrb.mxu0 %v1691_v30 }
0x1657   : > { %v5432_v1 = vmul.f32 %v7066_v34, %v5431_v63  ;;  %v1656_v63 = vld [vmem:[%s10242_s3 + $0x90] sm:$0xff]  ;;  %vm10256_vm2 = vmmov %vm10244_vm8 }
0x1658   : > { %5410 = vmatpush.msrb.mxu0 %v1690_v49  ;;  %vm10257_vm4 = vmmov %vm10254_vm1 }
0x1659   : > { %v5433_v5 = vmul.f32 0.5, %v5432_v1  ;;  %v1655_v1 = vld [vmem:[%s10242_s3 + $0x88] sm:$0xff] }
0x165b   : > { %v5434_v21 = vsub.f32 1.5, %v5433_v5  ;;  %v1654_v5 = vld [vmem:[%s10242_s3 + $0x80] sm:$0xff] }
0x165d   : > { %v5435_v20 = vmul.f32 %v7066_v34, %v5434_v21  ;;  %v1652_v21 = vld [vmem:[%s10242_s3 + $0x70] sm:$0xff] }
0x165f   : > { %v5439_v56 = vsel %vm5438_vm5, %v7066_v34, %v5435_v20  ;;  %v1657_v34 = vld [vmem:[%s10242_s3 + $0x98] sm:$0xff]  ;;  %vm10258_vm5 = vmmov %vm10254_vm1 }
0x1660   : > { %v5440_v19 = vmul.f32 %v5439_v56, %v9652_v11  ;;  %5500 = vmatpush.msra.mxu3 %v1657_v34  ;;  %v1635_v34 = vld [vmem:[%s10270_s6 + $0x8] sm:$0xff] }
0x1662   : > { %v9670_v39 = vmul.f32 %v7010_v38, %v5440_v19  ;;  %5501 = vmatpush.msra.mxu3 %v1656_v63 }
0x1664   : > { %5502 = vmatpush.msra.mxu3 %v1655_v1 }
0x1666   : > { %5503 = vmatpush.msra.mxu3 %v1654_v5 }
0x16c1   : > { %v5224_v35 = vpop.xlane.xlu2 %5223 }
0x16c2   : > { %7067 = vrcp.f32 %v5224_v35  ;;  %v1689_v35 = vld [vmem:[%s10251_s8] sm:$0xff]  ;;  %s10264_s8 = sld [smem:[#allocation22_spill]] }
0x16c3   : > { %5411 = vmatpush.msrb.mxu0 %v1689_v35  ;;  %v7342_v35 = vmov 8.0  }
0x16c8   : > { %v7068_v16 = vpop.eup %7067  ;;  %v1675_v0 = vld [vmem:[%s10264_s8] sm:$0xff] }
0x16c9   : > { %v5226_v58 = vmul.f32 %v7068_v16, %v7064_v12  ;;  %v1644_v12 = vld [vmem:[%s10242_s3 + $0x30] sm:$0xff] }
0x16cb   : > { %6846 = vmatmul.msk.f32.vlgmr.msrb.gmra.mxu1 %vm5082_vm12, %v5226_v58 }
0x16cc   : > { %5460 = vmatpush.msrb.mxu1 %v1641_v59  ;;  %v1653_v59 = vld [vmem:[%s10242_s3 + $0x78] sm:$0xff] }
0x16ce   : > { %5461 = vmatpush.msrb.mxu1 %v1640_v37  ;;  %v1651_v37 = vld [vmem:[%s10242_s3 + $0x68] sm:$0xff] }
0x16d0   : > { %5462 = vmatpush.msrb.mxu1 %v1639_v15  ;;  %v1650_v15 = vld [vmem:[%s10242_s3 + $0x60] sm:$0xff] }
0x16d2   : > { %5463 = vmatpush.msrb.mxu1 %v1638_v46 }
0x16d3   : > { %6848 = vmatmul.msk.f32.vlgmr.msra.gmra.mxu1 %vm10244_vm8, %v5118_v51  ;;  %vm10259_vm8 = vmmov %vm10254_vm1 }
0x16db   : > { %6852 = vmatmul.msk.f32.vlgmr.msrb.gmra.mxu1 %vm10246_vm9, %v9670_v39  ;;  %vm10261_vm9 = vmmov %vm10256_vm2 }
0x1748   : > { %v5250_v33 = vpop.f32.mrf.mxu1 }
0x1749   : > { %6847 = vmatmul.msk.f32.vlgmr.msra.gmra.mxu0 %vm10247_vm10, %v5250_v33 }
0x1750   : > { %v5296_v52 = vpop.f32.mrf.mxu1 }
0x17c6   : > { %v5273_v42 = vpop.f32.mrf.mxu0 }
0x17c7   : > { %v5297_v40 = vadd.f32 %v5296_v52, %v5273_v42 }
0x17c9   : > { %v9677_v24 = vadd.f32 %v5297_v40, %v9618_v25  ;;  %v1648_v25 = vld [vmem:[%s10242_s3 + $0x50] sm:$0xff] }
0x17ca   : > { %5481 = vmatpush.msrb.mxu2 %v1648_v25 }
0x17cb   : > { %v5300_v7 = vmul.f32 %v9677_v24, %v9677_v24 }
0x17cc   : > { %5482 = vmatpush.msrb.mxu2 %v1647_v47 }
0x17cd   : > { %v5301_v22 = vsel %vm10248_vm11, %v5300_v7, 0.0 }
0x17ce   : > { %5302 = vadd.xlane.f32.xlu0 %v5301_v22  ;;  %5483 = vmatpush.msrb.mxu2 %v1646_v48  ;;  %v1661_v48 = vld [vmem:[%s10242_s3 + $0xb8] sm:$0xff] }
0x1841   : > { %v5303_v32 = vpop.xlane.xlu0 %5302 }
0x1842   : > { %v5304_v61 = vmul.f32 %v5303_v32, %v10170_v23  ;;  %v1660_v32 = vld [vmem:[%s10242_s3 + $0xb0] sm:$0xff] }
0x1844   : > { %v5305_v17 = vadd.f32 1e-06, %v5304_v61  ;;  %v1659_v61 = vld [vmem:[%s10242_s3 + $0xa8] sm:$0xff] }
0x1846   : > { %7069 = vrsqrt.f32 %v5305_v17  ;;  %vm5312_vm13 = vweird.f32 %v5305_v17 }
0x184c   : > { %v7070_v50 = vpop.eup %7069 }
0x184d   : > { %v5307_v51 = vmul.f32 %v7070_v50, %v5305_v17  ;;  %vm5313_vm14 = vweird.f32 %v7070_v50  ;;  %v1658_v17 = vld [vmem:[%s10242_s3 + $0xa0] sm:$0xff]  ;;  %s10277_s3 = sld [smem:[#allocation13_spill]] }
0x184e   : > { %vm5314_vm15 = vmor %vm5312_vm13, %vm5313_vm14 }
0x184f   : > { %v5308_v55 = vmul.f32 %v7070_v50, %v5307_v51  ;;  %vm10263_vm13 = vmmov %vm10254_vm1 }
0x1851   : > { %v5309_v62 = vmul.f32 0.5, %v5308_v55 }
0x1853   : > { %v5310_v27 = vsub.f32 1.5, %v5309_v62 }
0x1855   : > { %v5311_v43 = vmul.f32 %v7070_v50, %v5310_v27 }
0x1857   : > { %v5315_v54 = vsel %vm5314_vm15, %v7070_v50, %v5311_v43  ;;  %v5465_v50 = vpop.f32.mrf.mxu1  ;;  %vm10265_vm15 = vmmov %vm10256_vm2 }
0x1858   : > { %v5316_v18 = vmul.f32 %v5315_v54, %v9677_v24  ;;  %v10269_v54 = vld [vmem:[#allocation87_spill] sm:$0xff] }
0x185a   : > { %v5320_v13 = vmul.f32 %v7011_v8, %v5316_v18  ;;  %v10268_v8 = vld [vmem:[#allocation58_spill] sm:$0xff] }
0x185b   : > { %v2947_v18 = vadd.f32 %v10269_v54, %v10268_v8  ;;  %v1627_v8 = vld [vmem:[%s10277_s3 + $0xa0] sm:$0xff] }
0x185c   : > { %6849 = vmatmul.msk.f32.vlgmr.msra.gmra.mxu2 %vm10252_vm6, %v5320_v13  ;;  %vm10266_vm6 = vmmov %vm10254_vm1 }
0x185d   : > { %5580 = vmatpush.msra.mxu2 %v1645_v10  ;;  %v2948_v10 = vmul.f32 %v2947_v18, %v2947_v18 }
0x185f   : > { %5581 = vmatpush.msra.mxu2 %v1644_v12 }
0x1861   : > { %5582 = vmatpush.msra.mxu2 %v1643_v31 }
0x1863   : > { %5583 = vmatpush.msra.mxu2 %v1642_v28 }
0x1864   : > { %6853 = vmatmul.msk.f32.vlgmr.msrb.gmra.mxu2 %vm10253_vm7, %v9670_v39  ;;  %vm10267_vm7 = vcmask 64512  }
0x186c   : > { %6858 = vmatmul.msk.f32.vlgmr.msra.gmra.mxu2 %vm10254_vm1, %v9670_v39  ;;  %vm10271_vm1 = vmmov %vm10267_vm7 }
0x18df   : > { %v5341_v16 = vpop.f32.mrf.mxu2 }
0x18e0   : > { %v5344_v58 = vmax.f32 %v5341_v16, 0.0 }
0x18e2   : > { %6850 = vmatmul.msk.f32.vlgmr.msrb.gmra.mxu3 %vm10255_vm0, %v5344_v58  ;;  %vm10272_vm0 = vmmov %vm10257_vm4 }
0x18e3   : > { %5600 = vmatpush.msrb.mxu3 %v1653_v59  ;;  %v2949_v12 = vsel %vm10272_vm0, %v2948_v10, 0.0  ;;  %v1625_v10 = vld [vmem:[%s10277_s3 + $0x90] sm:$0xff] }
0x18e5   : > { %5601 = vmatpush.msrb.mxu3 %v1652_v21 }
0x18e7   : > { %v5485_v20 = vpop.f32.mrf.mxu2  ;;  %5602 = vmatpush.msrb.mxu3 %v1651_v37  ;;  %v7014_v37 = vld [vmem:[%s10274_s9] ss:$0 sm:$0xff]  ;;  %s10026_s9 = scalar_lea.vmem [#allocation6], %s9742_s5 }
0x18e8   : > { %6855 = vmatpush.xpose.msk.msra.mxu0 %vm10256_vm2, %v5485_v20  ;;  %vm10273_vm2 = vmmov %vm10271_vm1 }
0x18e9   : > { %5603 = vmatpush.msrb.mxu3 %v1650_v15 }
0x18ea   : > { %6854 = vmatmul.msk.f32.vlgmr.msra.gmra.mxu3 %vm10257_vm4, %v9670_v39  ;;  %vm10275_vm4 = vmmov %vm10261_vm9 }
0x18ef   : > { %v5585_v49 = vpop.f32.mrf.mxu2 }
0x18f2   : > { %6859 = vmatmul.msk.f32.vlgmr.msrb.gmra.mxu3 %vm10258_vm5, %v9670_v39 }
0x1965   : > { %v5365_v46 = vpop.f32.mrf.mxu3 }
0x1966   : > { %v5368_v56 = vadd.f32 %v5365_v46, %v9677_v24 }
0x1968   : > { %v5369_v38 = vmul.f32 %v5368_v56, %v5368_v56 }
0x196a   : > { %v5370_v19 = vsel %vm10259_vm8, %v5369_v38, 0.0 }
0x196b   : > { %5371 = vadd.xlane.f32.xlu2 %v5370_v19 }
0x196d   : > { %v5505_v60 = vpop.f32.mrf.mxu3 }
0x196e   : > { %5563 = vmatpush.msra.mxu1 %v5505_v60 }
0x1975   : > { %v5605_v33 = vpop.f32.mrf.mxu3 }
0x1976   : > { %6861 = vmatpush.xpose.msk.msrb.mxu1 %vm10261_vm9, %v5605_v33 }
0x19de   : > { %v5372_v52 = vpop.xlane.xlu2 %5371 }
0x19df   : > { %v5373_v42 = vmul.f32 %v5372_v52, %v10170_v23 }
0x19e1   : > { %v5374_v40 = vadd.f32 1e-06, %v5373_v42 }
0x19e3   : > { %7071 = vrsqrt.f32 %v5374_v40  ;;  %vm5381_vm11 = vweird.f32 %v5374_v40 }
0x19e9   : > { %v7072_v7 = vpop.eup %7071 }
0x19ea   : > { %v5376_v22 = vmul.f32 %v7072_v7, %v5374_v40  ;;  %vm5382_vm10 = vweird.f32 %v7072_v7 }
0x19eb   : > { %vm5383_vm14 = vmor %vm5381_vm11, %vm5382_vm10 }
0x19ec   : > { %v5377_v24 = vmul.f32 %v7072_v7, %v5376_v22  ;;  %vm10276_vm10 = vmmov %vm10272_vm0 }
0x19ee   : > { %v5378_v41 = vmul.f32 0.5, %v5377_v24 }
0x19f0   : > { %v5379_v45 = vsub.f32 1.5, %v5378_v41 }
0x19f2   : > { %v5380_v4 = vmul.f32 %v7072_v7, %v5379_v45 }
0x19f4   : > { %v5384_v14 = vsel %vm5383_vm14, %v7072_v7, %v5380_v4  ;;  %vm4642_vm14 = vcmask 253952   ;;  %v1634_v4 = vld [vmem:[%s10270_s6] sm:$0xff] }
0x19f5   : > { %v5385_v25 = vmul.f32 %v5384_v14, %v5368_v56  ;;  %v1676_v14 = vld [vmem:[%s10264_s8 + $0x8] sm:$0xff]  ;;  %s10305_s8 = sld [smem:[#allocation16_spill]] }
0x19f7   : > { %v5389_v47 = vmul.f32 %v7012_v26, %v5385_v25 }
0x19f9   : > { %6851 = vmatmul.msk.f32.vlgmr.msrb.gmra.mxu0 %vm10263_vm13, %v5389_v47  ;;  %vm10278_vm13 = vmmov %vm10275_vm4 }
0x19fa   : > { %5620 = vmatpush.msrb.mxu0 %v1661_v48 }
0x19fc   : > { %5621 = vmatpush.msrb.mxu0 %v1660_v32 }
0x19fe   : > { %5622 = vmatpush.msrb.mxu0 %v1659_v61 }
0x1a00   : > { %5623 = vmatpush.msrb.mxu0 %v1658_v17 }
0x1a01   : > { %6856 = vmatmul.msk.f32.vlgmr.msra.gmra.mxu0 %vm10265_vm15, %v5465_v50  ;;  %vm10279_vm15 = vmmov %vm10271_vm1 }
0x1a02   : > { %5728 = vmatpush.msra.mxu0 %v1635_v34  ;;  %v1607_v34 = vld [vmem:[%s10277_s3] sm:$0xff] }
0x1a04   : > { %5729 = vmatpush.msra.mxu0 %v1634_v4 }
0x1a09   : > { %6860 = vmatmul.msk.f32.vlgmr.msrb.gmra.mxu0 %vm10266_vm6, %v9670_v39  ;;  %vm10280_vm6 = vmmov %vm10271_vm1 }
0x1a76   : > { %v5413_v36 = vpop.f32.mrf.mxu0 }
0x1a77   : > { %v5414_v51 = vadd.f32 %v7013_v57, %v5413_v36  ;;  %v1618_v36 = vld [vmem:[%s10277_s3 + $0x58] sm:$0xff] }
0x1a79   : > { %5416 = vst [vmem:[%s9748_s10] sm:$0xff] %v5414_v51  ;;  %v1617_v51 = vld [vmem:[%s10277_s3 + $0x50] sm:$0xff] }
0x1a7e   : > { %v5531_v55 = vpop.f32.mrf.mxu0 }
0x1a7f   : > { %v5532_v53 = vadd.f32 %v5531_v55, %v1675_v0  ;;  %v1616_v0 = vld [vmem:[%s10277_s3 + $0x48] sm:$0xff]  ;;  %v1615_v55 = vld [vmem:[%s10277_s3 + $0x40] sm:$0xff] }
0x1a81   : > { %v5534_v62 = vsel %vm10267_vm7, %v5532_v53, -inf  ;;  %vm10281_vm7 = vmmov %vm10271_vm1 }
0x1a82   : > { %5535 = vmax.xlane.f32.xlu0 %v5534_v62 }
0x1a86   : > { %v5625_v39 = vpop.f32.mrf.mxu0 }
0x1a87   : > { %5683 = vmatpush.msrb.mxu2 %v5625_v39 }
0x1a89   : > { %5797 = vmatpush.msra.mxu2 %v1618_v36  ;;  %v1620_v36 = vld [vmem:[%s10277_s3 + $0x68] sm:$0xff] }
0x1a8b   : > { %5798 = vmatpush.msra.mxu2 %v1617_v51  ;;  %v1619_v51 = vld [vmem:[%s10277_s3 + $0x60] sm:$0xff] }
0x1a8d   : > { %5799 = vmatpush.msra.mxu2 %v1616_v0 }
0x1a8f   : > { %5800 = vmatpush.msra.mxu2 %v1615_v55 }
0x1af5   : > { %v5536_v6 = vpop.xlane.xlu0 %5535 }
0x1af6   : > { %v5537_v27 = vsub.f32 %v5532_v53, %v5536_v6  ;;  %v1630_v6 = vld [vmem:[%s10277_s3 + $0xb8] sm:$0xff] }
0x1af8   : > { %v5538_v2 = vmul.f32 1.442695, %v5537_v27  ;;  %v1629_v27 = vld [vmem:[%s10277_s3 + $0xb0] sm:$0xff] }
0x1afa   : > { %7073 = vpow2.f32 %v5538_v2  ;;  %v1637_v2 = vld [vmem:[%s10270_s6 + $0x18] sm:$0xff] }
0x1afb   : > { %5705 = vmatpush.msra.mxu3 %v1637_v2 }
0x1b00   : > { %v7074_v43 = vpop.eup %7073 }
0x1b01   : > { %v5540_v13 = vsel %vm10271_vm1, %v7074_v43, 0.0  ;;  %vm10282_vm1 = vmmov %vm10272_vm0 }
0x1b02   : > { %5541 = vadd.xlane.f32.xlu1 %v5540_v13  ;;  %v1626_v13 = vld [vmem:[%s10277_s3 + $0x98] sm:$0xff] }
0x1b0a   : > { %2950 = vadd.xlane.f32.xlu1 %v2949_v12  ;;  %v1623_v12 = vld [vmem:[%s10277_s3 + $0x80] sm:$0xff] }
0x1b75   : > { %v5542_v31 = vpop.xlane.xlu1 %5541 }
0x1b76   : > { %7075 = vrcp.f32 %v5542_v31 }
0x1b7c   : > { %v7076_v28 = vpop.eup %7075 }
0x1b7d   : > { %v5544_v3 = vmul.f32 %v7076_v28, %v7074_v43  ;;  %v2951_v29 = vpop.xlane.xlu1 %2950  ;;  %v1628_v43 = vld [vmem:[%s10277_s3 + $0xa8] sm:$0xff] }
0x1b7e   : > { %v2952_v44 = vmul.f32 %v2951_v29, %v10170_v23  ;;  %v1610_v29 = vld [vmem:[%s10277_s3 + $0x18] sm:$0xff] }
0x1b7f   : > { %6857 = vmatmul.msk.f32.vlgmr.msra.gmra.mxu1 %vm10273_vm2, %v5544_v3  ;;  %vm10283_vm2 = vmmov %vm10272_vm0 }
0x1b80   : > { %v2953_v30 = vadd.f32 1e-06, %v2952_v44  ;;  %v1609_v44 = vld [vmem:[%s10277_s3 + $0x10] sm:$0xff]  ;;  %5771 = vmatpush.msra.mxu1 %v1610_v29 }
0x1b82   : > { %7077 = vrsqrt.f32 %v2953_v30  ;;  %vm2960_vm8 = vweird.f32 %v2953_v30  ;;  %5772 = vmatpush.msra.mxu1 %v1609_v44 }
0x1b83   : > { %7079 = vrcp.f32 %v7342_v35 }
0x1b87   : > { %6862 = vmatmul.msk.f32.vlgmr.msrb.gmra.mxu1 %vm10275_vm4, %v5585_v49  ;;  %vm10284_vm4 = vmmov %vm10272_vm0 }
0x1b88   : > { %v7078_v63 = vpop.eup %7077 }
0x1b89   : > { %v2955_v1 = vmul.f32 %v7078_v63, %v2953_v30  ;;  %v7080_v58 = vpop.eup %7079  ;;  %vm2961_vm5 = vweird.f32 %v7078_v63  ;;  %v1608_v30 = vld [vmem:[%s10277_s3 + $0x8] sm:$0xff] }
0x1b8a   : > { %v2977_v15 = vmul.f32 8.0, %v7080_v58  ;;  %vm2962_vm9 = vmor %vm2960_vm8, %vm2961_vm5  ;;  %vm2981_vm11 = vweird.f32 %v7080_v58  ;;  %5773 = vmatpush.msra.mxu1 %v1608_v30 }
0x1b8b   : > { %v2956_v5 = vmul.f32 %v7078_v63, %v2955_v1  ;;  %vm10285_vm5 = vmmov %vm10278_vm13 }
0x1b8c   : > { %v2978_v56 = vsub.f32 1.0, %v2977_v15  ;;  %vm10286_vm8 = vmmov %vm10272_vm0  ;;  %5774 = vmatpush.msra.mxu1 %v1607_v34  ;;  %v1612_v15 = vld [vmem:[%s10277_s3 + $0x28] sm:$0xff] }
0x1b8d   : > { %v2957_v16 = vmul.f32 0.5, %v2956_v5 }
0x1b8e   : > { %v2979_v33 = vmul.f32 %v7080_v58, %v2978_v56 }
0x1b8f   : > { %v2958_v59 = vsub.f32 1.5, %v2957_v16 }
0x1b90   : > { %v2980_v40 = vadd.f32 %v7080_v58, %v2979_v33 }
0x1b91   : > { %v2959_v21 = vmul.f32 %v7078_v63, %v2958_v59 }
0x1b92   : > { %v2982_v24 = vsel %vm2981_vm11, %v7080_v58, %v2980_v40  ;;  %vm10289_vm11 = vmmov %vm10285_vm5 }
0x1b93   : > { %v2963_v20 = vsel %vm2962_vm9, %v7078_v63, %v2959_v21  ;;  %vm10287_vm9 = vmmov %vm10272_vm0  ;;  %v1614_v21 = vld [vmem:[%s10277_s3 + $0x38] sm:$0xff] }
0x1b94   : > { %v2964_v46 = vmul.f32 %v2963_v20, %v2947_v18  ;;  %v1636_v18 = vld [vmem:[%s10270_s6 + $0x10] sm:$0xff]  ;;  %s10303_s6 = sld [smem:[#allocation20_spill]] }
0x1b95   : > { %5706 = vmatpush.msra.mxu3 %v1636_v18 }
0x1b96   : > { %v2968_v38 = vmul.f32 %v7014_v37, %v2964_v46  ;;  %v1613_v37 = vld [vmem:[%s10277_s3 + $0x30] sm:$0xff] }
0x1b97   : > { %5820 = vmatpush.msrb.mxu3 %v1626_v13 }
0x1b98   : > { %v2969_v19 = vsel %vm10276_vm10, %v2968_v38, 0.0  ;;  %vm10288_vm10 = vmmov %vm10285_vm5 }
0x1b99   : > { %v2970_v60 = vrot.slane %v2969_v19, 4  ;;  %5821 = vmatpush.msrb.mxu3 %v1625_v10 }
0x1b9b   : > { %v2971_v52 = vadd.f32 %v2970_v60, %v2969_v19 }
0x1b9d   : > { %v2972_v42 = vrot.slane %v2971_v52, 2 }
0x1b9f   : > { %v2973_v7 = vadd.f32 %v2972_v42, %v2971_v52 }
0x1ba1   : > { %v2974_v22 = vrot.slane %v2973_v7, 1 }
0x1ba3   : > { %v2975_v41 = vadd.f32 %v2974_v22, %v2973_v7 }
0x1ba5   : > { %v9763_v45 = vmul.f32 %v2982_v24, %v2975_v41  ;;  %v1611_v24 = vld [vmem:[%s10277_s3 + $0x20] sm:$0xff] }
0x1ba7   : > { %4643 = vst.msk [vmem:[%s10026_s9] sm:$0x1] %vm4642_vm14, %v9763_v45  ;;  %v9786_v54 = vadd.f32 %v9559_v9, %v9763_v45  ;;  %v1624_v9 = vld [vmem:[%s10277_s3 + $0x88] sm:$0xff]  ;;  %vm10290_vm14 = vmmov %vm10272_vm0  ;;  %s10291_s9 = sld [smem:[#allocation15_spill]] }
0x1ba8   : > { %5822 = vmatpush.msrb.mxu3 %v1624_v9 }
0x1baa   : > { %5823 = vmatpush.msrb.mxu3 %v1623_v12 }
0x1bad   : > { %v7015_v42 = vld [vmem:[%s10291_s9] ss:$0 sm:$0xff]  ;;  %s10296_s9 = sld [smem:[#allocation12_spill]] }
0x1bb3   : > { %v1604_v10 = vld [vmem:[%s10296_s9 + $0x8] sm:$0xff]  ;;  %v1603_v9 = vld [vmem:[%s10296_s9] sm:$0xff]  ;;  %v1606_v12 = vld [vmem:[%s10296_s9 + $0x18] sm:$0xff] }
0x1bb4   : > { %v1605_v29 = vld [vmem:[%s10296_s9 + $0x10] sm:$0xff]  ;;  %s6198_s9 = sand.u32 1, %s7634_s0  }
0x1bb5   : > { %s9885_s14 = scalar_lea.sflag [#allocation5], %s6198_s9 }
0x1bfc   : > { %v5565_v26 = vpop.f32.mrf.mxu1 }
0x1bfd   : > { %6865 = vmatmul.msk.f32.vlgmr.msra.gmra.mxu0 %vm10278_vm13, %v5565_v26 }
0x1c04   : > { %v5651_v25 = vpop.f32.mrf.mxu1 }
0x1c05   : > { %v5652_v47 = vadd.f32 %v5651_v25, %v1676_v14 }
0x1c07   : > { %v5654_v48 = vsel %vm10279_vm15, %v5652_v47, -inf }
0x1c08   : > { %5655 = vmax.xlane.f32.xlu2 %v5654_v48 }
0x1c7a   : > { %v5731_v49 = vpop.f32.mrf.mxu0 }
0x1c7b   : > { %v5656_v32 = vpop.xlane.xlu2 %5655 }
0x1c7c   : > { %v5657_v61 = vsub.f32 %v5652_v47, %v5656_v32 }
0x1c7e   : > { %v5658_v17 = vmul.f32 1.442695, %v5657_v61 }
0x1c80   : > { %7081 = vpow2.f32 %v5658_v17 }
0x1c86   : > { %v7082_v50 = vpop.eup %7081 }
0x1c87   : > { %v5660_v57 = vsel %vm10280_vm6, %v7082_v50, 0.0 }
0x1c88   : > { %5661 = vadd.xlane.f32.xlu0 %v5660_v57  ;;  %v1621_v57 = vld [vmem:[%s10277_s3 + $0x70] sm:$0xff] }
0x1cfb   : > { %v5662_v53 = vpop.xlane.xlu0 %5661 }
0x1cfc   : > { %7083 = vrcp.f32 %v5662_v53 }
0x1d02   : > { %v7084_v62 = vpop.eup %7083 }
0x1d03   : > { %v5664_v39 = vmul.f32 %v7084_v62, %v7082_v50  ;;  %v1622_v50 = vld [vmem:[%s10277_s3 + $0x78] sm:$0xff]  ;;  %s10300_s3 = sld [smem:[#allocation19_spill]] }
0x1d05   : > { %6863 = vmatmul.msk.f32.vlgmr.msrb.gmra.mxu2 %vm10281_vm7, %v5664_v39  ;;  %vm10292_vm7 = vmmov %vm10272_vm0 }
0x1d06   : > { %5952 = vmatpush.msrb.mxu2 %v1630_v6 }
0x1d08   : > { %5953 = vmatpush.msrb.mxu2 %v1629_v27 }
0x1d0a   : > { %5954 = vmatpush.msrb.mxu2 %v1628_v43 }
0x1d0c   : > { %5955 = vmatpush.msrb.mxu2 %v1627_v8 }
0x1d0d   : > { %6867 = vmatmul.msk.f32.vlgmr.msra.gmra.mxu2 %vm10282_vm1, %v9786_v54  ;;  %vm10293_vm1 = vmmov %vm10285_vm5 }
0x1d15   : > { %6868 = vmatmul.msk.f32.gmra.mxu2 %vm10272_vm0, %v9763_v45 }
0x1d1d   : > { %6879 = vmatmul.msk.f32.vlgmr.msrb.gmra.mxu2 %vm10283_vm2, %v9786_v54  ;;  %vm10295_vm2 = vmmov %vm10272_vm0 }
0x1d25   : > { %6880 = vmatmul.msk.f32.gmra.mxu2 %vm10284_vm4, %v9763_v45  ;;  %vm10297_vm4 = vmmov %vm10293_vm1 }
0x1d88   : > { %v5685_v31 = vpop.f32.mrf.mxu2 }
0x1d89   : > { %6864 = vmatmul.msk.f32.vlgmr.msra.gmra.mxu3 %vm10285_vm5, %v5685_v31  ;;  %vm10298_vm5 = vmmov %vm10293_vm1 }
0x1d90   : > { %v5802_v28 = vpop.f32.mrf.mxu2 }
0x1d91   : > { %6869 = vmatmul.msk.f32.vlgmr.msrb.gmra.mxu3 %vm10286_vm8, %v9786_v54  ;;  %vm10299_vm8 = vmmov %vm10293_vm1 }
0x1d98   : > { %v5805_v3 = vpop.f32.mrf.mxu2 }
0x1d99   : > { %6870 = vmatmul.msk.f32.gmra.mxu3 %vm10287_vm9, %v9763_v45  ;;  %6871 = vmatpush.xpose.msk.msrb.mxu0 %vm10288_vm10, %v5805_v3  ;;  %vm10301_vm9 = vmmov %vm10293_vm1 }
0x1d9a   : > { %vm10302_vm10 = vmmov %vm10293_vm1 }
0x1d9d   : > { %6872 = vmatpush.xpose.msk.msrb.mxu0 %vm10289_vm11, %v5802_v28  ;;  %vm10304_vm11 = vmmov %vm10272_vm0 }
0x1da0   : > { %v5957_v41 = vpop.f32.mrf.mxu2 }
0x1da1   : > { %5909 = vmatpush.msra.mxu0 %v1614_v21  ;;  %v1662_v21 = vld [vmem:[%s10300_s3] sm:$0xff] }
0x1da3   : > { %5910 = vmatpush.msra.mxu0 %v1613_v37  ;;  %v1673_v37 = vld [vmem:[%s10303_s6 + $0x38] sm:$0xff] }
0x1da4   : > { %6132 = vmatpush.msra.mxu2 %v1673_v37 }
0x1da5   : > { %5911 = vmatpush.msra.mxu0 %v1612_v15  ;;  %v1672_v15 = vld [vmem:[%s10303_s6 + $0x30] sm:$0xff] }
0x1da6   : > { %6133 = vmatpush.msra.mxu2 %v1672_v15 }
0x1da7   : > { %5912 = vmatpush.msra.mxu0 %v1611_v24 }
0x1da8   : > { %v5960_v26 = vpop.f32.mrf.mxu2 }
0x1e0c   : > { %v5708_v63 = vpop.f32.mrf.mxu3 }
0x1e0d   : > { %v5732_v35 = vadd.f32 %v5731_v49, %v5708_v63 }
0x1e0f   : > { %v9813_v1 = vadd.f32 %v5732_v35, %v9652_v11 }
0x1e11   : > { %v5735_v5 = vmul.f32 %v9813_v1, %v9813_v1 }
0x1e13   : > { %v5736_v16 = vsel %vm10290_vm14, %v5735_v5, 0.0 }
0x1e14   : > { %5737 = vadd.xlane.f32.xlu2 %v5736_v16  ;;  %v5825_v58 = vpop.f32.mrf.mxu3  ;;  %v1665_v16 = vld [vmem:[%s10300_s3 + $0x18] sm:$0xff] }
0x1e1c   : > { %v5828_v59 = vpop.f32.mrf.mxu3 }
0x1e1d   : > { %6874 = vmatpush.msk.msrb.mxu1 %vm5097_vm3, %v5828_v59  ;;  %v1663_v59 = vld [vmem:[%s10300_s3 + $0x8] sm:$0xff] }
0x1e1f   : > { %5892 = vmatpush.msrb.mxu1 %v5825_v58  ;;  %v1664_v58 = vld [vmem:[%s10300_s3 + $0x10] sm:$0xff]  ;;  %s10306_s3 = sld [smem:[#allocation27_spill]] }
0x1e87   : > { %v5738_v20 = vpop.xlane.xlu2 %5737 }
0x1e88   : > { %v5739_v11 = vmul.f32 %v5738_v20, %v10170_v23  ;;  %v1671_v20 = vld [vmem:[%s10303_s6 + $0x28] sm:$0xff] }
0x1e89   : > { %6134 = vmatpush.msra.mxu2 %v1671_v20 }
0x1e8a   : > { %v5740_v46 = vadd.f32 1e-06, %v5739_v11 }
0x1e8c   : > { %7085 = vrsqrt.f32 %v5740_v46  ;;  %vm5747_vm15 = vweird.f32 %v5740_v46 }
0x1e92   : > { %v7086_v56 = vpop.eup %7085 }
0x1e93   : > { %v5742_v38 = vmul.f32 %v7086_v56, %v5740_v46  ;;  %vm5748_vm13 = vweird.f32 %v7086_v56 }
0x1e94   : > { %vm5749_vm6 = vmor %vm5747_vm15, %vm5748_vm13 }
0x1e95   : > { %v5743_v19 = vmul.f32 %v7086_v56, %v5742_v38  ;;  %vm10307_vm15 = vmmov %vm10272_vm0 }
0x1e97   : > { %v5744_v60 = vmul.f32 0.5, %v5743_v19  ;;  %v1668_v19 = vld [vmem:[%s10303_s6 + $0x10] sm:$0xff] }
0x1e99   : > { %v5745_v33 = vsub.f32 1.5, %v5744_v60 }
0x1e9b   : > { %v5746_v52 = vmul.f32 %v7086_v56, %v5745_v33 }
0x1e9d   : > { %v5750_v40 = vsel %vm5749_vm6, %v7086_v56, %v5746_v52  ;;  %v1669_v56 = vld [vmem:[%s10303_s6 + $0x18] sm:$0xff]  ;;  %vm10308_vm6 = vcmask 523264  }
0x1e9e   : > { %v5751_v7 = vmul.f32 %v5750_v40, %v9813_v1 }
0x1ea0   : > { %v5755_v22 = vmul.f32 %v7015_v42, %v5751_v7 }
0x1ea2   : > { %6866 = vmatmul.msk.f32.vlgmr.msra.gmra.mxu1 %vm10292_vm7, %v5755_v22  ;;  %vm10309_vm7 = vmmov %vm10272_vm0 }
0x1ea3   : > { %5929 = vmatpush.msra.mxu1 %v1622_v50  ;;  %v1697_v50 = vld [vmem:[%s10306_s3 + $0x18] sm:$0xff] }
0x1ea5   : > { %5930 = vmatpush.msra.mxu1 %v1621_v57  ;;  %v1696_v57 = vld [vmem:[%s10306_s3 + $0x10] sm:$0xff] }
0x1ea7   : > { %5931 = vmatpush.msra.mxu1 %v1620_v36  ;;  %v1695_v36 = vld [vmem:[%s10306_s3 + $0x8] sm:$0xff] }
0x1ea9   : > { %5932 = vmatpush.msra.mxu1 %v1619_v51  ;;  %v1694_v51 = vld [vmem:[%s10306_s3] sm:$0xff]  ;;  %s10037_s3 = sshll.u32 %s7634_s0, 3 }
0x1f1f   : > { %v5776_v4 = vpop.f32.mrf.mxu1 }
0x1f20   : > { %6873 = vmatmul.msk.f32.vlgmr.msrb.gmra.mxu0 %vm10293_vm1, %v5776_v4 }
0x1f21   : > { %6884 = vmatpush.msk.msrb.mxu0 %vm5097_vm3, %v5960_v26  ;;  %vm10294_vm3 = vmmov %vm10272_vm0  ;;  %v1667_v26 = vld [vmem:[%s10303_s6 + $0x8] sm:$0xff] }
0x1f23   : > { %6024 = vmatpush.msrb.mxu0 %v5957_v41 }
0x1f28   : > { %6876 = vmatmul.msk.f32.vlgmr.msra.gmra.mxu0 %vm10272_vm0, %v5755_v22  ;;  %v7016_v22 = vld [vmem:[%s10305_s8] ss:$0 sm:$0xff]  ;;  %s10310_s8 = sld [smem:[#allocation21_spill]] }
0x1f29   : > { %6069 = vmatpush.msra.mxu0 %v1604_v10 }
0x1f2b   : > { %6070 = vmatpush.msra.mxu0 %v1603_v9 }
0x1f9d   : > { %v5857_v14 = vpop.f32.mrf.mxu0 }
0x1f9e   : > { %v5860_v25 = vsel %vm5082_vm12, %v5857_v14, -inf }
0x1f9f   : > { %5861 = vmax.xlane.f32.xlu0 %v5860_v25 }
0x1fa5   : > { %v5914_v27 = vpop.f32.mrf.mxu0 }
0x2012   : > { %v5862_v47 = vpop.xlane.xlu0 %5861 }
0x2013   : > { %v5863_v48 = vsub.f32 %v5857_v14, %v5862_v47  ;;  %v1666_v14 = vld [vmem:[%s10303_s6] sm:$0xff] }
0x2015   : > { %v5864_v32 = vmul.f32 1.442695, %v5863_v48 }
0x2017   : > { %7087 = vpow2.f32 %v5864_v32 }
0x201d   : > { %v7088_v61 = vpop.eup %7087 }
0x201e   : > { %v5866_v17 = vsel %vm5082_vm12, %v7088_v61, 0.0 }
0x201f   : > { %5867 = vadd.xlane.f32.xlu1 %v5866_v17 }
0x2092   : > { %v5868_v0 = vpop.xlane.xlu1 %5867 }
0x2093   : > { %7089 = vrcp.f32 %v5868_v0 }
0x2099   : > { %v7090_v55 = vpop.eup %7089 }
0x209a   : > { %v5870_v53 = vmul.f32 %v7090_v55, %v7088_v61 }
0x209c   : > { %6875 = vmatmul.msk.f32.vlgmr.msrb.gmra.mxu1 %vm5082_vm12, %v5870_v53 }
0x209d   : > { %6112 = vmatpush.msrb.mxu1 %v1665_v16 }
0x209f   : > { %6113 = vmatpush.msrb.mxu1 %v1664_v58 }
0x20a1   : > { %6114 = vmatpush.msrb.mxu1 %v1663_v59 }
0x20a3   : > { %6115 = vmatpush.msrb.mxu1 %v1662_v21 }
0x20a4   : > { %6877 = vmatmul.msk.f32.vlgmr.msra.gmra.mxu1 %vm10294_vm3, %v9786_v54 }
0x20ac   : > { %6878 = vmatmul.msk.f32.gmra.mxu1 %vm10295_vm2, %v9763_v45 }
0x2119   : > { %v5894_v62 = vpop.f32.mrf.mxu1 }
0x2121   : > { %v5934_v39 = vpop.f32.mrf.mxu1 }
0x2129   : > { %v5937_v6 = vpop.f32.mrf.mxu1 }
0x212a   : > { %6881 = vmatpush.xpose.msk.msra.mxu3 %vm10297_vm4, %v5937_v6 }
0x212e   : > { %6882 = vmatpush.xpose.msk.msra.mxu3 %vm10298_vm5, %v5934_v39 }
0x2131   : > { %6883 = vmatmul.msk.f32.vlgmr.msra.gmra.mxu3 %vm10299_vm8, %v5914_v27 }
0x2132   : > { %6046 = vmatpush.msrb.mxu3 %v1606_v12 }
0x2134   : > { %6047 = vmatpush.msrb.mxu3 %v1605_v29 }
0x2136   : > { %6184 = vmatpush.msra.mxu3 %v1697_v50 }
0x2138   : > { %6185 = vmatpush.msra.mxu3 %v1696_v57 }
0x213a   : > { %6186 = vmatpush.msra.mxu3 %v1695_v36 }
0x213c   : > { %6187 = vmatpush.msra.mxu3 %v1694_v51 }
0x21b4   : > { %v5989_v2 = vpop.f32.mrf.mxu3 }
0x21b5   : > { %v5992_v43 = vsel %vm5082_vm12, %v5989_v2, -inf }
0x21b6   : > { %5993 = vmax.xlane.f32.xlu2 %v5992_v43 }
0x2229   : > { %v5994_v8 = vpop.xlane.xlu2 %5993 }
0x222a   : > { %v5995_v54 = vsub.f32 %v5989_v2, %v5994_v8  ;;  %v7017_v8 = vld [vmem:[%s10310_s8] ss:$0 sm:$0xff] }
0x222c   : > { %v5996_v45 = vmul.f32 1.442695, %v5995_v54 }
0x222e   : > { %7091 = vpow2.f32 %v5996_v45 }
0x2234   : > { %v7092_v18 = vpop.eup %7091 }
0x2235   : > { %v5998_v13 = vsel %vm5082_vm12, %v7092_v18, 0.0 }
0x2236   : > { %5999 = vadd.xlane.f32.xlu0 %v5998_v13 }
0x22a9   : > { %v6000_v31 = vpop.xlane.xlu0 %5999 }
0x22aa   : > { %7093 = vrcp.f32 %v6000_v31 }
0x22b0   : > { %v7094_v28 = vpop.eup %7093 }
0x22b1   : > { %v6002_v3 = vmul.f32 %v7094_v28, %v7092_v18 }
0x22b3   : > { %6885 = vmatmul.msk.f32.vlgmr.msrb.gmra.mxu0 %vm5082_vm12, %v6002_v3 }
0x22bb   : > { %6887 = vmatmul.msk.f32.vlgmr.msra.gmra.mxu0 %vm10301_vm9, %v5894_v62 }
0x2330   : > { %v6026_v44 = vpop.f32.mrf.mxu0 }
0x2331   : > { %6886 = vmatmul.msk.f32.vlgmr.msrb.gmra.mxu3 %vm10302_vm10, %v6026_v44 }
0x2338   : > { %v6072_v30 = vpop.f32.mrf.mxu0 }
0x23b4   : > { %v6049_v34 = vpop.f32.mrf.mxu3 }
0x23b5   : > { %v6073_v49 = vadd.f32 %v6072_v30, %v6049_v34 }
0x23b7   : > { %v6075_v63 = vadd.f32 %v6073_v49, %v9813_v1  ;;  %v1670_v1 = vld [vmem:[%s10303_s6 + $0x20] sm:$0xff]  ;;  %s6231_s6 = scalar_lea.hbm %s10085_s4, %s10037_s3 }
0x23b8   : > { %6135 = vmatpush.msra.mxu2 %v1670_v1  ;;  %s6235_s13 = sshll.u32 %s6231_s6, 4  ;;  %s6236_s13 = int_to_ptr.hbm [resolvable:$true] %s6235_s13 }
0x23b9   : > { %v6076_v35 = vmul.f32 %v6075_v63, %v6075_v63  ;;  %s7177_s8 = sshra.s32 %s6236_s13, 4  ;;  %s7178_s8 = int_to_ptr.hbm [resolvable:$true] %s7177_s8 }
0x23ba   : > { %6136 = vmatpush.msra.mxu2 %v1669_v56  ;;  %s7179_s15 = scalar_lea.hbm %s7178_s8, 8  ;;  %p7184_p0 = scmp.lt.s32.totalorder %s7178_s8, %s10085_s4 }
0x23bb   : > { %v6077_v5 = vsel %vm10304_vm11, %v6076_v35, 0.0  ;;  %p7180_p11 = scmp.ne.s32.totalorder %s7178_s8, %s7179_s15  ;;  %p7185_p1 = scmp.lt.s32.totalorder %s7183_s16, %s7179_s15 }
0x23bc   : > { %6078 = vadd.xlane.f32.xlu1 %v6077_v5  ;;  %6137 = vmatpush.msra.mxu2 %v1668_v19 }
0x23bd   : > { %p7181_p12 = pnand %p7180_p11, %p7653_p5  ;;  %p7186_p2 = por %p7185_p1, %p7184_p0 }
0x23be   : > { %6138 = vmatpush.msra.mxu2 %v1667_v26 }
0x23bf   : > { %p7182_p13 = pneg %p7181_p12 }
0x23c0   : > { %6139 = vmatpush.msra.mxu2 %v1666_v14 }
0x23c1   : > { %p7187_p3 = pnand %p7186_p2, %p7182_p13 }
0x242f   : > { %v6079_v11 = vpop.xlane.xlu1 %6078 }
0x2430   : > { %v6080_v46 = vmul.f32 %v6079_v11, %v10170_v23 }
0x2432   : > { %v6081_v38 = vadd.f32 1e-06, %v6080_v46 }
0x2434   : > { %7095 = vrsqrt.f32 %v6081_v38  ;;  %vm6088_vm14 = vweird.f32 %v6081_v38 }
0x243a   : > { %v7096_v60 = vpop.eup %7095 }
0x243b   : > { %v6083_v33 = vmul.f32 %v7096_v60, %v6081_v38  ;;  %vm6089_vm12 = vweird.f32 %v7096_v60 }
0x243c   : > { %vm6090_vm13 = vmor %vm6088_vm14, %vm6089_vm12 }
0x243d   : > { %v6084_v52 = vmul.f32 %v7096_v60, %v6083_v33 }
0x243f   : > { %v6085_v42 = vmul.f32 0.5, %v6084_v52 }
0x2441   : > { %v6086_v40 = vsub.f32 1.5, %v6085_v42 }
0x2443   : > { %v6087_v7 = vmul.f32 %v7096_v60, %v6086_v40 }
0x2445   : > { %v6091_v24 = vsel %vm6090_vm13, %v7096_v60, %v6087_v7 }
0x2446   : > { %v6092_v41 = vmul.f32 %v6091_v24, %v6075_v63 }
0x2448   : > { %v6096_v4 = vmul.f32 %v7016_v22, %v6092_v41 }
0x244a   : > { %6888 = vmatmul.msk.f32.vlgmr.msrb.gmra.mxu1 %vm10307_vm15, %v6096_v4 }
0x24c7   : > { %v6117_v25 = vpop.f32.mrf.mxu1 }
0x24c8   : > { %v6120_v47 = vmax.f32 %v6117_v25, 0.0 }
0x24ca   : > { %6889 = vmatmul.msk.f32.vlgmr.msra.gmra.mxu2 %vm10308_vm6, %v6120_v47 }
0x254d   : > { %v6141_v48 = vpop.f32.mrf.mxu2 }
0x254e   : > { %v6144_v32 = vadd.f32 %v6141_v48, %v6075_v63 }
0x2550   : > { %v6145_v61 = vmul.f32 %v6144_v32, %v6144_v32 }
0x2552   : > { %v6146_v17 = vsel %vm10309_vm7, %v6145_v61, 0.0 }
0x2553   : > { %6147 = vadd.xlane.f32.xlu2 %v6146_v17 }
0x25c6   : > { %v6148_v0 = vpop.xlane.xlu2 %6147 }
0x25c7   : > { %v6149_v55 = vmul.f32 %v6148_v0, %v10170_v23 }
0x25c9   : > { %v6150_v53 = vadd.f32 1e-06, %v6149_v55 }
0x25cb   : > { %7097 = vrsqrt.f32 %v6150_v53  ;;  %vm6157_vm0 = vweird.f32 %v6150_v53 }
0x25d1   : > { %v7098_v62 = vpop.eup %7097 }
0x25d2   : > { %v6152_v39 = vmul.f32 %v7098_v62, %v6150_v53  ;;  %vm6158_vm1 = vweird.f32 %v7098_v62 }
0x25d3   : > { %vm6159_vm3 = vmor %vm6157_vm0, %vm6158_vm1 }
0x25d4   : > { %v6153_v6 = vmul.f32 %v7098_v62, %v6152_v39 }
0x25d6   : > { %v6154_v27 = vmul.f32 0.5, %v6153_v6 }
0x25d8   : > { %v6155_v2 = vsub.f32 1.5, %v6154_v27 }
0x25da   : > { %v6156_v43 = vmul.f32 %v7098_v62, %v6155_v2 }
0x25dc   : > { %v6160_v54 = vsel %vm6159_vm3, %v7098_v62, %v6156_v43 }
0x25dd   : > { %v6161_v23 = vmul.f32 %v6160_v54, %v6144_v32 }
0x25df   : > { %v6165_v45 = vmul.f32 %v7017_v8, %v6161_v23 }
0x25e1   : > { %6890 = vmatmul.msk.f32.vlgmr.msra.gmra.mxu3 %vm10295_vm2, %v6165_v45 }
0x25e2   : > { %7190 = shalt.err (!%p7187_p3)
}
0x25e3   : > { %6898 = dma.vmem_to_hbm [thread:$0]  (%p7653_p5), %s6234_s12, 128, %s6236_s13, %s9885_s14  }
0x25e4   : > { %s6244_s10 = scalar_lea.hbm %s7606_s21, %s7634_s0  ;;  %s10311_s6 = scalar_lea.vmem [#allocation6], %s9742_s5 }
0x25e5   : > { %s6246_s9 = sshll.u32 %s10311_s6, 4  ;;  %s6248_s3 = sshll.u32 %s6244_s10, 4  ;;  %s6247_s9 = int_to_ptr.vmem [resolvable:$true] %s6246_s9  ;;  %s6249_s3 = int_to_ptr.hbm [resolvable:$true] %s6248_s3 }
0x25e6   : > { %s7205_s16 = sshra.s32 %s6249_s3, 4  ;;  %s7211_s8 = scalar_lea.hbm %s7606_s21, 2  ;;  %s7206_s16 = int_to_ptr.hbm [resolvable:$true] %s7205_s16 }
0x25e7   : > { %s7207_s15 = scalar_lea.hbm %s7206_s16, 1  ;;  %p7212_p9 = scmp.lt.s32.totalorder %s7206_s16, %s7606_s21 }
0x25e8   : > { %p7208_p4 = scmp.ne.s32.totalorder %s7206_s16, %s7207_s15  ;;  %p7213_p10 = scmp.lt.s32.totalorder %s7211_s8, %s7207_s15 }
0x25ea   : > { %p7209_p7 = pnand %p7208_p4, %p7653_p5  ;;  %p7214_p11 = por %p7213_p10, %p7212_p9 }
0x25ec   : > { %p7210_p8 = pneg %p7209_p7 }
0x25ee   : > { %p7215_p12 = pnand %p7214_p11, %p7210_p8 }
0x25f0   : > { %7218 = shalt.err (!%p7215_p12)
}
0x25f1   : > { %s10312_s13 = sld [smem:[#allocation26_spill]]  ;;  %s10313_s12 = sshll.u32 %s7634_s0, 3 }
0x25f2   : > { %6899 = dma.vmem_to_hbm [thread:$0]  (%p7653_p5), %s6247_s9, 16, %s6249_s3, %s9885_s14  }
0x25f3   : > { %s6217_s10 = scalar_lea.hbm %s7596_s29, %s10313_s12  ;;  %s10314_s6 = sshll.u32 %s9742_s5, 3 }
0x25f4   : > { %s1567_s16 = scalar_lea.vmem [#allocation2], %s10314_s6  ;;  %s6221_s8 = sshll.u32 %s6217_s10, 4  ;;  %s6222_s8 = int_to_ptr.hbm [resolvable:$true] %s6221_s8 }
0x25f5   : > { %s6219_s15 = sshll.u32 %s1567_s16, 4  ;;  %s6194_s4 = scalar_lea.sflag [#allocation3], %s9742_s5  ;;  %s6220_s15 = int_to_ptr.vmem [resolvable:$true] %s6219_s15 }
0x25f6   : > { %s7233_s17 = sshra.s32 %s6222_s8, 4  ;;  %s7239_s14 = scalar_lea.hbm %s7596_s29, 16  ;;  %s7234_s17 = int_to_ptr.hbm [resolvable:$true] %s7233_s17 }
0x25f7   : > { %v7018_v18 = vld [vmem:[%s10312_s13] ss:$0 sm:$0xff]  ;;  %s7235_s19 = scalar_lea.hbm %s7234_s17, 8  ;;  %p7240_p2 = scmp.lt.s32.totalorder %s7234_s17, %s7596_s29 }
0x25f8   : > { %p7236_p13 = scmp.ne.s32.totalorder %s7234_s17, %s7235_s19  ;;  %p7241_p3 = scmp.lt.s32.totalorder %s7239_s14, %s7235_s19 }
0x25fa   : > { %p7237_p0 = pnand %p7236_p13, %p7653_p5  ;;  %p7242_p4 = por %p7241_p3, %p7240_p2 }
0x25fc   : > { %p7238_p1 = pneg %p7237_p0 }
0x25fe   : > { %p7243_p7 = pnand %p7242_p4, %p7238_p1 }
0x2664   : > { %v6189_v13 = vpop.f32.mrf.mxu3 }
0x2665   : > { %v6190_v10 = vadd.f32 %v7018_v18, %v6189_v13 }
0x2667   : > { %6192 = vst [vmem:[%s1567_s16] sm:$0xff] %v6190_v10 }
0x2668   : > { %7246 = shalt.err (!%p7243_p7)
}
0x2669   : > { %6897 = dma.vmem_to_hbm [thread:$0]  (%p7653_p5), %s6220_s15, 128, %s6222_s8, %s6194_s4  }
0x266a PF: > { %p6913_p8 = scmp.ge.s32.totalorder %s7285_s7, 2  ;;  %s6263_s0 = sand.u32 1, %s7273_s28  }
0x266b   : > { %s6264_s3 = scalar_lea.sflag [#allocation3], %s6263_s0 }
0x266c   : > { %p6904_p9 = pnand %p6913_p8, %p7657_p6 }
0x266e   : > { %p6905_p10 = pneg %p6904_p9 }
0x2670   : > { %7264 = dma.done.wait (%p6905_p10), %s6264_s3, 128  }
0x2671   : > { %7266 = vsyncadd (%p6905_p10), %s6264_s3, 4294967168  ;;  %s10315_s17 = sadd.s32 4294967294, %s7285_s7  }
0x2672   : > { %s6273_s19 = sand.u32 1, %s10315_s17  }
0x2673   : > { %s6274_s5 = scalar_lea.sflag [#allocation5], %s6273_s19 }
0x2674   : > { %7268 = dma.done.wait (%p6905_p10), %s6274_s5, 144  }
0x2675   : > { %7270 = vsyncadd (%p6905_p10), %s6274_s5, 4294967152  ;;  %p119_p5 = scmp.ge.s32.totalorder %s7638_s11, 4   ;;  %s10316_s28 = smov %s7277_s1 }
0x2676   : > { %s10317_s1 = smov %s7281_s2  ;;  %s10318_s2 = smov %s7651_s18 }
0x2677   : > { %s10319_s7 = smov %s7638_s11  ;;  %121 = sbr.rel (!%p119_p5) target bundleno = 111 (0x6f), region = 353 }
0x267c   :  { %6296 = vsyncpa [#allocation3], 1 }
0x267d   :  { %6298 = vsyncpa [#allocation3 + $0x1], 1 }
0x267e   :  { %6299 = vsyncpa [#allocation5], 1 }
0x267f   :  { %6301 = vsyncpa [#allocation5 + $0x1], 1 }

</bundles_post_ra>
